<compile_context>
chip_gen: v7x
topology: tpu7x:2x2x1
jax: 0.10.0
libtpu: 0.0.40
codegen_flags: <defaults>
</compile_context>

<pallas_src>
import functools

import numpy as np
import jax
import jax.numpy as jnp
from jax.experimental import pallas as pl
from jax.experimental.pallas import tpu as pltpu

# Static geometry (the PyTorch module needs 64x64 inputs so Flatten sees
# 32*16*16 features).
H1, W1, C0, C1 = 64, 64, 3, 8
H2, W2, C2 = 32, 32, 16
H3, W3, C3 = 16, 16, 32
FC_BLK = 8                 # classes padded to 8 per spatial-row block in wfc
LANES = 128                # lane-dense width of the padded logits
BN_EPS = 1e-5


# ------------------------------ fused kernel ------------------------------- #

def _cnn_kernel(x_ref, d1_ref, b1_ref, s1_ref, cl1_ref, rs2_ref, b2_ref,
                s2_ref, cl2_ref, rs3_ref, b3_ref, s3_ref, wfc_ref, fmask_ref,
                tsel_ref, bfc_ref, o_ref):
    f32, bf16 = jnp.float32, jnp.bfloat16

    # ---- conv1 (3->8) + BN + ReLU; input rows = c*64 + h (NCHW), lanes = w --
    x = x_ref[...].reshape(C0 * H1, W1).astype(bf16)              # (192, 64)
    acc = jnp.zeros((H1, W1 * C1), f32)                           # (64, 512)
    for t in range(C0 * 3):                                       # t = ci*3+kh
        rows = jnp.dot(d1_ref[t], x,
                       preferred_element_type=f32).astype(bf16)   # (64, 64)
        acc = acc + jnp.dot(rows, b1_ref[t], preferred_element_type=f32)
    y = jnp.maximum(acc + s1_ref[...], 0.0).astype(bf16)          # (64, 512)

    # ---- maxpool 2x2 + conv2 (8->16) + BN + ReLU ---------------------------
    m = jnp.maximum(jnp.dot(y, cl1_ref[0], preferred_element_type=f32),
                    jnp.dot(y, cl1_ref[1], preferred_element_type=f32))
    m = m.astype(bf16)                                            # (64, 256)
    acc = jnp.zeros((H2, W2 * C2), f32)                           # (32, 512)
    for kh in range(3):
        rows = jnp.maximum(
            jnp.dot(rs2_ref[2 * kh], m, preferred_element_type=f32),
            jnp.dot(rs2_ref[2 * kh + 1], m, preferred_element_type=f32))
        acc = acc + jnp.dot(rows.astype(bf16), b2_ref[kh],
                            preferred_element_type=f32)
    y = jnp.maximum(acc + s2_ref[...], 0.0).astype(bf16)          # (32, 512)

    # ---- maxpool 2x2 + conv3 (16->32) + BN + ReLU --------------------------
    m = jnp.maximum(jnp.dot(y, cl2_ref[0], preferred_element_type=f32),
                    jnp.dot(y, cl2_ref[1], preferred_element_type=f32))
    m = m.astype(bf16)                                            # (32, 256)
    acc = jnp.zeros((H3, W3 * C3), f32)                           # (16, 512)
    for kh in range(3):
        rows = jnp.maximum(
            jnp.dot(rs3_ref[2 * kh], m, preferred_element_type=f32),
            jnp.dot(rs3_ref[2 * kh + 1], m, preferred_element_type=f32))
        acc = acc + jnp.dot(rows.astype(bf16), b3_ref[kh],
                            preferred_element_type=f32)
    y3 = jnp.maximum(acc + s3_ref[...], 0.0)                      # (16, 512)
    # Dropout(0.1) is the identity in eval mode.
    # TODO(synk): training-mode dropout / batch-stat BatchNorm not implemented.

    # ---- Linear(32*16*16 -> num_classes); NCHW flatten folded into wfc -----
    p = jnp.dot(y3.astype(bf16), wfc_ref[...],
                preferred_element_type=f32)                       # (16, 128)
    p = p * fmask_ref[...]                                        # block-diag
    s = jnp.sum(p, axis=0, keepdims=True)                         # (1, 128)
    logits = jnp.dot(s, tsel_ref[...],
                     preferred_element_type=f32) + bfc_ref[...]   # (1, 128)
    o_ref[...] = logits.reshape(1, 1, LANES)


@functools.partial(jax.jit, static_argnames=("num_classes",))
def cnn_forward(x_nchw, prep, num_classes=2):
    """Single fused pallas_call reproducing CNN.forward (eval semantics)."""
    n = x_nchw.shape[0]
    x = x_nchw.reshape(n, C0 * H1, W1).astype(jnp.float32)  # free bitcast view
    c3 = lambda i: (0, 0, 0)
    c2 = lambda i: (0, 0)
    out = pl.pallas_call(
        _cnn_kernel,
        out_shape=jax.ShapeDtypeStruct((n, 1, LANES), jnp.float32),
        grid_spec=pltpu.PrefetchScalarGridSpec(
            num_scalar_prefetch=0,
            grid=(n,),
            in_specs=[
                pl.BlockSpec((1, C0 * H1, W1), lambda i: (i, 0, 0)),
                pl.BlockSpec(prep["d1"].shape, c3),
                pl.BlockSpec(prep["b1"].shape, c3),
                pl.BlockSpec(prep["s1"].shape, c2),
                pl.BlockSpec(prep["cl1"].shape, c3),
                pl.BlockSpec(prep["rs2"].shape, c3),
                pl.BlockSpec(prep["b2"].shape, c3),
                pl.BlockSpec(prep["s2"].shape, c2),
                pl.BlockSpec(prep["cl2"].shape, c3),
                pl.BlockSpec(prep["rs3"].shape, c3),
                pl.BlockSpec(prep["b3"].shape, c3),
                pl.BlockSpec(prep["s3"].shape, c2),
                pl.BlockSpec(prep["wfc"].shape, c2),
                pl.BlockSpec(prep["fmask"].shape, c2),
                pl.BlockSpec(prep["tsel"].shape, c2),
                pl.BlockSpec(prep["bfc"].shape, c2),
            ],
            out_specs=pl.BlockSpec((1, 1, LANES), lambda i: (i, 0, 0)),
        ),
        compiler_params=pltpu.CompilerParams(
            dimension_semantics=("parallel",),
            vmem_limit_bytes=32 * 1024 * 1024),
    )(x, prep["d1"], prep["b1"], prep["s1"], prep["cl1"], prep["rs2"],
      prep["b2"], prep["s2"], prep["cl2"], prep["rs3"], prep["b3"],
      prep["s3"], prep["wfc"], prep["fmask"], prep["tsel"], prep["bfc"])
    return out[:, 0, :num_classes]


# ------------------- one-time weight repacking (init) ---------------------- #

def prepare_params(params, num_classes=2, eps=BN_EPS):
    """Repack PyTorch-layout weights into fused-kernel operands (host, once)."""
    f32 = lambda a: np.asarray(a, np.float32)

    def bn_fold(b, gamma, beta, mean, var):
        scale = f32(gamma) / np.sqrt(f32(var) + eps)
        shift = (f32(b) - f32(mean)) * scale + f32(beta)
        return scale, shift

    def lane_shift(shift, w):                       # per-channel -> per-lane
        return np.tile(shift, w)[None, :]

    def band(wmat, scale, w):                       # (3, w*Cin, w*Cout)
        cout, cin = wmat.shape[0], wmat.shape[1]
        ws = f32(wmat) * scale[:, None, None, None]
        out = np.zeros((3, w * cin, w * cout), np.float32)
        for kh in range(3):
            for kw in range(3):
                blk = ws[:, :, kh, kw].T
                for xw in range(w):
                    xi = xw + kw - 1
                    if 0 <= xi < w:
                        out[kh, xi * cin:(xi + 1) * cin,
                            xw * cout:(xw + 1) * cout] = blk
        return out

    def layer1_mats(wmat, scale):                   # NCHW input, per (ci, kh)
        cout, cin = wmat.shape[0], wmat.shape[1]
        ws = f32(wmat) * scale[:, None, None, None]
        d = np.zeros((cin * 3, H1, cin * H1), np.float32)
        b = np.zeros((cin * 3, W1, W1 * cout), np.float32)
        for ci in range(cin):
            for kh in range(3):
                t = ci * 3 + kh
                for h in range(H1):
                    hi = h + kh - 1
                    if 0 <= hi < H1:
                        d[t, h, ci * H1 + hi] = 1.0
                for kw in range(3):
                    for xw in range(W1):
                        xi = xw + kw - 1
                        if 0 <= xi < W1:
                            b[t, xi, xw * cout:(xw + 1) * cout] = ws[:, ci, kh, kw]
        return d, b

    def lane_pool(w, c):                            # (2, w*c, (w//2)*c)
        out = np.zeros((2, w * c, (w // 2) * c), np.float32)
        for bb in range(2):
            for wp in range(w // 2):
                for cc in range(c):
                    out[bb, (2 * wp + bb) * c + cc, wp * c + cc] = 1.0
        return out

    def row_shift_pool(hout):                       # (6, hout, 2*hout)
        out = np.zeros((3, 2, hout, 2 * hout), np.float32)
        for kh in range(3):
            for a in range(2):
                for h in range(hout):
                    hp = h + kh - 1
                    if 0 <= hp < hout:
                        out[kh, a, h, 2 * hp + a] = 1.0
        return out.reshape(6, hout, 2 * hout)

    w1, bb1, g1, be1, mu1, va1 = params["conv1"]
    w2, bb2, g2, be2, mu2, va2 = params["conv2"]
    w3, bb3, g3, be3, mu3, va3 = params["conv3"]
    wfc, bfc = params["fc"]

    sc1, sh1 = bn_fold(bb1, g1, be1, mu1, va1)
    sc2, sh2 = bn_fold(bb2, g2, be2, mu2, va2)
    sc3, sh3 = bn_fold(bb3, g3, be3, mu3, va3)

    d1, b1 = layer1_mats(w1, sc1)
    b2m = band(w2, sc2, W2)
    b3m = band(w3, sc3, W3)

    # FC weight permuted for the NCHW flatten + padded to FC_BLK classes.
    assert num_classes <= FC_BLK
    wfc_r = f32(wfc).reshape(num_classes, C3, H3, W3)
    a = np.transpose(wfc_r, (3, 1, 2, 0))                 # (w, c, h, k)
    a8 = np.zeros((W3, C3, H3, FC_BLK), np.float32)
    a8[..., :num_classes] = a
    wflat = a8.reshape(W3 * C3, H3 * FC_BLK)              # (512, 128)

    # Block-diagonal row mask: keep p[h, h*8 + k] only.
    fmask = np.zeros((H3, H3 * FC_BLK), np.float32)
    for h in range(H3):
        fmask[h, h * FC_BLK:(h + 1) * FC_BLK] = 1.0

    # Class-collapse selector (lane-dense 128-wide output).
    tsel = np.zeros((H3 * FC_BLK, LANES), np.float32)
    for j in range(H3 * FC_BLK):
        tsel[j, j % FC_BLK] = 1.0

    bfc_pad = np.zeros((1, LANES), np.float32)
    bfc_pad[0, :num_classes] = f32(bfc)

    bf16 = jnp.bfloat16
    return {
        "d1": jnp.asarray(d1, bf16),
        "b1": jnp.asarray(b1, bf16),
        "s1": jnp.asarray(lane_shift(sh1, W1), jnp.float32),
        "cl1": jnp.asarray(lane_pool(W1, C1), bf16),
        "rs2": jnp.asarray(row_shift_pool(H2), bf16),
        "b2": jnp.asarray(b2m, bf16),
        "s2": jnp.asarray(lane_shift(sh2, W2), jnp.float32),
        "cl2": jnp.asarray(lane_pool(W2, C2), bf16),
        "rs3": jnp.asarray(row_shift_pool(H3), bf16),
        "b3": jnp.asarray(b3m, bf16),
        "s3": jnp.asarray(lane_shift(sh3, W3), jnp.float32),
        "wfc": jnp.asarray(wflat, bf16),
        "fmask": jnp.asarray(fmask, jnp.float32),
        "tsel": jnp.asarray(tsel, jnp.float32),
        "bfc": jnp.asarray(bfc_pad, jnp.float32),
    }


# ------------------------------ parameters --------------------------------- #

def init_params(key, num_classes=2):
    def conv_params(k, cin, cout):
        k1, k2, k3, k4, k5, k6 = jax.random.split(k, 6)
        w = 0.1 * jax.random.normal(k1, (cout, cin, 3, 3), jnp.float32)
        b = 0.1 * jax.random.normal(k2, (cout,), jnp.float32)
        gamma = 1.0 + 0.1 * jax.random.normal(k3, (cout,), jnp.float32)
        beta = 0.1 * jax.random.normal(k4, (cout,), jnp.float32)
        mean = 0.1 * jax.random.normal(k5, (cout,), jnp.float32)
        var = 1.0 + 0.1 * jnp.abs(jax.random.normal(k6, (cout,), jnp.float32))
        return (w, b, gamma, beta, mean, var)

    kc1, kc2, kc3, kfw, kfb = jax.random.split(key, 5)
    return {
        "conv1": conv_params(kc1, 3, 8),
        "conv2": conv_params(kc2, 8, 16),
        "conv3": conv_params(kc3, 16, 32),
        "fc": (0.01 * jax.random.normal(kfw, (num_classes, 32 * 16 * 16),
                                        jnp.float32),
               0.01 * jax.random.normal(kfb, (num_classes,), jnp.float32)),
    }


if __name__ == "__main__":
    key = jax.random.PRNGKey(0)
    kx, kp = jax.random.split(key)
    # Spatial size must be 64 so that Flatten sees 32*16*16 features.
    x = jax.random.normal(kx, (2, 3, 64, 64), jnp.float32)
    params = init_params(kp, num_classes=2)
    prep = prepare_params(params, num_classes=2)   # one-time weight repacking

    logits = cnn_forward(x, prep, num_classes=2)
    jax.block_until_ready(logits)
    assert logits.shape == (2, 2)
    print("KERNEL_OK")
</pallas_src>

<mosaic_0001>
module attributes {stable_mosaic.version = 11 : i64} {
  func.func @_cnn_kernel(%arg0: i32, %arg1: memref<1x192x64xf32, #tpu.memory_space<vmem>>, %arg2: memref<9x64x192xbf16, #tpu.memory_space<vmem>>, %arg3: memref<9x64x512xbf16, #tpu.memory_space<vmem>>, %arg4: memref<1x512xf32, #tpu.memory_space<vmem>>, %arg5: memref<2x512x256xbf16, #tpu.memory_space<vmem>>, %arg6: memref<6x32x64xbf16, #tpu.memory_space<vmem>>, %arg7: memref<3x256x512xbf16, #tpu.memory_space<vmem>>, %arg8: memref<1x512xf32, #tpu.memory_space<vmem>>, %arg9: memref<2x512x256xbf16, #tpu.memory_space<vmem>>, %arg10: memref<6x16x32xbf16, #tpu.memory_space<vmem>>, %arg11: memref<3x256x512xbf16, #tpu.memory_space<vmem>>, %arg12: memref<1x512xf32, #tpu.memory_space<vmem>>, %arg13: memref<512x128xbf16, #tpu.memory_space<vmem>>, %arg14: memref<16x128xf32, #tpu.memory_space<vmem>>, %arg15: memref<128x128xf32, #tpu.memory_space<vmem>>, %arg16: memref<1x128xf32, #tpu.memory_space<vmem>>, %arg17: memref<1x1x128xf32, #tpu.memory_space<vmem>>) attributes {dimension_semantics = [#tpu.dimension_semantics<parallel>], iteration_bounds = array<i64: 2>, scalar_prefetch = 0 : i64, scratch_operands = 0 : i64, tpu.core_type = #tpu.core_type<tc>, window_params = [{transform_indices = @transform_0, window_bounds = array<i64: 1, 192, 64>}, {pipeline_mode = #tpu.pipeline_mode<synchronous>, transform_indices = @transform_1, window_bounds = array<i64: 9, 64, 192>}, {pipeline_mode = #tpu.pipeline_mode<synchronous>, transform_indices = @transform_2, window_bounds = array<i64: 9, 64, 512>}, {pipeline_mode = #tpu.pipeline_mode<synchronous>, transform_indices = @transform_3, window_bounds = array<i64: 1, 512>}, {pipeline_mode = #tpu.pipeline_mode<synchronous>, transform_indices = @transform_4, window_bounds = array<i64: 2, 512, 256>}, {pipeline_mode = #tpu.pipeline_mode<synchronous>, transform_indices = @transform_5, window_bounds = array<i64: 6, 32, 64>}, {pipeline_mode = #tpu.pipeline_mode<synchronous>, transform_indices = @transform_6, window_bounds = array<i64: 3, 256, 512>}, {pipeline_mode = #tpu.pipeline_mode<synchronous>, transform_indices = @transform_7, window_bounds = array<i64: 1, 512>}, {pipeline_mode = #tpu.pipeline_mode<synchronous>, transform_indices = @transform_8, window_bounds = array<i64: 2, 512, 256>}, {pipeline_mode = #tpu.pipeline_mode<synchronous>, transform_indices = @transform_9, window_bounds = array<i64: 6, 16, 32>}, {pipeline_mode = #tpu.pipeline_mode<synchronous>, transform_indices = @transform_10, window_bounds = array<i64: 3, 256, 512>}, {pipeline_mode = #tpu.pipeline_mode<synchronous>, transform_indices = @transform_11, window_bounds = array<i64: 1, 512>}, {pipeline_mode = #tpu.pipeline_mode<synchronous>, transform_indices = @transform_12, window_bounds = array<i64: 512, 128>}, {pipeline_mode = #tpu.pipeline_mode<synchronous>, transform_indices = @transform_13, window_bounds = array<i64: 16, 128>}, {pipeline_mode = #tpu.pipeline_mode<synchronous>, transform_indices = @transform_14, window_bounds = array<i64: 128, 128>}, {pipeline_mode = #tpu.pipeline_mode<synchronous>, transform_indices = @transform_15, window_bounds = array<i64: 1, 128>}, {transform_indices = @transform_16, window_bounds = array<i64: 1, 1, 128>}]} {
    %c0 = arith.constant 0 : index
    %c0_0 = arith.constant 0 : index
    %c0_1 = arith.constant 0 : index
    %0 = vector.load %arg1[%c0, %c0_0, %c0_1] : memref<1x192x64xf32, #tpu.memory_space<vmem>>, vector<1x192x64xf32>
    %1 = vector.shape_cast %0 : vector<1x192x64xf32> to vector<192x64xf32>
    %2 = arith.truncf %1 : vector<192x64xf32> to vector<192x64xbf16>
    %cst = arith.constant 0.000000e+00 : f32
    %3 = vector.broadcast %cst : f32 to vector<64x512xf32>
    %c0_2 = arith.constant 0 : index
    %c0_3 = arith.constant 0 : index
    %c0_4 = arith.constant 0 : index
    %4 = vector.load %arg2[%c0_2, %c0_3, %c0_4] : memref<9x64x192xbf16, #tpu.memory_space<vmem>>, vector<1x64x192xbf16>
    %5 = vector.shape_cast %4 : vector<1x64x192xbf16> to vector<64x192xbf16>
    %cst_5 = arith.constant dense<0.000000e+00> : vector<64x64xf32>
    %6 = tpu.matmul %5, %2, %cst_5 {dimension_numbers = #tpu.dot_dimension_numbers<[1], [0], [0], [1], [0, 0, 1, 1], [], []>} : vector<64x192xbf16>, vector<192x64xbf16>, vector<64x64xf32> -> vector<64x64xf32>
    %7 = arith.truncf %6 : vector<64x64xf32> to vector<64x64xbf16>
    %c0_6 = arith.constant 0 : index
    %c0_7 = arith.constant 0 : index
    %c0_8 = arith.constant 0 : index
    %8 = vector.load %arg3[%c0_6, %c0_7, %c0_8] : memref<9x64x512xbf16, #tpu.memory_space<vmem>>, vector<1x64x512xbf16>
    %9 = vector.shape_cast %8 : vector<1x64x512xbf16> to vector<64x512xbf16>
    %cst_9 = arith.constant dense<0.000000e+00> : vector<64x512xf32>
    %10 = tpu.matmul %7, %9, %cst_9 {dimension_numbers = #tpu.dot_dimension_numbers<[1], [0], [0], [1], [0, 0, 1, 1], [], []>} : vector<64x64xbf16>, vector<64x512xbf16>, vector<64x512xf32> -> vector<64x512xf32>
    %11 = arith.addf %3, %10 : vector<64x512xf32>
    %c1 = arith.constant 1 : index
    %c0_10 = arith.constant 0 : index
    %c0_11 = arith.constant 0 : index
    %12 = vector.load %arg2[%c1, %c0_10, %c0_11] : memref<9x64x192xbf16, #tpu.memory_space<vmem>>, vector<1x64x192xbf16>
    %13 = vector.shape_cast %12 : vector<1x64x192xbf16> to vector<64x192xbf16>
    %cst_12 = arith.constant dense<0.000000e+00> : vector<64x64xf32>
    %14 = tpu.matmul %13, %2, %cst_12 {dimension_numbers = #tpu.dot_dimension_numbers<[1], [0], [0], [1], [0, 0, 1, 1], [], []>} : vector<64x192xbf16>, vector<192x64xbf16>, vector<64x64xf32> -> vector<64x64xf32>
    %15 = arith.truncf %14 : vector<64x64xf32> to vector<64x64xbf16>
    %c1_13 = arith.constant 1 : index
    %c0_14 = arith.constant 0 : index
    %c0_15 = arith.constant 0 : index
    %16 = vector.load %arg3[%c1_13, %c0_14, %c0_15] : memref<9x64x512xbf16, #tpu.memory_space<vmem>>, vector<1x64x512xbf16>
    %17 = vector.shape_cast %16 : vector<1x64x512xbf16> to vector<64x512xbf16>
    %cst_16 = arith.constant dense<0.000000e+00> : vector<64x512xf32>
    %18 = tpu.matmul %15, %17, %cst_16 {dimension_numbers = #tpu.dot_dimension_numbers<[1], [0], [0], [1], [0, 0, 1, 1], [], []>} : vector<64x64xbf16>, vector<64x512xbf16>, vector<64x512xf32> -> vector<64x512xf32>
    %19 = arith.addf %11, %18 : vector<64x512xf32>
    %c2 = arith.constant 2 : index
    %c0_17 = arith.constant 0 : index
    %c0_18 = arith.constant 0 : index
    %20 = vector.load %arg2[%c2, %c0_17, %c0_18] : memref<9x64x192xbf16, #tpu.memory_space<vmem>>, vector<1x64x192xbf16>
    %21 = vector.shape_cast %20 : vector<1x64x192xbf16> to vector<64x192xbf16>
    %cst_19 = arith.constant dense<0.000000e+00> : vector<64x64xf32>
    %22 = tpu.matmul %21, %2, %cst_19 {dimension_numbers = #tpu.dot_dimension_numbers<[1], [0], [0], [1], [0, 0, 1, 1], [], []>} : vector<64x192xbf16>, vector<192x64xbf16>, vector<64x64xf32> -> vector<64x64xf32>
    %23 = arith.truncf %22 : vector<64x64xf32> to vector<64x64xbf16>
    %c2_20 = arith.constant 2 : index
    %c0_21 = arith.constant 0 : index
    %c0_22 = arith.constant 0 : index
    %24 = vector.load %arg3[%c2_20, %c0_21, %c0_22] : memref<9x64x512xbf16, #tpu.memory_space<vmem>>, vector<1x64x512xbf16>
    %25 = vector.shape_cast %24 : vector<1x64x512xbf16> to vector<64x512xbf16>
    %cst_23 = arith.constant dense<0.000000e+00> : vector<64x512xf32>
    %26 = tpu.matmul %23, %25, %cst_23 {dimension_numbers = #tpu.dot_dimension_numbers<[1], [0], [0], [1], [0, 0, 1, 1], [], []>} : vector<64x64xbf16>, vector<64x512xbf16>, vector<64x512xf32> -> vector<64x512xf32>
    %27 = arith.addf %19, %26 : vector<64x512xf32>
    %c3 = arith.constant 3 : index
    %c0_24 = arith.constant 0 : index
    %c0_25 = arith.constant 0 : index
    %28 = vector.load %arg2[%c3, %c0_24, %c0_25] : memref<9x64x192xbf16, #tpu.memory_space<vmem>>, vector<1x64x192xbf16>
    %29 = vector.shape_cast %28 : vector<1x64x192xbf16> to vector<64x192xbf16>
    %cst_26 = arith.constant dense<0.000000e+00> : vector<64x64xf32>
    %30 = tpu.matmul %29, %2, %cst_26 {dimension_numbers = #tpu.dot_dimension_numbers<[1], [0], [0], [1], [0, 0, 1, 1], [], []>} : vector<64x192xbf16>, vector<192x64xbf16>, vector<64x64xf32> -> vector<64x64xf32>
    %31 = arith.truncf %30 : vector<64x64xf32> to vector<64x64xbf16>
    %c3_27 = arith.constant 3 : index
    %c0_28 = arith.constant 0 : index
    %c0_29 = arith.constant 0 : index
    %32 = vector.load %arg3[%c3_27, %c0_28, %c0_29] : memref<9x64x512xbf16, #tpu.memory_space<vmem>>, vector<1x64x512xbf16>
    %33 = vector.shape_cast %32 : vector<1x64x512xbf16> to vector<64x512xbf16>
    %cst_30 = arith.constant dense<0.000000e+00> : vector<64x512xf32>
    %34 = tpu.matmul %31, %33, %cst_30 {dimension_numbers = #tpu.dot_dimension_numbers<[1], [0], [0], [1], [0, 0, 1, 1], [], []>} : vector<64x64xbf16>, vector<64x512xbf16>, vector<64x512xf32> -> vector<64x512xf32>
    %35 = arith.addf %27, %34 : vector<64x512xf32>
    %c4 = arith.constant 4 : index
    %c0_31 = arith.constant 0 : index
    %c0_32 = arith.constant 0 : index
    %36 = vector.load %arg2[%c4, %c0_31, %c0_32] : memref<9x64x192xbf16, #tpu.memory_space<vmem>>, vector<1x64x192xbf16>
    %37 = vector.shape_cast %36 : vector<1x64x192xbf16> to vector<64x192xbf16>
    %cst_33 = arith.constant dense<0.000000e+00> : vector<64x64xf32>
    %38 = tpu.matmul %37, %2, %cst_33 {dimension_numbers = #tpu.dot_dimension_numbers<[1], [0], [0], [1], [0, 0, 1, 1], [], []>} : vector<64x192xbf16>, vector<192x64xbf16>, vector<64x64xf32> -> vector<64x64xf32>
    %39 = arith.truncf %38 : vector<64x64xf32> to vector<64x64xbf16>
    %c4_34 = arith.constant 4 : index
    %c0_35 = arith.constant 0 : index
    %c0_36 = arith.constant 0 : index
    %40 = vector.load %arg3[%c4_34, %c0_35, %c0_36] : memref<9x64x512xbf16, #tpu.memory_space<vmem>>, vector<1x64x512xbf16>
    %41 = vector.shape_cast %40 : vector<1x64x512xbf16> to vector<64x512xbf16>
    %cst_37 = arith.constant dense<0.000000e+00> : vector<64x512xf32>
    %42 = tpu.matmul %39, %41, %cst_37 {dimension_numbers = #tpu.dot_dimension_numbers<[1], [0], [0], [1], [0, 0, 1, 1], [], []>} : vector<64x64xbf16>, vector<64x512xbf16>, vector<64x512xf32> -> vector<64x512xf32>
    %43 = arith.addf %35, %42 : vector<64x512xf32>
    %c5 = arith.constant 5 : index
    %c0_38 = arith.constant 0 : index
    %c0_39 = arith.constant 0 : index
    %44 = vector.load %arg2[%c5, %c0_38, %c0_39] : memref<9x64x192xbf16, #tpu.memory_space<vmem>>, vector<1x64x192xbf16>
    %45 = vector.shape_cast %44 : vector<1x64x192xbf16> to vector<64x192xbf16>
    %cst_40 = arith.constant dense<0.000000e+00> : vector<64x64xf32>
    %46 = tpu.matmul %45, %2, %cst_40 {dimension_numbers = #tpu.dot_dimension_numbers<[1], [0], [0], [1], [0, 0, 1, 1], [], []>} : vector<64x192xbf16>, vector<192x64xbf16>, vector<64x64xf32> -> vector<64x64xf32>
    %47 = arith.truncf %46 : vector<64x64xf32> to vector<64x64xbf16>
    %c5_41 = arith.constant 5 : index
    %c0_42 = arith.constant 0 : index
    %c0_43 = arith.constant 0 : index
    %48 = vector.load %arg3[%c5_41, %c0_42, %c0_43] : memref<9x64x512xbf16, #tpu.memory_space<vmem>>, vector<1x64x512xbf16>
    %49 = vector.shape_cast %48 : vector<1x64x512xbf16> to vector<64x512xbf16>
    %cst_44 = arith.constant dense<0.000000e+00> : vector<64x512xf32>
    %50 = tpu.matmul %47, %49, %cst_44 {dimension_numbers = #tpu.dot_dimension_numbers<[1], [0], [0], [1], [0, 0, 1, 1], [], []>} : vector<64x64xbf16>, vector<64x512xbf16>, vector<64x512xf32> -> vector<64x512xf32>
    %51 = arith.addf %43, %50 : vector<64x512xf32>
    %c6 = arith.constant 6 : index
    %c0_45 = arith.constant 0 : index
    %c0_46 = arith.constant 0 : index
    %52 = vector.load %arg2[%c6, %c0_45, %c0_46] : memref<9x64x192xbf16, #tpu.memory_space<vmem>>, vector<1x64x192xbf16>
    %53 = vector.shape_cast %52 : vector<1x64x192xbf16> to vector<64x192xbf16>
    %cst_47 = arith.constant dense<0.000000e+00> : vector<64x64xf32>
    %54 = tpu.matmul %53, %2, %cst_47 {dimension_numbers = #tpu.dot_dimension_numbers<[1], [0], [0], [1], [0, 0, 1, 1], [], []>} : vector<64x192xbf16>, vector<192x64xbf16>, vector<64x64xf32> -> vector<64x64xf32>
    %55 = arith.truncf %54 : vector<64x64xf32> to vector<64x64xbf16>
    %c6_48 = arith.constant 6 : index
    %c0_49 = arith.constant 0 : index
    %c0_50 = arith.constant 0 : index
    %56 = vector.load %arg3[%c6_48, %c0_49, %c0_50] : memref<9x64x512xbf16, #tpu.memory_space<vmem>>, vector<1x64x512xbf16>
    %57 = vector.shape_cast %56 : vector<1x64x512xbf16> to vector<64x512xbf16>
    %cst_51 = arith.constant dense<0.000000e+00> : vector<64x512xf32>
    %58 = tpu.matmul %55, %57, %cst_51 {dimension_numbers = #tpu.dot_dimension_numbers<[1], [0], [0], [1], [0, 0, 1, 1], [], []>} : vector<64x64xbf16>, vector<64x512xbf16>, vector<64x512xf32> -> vector<64x512xf32>
    %59 = arith.addf %51, %58 : vector<64x512xf32>
    %c7 = arith.constant 7 : index
    %c0_52 = arith.constant 0 : index
    %c0_53 = arith.constant 0 : index
    %60 = vector.load %arg2[%c7, %c0_52, %c0_53] : memref<9x64x192xbf16, #tpu.memory_space<vmem>>, vector<1x64x192xbf16>
    %61 = vector.shape_cast %60 : vector<1x64x192xbf16> to vector<64x192xbf16>
    %cst_54 = arith.constant dense<0.000000e+00> : vector<64x64xf32>
    %62 = tpu.matmul %61, %2, %cst_54 {dimension_numbers = #tpu.dot_dimension_numbers<[1], [0], [0], [1], [0, 0, 1, 1], [], []>} : vector<64x192xbf16>, vector<192x64xbf16>, vector<64x64xf32> -> vector<64x64xf32>
    %63 = arith.truncf %62 : vector<64x64xf32> to vector<64x64xbf16>
    %c7_55 = arith.constant 7 : index
    %c0_56 = arith.constant 0 : index
    %c0_57 = arith.constant 0 : index
    %64 = vector.load %arg3[%c7_55, %c0_56, %c0_57] : memref<9x64x512xbf16, #tpu.memory_space<vmem>>, vector<1x64x512xbf16>
    %65 = vector.shape_cast %64 : vector<1x64x512xbf16> to vector<64x512xbf16>
    %cst_58 = arith.constant dense<0.000000e+00> : vector<64x512xf32>
    %66 = tpu.matmul %63, %65, %cst_58 {dimension_numbers = #tpu.dot_dimension_numbers<[1], [0], [0], [1], [0, 0, 1, 1], [], []>} : vector<64x64xbf16>, vector<64x512xbf16>, vector<64x512xf32> -> vector<64x512xf32>
    %67 = arith.addf %59, %66 : vector<64x512xf32>
    %c8 = arith.constant 8 : index
    %c0_59 = arith.constant 0 : index
    %c0_60 = arith.constant 0 : index
    %68 = vector.load %arg2[%c8, %c0_59, %c0_60] : memref<9x64x192xbf16, #tpu.memory_space<vmem>>, vector<1x64x192xbf16>
    %69 = vector.shape_cast %68 : vector<1x64x192xbf16> to vector<64x192xbf16>
    %cst_61 = arith.constant dense<0.000000e+00> : vector<64x64xf32>
    %70 = tpu.matmul %69, %2, %cst_61 {dimension_numbers = #tpu.dot_dimension_numbers<[1], [0], [0], [1], [0, 0, 1, 1], [], []>} : vector<64x192xbf16>, vector<192x64xbf16>, vector<64x64xf32> -> vector<64x64xf32>
    %71 = arith.truncf %70 : vector<64x64xf32> to vector<64x64xbf16>
    %c8_62 = arith.constant 8 : index
    %c0_63 = arith.constant 0 : index
    %c0_64 = arith.constant 0 : index
    %72 = vector.load %arg3[%c8_62, %c0_63, %c0_64] : memref<9x64x512xbf16, #tpu.memory_space<vmem>>, vector<1x64x512xbf16>
    %73 = vector.shape_cast %72 : vector<1x64x512xbf16> to vector<64x512xbf16>
    %cst_65 = arith.constant dense<0.000000e+00> : vector<64x512xf32>
    %74 = tpu.matmul %71, %73, %cst_65 {dimension_numbers = #tpu.dot_dimension_numbers<[1], [0], [0], [1], [0, 0, 1, 1], [], []>} : vector<64x64xbf16>, vector<64x512xbf16>, vector<64x512xf32> -> vector<64x512xf32>
    %75 = arith.addf %67, %74 : vector<64x512xf32>
    %c0_66 = arith.constant 0 : index
    %c0_67 = arith.constant 0 : index
    %76 = vector.load %arg4[%c0_66, %c0_67] : memref<1x512xf32, #tpu.memory_space<vmem>>, vector<1x512xf32>
    %77 = vector.broadcast %76 : vector<1x512xf32> to vector<64x512xf32>
    %78 = arith.addf %75, %77 : vector<64x512xf32>
    %cst_68 = arith.constant 0.000000e+00 : f32
    %79 = vector.broadcast %cst_68 : f32 to vector<64x512xf32>
    %80 = arith.maximumf %78, %79 : vector<64x512xf32>
    %81 = arith.truncf %80 : vector<64x512xf32> to vector<64x512xbf16>
    %c0_69 = arith.constant 0 : index
    %c0_70 = arith.constant 0 : index
    %c0_71 = arith.constant 0 : index
    %82 = vector.load %arg5[%c0_69, %c0_70, %c0_71] : memref<2x512x256xbf16, #tpu.memory_space<vmem>>, vector<1x512x256xbf16>
    %83 = vector.shape_cast %82 : vector<1x512x256xbf16> to vector<512x256xbf16>
    %cst_72 = arith.constant dense<0.000000e+00> : vector<64x256xf32>
    %84 = tpu.matmul %81, %83, %cst_72 {dimension_numbers = #tpu.dot_dimension_numbers<[1], [0], [0], [1], [0, 0, 1, 1], [], []>} : vector<64x512xbf16>, vector<512x256xbf16>, vector<64x256xf32> -> vector<64x256xf32>
    %c1_73 = arith.constant 1 : index
    %c0_74 = arith.constant 0 : index
    %c0_75 = arith.constant 0 : index
    %85 = vector.load %arg5[%c1_73, %c0_74, %c0_75] : memref<2x512x256xbf16, #tpu.memory_space<vmem>>, vector<1x512x256xbf16>
    %86 = vector.shape_cast %85 : vector<1x512x256xbf16> to vector<512x256xbf16>
    %cst_76 = arith.constant dense<0.000000e+00> : vector<64x256xf32>
    %87 = tpu.matmul %81, %86, %cst_76 {dimension_numbers = #tpu.dot_dimension_numbers<[1], [0], [0], [1], [0, 0, 1, 1], [], []>} : vector<64x512xbf16>, vector<512x256xbf16>, vector<64x256xf32> -> vector<64x256xf32>
    %88 = arith.maximumf %84, %87 : vector<64x256xf32>
    %89 = arith.truncf %88 : vector<64x256xf32> to vector<64x256xbf16>
    %cst_77 = arith.constant 0.000000e+00 : f32
    %90 = vector.broadcast %cst_77 : f32 to vector<32x512xf32>
    %c0_78 = arith.constant 0 : index
    %c0_79 = arith.constant 0 : index
    %c0_80 = arith.constant 0 : index
    %91 = vector.load %arg6[%c0_78, %c0_79, %c0_80] : memref<6x32x64xbf16, #tpu.memory_space<vmem>>, vector<1x32x64xbf16>
    %92 = vector.shape_cast %91 : vector<1x32x64xbf16> to vector<32x64xbf16>
    %cst_81 = arith.constant dense<0.000000e+00> : vector<32x256xf32>
    %93 = tpu.matmul %92, %89, %cst_81 {dimension_numbers = #tpu.dot_dimension_numbers<[1], [0], [0], [1], [0, 0, 1, 1], [], []>} : vector<32x64xbf16>, vector<64x256xbf16>, vector<32x256xf32> -> vector<32x256xf32>
    %c1_82 = arith.constant 1 : index
    %c0_83 = arith.constant 0 : index
    %c0_84 = arith.constant 0 : index
    %94 = vector.load %arg6[%c1_82, %c0_83, %c0_84] : memref<6x32x64xbf16, #tpu.memory_space<vmem>>, vector<1x32x64xbf16>
    %95 = vector.shape_cast %94 : vector<1x32x64xbf16> to vector<32x64xbf16>
    %cst_85 = arith.constant dense<0.000000e+00> : vector<32x256xf32>
    %96 = tpu.matmul %95, %89, %cst_85 {dimension_numbers = #tpu.dot_dimension_numbers<[1], [0], [0], [1], [0, 0, 1, 1], [], []>} : vector<32x64xbf16>, vector<64x256xbf16>, vector<32x256xf32> -> vector<32x256xf32>
    %97 = arith.maximumf %93, %96 : vector<32x256xf32>
    %98 = arith.truncf %97 : vector<32x256xf32> to vector<32x256xbf16>
    %c0_86 = arith.constant 0 : index
    %c0_87 = arith.constant 0 : index
    %c0_88 = arith.constant 0 : index
    %99 = vector.load %arg7[%c0_86, %c0_87, %c0_88] : memref<3x256x512xbf16, #tpu.memory_space<vmem>>, vector<1x256x512xbf16>
    %100 = vector.shape_cast %99 : vector<1x256x512xbf16> to vector<256x512xbf16>
    %cst_89 = arith.constant dense<0.000000e+00> : vector<32x512xf32>
    %101 = tpu.matmul %98, %100, %cst_89 {dimension_numbers = #tpu.dot_dimension_numbers<[1], [0], [0], [1], [0, 0, 1, 1], [], []>} : vector<32x256xbf16>, vector<256x512xbf16>, vector<32x512xf32> -> vector<32x512xf32>
    %102 = arith.addf %90, %101 : vector<32x512xf32>
    %c2_90 = arith.constant 2 : index
    %c0_91 = arith.constant 0 : index
    %c0_92 = arith.constant 0 : index
    %103 = vector.load %arg6[%c2_90, %c0_91, %c0_92] : memref<6x32x64xbf16, #tpu.memory_space<vmem>>, vector<1x32x64xbf16>
    %104 = vector.shape_cast %103 : vector<1x32x64xbf16> to vector<32x64xbf16>
    %cst_93 = arith.constant dense<0.000000e+00> : vector<32x256xf32>
    %105 = tpu.matmul %104, %89, %cst_93 {dimension_numbers = #tpu.dot_dimension_numbers<[1], [0], [0], [1], [0, 0, 1, 1], [], []>} : vector<32x64xbf16>, vector<64x256xbf16>, vector<32x256xf32> -> vector<32x256xf32>
    %c3_94 = arith.constant 3 : index
    %c0_95 = arith.constant 0 : index
    %c0_96 = arith.constant 0 : index
    %106 = vector.load %arg6[%c3_94, %c0_95, %c0_96] : memref<6x32x64xbf16, #tpu.memory_space<vmem>>, vector<1x32x64xbf16>
    %107 = vector.shape_cast %106 : vector<1x32x64xbf16> to vector<32x64xbf16>
    %cst_97 = arith.constant dense<0.000000e+00> : vector<32x256xf32>
    %108 = tpu.matmul %107, %89, %cst_97 {dimension_numbers = #tpu.dot_dimension_numbers<[1], [0], [0], [1], [0, 0, 1, 1], [], []>} : vector<32x64xbf16>, vector<64x256xbf16>, vector<32x256xf32> -> vector<32x256xf32>
    %109 = arith.maximumf %105, %108 : vector<32x256xf32>
    %110 = arith.truncf %109 : vector<32x256xf32> to vector<32x256xbf16>
    %c1_98 = arith.constant 1 : index
    %c0_99 = arith.constant 0 : index
    %c0_100 = arith.constant 0 : index
    %111 = vector.load %arg7[%c1_98, %c0_99, %c0_100] : memref<3x256x512xbf16, #tpu.memory_space<vmem>>, vector<1x256x512xbf16>
    %112 = vector.shape_cast %111 : vector<1x256x512xbf16> to vector<256x512xbf16>
    %cst_101 = arith.constant dense<0.000000e+00> : vector<32x512xf32>
    %113 = tpu.matmul %110, %112, %cst_101 {dimension_numbers = #tpu.dot_dimension_numbers<[1], [0], [0], [1], [0, 0, 1, 1], [], []>} : vector<32x256xbf16>, vector<256x512xbf16>, vector<32x512xf32> -> vector<32x512xf32>
    %114 = arith.addf %102, %113 : vector<32x512xf32>
    %c4_102 = arith.constant 4 : index
    %c0_103 = arith.constant 0 : index
    %c0_104 = arith.constant 0 : index
    %115 = vector.load %arg6[%c4_102, %c0_103, %c0_104] : memref<6x32x64xbf16, #tpu.memory_space<vmem>>, vector<1x32x64xbf16>
    %116 = vector.shape_cast %115 : vector<1x32x64xbf16> to vector<32x64xbf16>
    %cst_105 = arith.constant dense<0.000000e+00> : vector<32x256xf32>
    %117 = tpu.matmul %116, %89, %cst_105 {dimension_numbers = #tpu.dot_dimension_numbers<[1], [0], [0], [1], [0, 0, 1, 1], [], []>} : vector<32x64xbf16>, vector<64x256xbf16>, vector<32x256xf32> -> vector<32x256xf32>
    %c5_106 = arith.constant 5 : index
    %c0_107 = arith.constant 0 : index
    %c0_108 = arith.constant 0 : index
    %118 = vector.load %arg6[%c5_106, %c0_107, %c0_108] : memref<6x32x64xbf16, #tpu.memory_space<vmem>>, vector<1x32x64xbf16>
    %119 = vector.shape_cast %118 : vector<1x32x64xbf16> to vector<32x64xbf16>
    %cst_109 = arith.constant dense<0.000000e+00> : vector<32x256xf32>
    %120 = tpu.matmul %119, %89, %cst_109 {dimension_numbers = #tpu.dot_dimension_numbers<[1], [0], [0], [1], [0, 0, 1, 1], [], []>} : vector<32x64xbf16>, vector<64x256xbf16>, vector<32x256xf32> -> vector<32x256xf32>
    %121 = arith.maximumf %117, %120 : vector<32x256xf32>
    %122 = arith.truncf %121 : vector<32x256xf32> to vector<32x256xbf16>
    %c2_110 = arith.constant 2 : index
    %c0_111 = arith.constant 0 : index
    %c0_112 = arith.constant 0 : index
    %123 = vector.load %arg7[%c2_110, %c0_111, %c0_112] : memref<3x256x512xbf16, #tpu.memory_space<vmem>>, vector<1x256x512xbf16>
    %124 = vector.shape_cast %123 : vector<1x256x512xbf16> to vector<256x512xbf16>
    %cst_113 = arith.constant dense<0.000000e+00> : vector<32x512xf32>
    %125 = tpu.matmul %122, %124, %cst_113 {dimension_numbers = #tpu.dot_dimension_numbers<[1], [0], [0], [1], [0, 0, 1, 1], [], []>} : vector<32x256xbf16>, vector<256x512xbf16>, vector<32x512xf32> -> vector<32x512xf32>
    %126 = arith.addf %114, %125 : vector<32x512xf32>
    %c0_114 = arith.constant 0 : index
    %c0_115 = arith.constant 0 : index
    %127 = vector.load %arg8[%c0_114, %c0_115] : memref<1x512xf32, #tpu.memory_space<vmem>>, vector<1x512xf32>
    %128 = vector.broadcast %127 : vector<1x512xf32> to vector<32x512xf32>
    %129 = arith.addf %126, %128 : vector<32x512xf32>
    %cst_116 = arith.constant 0.000000e+00 : f32
    %130 = vector.broadcast %cst_116 : f32 to vector<32x512xf32>
    %131 = arith.maximumf %129, %130 : vector<32x512xf32>
    %132 = arith.truncf %131 : vector<32x512xf32> to vector<32x512xbf16>
    %c0_117 = arith.constant 0 : index
    %c0_118 = arith.constant 0 : index
    %c0_119 = arith.constant 0 : index
    %133 = vector.load %arg9[%c0_117, %c0_118, %c0_119] : memref<2x512x256xbf16, #tpu.memory_space<vmem>>, vector<1x512x256xbf16>
    %134 = vector.shape_cast %133 : vector<1x512x256xbf16> to vector<512x256xbf16>
    %cst_120 = arith.constant dense<0.000000e+00> : vector<32x256xf32>
    %135 = tpu.matmul %132, %134, %cst_120 {dimension_numbers = #tpu.dot_dimension_numbers<[1], [0], [0], [1], [0, 0, 1, 1], [], []>} : vector<32x512xbf16>, vector<512x256xbf16>, vector<32x256xf32> -> vector<32x256xf32>
    %c1_121 = arith.constant 1 : index
    %c0_122 = arith.constant 0 : index
    %c0_123 = arith.constant 0 : index
    %136 = vector.load %arg9[%c1_121, %c0_122, %c0_123] : memref<2x512x256xbf16, #tpu.memory_space<vmem>>, vector<1x512x256xbf16>
    %137 = vector.shape_cast %136 : vector<1x512x256xbf16> to vector<512x256xbf16>
    %cst_124 = arith.constant dense<0.000000e+00> : vector<32x256xf32>
    %138 = tpu.matmul %132, %137, %cst_124 {dimension_numbers = #tpu.dot_dimension_numbers<[1], [0], [0], [1], [0, 0, 1, 1], [], []>} : vector<32x512xbf16>, vector<512x256xbf16>, vector<32x256xf32> -> vector<32x256xf32>
    %139 = arith.maximumf %135, %138 : vector<32x256xf32>
    %140 = arith.truncf %139 : vector<32x256xf32> to vector<32x256xbf16>
    %cst_125 = arith.constant 0.000000e+00 : f32
    %141 = vector.broadcast %cst_125 : f32 to vector<16x512xf32>
    %c0_126 = arith.constant 0 : index
    %c0_127 = arith.constant 0 : index
    %c0_128 = arith.constant 0 : index
    %142 = vector.load %arg10[%c0_126, %c0_127, %c0_128] : memref<6x16x32xbf16, #tpu.memory_space<vmem>>, vector<1x16x32xbf16>
    %143 = vector.shape_cast %142 : vector<1x16x32xbf16> to vector<16x32xbf16>
    %cst_129 = arith.constant dense<0.000000e+00> : vector<16x256xf32>
    %144 = tpu.matmul %143, %140, %cst_129 {dimension_numbers = #tpu.dot_dimension_numbers<[1], [0], [0], [1], [0, 0, 1, 1], [], []>} : vector<16x32xbf16>, vector<32x256xbf16>, vector<16x256xf32> -> vector<16x256xf32>
    %c1_130 = arith.constant 1 : index
    %c0_131 = arith.constant 0 : index
    %c0_132 = arith.constant 0 : index
    %145 = vector.load %arg10[%c1_130, %c0_131, %c0_132] : memref<6x16x32xbf16, #tpu.memory_space<vmem>>, vector<1x16x32xbf16>
    %146 = vector.shape_cast %145 : vector<1x16x32xbf16> to vector<16x32xbf16>
    %cst_133 = arith.constant dense<0.000000e+00> : vector<16x256xf32>
    %147 = tpu.matmul %146, %140, %cst_133 {dimension_numbers = #tpu.dot_dimension_numbers<[1], [0], [0], [1], [0, 0, 1, 1], [], []>} : vector<16x32xbf16>, vector<32x256xbf16>, vector<16x256xf32> -> vector<16x256xf32>
    %148 = arith.maximumf %144, %147 : vector<16x256xf32>
    %149 = arith.truncf %148 : vector<16x256xf32> to vector<16x256xbf16>
    %c0_134 = arith.constant 0 : index
    %c0_135 = arith.constant 0 : index
    %c0_136 = arith.constant 0 : index
    %150 = vector.load %arg11[%c0_134, %c0_135, %c0_136] : memref<3x256x512xbf16, #tpu.memory_space<vmem>>, vector<1x256x512xbf16>
    %151 = vector.shape_cast %150 : vector<1x256x512xbf16> to vector<256x512xbf16>
    %cst_137 = arith.constant dense<0.000000e+00> : vector<16x512xf32>
    %152 = tpu.matmul %149, %151, %cst_137 {dimension_numbers = #tpu.dot_dimension_numbers<[1], [0], [0], [1], [0, 0, 1, 1], [], []>} : vector<16x256xbf16>, vector<256x512xbf16>, vector<16x512xf32> -> vector<16x512xf32>
    %153 = arith.addf %141, %152 : vector<16x512xf32>
    %c2_138 = arith.constant 2 : index
    %c0_139 = arith.constant 0 : index
    %c0_140 = arith.constant 0 : index
    %154 = vector.load %arg10[%c2_138, %c0_139, %c0_140] : memref<6x16x32xbf16, #tpu.memory_space<vmem>>, vector<1x16x32xbf16>
    %155 = vector.shape_cast %154 : vector<1x16x32xbf16> to vector<16x32xbf16>
    %cst_141 = arith.constant dense<0.000000e+00> : vector<16x256xf32>
    %156 = tpu.matmul %155, %140, %cst_141 {dimension_numbers = #tpu.dot_dimension_numbers<[1], [0], [0], [1], [0, 0, 1, 1], [], []>} : vector<16x32xbf16>, vector<32x256xbf16>, vector<16x256xf32> -> vector<16x256xf32>
    %c3_142 = arith.constant 3 : index
    %c0_143 = arith.constant 0 : index
    %c0_144 = arith.constant 0 : index
    %157 = vector.load %arg10[%c3_142, %c0_143, %c0_144] : memref<6x16x32xbf16, #tpu.memory_space<vmem>>, vector<1x16x32xbf16>
    %158 = vector.shape_cast %157 : vector<1x16x32xbf16> to vector<16x32xbf16>
    %cst_145 = arith.constant dense<0.000000e+00> : vector<16x256xf32>
    %159 = tpu.matmul %158, %140, %cst_145 {dimension_numbers = #tpu.dot_dimension_numbers<[1], [0], [0], [1], [0, 0, 1, 1], [], []>} : vector<16x32xbf16>, vector<32x256xbf16>, vector<16x256xf32> -> vector<16x256xf32>
    %160 = arith.maximumf %156, %159 : vector<16x256xf32>
    %161 = arith.truncf %160 : vector<16x256xf32> to vector<16x256xbf16>
    %c1_146 = arith.constant 1 : index
    %c0_147 = arith.constant 0 : index
    %c0_148 = arith.constant 0 : index
    %162 = vector.load %arg11[%c1_146, %c0_147, %c0_148] : memref<3x256x512xbf16, #tpu.memory_space<vmem>>, vector<1x256x512xbf16>
    %163 = vector.shape_cast %162 : vector<1x256x512xbf16> to vector<256x512xbf16>
    %cst_149 = arith.constant dense<0.000000e+00> : vector<16x512xf32>
    %164 = tpu.matmul %161, %163, %cst_149 {dimension_numbers = #tpu.dot_dimension_numbers<[1], [0], [0], [1], [0, 0, 1, 1], [], []>} : vector<16x256xbf16>, vector<256x512xbf16>, vector<16x512xf32> -> vector<16x512xf32>
    %165 = arith.addf %153, %164 : vector<16x512xf32>
    %c4_150 = arith.constant 4 : index
    %c0_151 = arith.constant 0 : index
    %c0_152 = arith.constant 0 : index
    %166 = vector.load %arg10[%c4_150, %c0_151, %c0_152] : memref<6x16x32xbf16, #tpu.memory_space<vmem>>, vector<1x16x32xbf16>
    %167 = vector.shape_cast %166 : vector<1x16x32xbf16> to vector<16x32xbf16>
    %cst_153 = arith.constant dense<0.000000e+00> : vector<16x256xf32>
    %168 = tpu.matmul %167, %140, %cst_153 {dimension_numbers = #tpu.dot_dimension_numbers<[1], [0], [0], [1], [0, 0, 1, 1], [], []>} : vector<16x32xbf16>, vector<32x256xbf16>, vector<16x256xf32> -> vector<16x256xf32>
    %c5_154 = arith.constant 5 : index
    %c0_155 = arith.constant 0 : index
    %c0_156 = arith.constant 0 : index
    %169 = vector.load %arg10[%c5_154, %c0_155, %c0_156] : memref<6x16x32xbf16, #tpu.memory_space<vmem>>, vector<1x16x32xbf16>
    %170 = vector.shape_cast %169 : vector<1x16x32xbf16> to vector<16x32xbf16>
    %cst_157 = arith.constant dense<0.000000e+00> : vector<16x256xf32>
    %171 = tpu.matmul %170, %140, %cst_157 {dimension_numbers = #tpu.dot_dimension_numbers<[1], [0], [0], [1], [0, 0, 1, 1], [], []>} : vector<16x32xbf16>, vector<32x256xbf16>, vector<16x256xf32> -> vector<16x256xf32>
    %172 = arith.maximumf %168, %171 : vector<16x256xf32>
    %173 = arith.truncf %172 : vector<16x256xf32> to vector<16x256xbf16>
    %c2_158 = arith.constant 2 : index
    %c0_159 = arith.constant 0 : index
    %c0_160 = arith.constant 0 : index
    %174 = vector.load %arg11[%c2_158, %c0_159, %c0_160] : memref<3x256x512xbf16, #tpu.memory_space<vmem>>, vector<1x256x512xbf16>
    %175 = vector.shape_cast %174 : vector<1x256x512xbf16> to vector<256x512xbf16>
    %cst_161 = arith.constant dense<0.000000e+00> : vector<16x512xf32>
    %176 = tpu.matmul %173, %175, %cst_161 {dimension_numbers = #tpu.dot_dimension_numbers<[1], [0], [0], [1], [0, 0, 1, 1], [], []>} : vector<16x256xbf16>, vector<256x512xbf16>, vector<16x512xf32> -> vector<16x512xf32>
    %177 = arith.addf %165, %176 : vector<16x512xf32>
    %c0_162 = arith.constant 0 : index
    %c0_163 = arith.constant 0 : index
    %178 = vector.load %arg12[%c0_162, %c0_163] : memref<1x512xf32, #tpu.memory_space<vmem>>, vector<1x512xf32>
    %179 = vector.broadcast %178 : vector<1x512xf32> to vector<16x512xf32>
    %180 = arith.addf %177, %179 : vector<16x512xf32>
    %cst_164 = arith.constant 0.000000e+00 : f32
    %181 = vector.broadcast %cst_164 : f32 to vector<16x512xf32>
    %182 = arith.maximumf %180, %181 : vector<16x512xf32>
    %183 = arith.truncf %182 : vector<16x512xf32> to vector<16x512xbf16>
    %c0_165 = arith.constant 0 : index
    %c0_166 = arith.constant 0 : index
    %184 = vector.load %arg13[%c0_165, %c0_166] : memref<512x128xbf16, #tpu.memory_space<vmem>>, vector<512x128xbf16>
    %cst_167 = arith.constant dense<0.000000e+00> : vector<16x128xf32>
    %185 = tpu.matmul %183, %184, %cst_167 {dimension_numbers = #tpu.dot_dimension_numbers<[1], [0], [0], [1], [0, 0, 1, 1], [], []>} : vector<16x512xbf16>, vector<512x128xbf16>, vector<16x128xf32> -> vector<16x128xf32>
    %c0_168 = arith.constant 0 : index
    %c0_169 = arith.constant 0 : index
    %186 = vector.load %arg14[%c0_168, %c0_169] : memref<16x128xf32, #tpu.memory_space<vmem>>, vector<16x128xf32>
    %187 = arith.mulf %185, %186 : vector<16x128xf32>
    %cst_170 = arith.constant dense<0.000000e+00> : vector<128xf32>
    %188 = vector.multi_reduction <add>, %187, %cst_170 [0] : vector<16x128xf32> to vector<128xf32>
    %189 = vector.shape_cast %188 : vector<128xf32> to vector<1x128xf32>
    %c0_171 = arith.constant 0 : index
    %c0_172 = arith.constant 0 : index
    %190 = vector.load %arg15[%c0_171, %c0_172] : memref<128x128xf32, #tpu.memory_space<vmem>>, vector<128x128xf32>
    %cst_173 = arith.constant dense<0.000000e+00> : vector<1x128xf32>
    %191 = tpu.matmul %189, %190, %cst_173 {dimension_numbers = #tpu.dot_dimension_numbers<[1], [0], [0], [1], [0, 0, 1, 1], [], []>} : vector<1x128xf32>, vector<128x128xf32>, vector<1x128xf32> -> vector<1x128xf32>
    %c0_174 = arith.constant 0 : index
    %c0_175 = arith.constant 0 : index
    %192 = vector.load %arg16[%c0_174, %c0_175] : memref<1x128xf32, #tpu.memory_space<vmem>>, vector<1x128xf32>
    %193 = arith.addf %191, %192 : vector<1x128xf32>
    %194 = vector.shape_cast %193 : vector<1x128xf32> to vector<1x1x128xf32>
    %c0_176 = arith.constant 0 : index
    %c0_177 = arith.constant 0 : index
    %c0_178 = arith.constant 0 : index
    %195 = vector.load %arg17[%c0_176, %c0_177, %c0_178] : memref<1x1x128xf32, #tpu.memory_space<vmem>>, vector<1x1x128xf32>
    tpu.vector_store %arg17[%c0_176, %c0_177, %c0_178], %194 {strides = array<i32>} : memref<1x1x128xf32, #tpu.memory_space<vmem>>, vector<1x1x128xf32>,
    return
  }
  func.func @transform_0(%arg0: i32) -> (i32, i32, i32) {
    %c0_i32 = arith.constant 0 : i32
    %c0_i32_0 = arith.constant 0 : i32
    %c0_i32_1 = arith.constant 0 : i32
    return %arg0, %c0_i32, %c0_i32_0 : i32, i32, i32
  }
  func.func @transform_1(%arg0: i32) -> (i32, i32, i32) {
    %c0_i32 = arith.constant 0 : i32
    %c0_i32_0 = arith.constant 0 : i32
    %c0_i32_1 = arith.constant 0 : i32
    %c0_i32_2 = arith.constant 0 : i32
    return %c0_i32, %c0_i32_0, %c0_i32_1 : i32, i32, i32
  }
  func.func @transform_2(%arg0: i32) -> (i32, i32, i32) {
    %c0_i32 = arith.constant 0 : i32
    %c0_i32_0 = arith.constant 0 : i32
    %c0_i32_1 = arith.constant 0 : i32
    %c0_i32_2 = arith.constant 0 : i32
    return %c0_i32, %c0_i32_0, %c0_i32_1 : i32, i32, i32
  }
  func.func @transform_3(%arg0: i32) -> (i32, i32) {
    %c0_i32 = arith.constant 0 : i32
    %c0_i32_0 = arith.constant 0 : i32
    %c0_i32_1 = arith.constant 0 : i32
    return %c0_i32, %c0_i32_0 : i32, i32
  }
  func.func @transform_4(%arg0: i32) -> (i32, i32, i32) {
    %c0_i32 = arith.constant 0 : i32
    %c0_i32_0 = arith.constant 0 : i32
    %c0_i32_1 = arith.constant 0 : i32
    %c0_i32_2 = arith.constant 0 : i32
    return %c0_i32, %c0_i32_0, %c0_i32_1 : i32, i32, i32
  }
  func.func @transform_5(%arg0: i32) -> (i32, i32, i32) {
    %c0_i32 = arith.constant 0 : i32
    %c0_i32_0 = arith.constant 0 : i32
    %c0_i32_1 = arith.constant 0 : i32
    %c0_i32_2 = arith.constant 0 : i32
    return %c0_i32, %c0_i32_0, %c0_i32_1 : i32, i32, i32
  }
  func.func @transform_6(%arg0: i32) -> (i32, i32, i32) {
    %c0_i32 = arith.constant 0 : i32
    %c0_i32_0 = arith.constant 0 : i32
    %c0_i32_1 = arith.constant 0 : i32
    %c0_i32_2 = arith.constant 0 : i32
    return %c0_i32, %c0_i32_0, %c0_i32_1 : i32, i32, i32
  }
  func.func @transform_7(%arg0: i32) -> (i32, i32) {
    %c0_i32 = arith.constant 0 : i32
    %c0_i32_0 = arith.constant 0 : i32
    %c0_i32_1 = arith.constant 0 : i32
    return %c0_i32, %c0_i32_0 : i32, i32
  }
  func.func @transform_8(%arg0: i32) -> (i32, i32, i32) {
    %c0_i32 = arith.constant 0 : i32
    %c0_i32_0 = arith.constant 0 : i32
    %c0_i32_1 = arith.constant 0 : i32
    %c0_i32_2 = arith.constant 0 : i32
    return %c0_i32, %c0_i32_0, %c0_i32_1 : i32, i32, i32
  }
  func.func @transform_9(%arg0: i32) -> (i32, i32, i32) {
    %c0_i32 = arith.constant 0 : i32
    %c0_i32_0 = arith.constant 0 : i32
    %c0_i32_1 = arith.constant 0 : i32
    %c0_i32_2 = arith.constant 0 : i32
    return %c0_i32, %c0_i32_0, %c0_i32_1 : i32, i32, i32
  }
  func.func @transform_10(%arg0: i32) -> (i32, i32, i32) {
    %c0_i32 = arith.constant 0 : i32
    %c0_i32_0 = arith.constant 0 : i32
    %c0_i32_1 = arith.constant 0 : i32
    %c0_i32_2 = arith.constant 0 : i32
    return %c0_i32, %c0_i32_0, %c0_i32_1 : i32, i32, i32
  }
  func.func @transform_11(%arg0: i32) -> (i32, i32) {
    %c0_i32 = arith.constant 0 : i32
    %c0_i32_0 = arith.constant 0 : i32
    %c0_i32_1 = arith.constant 0 : i32
    return %c0_i32, %c0_i32_0 : i32, i32
  }
  func.func @transform_12(%arg0: i32) -> (i32, i32) {
    %c0_i32 = arith.constant 0 : i32
    %c0_i32_0 = arith.constant 0 : i32
    %c0_i32_1 = arith.constant 0 : i32
    return %c0_i32, %c0_i32_0 : i32, i32
  }
  func.func @transform_13(%arg0: i32) -> (i32, i32) {
    %c0_i32 = arith.constant 0 : i32
    %c0_i32_0 = arith.constant 0 : i32
    %c0_i32_1 = arith.constant 0 : i32
    return %c0_i32, %c0_i32_0 : i32, i32
  }
  func.func @transform_14(%arg0: i32) -> (i32, i32) {
    %c0_i32 = arith.constant 0 : i32
    %c0_i32_0 = arith.constant 0 : i32
    %c0_i32_1 = arith.constant 0 : i32
    return %c0_i32, %c0_i32_0 : i32, i32
  }
  func.func @transform_15(%arg0: i32) -> (i32, i32) {
    %c0_i32 = arith.constant 0 : i32
    %c0_i32_0 = arith.constant 0 : i32
    %c0_i32_1 = arith.constant 0 : i32
    return %c0_i32, %c0_i32_0 : i32, i32
  }
  func.func @transform_16(%arg0: i32) -> (i32, i32, i32) {
    %c0_i32 = arith.constant 0 : i32
    %c0_i32_0 = arith.constant 0 : i32
    %c0_i32_1 = arith.constant 0 : i32
    return %arg0, %c0_i32, %c0_i32_0 : i32, i32, i32
  }
}

</mosaic_0001>

<bundles_post_ra>
// kernel: cnn_forward.1
= control target key start
LH: loop header
LB: loop body
LE: loop exit
PB: predicated region body
PF: predicated region fallthrough
CT: control target
= control target key end

     0   :  { %s15691_s0 = inlined_call_operand.hbm [shape: f32[2,192,64], index: 0, kind: input, shape index: {}]   ;;  %s15692_s1 = inlined_call_operand.hbm [shape: bf16[9,64,192], index: 1, kind: input, shape index: {}]   ;;  %s15693_s2 = inlined_call_operand.hbm [shape: bf16[9,64,512], index: 2, kind: input, shape index: {}]   ;;  %s15694_s3 = inlined_call_operand.vmem [shape: f32[1,512], index: 3, kind: input, shape index: {}]   ;;  %s15695_s4 = inlined_call_operand.hbm [shape: bf16[2,512,256], index: 4, kind: input, shape index: {}]   ;;  %s15696_s5 = inlined_call_operand.hbm [shape: bf16[6,32,64], index: 5, kind: input, shape index: {}]   ;;  %s15697_s6 = inlined_call_operand.hbm [shape: bf16[3,256,512], index: 6, kind: input, shape index: {}]   ;;  %s15698_s7 = inlined_call_operand.vmem [shape: f32[1,512], index: 7, kind: input, shape index: {}]   ;;  %s15699_s8 = inlined_call_operand.hbm [shape: bf16[2,512,256], index: 8, kind: input, shape index: {}]   ;;  %s15700_s9 = inlined_call_operand.hbm [shape: bf16[6,16,32], index: 9, kind: input, shape index: {}]   ;;  %s15701_s10 = inlined_call_operand.hbm [shape: bf16[3,256,512], index: 10, kind: input, shape index: {}]   ;;  %s15702_s11 = inlined_call_operand.vmem [shape: f32[1,512], index: 11, kind: input, shape index: {}]   ;;  %s15703_s12 = inlined_call_operand.hbm [shape: bf16[512,128], index: 12, kind: input, shape index: {}]   ;;  %s15704_s13 = inlined_call_operand.vmem [shape: f32[16,128], index: 13, kind: input, shape index: {}]   ;;  %s15705_s14 = inlined_call_operand.hbm [shape: f32[128,128], index: 14, kind: input, shape index: {}]   ;;  %s15706_s15 = inlined_call_operand.vmem [shape: f32[1,128], index: 15, kind: input, shape index: {}]   ;;  %s15707_s16 = inlined_call_operand.hbm [shape: f32[2,1,128], index: 16, kind: output, shape index: {}]  }
   0x1   :  { %15722 = sst [smem:[#allocation29_spill]] %s15691_s0 }
   0x2   :  { %15723 = sst [smem:[#allocation30_spill]] %s15692_s1 }
   0x3   :  { %15724 = sst [smem:[#allocation31_spill]] %s15693_s2 }
   0x4   :  { %15725 = sst [smem:[#allocation32_spill]] %s15694_s3 }
   0x5   :  { %15726 = sst [smem:[#allocation33_spill]] %s15695_s4 }
   0x6   :  { %15727 = sst [smem:[#allocation34_spill]] %s15696_s5 }
   0x7   :  { %15728 = sst [smem:[#allocation35_spill]] %s15697_s6 }
   0x8   :  { %15729 = sst [smem:[#allocation36_spill]] %s15698_s7 }
   0x9   :  { %15730 = sst [smem:[#allocation37_spill]] %s15702_s11 }
   0xa   :  { %15731 = sst [smem:[#allocation38_spill]] %s15704_s13 }
   0xb   :  { %15732 = sst [smem:[#allocation39_spill]] %s15706_s15 }
   0xc   :  { %15733 = sst [smem:[#allocation40_spill]] %s15707_s16 }
   0xd   :  { %21 = vsyncpa [#allocation3], 0 }
   0xe   :  { %23 = vsyncpa [#allocation3 + $0x1], 0 }
   0xf   :  { %24 = vsyncpa [#allocation6], 0 }
  0x10   :  { %25 = vsyncpa [#allocation9], 0 }
  0x11   :  { %26 = vsyncpa [#allocation12], 0 }
  0x12   :  { %27 = vsyncpa [#allocation15], 0 }
  0x13   :  { %28 = vsyncpa [#allocation18], 0 }
  0x14   :  { %29 = vsyncpa [#allocation4], 0 }
  0x15   :  { %31 = vsyncpa [#allocation4 + $0x1], 0  ;;  %s14528_s21 = smov 0   ;;  %s14530_s22 = smov 0  }
  0x16   :  { %s14532_s23 = smov 0   ;;  %s14534_s24 = smov 0  }
  0x17 LB: > { %s14421_s25 = smov [#allocation5]   ;;  %s14549_s27 = sadd.s32 4294967295, %s14419_s24   ;;  %s14419_s24 = sphi %s14534_s24, %s15777_s24   ;;  %s14415_s23 = sphi %s14532_s23, %s15776_s23   ;;  %s14411_s22 = sphi %s14530_s22, %s15775_s22   ;;  %s14407_s21 = sphi %s14528_s21, %s15774_s21  }
  0x18   : > { %s421_s26 = sshll.u32 %s14421_s25, 4  ;;  %p10998_p0 = scmp.ge.s32.totalorder %s14419_s24, 1  ;;  %s14554_s26 = int_to_ptr.vmem [resolvable:$true] %s421_s26 }
  0x19   : > { %p15712_p1 = scmp.eq.s32.totalorder %s14549_s27, 0  ;;  %p409_p2 = scmp.lt.s32.totalorder %s14419_s24, 3 }
  0x1a   : > { %s14422_s29 = smov [#allocation8]   ;;  %s14423_s17 = smov [#allocation11]  }
  0x1b   : > { %p14556_p3 = pnand %p10998_p0, %p409_p2  ;;  %s450_s30 = sshll.u32 %s14422_s29, 4  ;;  %s14569_s30 = int_to_ptr.vmem [resolvable:$true] %s450_s30 }
  0x1c   : > { %s14571_s18 = sshll.u32 %s14423_s17, 4  ;;  %s15737_s1 = sld [smem:[#allocation30_spill]]  ;;  %s477_s18 = int_to_ptr.vmem [resolvable:$true] %s14571_s18 }
  0x1d   : > { %s15734_s28 = scalar_select %p14556_p3, 1, 0 }
  0x1e   : > { %p12576_p5 = pneg %p14556_p3 }
  0x1f   : > { %15735 = sst [smem:[#allocation28_spill]] %s15734_s28 }
  0x20   : > { %p14565_p6 = pnand %p12576_p5, %p15712_p1 }
  0x22   : > { %s14023_s25 = scalar_lea.hbm %s15737_s1, 9216  ;;  %p14581_p8 = pneg %p14565_p6 }
  0x23   : > { %p14024_p7 = scmp.ne.s32.totalorder %s15737_s1, %s14023_s25  ;;  %p14030_p11 = scmp.lt.u32.totalorder %s14023_s25, %s15737_s1 }
  0x25   : > { %p14026_p9 = pnand %p14581_p8, %p14024_p7 }
  0x27   : > { %p14027_p10 = pneg %p14026_p9 }
  0x29   : > { %p14032_p12 = pnand %p14030_p11, %p14027_p10 }
  0x2b   : > { %14035 = shalt.err (!%p14032_p12)
}
  0x2c   : > { %s14036_s15 = scalar_lea.vmem %s14554_s26, 9216  ;;  %p14044_p5 = scmp.lt.s32.totalorder %s14554_s26, %s14554_s26 }
  0x2d   : > { %p14037_p13 = scmp.ne.s32.totalorder %s14554_s26, %s14036_s15  ;;  %p14045_p4 = scmp.lt.s32.totalorder %s14036_s15, %s14036_s15 }
  0x2f   : > { %p14039_p0 = pnand %p14037_p13, %p14581_p8  ;;  %p14046_p7 = por %p14045_p4, %p14044_p5 }
  0x31   : > { %p14040_p2 = pneg %p14039_p0 }
  0x33   : > { %p14047_p9 = pnand %p14046_p7, %p14040_p2 }
  0x35   : > { %14050 = shalt.err (!%p14047_p9)
}
  0x36   : > { %s15714_s16 = smov 128   ;;  %s15716_s13 = smov 8  }
  0x37   : > { %12579 = dma.hbm_to_vmem [thread:$0]  (!%p14565_p6), %s15737_s1, 9216, %s14554_s26, [#allocation6], %s15714_s16, %s15714_s16, %s15716_s13  }
  0x38   : > { %s15739_s4 = sld [smem:[#allocation33_spill]] }
  0x3e   : > { %s14051_s15 = scalar_lea.hbm %s15739_s4, 16384 }
  0x3f   : > { %p14052_p4 = scmp.ne.s32.totalorder %s15739_s4, %s14051_s15  ;;  %p14058_p12 = scmp.lt.u32.totalorder %s14051_s15, %s15739_s4 }
  0x41   : > { %p14054_p10 = pnand %p14052_p4, %p14581_p8 }
  0x43   : > { %p14055_p11 = pneg %p14054_p10 }
  0x45   : > { %p14060_p13 = pnand %p14058_p12, %p14055_p11 }
  0x47   : > { %14063 = shalt.err (!%p14060_p13)
}
  0x48   : > { %s14064_s26 = scalar_lea.vmem %s14569_s30, 16384  ;;  %p14072_p7 = scmp.lt.s32.totalorder %s14569_s30, %s14569_s30 }
  0x49   : > { %p14065_p0 = scmp.ne.s32.totalorder %s14569_s30, %s14064_s26  ;;  %p14073_p9 = scmp.lt.s32.totalorder %s14064_s26, %s14064_s26 }
  0x4b   : > { %p14067_p2 = pnand %p14065_p0, %p14581_p8  ;;  %p14074_p4 = por %p14073_p9, %p14072_p7 }
  0x4d   : > { %p14068_p5 = pneg %p14067_p2 }
  0x4f   : > { %p14075_p10 = pnand %p14074_p4, %p14068_p5 }
  0x51   : > { %14078 = shalt.err (!%p14075_p10)
}
  0x52   : > { %12585 = dma.hbm_to_vmem [thread:$0]  (!%p14565_p6), %s15739_s4, 16384, %s14569_s30, [#allocation9], %s15714_s16, %s15714_s16, %s15716_s13  }
  0x53   : > { %s15740_s6 = sld [smem:[#allocation35_spill]] }
  0x59   : > { %s14079_s19 = scalar_lea.hbm %s15740_s6, 24576 }
  0x5a   : > { %p14080_p11 = scmp.ne.s32.totalorder %s15740_s6, %s14079_s19  ;;  %p14086_p0 = scmp.lt.u32.totalorder %s14079_s19, %s15740_s6 }
  0x5c   : > { %p14082_p12 = pnand %p14080_p11, %p14581_p8 }
  0x5e   : > { %p14083_p13 = pneg %p14082_p12 }
  0x60   : > { %p14088_p2 = pnand %p14086_p0, %p14083_p13 }
  0x62   : > { %14091 = shalt.err (!%p14088_p2)
}
  0x63   : > { %s14092_s26 = scalar_lea.vmem %s477_s18, 24576  ;;  %p14100_p4 = scmp.lt.s32.totalorder %s477_s18, %s477_s18 }
  0x64   : > { %p14093_p5 = scmp.ne.s32.totalorder %s477_s18, %s14092_s26  ;;  %p14101_p10 = scmp.lt.s32.totalorder %s14092_s26, %s14092_s26 }
  0x66   : > { %p14095_p7 = pnand %p14093_p5, %p14581_p8  ;;  %p14102_p1 = por %p14101_p10, %p14100_p4 }
  0x68   : > { %p14096_p9 = pneg %p14095_p7 }
  0x6a   : > { %p14103_p3 = pnand %p14102_p1, %p14096_p9 }
  0x6c   : > { %14106 = shalt.err (!%p14103_p3)
}
  0x6d   : > { %s15718_s30 = smov 256   ;;  %s15720_s3 = smov 16  }
  0x6e   : > { %12591 = dma.hbm_to_vmem [thread:$0]  (!%p14565_p6), %s15740_s6, 24576, %s477_s18, [#allocation12], %s15718_s30, %s15718_s30, %s15720_s3  }
  0x6f   : > { %s14428_s28 = smov [#allocation14]   ;;  %s14429_s20 = smov [#allocation17]  }
  0x70   : > { %s505_s19 = sshll.u32 %s14428_s28, 4  ;;  %s534_s25 = sshll.u32 %s14429_s20, 4  ;;  %s506_s19 = int_to_ptr.vmem [resolvable:$true] %s505_s19  ;;  %s535_s25 = int_to_ptr.vmem [resolvable:$true] %s534_s25 }
  0x71   : > { %s14107_s26 = scalar_lea.hbm %s15700_s9, 768 }
  0x72   : > { %p14108_p1 = scmp.ne.s32.totalorder %s15700_s9, %s14107_s26  ;;  %p14114_p12 = scmp.lt.u32.totalorder %s14107_s26, %s15700_s9 }
  0x74   : > { %p14110_p3 = pnand %p14108_p1, %p14581_p8 }
  0x76   : > { %p14111_p11 = pneg %p14110_p3 }
  0x78   : > { %p14116_p13 = pnand %p14114_p12, %p14111_p11 }
  0x7a   : > { %14119 = shalt.err (!%p14116_p13)
}
  0x7b   : > { %s14120_s18 = scalar_lea.vmem %s506_s19, 768  ;;  %p14128_p7 = scmp.lt.s32.totalorder %s506_s19, %s506_s19 }
  0x7c   : > { %p14121_p0 = scmp.ne.s32.totalorder %s506_s19, %s14120_s18  ;;  %p14129_p9 = scmp.lt.s32.totalorder %s14120_s18, %s14120_s18 }
  0x7e   : > { %p14123_p2 = pnand %p14121_p0, %p14581_p8  ;;  %p14130_p4 = por %p14129_p9, %p14128_p7 }
  0x80   : > { %p14124_p5 = pneg %p14123_p2 }
  0x82   : > { %p14131_p10 = pnand %p14130_p4, %p14124_p5 }
  0x84   : > { %14134 = shalt.err (!%p14131_p10)
}
  0x85   : > { %s14430_s16 = smov 64   ;;  %s14431_s13 = smov 4  }
  0x86   : > { %12597 = dma.hbm_to_vmem [thread:$0]  (!%p14565_p6), %s15700_s9, 768, %s506_s19, [#allocation15], %s14430_s16, %s14430_s16, %s14431_s13  }
  0x87   : > { %s14135_s28 = scalar_lea.hbm %s15703_s12, 4096 }
  0x88   : > { %p14136_p1 = scmp.ne.s32.totalorder %s15703_s12, %s14135_s28  ;;  %p14142_p12 = scmp.lt.u32.totalorder %s14135_s28, %s15703_s12 }
  0x8a   : > { %p14138_p3 = pnand %p14136_p1, %p14581_p8 }
  0x8c   : > { %p14139_p11 = pneg %p14138_p3 }
  0x8e   : > { %p14144_p13 = pnand %p14142_p12, %p14139_p11 }
  0x90   : > { %14147 = shalt.err (!%p14144_p13)
}
  0x91   : > { %s14148_s18 = scalar_lea.vmem %s535_s25, 4096  ;;  %p14156_p7 = scmp.lt.s32.totalorder %s535_s25, %s535_s25 }
  0x92   : > { %p14149_p0 = scmp.ne.s32.totalorder %s535_s25, %s14148_s18  ;;  %p14157_p9 = scmp.lt.s32.totalorder %s14148_s18, %s14148_s18 }
  0x94   : > { %p14151_p2 = pnand %p14149_p0, %p14581_p8  ;;  %p14158_p4 = por %p14157_p9, %p14156_p7 }
  0x96   : > { %p14152_p5 = pneg %p14151_p2 }
  0x98   : > { %p14159_p10 = pnand %p14158_p4, %p14152_p5 }
  0x9a   : > { %14162 = shalt.err (!%p14159_p10)
}
  0x9b   : > { %12603 = dma.hbm_to_vmem [thread:$0]  (!%p14565_p6), %s15703_s12, 4096, %s535_s25, [#allocation18], %s14430_s16, %s14430_s16, %s14431_s13  }
  0x9c   : > { %s14432_s4 = smov [#allocation7]   ;;  %s14433_s11 = smov [#allocation10]  }
  0x9d   : > { %s434_s7 = sshll.u32 %s14432_s4, 4  ;;  %s463_s28 = sshll.u32 %s14433_s11, 4  ;;  %s435_s7 = int_to_ptr.vmem [resolvable:$true] %s434_s7  ;;  %s464_s28 = int_to_ptr.vmem [resolvable:$true] %s463_s28 }
  0x9e   : > { %s15741_s2 = sld [smem:[#allocation31_spill]] }
  0xa4   : > { %s14163_s15 = scalar_lea.hbm %s15741_s2, 18432 }
  0xa5   : > { %p14164_p1 = scmp.ne.s32.totalorder %s15741_s2, %s14163_s15  ;;  %p14170_p12 = scmp.lt.u32.totalorder %s14163_s15, %s15741_s2 }
  0xa7   : > { %p14166_p3 = pnand %p14164_p1, %p14581_p8 }
  0xa9   : > { %p14167_p11 = pneg %p14166_p3 }
  0xab   : > { %p14172_p13 = pnand %p14170_p12, %p14167_p11 }
  0xad   : > { %14175 = shalt.err (!%p14172_p13)
}
  0xae   : > { %s14176_s25 = scalar_lea.vmem %s435_s7, 18432  ;;  %p14184_p7 = scmp.lt.s32.totalorder %s435_s7, %s435_s7 }
  0xaf   : > { %p14177_p0 = scmp.ne.s32.totalorder %s435_s7, %s14176_s25  ;;  %p14185_p9 = scmp.lt.s32.totalorder %s14176_s25, %s14176_s25 }
  0xb1   : > { %p14179_p2 = pnand %p14177_p0, %p14581_p8  ;;  %p14186_p4 = por %p14185_p9, %p14184_p7 }
  0xb3   : > { %p14180_p5 = pneg %p14179_p2 }
  0xb5   : > { %p14187_p10 = pnand %p14186_p4, %p14180_p5 }
  0xb7   : > { %14190 = shalt.err (!%p14187_p10)
}
  0xb8   : > { %s15742_s1 = smov 256   ;;  %s15743_s5 = sld [smem:[#allocation34_spill]] }
  0xb9   : > { %12582 = dma.hbm_to_vmem [thread:$0]  (!%p14565_p6), %s15741_s2, 18432, %s435_s7, [#allocation6], %s15742_s1, %s15742_s1, %s15720_s3  }
  0xbe   : > { %s14191_s17 = scalar_lea.hbm %s15743_s5, 1536 }
  0xbf   : > { %p14192_p1 = scmp.ne.s32.totalorder %s15743_s5, %s14191_s17  ;;  %p14198_p12 = scmp.lt.u32.totalorder %s14191_s17, %s15743_s5 }
  0xc1   : > { %p14194_p3 = pnand %p14192_p1, %p14581_p8 }
  0xc3   : > { %p14195_p11 = pneg %p14194_p3 }
  0xc5   : > { %p14200_p13 = pnand %p14198_p12, %p14195_p11 }
  0xc7   : > { %14203 = shalt.err (!%p14200_p13)
}
  0xc8   : > { %s14204_s25 = scalar_lea.vmem %s464_s28, 1536  ;;  %p14212_p7 = scmp.lt.s32.totalorder %s464_s28, %s464_s28 }
  0xc9   : > { %p14205_p0 = scmp.ne.s32.totalorder %s464_s28, %s14204_s25  ;;  %p14213_p9 = scmp.lt.s32.totalorder %s14204_s25, %s14204_s25 }
  0xcb   : > { %p14207_p2 = pnand %p14205_p0, %p14581_p8  ;;  %p14214_p4 = por %p14213_p9, %p14212_p7 }
  0xcd   : > { %p14208_p5 = pneg %p14207_p2 }
  0xcf   : > { %p14215_p10 = pnand %p14214_p4, %p14208_p5 }
  0xd1   : > { %14218 = shalt.err (!%p14215_p10)
}
  0xd2   : > { %12588 = dma.hbm_to_vmem [thread:$0]  (!%p14565_p6), %s15743_s5, 1536, %s464_s28, [#allocation9], %s14430_s16, %s14430_s16, %s14431_s13  }
  0xd3   : > { %s14434_s4 = smov [#allocation13]   ;;  %s14435_s20 = smov [#allocation16]  }
  0xd4   : > { %s492_s11 = sshll.u32 %s14434_s4, 4  ;;  %s518_s17 = sshll.u32 %s14435_s20, 4  ;;  %s493_s11 = int_to_ptr.vmem [resolvable:$true] %s492_s11  ;;  %s519_s17 = int_to_ptr.vmem [resolvable:$true] %s518_s17 }
  0xd5   : > { %s14219_s18 = scalar_lea.hbm %s15699_s8, 16384 }
  0xd6   : > { %p14220_p1 = scmp.ne.s32.totalorder %s15699_s8, %s14219_s18  ;;  %p14226_p12 = scmp.lt.u32.totalorder %s14219_s18, %s15699_s8 }
  0xd8   : > { %p14222_p3 = pnand %p14220_p1, %p14581_p8 }
  0xda   : > { %p14223_p11 = pneg %p14222_p3 }
  0xdc   : > { %p14228_p13 = pnand %p14226_p12, %p14223_p11 }
  0xde   : > { %14231 = shalt.err (!%p14228_p13)
}
  0xdf   : > { %s14232_s16 = scalar_lea.vmem %s493_s11, 16384  ;;  %p14240_p7 = scmp.lt.s32.totalorder %s493_s11, %s493_s11 }
  0xe0   : > { %p14233_p0 = scmp.ne.s32.totalorder %s493_s11, %s14232_s16  ;;  %p14241_p9 = scmp.lt.s32.totalorder %s14232_s16, %s14232_s16 }
  0xe2   : > { %p14235_p2 = pnand %p14233_p0, %p14581_p8  ;;  %p14242_p4 = por %p14241_p9, %p14240_p7 }
  0xe4   : > { %p14236_p5 = pneg %p14235_p2 }
  0xe6   : > { %p14243_p10 = pnand %p14242_p4, %p14236_p5 }
  0xe8   : > { %14246 = shalt.err (!%p14243_p10)
}
  0xe9   : > { %s15744_s13 = smov 8   ;;  %s15745_s28 = smov 128  }
  0xea   : > { %12594 = dma.hbm_to_vmem [thread:$0]  (!%p14565_p6), %s15699_s8, 16384, %s493_s11, [#allocation12], %s15745_s28, %s15745_s28, %s15744_s13  }
  0xeb   : > { %s14247_s15 = scalar_lea.hbm %s15701_s10, 24576 }
  0xec   : > { %p14248_p1 = scmp.ne.s32.totalorder %s15701_s10, %s14247_s15  ;;  %p14254_p12 = scmp.lt.u32.totalorder %s14247_s15, %s15701_s10 }
  0xee   : > { %p14250_p3 = pnand %p14248_p1, %p14581_p8 }
  0xf0   : > { %p14251_p11 = pneg %p14250_p3 }
  0xf2   : > { %p14256_p13 = pnand %p14254_p12, %p14251_p11 }
  0xf4   : > { %14259 = shalt.err (!%p14256_p13)
}
  0xf5   : > { %s14260_s7 = scalar_lea.vmem %s519_s17, 24576  ;;  %p14268_p7 = scmp.lt.s32.totalorder %s519_s17, %s519_s17 }
  0xf6   : > { %p14261_p0 = scmp.ne.s32.totalorder %s519_s17, %s14260_s7  ;;  %p14269_p9 = scmp.lt.s32.totalorder %s14260_s7, %s14260_s7 }
  0xf8   : > { %p14263_p2 = pnand %p14261_p0, %p14581_p8  ;;  %p14270_p4 = por %p14269_p9, %p14268_p7 }
  0xfa   : > { %p14264_p5 = pneg %p14263_p2 }
  0xfc   : > { %p14271_p10 = pnand %p14270_p4, %p14264_p5 }
  0xfe   : > { %14274 = shalt.err (!%p14271_p10)
}
  0xff   : > { %s15746_s11 = smov 16   ;;  %s14436_s30 = smov [#allocation19]  }
 0x100   : > { %12600 = dma.hbm_to_vmem [thread:$0]  (!%p14565_p6), %s15701_s10, 24576, %s519_s17, [#allocation15], %s15742_s1, %s15742_s1, %s15746_s11  }
 0x101   : > { %s550_s4 = sshll.u32 %s14436_s30, 4  ;;  %s14275_s26 = scalar_lea.hbm %s15705_s14, 2048  ;;  %s551_s4 = int_to_ptr.vmem [resolvable:$true] %s550_s4 }
 0x102   : > { %p14276_p1 = scmp.ne.s32.totalorder %s15705_s14, %s14275_s26  ;;  %p14282_p12 = scmp.lt.u32.totalorder %s14275_s26, %s15705_s14 }
 0x104   : > { %p14278_p3 = pnand %p14276_p1, %p14581_p8 }
 0x106   : > { %p14279_p11 = pneg %p14278_p3 }
 0x108   : > { %p14284_p13 = pnand %p14282_p12, %p14279_p11 }
 0x10a   : > { %14287 = shalt.err (!%p14284_p13)
}
 0x10b   : > { %s14288_s1 = scalar_lea.vmem %s551_s4, 2048  ;;  %p14296_p7 = scmp.lt.s32.totalorder %s551_s4, %s551_s4 }
 0x10c   : > { %p14289_p0 = scmp.ne.s32.totalorder %s551_s4, %s14288_s1  ;;  %p14297_p9 = scmp.lt.s32.totalorder %s14288_s1, %s14288_s1 }
 0x10e   : > { %p14291_p2 = pnand %p14289_p0, %p14581_p8  ;;  %p14298_p4 = por %p14297_p9, %p14296_p7 }
 0x110   : > { %p14292_p5 = pneg %p14291_p2 }
 0x112   : > { %p14299_p10 = pnand %p14298_p4, %p14292_p5 }
 0x114   : > { %14302 = shalt.err (!%p14299_p10)
}
 0x115   : > { %12606 = dma.hbm_to_vmem [thread:$0]  (!%p14565_p6), %s15705_s14, 2048, %s551_s4, [#allocation18], %s15745_s28, %s15745_s28, %s15744_s13  }
 0x116   : > { %s10997_s0 = sadd.s32 4294967294, %s14419_s24   ;;  %s14802_s29 = sadd.s32 1, %s14419_s24  }
 0x117   : > { %s41_s16 = ssub.s32 %s14419_s24, %s14802_s29  ;;  %s44_s3 = sadd.s32 1, %s14415_s23 }
 0x118   : > { %p42_p8 = scmp.eq.s32.totalorder %s41_s16, 0  ;;  %p51_p1 = scmp.ne.s32.totalorder %s14415_s23, %s14411_s22 }
 0x119   : > { %p52_p3 = scmp.eq.s32.totalorder %s14419_s24, 0  ;;  %p57_p11 = scmp.ne.s32.totalorder %s14411_s22, %s14407_s21 }
 0x11a   : > { %s14813_s30 = scalar_select %p42_p8, %s14415_s23, %s44_s3  }
 0x11b   : > { %p53_p12 = por %p52_p3, %p51_p1  ;;  %p15747_p13 = scmp.eq.s32.totalorder %s14549_s27, 0 }
 0x11c   : > { %p396_p6 = scmp.eq.s32.totalorder %s14549_s27, 1  ;;  %p402_p2 = scmp.eq.s32.totalorder %s10997_s0, 1 }
 0x11d   : > { %p14817_p0 = por %p15747_p13, %p57_p11  ;;  %p12625_p5 = scmp.lt.s32.totalorder %s14419_s24, 2 }
 0x11e   : > { %s567_s4 = sand.u32 1, %s14415_s23   ;;  %p14824_p7 = por %p396_p6, %p51_p1 }
 0x11f   : > { %p14828_p9 = por %p402_p2, %p57_p11  ;;  %s12529_s18 = smul.u32 192, %s567_s4 }
 0x120   : > { %s15749_s15 = scalar_select %p14824_p7, 1, 0 }
 0x121   : > { %s15750_s26 = scalar_select %p14828_p9, 1, 0 }
 0x122   : > { %s12530_s19 = smul.u32 3072, %s14419_s24  ;;  %p14833_p4 = pnand %p12625_p5, %p53_p12 }
 0x123   : > { %s15752_s17 = sld [smem:[#allocation29_spill]]  ;;  %s571_s0 = scalar_lea.vmem [#allocation2], %s12529_s18 }
 0x124   : > { %s578_s16 = sshll.u32 %s571_s0, 4  ;;  %s14844_s3 = scalar_lea.sflag [#allocation3], %s567_s4  ;;  %s14842_s16 = int_to_ptr.vmem [resolvable:$true] %s578_s16 }
 0x125   : > { %p14305_p8 = pneg %p14833_p4 }
 0x129   : > { %s14840_s11 = scalar_lea.hbm %s15752_s17, %s12530_s19  ;;  %s14308_s1 = scalar_lea.hbm %s15752_s17, 6144 }
 0x12a   : > { %s14303_s2 = scalar_lea.hbm %s14840_s11, 3072  ;;  %p14309_p11 = scmp.lt.u32.totalorder %s14840_s11, %s15752_s17 }
 0x12b   : > { %p14304_p10 = scmp.ne.s32.totalorder %s14840_s11, %s14303_s2  ;;  %p14310_p12 = scmp.lt.u32.totalorder %s14308_s1, %s14303_s2 }
 0x12c   : > { %p14312_p6 = scmp.lt.u32.totalorder %s14303_s2, %s14840_s11 }
 0x12d   : > { %p14306_p1 = pnand %p14305_p8, %p14304_p10  ;;  %p14311_p13 = por %p14310_p12, %p14309_p11 }
 0x12f   : > { %p14307_p3 = pneg %p14306_p1  ;;  %p14313_p2 = por %p14312_p6, %p14311_p13 }
 0x131   : > { %p14314_p5 = pnand %p14313_p2, %p14307_p3 }
 0x133   : > { %14317 = shalt.err (!%p14314_p5)
}
 0x134   : > { %s14318_s4 = scalar_lea.vmem %s14842_s16, 3072  ;;  %s14437_s18 = smov [#allocation2]  }
 0x135   : > { %p14319_p10 = scmp.ne.s32.totalorder %s14842_s16, %s14318_s4  ;;  %s14323_s0 = sshll.u32 %s14437_s18, 4  ;;  %s14324_s0 = int_to_ptr.vmem [resolvable:$false] %s14323_s0 }
 0x136   : > { %s14325_s5 = scalar_lea.vmem %s14324_s0, 6144  ;;  %p14326_p7 = scmp.lt.s32.totalorder %s14842_s16, %s14324_s0 }
 0x137   : > { %p14321_p1 = pnand %p14319_p10, %p14305_p8  ;;  %p14327_p11 = scmp.lt.s32.totalorder %s14325_s5, %s14318_s4 }
 0x139   : > { %p14322_p9 = pneg %p14321_p1  ;;  %p14328_p12 = por %p14327_p11, %p14326_p7 }
 0x13b   : > { %p14329_p13 = pnand %p14328_p12, %p14322_p9 }
 0x13d   : > { %14332 = shalt.err (!%p14329_p13)
}
 0x13e   : > { %12610 = dma.hbm_to_vmem [thread:$0]  (!%p14833_p4), %s14840_s11, 3072, %s14842_s16, %s14844_s3, %s15745_s28, %s15745_s28, %s15744_s13  }
 0x13f   : > { %s15753_s2 = sld [smem:[#allocation28_spill]] }
 0x145   : > { %p15754_p8 = scmp.ne.s32.totalorder %s15753_s2, 0 }
 0x146   : > { %s14878_s6 = sand.u32 (!%p15754_p8), 1, %s14411_s22  }
 0x147   : > { %590 = sbr.rel (%p15754_p8) target bundleno = 5321 (0x14c9), region = 84  ;;  %s593_s7 = scalar_lea.sflag (!%p15754_p8), [#allocation3], %s14878_s6 }
 0x148   : > { %s12531_s19 = smul.u32 (!%p15754_p8), 192, %s14878_s6 }
 0x14a   : > { %s14882_s1 = scalar_lea.vmem (!%p15754_p8), [#allocation2], %s12531_s19 }
 0x14e   : > { %14378 = dma.done.wait (%p14817_p0), %s593_s7, 3072  }
 0x14f   : > { %14380 = vsyncadd (%p14817_p0), %s593_s7, 4294964224  ;;  %p15755_p7 = scmp.eq.s32.totalorder %s14549_s27, 0 }
 0x151   : > { %14382 = dma.done.wait (%p15755_p7), [#allocation6], 27648   ;;  %p15756_p9 = pmov %p15755_p7 }
 0x152   : > { %p15757_p4 = pmov %p15755_p7 }
 0x153   : > { %14384 = vsyncadd (%p15756_p9), [#allocation6], 4294939648 }
 0x154   : > { %14386 = dma.done.wait (%p15757_p4), [#allocation9], 17920   ;;  %p15758_p3 = pmov %p15757_p4 }
 0x156   : > { %14388 = vsyncadd (%p15758_p3), [#allocation9], 4294949376  ;;  %p15759_p6 = pmov %p15758_p3 }
 0x157   : > { %p15760_p2 = pmov %p15758_p3 }
 0x158   : > { %14390 = dma.done.wait (%p15759_p6), [#allocation12], 40960  }
 0x159   : > { %14392 = vsyncadd (%p15760_p2), [#allocation12], 4294926336  ;;  %p15761_p0 = pmov %p15760_p2 }
 0x15b   : > { %14394 = dma.done.wait (%p15761_p0), [#allocation15], 25344   ;;  %p15762_p5 = pmov %p15761_p0 }
 0x15c   : > { %p15763_p10 = pmov %p15761_p0 }
 0x15d   : > { %14396 = vsyncadd (%p15762_p5), [#allocation15], 4294941952 }
 0x15e   : > { %14398 = dma.done.wait (%p15763_p10), [#allocation18], 6144   ;;  %p15764_p1 = pmov %p15761_p0 }
 0x15f   : > { %v14438_v0 = vmov 0   ;;  %v685_v1 = vld [vmem:[%s14882_s1] sm:$0xff]  ;;  %v686_v2 = vld [vmem:[%s14882_s1 + $0x8] sm:$0xff]  ;;  %v687_v3 = vld [vmem:[%s14882_s1 + $0x10] sm:$0xff]  ;;  %vm765_vm0 = vcmask 523264   ;;  %s15765_s20 = sld [smem:[#allocation32_spill]] }
 0x160   : > { %14400 = vsyncadd (%p15764_p1), [#allocation18], 4294961152  ;;  %920 = vmatprep.subr.bf16.mxu1 %v14438_v0  ;;  %778 = vmatprep.subr.bf16.mxu0 %v14438_v0  ;;  %v14913_v4 = vpack.c.bf16 %v686_v2, %v685_v1  ;;  %v688_v5 = vld [vmem:[%s14882_s1 + $0x18] sm:$0xff]  ;;  %v689_v7 = vld [vmem:[%s14882_s1 + $0x20] sm:$0xff]  ;;  %s15766_s16 = sld [smem:[#allocation36_spill]]  ;;  %vm8589_vm1 = vcmask 261120  }
 0x161   : > { %v14917_v6 = vpack.c.bf16 %v688_v5, %v687_v3  ;;  %v690_v8 = vld [vmem:[%s14882_s1 + $0x28] sm:$0xff]  ;;  %v691_v10 = vld [vmem:[%s14882_s1 + $0x30] sm:$0xff]  ;;  %v692_v11 = vld [vmem:[%s14882_s1 + $0x38] sm:$0xff]  ;;  %s15767_s18 = sld [smem:[#allocation37_spill]]  ;;  %vm14440_vm2 = vmmov 0   ;;  %s15768_s2 = sld [smem:[#allocation38_spill]] }
 0x162   : > { %921 = vmatpush1.bf16.msra.mxu1 %v14913_v4  ;;  %779 = vmatpush1.bf16.msra.mxu0 %v14913_v4  ;;  %v14925_v9 = vpack.c.bf16 %v690_v8, %v689_v7  ;;  %v12691_v12 = vld [vmem:[#allocation5 + $0x44] ss:$8 sps:$4 sm:$0xff]   ;;  %v14933_v13 = vpack.c.bf16 %v692_v11, %v691_v10  ;;  %v695_v18 = vld [vmem:[%s14882_s1 + $0x50] sm:$0xff]  ;;  %v696_v19 = vld [vmem:[%s14882_s1 + $0x58] sm:$0xff]  ;;  %s15769_s28 = sld [smem:[#allocation39_spill]]  ;;  %s683_s25 = scalar_lea.vmem [#allocation20], %s14878_s6 }
 0x163   : > { %922 = vmatprep.subr.bf16.mxu1 %v14438_v0  ;;  %780 = vmatprep.subr.bf16.mxu0 %v14438_v0  ;;  %v693_v14 = vld [vmem:[%s14882_s1 + $0x40] sm:$0xff]  ;;  %v694_v15 = vld [vmem:[%s14882_s1 + $0x48] sm:$0xff]  ;;  %v14951_v20 = vpack.c.bf16 %v696_v19, %v695_v18  ;;  %v699_v24 = vld [vmem:[%s14882_s1 + $0x70] sm:$0xff]  ;;  %s10836_s11 = sshll.u32 %s683_s25, 4  ;;  %s15770_s4 = sld [smem:[#allocation40_spill]]  ;;  %s15649_s11 = int_to_ptr.vmem [resolvable:$true] %s10836_s11 }
 0x164   : > { %11042 = vmatprep.mubr.msk.bf16.mxu1 %vm765_vm0, %v12691_v12  ;;  %v12703_v16 = vld [vmem:[#allocation5 + $0x4] ss:$8 sps:$4 sm:$0xff]   ;;  %v14942_v17 = vpack.c.bf16 %v694_v15, %v693_v14  ;;  %v700_v25 = vld [vmem:[%s14882_s1 + $0x78] sm:$0xff]  ;;  %v703_v29 = vld [vmem:[%s14882_s1 + $0x90] sm:$0xff]  ;;  %s10824_s0 = scalar_lea.sflag [#allocation4], %s14878_s6  ;;  %s14333_s5 = scalar_lea.vmem %s15649_s11, 16 }
 0x165   : > { %11030 = vmatprep.mubr.msk.bf16.mxu0 %vm765_vm0, %v12703_v16  ;;  %v697_v21 = vld [vmem:[%s14882_s1 + $0x60] sm:$0xff]  ;;  %v698_v22 = vld [vmem:[%s14882_s1 + $0x68] sm:$0xff]  ;;  %v14969_v28 = vpack.c.bf16 %v700_v25, %v699_v24  ;;  %v704_v30 = vld [vmem:[%s14882_s1 + $0x98] sm:$0xff]  ;;  %p14334_p11 = scmp.ne.s32.totalorder %s15649_s11, %s14333_s5  ;;  %p15771_p12 = scmp.ne.s32.totalorder %s15749_s15, 0 }
 0x166   : > { %923 = vmatpush1.bf16.msra.mxu1 %v14917_v6  ;;  %781 = vmatpush1.bf16.msra.mxu0 %v14917_v6  ;;  %v14959_v23 = vpack.c.bf16 %v698_v22, %v697_v21  ;;  %v701_v26 = vld [vmem:[%s14882_s1 + $0x80] sm:$0xff]  ;;  %v702_v27 = vld [vmem:[%s14882_s1 + $0x88] sm:$0xff]  ;;  %v14985_v34 = vpack.c.bf16 %v704_v30, %v703_v29  ;;  %v707_v35 = vld [vmem:[%s14882_s1 + $0xb0] sm:$0xff] }
 0x167   : > { %924 = vmatprep.subr.bf16.mxu1 %v14438_v0  ;;  %782 = vmatprep.subr.bf16.mxu0 %v14438_v0  ;;  %v14977_v31 = vpack.c.bf16 %v702_v27, %v701_v26  ;;  %v705_v32 = vld [vmem:[%s14882_s1 + $0xa0] sm:$0xff]  ;;  %v706_v33 = vld [vmem:[%s14882_s1 + $0xa8] sm:$0xff]  ;;  %v708_v36 = vld [vmem:[%s14882_s1 + $0xb8] sm:$0xff]  ;;  %p14335_p13 = pnand %p14334_p11, %p15771_p12 }
 0x168   : > { %v14993_v37 = vpack.c.bf16 %v706_v33, %v705_v32  ;;  %v12715_v38 = vld [vmem:[#allocation7 + $0x84] ss:$16 sps:$4 sm:$0xff]   ;;  %v12721_v39 = vld [vmem:[#allocation7 + $0x8c] ss:$16 sps:$4 sm:$0xff]   ;;  %v14999_v40 = vpack.c.bf16 %v708_v36, %v707_v35  ;;  %v12689_v41 = vld [vmem:[#allocation5 + $0x40] ss:$8 sps:$4 sm:$0xff]  }
 0x169   : > { %v12701_v42 = vld [vmem:[#allocation5] ss:$8 sps:$4 sm:$0xff]   ;;  %v12692_v43 = vld [vmem:[#allocation5 + $0x54] ss:$8 sps:$4 sm:$0xff]   ;;  %v12694_v53 = vld [vmem:[#allocation5 + $0x50] ss:$8 sps:$4 sm:$0xff]   ;;  %p14336_p8 = pneg %p14335_p13 }
 0x16a   : > { %925 = vmatpush1.bf16.msra.mxu1 %v14925_v9  ;;  %783 = vmatpush1.bf16.msra.mxu0 %v14925_v9  ;;  %v12704_v44 = vld [vmem:[#allocation5 + $0x14] ss:$8 sps:$4 sm:$0xff]   ;;  %v12713_v45 = vld [vmem:[#allocation7 + $0x80] ss:$16 sps:$4 sm:$0xff]   ;;  %v12719_v46 = vld [vmem:[#allocation7 + $0x88] ss:$16 sps:$4 sm:$0xff]  }
 0x16b   : > { %926 = vmatprep.subr.bf16.mxu1 %v14438_v0  ;;  %784 = vmatprep.subr.bf16.mxu0 %v14438_v0  ;;  %v12718_v47 = vld [vmem:[#allocation7 + $0xa4] ss:$16 sps:$4 sm:$0xff]   ;;  %v12727_v48 = vld [vmem:[#allocation7 + $0xac] ss:$16 sps:$4 sm:$0xff]   ;;  %v12716_v49 = vld [vmem:[#allocation7 + $0xa0] ss:$16 sps:$4 sm:$0xff]  }
 0x16c   : > { %v12725_v50 = vld [vmem:[#allocation7 + $0xa8] ss:$16 sps:$4 sm:$0xff]   ;;  %v12724_v51 = vld [vmem:[#allocation7 + $0xc4] ss:$16 sps:$4 sm:$0xff]   ;;  %v12730_v52 = vld [vmem:[#allocation7 + $0xcc] ss:$16 sps:$4 sm:$0xff]  }
 0x16d   : > { %v12706_v54 = vld [vmem:[#allocation5 + $0x10] ss:$8 sps:$4 sm:$0xff]   ;;  %v12695_v55 = vld [vmem:[#allocation5 + $0x64] ss:$8 sps:$4 sm:$0xff]   ;;  %v12697_v59 = vld [vmem:[#allocation5 + $0x60] ss:$8 sps:$4 sm:$0xff]  }
 0x16e   : > { %927 = vmatpush1.bf16.msra.mxu1 %v14933_v13  ;;  %785 = vmatpush1.bf16.msra.mxu0 %v14933_v13  ;;  %v12707_v56 = vld [vmem:[#allocation5 + $0x24] ss:$8 sps:$4 sm:$0xff]   ;;  %v12722_v57 = vld [vmem:[#allocation7 + $0xc0] ss:$16 sps:$4 sm:$0xff]   ;;  %v12728_v58 = vld [vmem:[#allocation7 + $0xc8] ss:$16 sps:$4 sm:$0xff]  }
 0x16f   : > { %928 = vmatprep.subr.bf16.mxu1 %v14438_v0  ;;  %786 = vmatprep.subr.bf16.mxu0 %v14438_v0  ;;  %v12709_v60 = vld [vmem:[#allocation5 + $0x20] ss:$8 sps:$4 sm:$0xff]   ;;  %v12698_v61 = vld [vmem:[#allocation5 + $0x74] ss:$8 sps:$4 sm:$0xff]   ;;  %v12700_v63 = vld [vmem:[#allocation5 + $0x70] ss:$8 sps:$4 sm:$0xff]  }
 0x170   : > { %v12710_v62 = vld [vmem:[#allocation5 + $0x34] ss:$8 sps:$4 sm:$0xff]   ;;  %v12712_v1 = vld [vmem:[#allocation5 + $0x30] ss:$8 sps:$4 sm:$0xff]  }
 0x171   : > { %v12733_v2 = vld [vmem:[#allocation7 + $0xe4] ss:$16 sps:$4 sm:$0xff]   ;;  %v12736_v3 = vld [vmem:[#allocation7 + $0xec] ss:$16 sps:$4 sm:$0xff]   ;;  %v12731_v5 = vld [vmem:[#allocation7 + $0xe0] ss:$16 sps:$4 sm:$0xff]  }
 0x172   : > { %929 = vmatpush1.bf16.msra.mxu1 %v14942_v17  ;;  %787 = vmatpush1.bf16.msra.mxu0 %v14942_v17  ;;  %v12734_v7 = vld [vmem:[#allocation7 + $0xe8] ss:$16 sps:$4 sm:$0xff]   ;;  %v12739_v8 = vld [vmem:[#allocation7 + $0x4] ss:$16 sps:$4 sm:$0xff]   ;;  %v12745_v10 = vld [vmem:[#allocation7 + $0xc] ss:$16 sps:$4 sm:$0xff]  }
 0x173   : > { %930 = vmatprep.subr.bf16.mxu1 %v14438_v0  ;;  %788 = vmatprep.subr.bf16.mxu0 %v14438_v0  ;;  %v12737_v12 = vld [vmem:[#allocation7] ss:$16 sps:$4 sm:$0xff]   ;;  %v12742_v16 = vld [vmem:[#allocation7 + $0x24] ss:$16 sps:$4 sm:$0xff]   ;;  %v12743_v21 = vld [vmem:[#allocation7 + $0x8] ss:$16 sps:$4 sm:$0xff]  }
 0x174   : > { %v12751_v26 = vld [vmem:[#allocation7 + $0x2c] ss:$16 sps:$4 sm:$0xff]   ;;  %v12740_v30 = vld [vmem:[#allocation7 + $0x20] ss:$16 sps:$4 sm:$0xff]   ;;  %v12748_v32 = vld [vmem:[#allocation7 + $0x44] ss:$16 sps:$4 sm:$0xff]  }
 0x175   : > { %v12749_v33 = vld [vmem:[#allocation7 + $0x28] ss:$16 sps:$4 sm:$0xff]  }
 0x176   : > { %931 = vmatpush1.bf16.msra.mxu1 %v14951_v20  ;;  %789 = vmatpush1.bf16.msra.mxu0 %v14951_v20 }
 0x177   : > { %932 = vmatprep.subr.bf16.mxu1 %v14438_v0  ;;  %790 = vmatprep.subr.bf16.mxu0 %v14438_v0 }
 0x17a   : > { %933 = vmatpush1.bf16.msra.mxu1 %v14959_v23  ;;  %791 = vmatpush1.bf16.msra.mxu0 %v14959_v23 }
 0x17b   : > { %934 = vmatprep.subr.bf16.mxu1 %v14438_v0  ;;  %792 = vmatprep.subr.bf16.mxu0 %v14438_v0 }
 0x17e   : > { %935 = vmatpush1.bf16.msra.mxu1 %v14969_v28  ;;  %793 = vmatpush1.bf16.msra.mxu0 %v14969_v28 }
 0x17f   : > { %936 = vmatprep.subr.bf16.mxu1 %v14438_v0  ;;  %794 = vmatprep.subr.bf16.mxu0 %v14438_v0 }
 0x182   : > { %937 = vmatpush1.bf16.msra.mxu1 %v14977_v31  ;;  %795 = vmatpush1.bf16.msra.mxu0 %v14977_v31 }
 0x183   : > { %938 = vmatprep.subr.bf16.mxu1 %v14438_v0  ;;  %796 = vmatprep.subr.bf16.mxu0 %v14438_v0 }
 0x186   : > { %939 = vmatpush1.bf16.msra.mxu1 %v14985_v34  ;;  %797 = vmatpush1.bf16.msra.mxu0 %v14985_v34 }
 0x187   : > { %940 = vmatprep.subr.bf16.mxu1 %v14438_v0  ;;  %798 = vmatprep.subr.bf16.mxu0 %v14438_v0 }
 0x18a   : > { %941 = vmatpush1.bf16.msra.mxu1 %v14993_v37  ;;  %799 = vmatpush1.bf16.msra.mxu0 %v14993_v37 }
 0x18b   : > { %942 = vmatprep.subr.bf16.mxu1 %v14438_v0  ;;  %800 = vmatprep.subr.bf16.mxu0 %v14438_v0 }
 0x18e   : > { %943 = vmatpush1.bf16.msra.mxu1 %v14999_v40  ;;  %801 = vmatpush1.bf16.msra.mxu0 %v14999_v40 }
 0x18f   : > { %1098 = vmatprep.subr.bf16.mxu0 %v12715_v38  ;;  %1171 = vmatprep.subr.bf16.mxu1 %v12721_v39  ;;  %v12746_v39 = vld [vmem:[#allocation7 + $0x40] ss:$16 sps:$4 sm:$0xff]  }
 0x191   : > { %953 = vmatmul.mubr.bf16.vlgmr.msra.gmra.mrb[0].mxu1 %v12689_v41  ;;  %811 = vmatmul.mubr.bf16.vlgmr.msra.gmra.mrb[0].mxu0 %v12701_v42  ;;  %v12754_v41 = vld [vmem:[#allocation7 + $0x4c] ss:$16 sps:$4 sm:$0xff]  }
 0x192   : > { %11043 = vmatprep.mubr.msk.bf16.mxu1 %vm765_vm0, %v12692_v43  ;;  %11031 = vmatprep.mubr.msk.bf16.mxu0 %vm765_vm0, %v12704_v44  ;;  %v12752_v44 = vld [vmem:[#allocation7 + $0x48] ss:$16 sps:$4 sm:$0xff]  }
 0x193   : > { %1099 = vmatpush1.bf16.msra.mxu0 %v12713_v45  ;;  %1172 = vmatpush1.bf16.msra.mxu1 %v12719_v46  ;;  %v12757_v45 = vld [vmem:[#allocation7 + $0x64] ss:$16 sps:$4 sm:$0xff]  }
 0x194   : > { %1100 = vmatprep.subr.bf16.mxu0 %v12718_v47  ;;  %1173 = vmatprep.subr.bf16.mxu1 %v12727_v48 }
 0x197   : > { %1101 = vmatpush1.bf16.msra.mxu0 %v12716_v49  ;;  %1174 = vmatpush1.bf16.msra.mxu1 %v12725_v50  ;;  %v12760_v49 = vld [vmem:[#allocation7 + $0x6c] ss:$16 sps:$4 sm:$0xff]  }
 0x198   : > { %1102 = vmatprep.subr.bf16.mxu0 %v12724_v51  ;;  %1175 = vmatprep.subr.bf16.mxu1 %v12730_v52  ;;  %v12755_v52 = vld [vmem:[#allocation7 + $0x60] ss:$16 sps:$4 sm:$0xff]  }
 0x199   : > { %961 = vmatmul.mubr.bf16.gmra.mrb[4].mxu1 %v12694_v53  ;;  %819 = vmatmul.mubr.bf16.gmra.mrb[4].mxu0 %v12706_v54  ;;  %v12758_v53 = vld [vmem:[#allocation7 + $0x68] ss:$16 sps:$4 sm:$0xff]  }
 0x19a   : > { %11044 = vmatprep.mubr.msk.bf16.mxu1 %vm765_vm0, %v12695_v55  ;;  %11032 = vmatprep.mubr.msk.bf16.mxu0 %vm765_vm0, %v12707_v56 }
 0x19b   : > { %1103 = vmatpush1.bf16.msra.mxu0 %v12722_v57  ;;  %1176 = vmatpush1.bf16.msra.mxu1 %v12728_v58  ;;  %v12775_v58 = vld [vmem:[#allocation7 + $0x10c] ss:$16 sps:$4 sm:$0xff]  }
 0x19c   : > { %1104 = vmatprep.subr.bf16.mxu0 %v12733_v2  ;;  %1177 = vmatprep.subr.bf16.mxu1 %v12736_v3 }
 0x19f   : > { %1105 = vmatpush1.bf16.msra.mxu0 %v12731_v5  ;;  %1178 = vmatpush1.bf16.msra.mxu1 %v12734_v7 }
 0x1a0   : > { %1336 = vmatprep.subr.bf16.mxu0 %v12739_v8  ;;  %1409 = vmatprep.subr.bf16.mxu1 %v12745_v10 }
 0x1a1   : > { %969 = vmatmul.mubr.bf16.gmra.mrb[8].mxu1 %v12697_v59  ;;  %827 = vmatmul.mubr.bf16.gmra.mrb[8].mxu0 %v12709_v60 }
 0x1a2   : > { %11045 = vmatprep.mubr.msk.bf16.mxu1 %vm765_vm0, %v12698_v61  ;;  %11033 = vmatprep.mubr.msk.bf16.mxu0 %vm765_vm0, %v12710_v62 }
 0x1a9   : > { %977 = vmatmul.mubr.bf16.gmra.mrb[12].mxu1 %v12700_v63  ;;  %835 = vmatmul.mubr.bf16.gmra.mrb[12].mxu0 %v12712_v1 }
 0x1aa   : > { %1130 = vmatprep.mubr.bf16.mxu0 %v14438_v0  ;;  %1203 = vmatprep.mubr.bf16.mxu1 %v14438_v0 }
 0x264   : > { %v954_v11 = vpop.f32.mrb[0].mxu1  ;;  %v812_v14 = vpop.f32.mrb[0].mxu0 }
 0x265   : > { %v956_v15 = vpop.f32.mrb[1].mxu1  ;;  %v814_v18 = vpop.f32.mrb[1].mxu0 }
 0x266   : > { %v957_v19 = vpop.f32.mrb[2].mxu1  ;;  %v815_v22 = vpop.f32.mrb[2].mxu0  ;;  %v12778_v18 = vld [vmem:[#allocation7 + $0x12c] ss:$16 sps:$4 sm:$0xff]  }
 0x267   : > { %v985_v24 = vpack.c.bf16 %v957_v19, %v954_v11  ;;  %v959_v25 = vpop.f32.mrb[3].mxu1  ;;  %v15014_v27 = vpack.c.bf16 %v815_v22, %v812_v14  ;;  %v817_v29 = vpop.f32.mrb[3].mxu0  ;;  %v12776_v19 = vld [vmem:[#allocation7 + $0x128] ss:$16 sps:$4 sm:$0xff]  }
 0x268   : > { %v12785_v22 = vld [vmem:[#allocation7 + $0x148] ss:$16 sps:$4 sm:$0xff]   ;;  %v12781_v25 = vld [vmem:[#allocation7 + $0x104] ss:$16 sps:$4 sm:$0xff]   ;;  %v12779_v29 = vld [vmem:[#allocation7 + $0x100] ss:$16 sps:$4 sm:$0xff]  }
 0x269   : > { %11062 = vmatmul.mubr.msk.bf16.vlgmr.msra.gmra.mrb[16].mxu0 %vm765_vm0, %v985_v24  ;;  %11066 = vmatmul.mubr.msk.bf16.vlgmr.msra.gmra.mrb[16].mxu1 %vm765_vm0, %v985_v24  ;;  %v12763_v24 = vld [vmem:[#allocation5 + $0x84] ss:$8 sps:$4 sm:$0xff]  }
 0x26a   : > { %1337 = vmatpush1.bf16.msra.mxu0 %v12737_v12  ;;  %1140 = vmatprep.mubr.bf16.mxu0 %v14438_v0 }
 0x26b   : > { %1213 = vmatprep.mubr.bf16.mxu1 %v14438_v0  ;;  %1338 = vmatprep.subr.bf16.mxu0 %v12742_v16  ;;  %v12773_v16 = vld [vmem:[#allocation7 + $0x108] ss:$16 sps:$4 sm:$0xff]  }
 0x26c   : > { %v962_v35 = vpop.f32.mrb[4].mxu1  ;;  %1410 = vmatpush1.bf16.msra.mxu1 %v12743_v21  ;;  %v820_v36 = vpop.f32.mrb[4].mxu0  ;;  %v12787_v21 = vld [vmem:[#allocation7 + $0x14c] ss:$16 sps:$4 sm:$0xff]  }
 0x26d   : > { %v964_v38 = vpop.f32.mrb[5].mxu1  ;;  %1411 = vmatprep.subr.bf16.mxu1 %v12751_v26  ;;  %v822_v42 = vpop.f32.mrb[5].mxu0  ;;  %v12761_v26 = vld [vmem:[#allocation5 + $0x80] ss:$8 sps:$4 sm:$0xff]  }
 0x26e   : > { %v965_v43 = vpop.f32.mrb[6].mxu1  ;;  %1339 = vmatpush1.bf16.msra.mxu0 %v12740_v30  ;;  %v823_v46 = vpop.f32.mrb[6].mxu0  ;;  %v12784_v30 = vld [vmem:[#allocation7 + $0x124] ss:$16 sps:$4 sm:$0xff]   ;;  %v12788_v38 = vld [vmem:[#allocation7 + $0x140] ss:$16 sps:$4 sm:$0xff]  }
 0x26f   : > { %v986_v47 = vpack.c.bf16 %v965_v43, %v962_v35  ;;  %v967_v48 = vpop.f32.mrb[7].mxu1  ;;  %1340 = vmatprep.subr.bf16.mxu0 %v12748_v32  ;;  %v15020_v50 = vpack.c.bf16 %v823_v46, %v820_v36  ;;  %v825_v51 = vpop.f32.mrb[7].mxu0  ;;  %v12782_v32 = vld [vmem:[#allocation7 + $0x120] ss:$16 sps:$4 sm:$0xff]   ;;  %v12767_v36 = vld [vmem:[#allocation5 + $0xa4] ss:$8 sps:$4 sm:$0xff]  }
 0x270   : > { %1412 = vmatpush1.bf16.msra.mxu1 %v12749_v33  ;;  %v12790_v33 = vld [vmem:[#allocation7 + $0x144] ss:$16 sps:$4 sm:$0xff]   ;;  %v12766_v35 = vld [vmem:[#allocation5 + $0x90] ss:$8 sps:$4 sm:$0xff]   ;;  %v12793_v43 = vld [vmem:[#allocation7 + $0x16c] ss:$16 sps:$4 sm:$0xff]  }
 0x271   : > { %11063 = vmatmul.mubr.msk.bf16.gmra.mrb[20].mxu0 %vm765_vm0, %v986_v47  ;;  %11067 = vmatmul.mubr.msk.bf16.gmra.mrb[20].mxu1 %vm765_vm0, %v986_v47  ;;  %v12772_v42 = vld [vmem:[#allocation5 + $0xb0] ss:$8 sps:$4 sm:$0xff]   ;;  %v12811_v47 = vld [vmem:[#allocation7 + $0x184] ss:$16 sps:$4 sm:$0xff]  }
 0x272   : > { %1150 = vmatprep.mubr.bf16.mxu0 %v14438_v0  ;;  %1223 = vmatprep.mubr.bf16.mxu1 %v14438_v0  ;;  %v12794_v46 = vld [vmem:[#allocation7 + $0x160] ss:$16 sps:$4 sm:$0xff]  }
 0x273   : > { %1341 = vmatpush1.bf16.msra.mxu0 %v12746_v39  ;;  %1413 = vmatprep.subr.bf16.mxu1 %v12754_v41  ;;  %v12769_v39 = vld [vmem:[#allocation5 + $0xa0] ss:$8 sps:$4 sm:$0xff]   ;;  %v12770_v41 = vld [vmem:[#allocation5 + $0xb4] ss:$8 sps:$4 sm:$0xff]  }
 0x274   : > { %v970_v54 = vpop.f32.mrb[8].mxu1  ;;  %1414 = vmatpush1.bf16.msra.mxu1 %v12752_v44  ;;  %1342 = vmatprep.subr.bf16.mxu0 %v12757_v45  ;;  %v828_v55 = vpop.f32.mrb[8].mxu0  ;;  %v12791_v44 = vld [vmem:[#allocation7 + $0x168] ss:$16 sps:$4 sm:$0xff]   ;;  %v12796_v45 = vld [vmem:[#allocation7 + $0x164] ss:$16 sps:$4 sm:$0xff]  }
 0x275   : > { %v972_v56 = vpop.f32.mrb[9].mxu1  ;;  %1415 = vmatprep.subr.bf16.mxu1 %v12760_v49  ;;  %v830_v57 = vpop.f32.mrb[9].mxu0 }
 0x276   : > { %v973_v59 = vpop.f32.mrb[10].mxu1  ;;  %v831_v60 = vpop.f32.mrb[10].mxu0  ;;  %v12812_v56 = vld [vmem:[#allocation7 + $0x1a0] ss:$16 sps:$4 sm:$0xff]  }
 0x277   : > { %v987_v61 = vpack.c.bf16 %v973_v59, %v970_v54  ;;  %v975_v62 = vpop.f32.mrb[11].mxu1  ;;  %1343 = vmatpush1.bf16.msra.mxu0 %v12755_v52  ;;  %v845_v63 = vpack.c.bf16 %v831_v60, %v828_v55  ;;  %v833_v1 = vpop.f32.mrb[11].mxu0  ;;  %v12814_v54 = vld [vmem:[#allocation7 + $0x1a4] ss:$16 sps:$4 sm:$0xff]  }
 0x278   : > { %1416 = vmatpush1.bf16.msra.mxu1 %v12758_v53  ;;  %1539 = vmatprep.subr.bf16.mxu0 %v14438_v0  ;;  %v12809_v53 = vld [vmem:[#allocation7 + $0x180] ss:$16 sps:$4 sm:$0xff]  }
 0x279   : > { %11064 = vmatmul.mubr.msk.bf16.gmra.mrb[24].mxu0 %vm765_vm0, %v987_v61  ;;  %11068 = vmatmul.mubr.msk.bf16.gmra.mrb[24].mxu1 %vm765_vm0, %v987_v61  ;;  %v12820_v61 = vld [vmem:[#allocation7 + $0x1c4] ss:$16 sps:$4 sm:$0xff]   ;;  %v12818_v62 = vld [vmem:[#allocation7 + $0x1c0] ss:$16 sps:$4 sm:$0xff]  }
 0x27a   : > { %1160 = vmatprep.mubr.bf16.mxu0 %v14438_v0  ;;  %1233 = vmatprep.mubr.bf16.mxu1 %v14438_v0 }
 0x27b   : > { %1790 = vmatprep.subr.bf16.mxu1 %v12775_v58 }
 0x27c   : > { %v978_v2 = vpop.f32.mrb[12].mxu1  ;;  %v836_v3 = vpop.f32.mrb[12].mxu0 }
 0x27d   : > { %v980_v5 = vpop.f32.mrb[13].mxu1  ;;  %v838_v7 = vpop.f32.mrb[13].mxu0 }
 0x27e   : > { %v981_v8 = vpop.f32.mrb[14].mxu1  ;;  %v839_v10 = vpop.f32.mrb[14].mxu0 }
 0x27f   : > { %v988_v11 = vpack.c.bf16 %v981_v8, %v978_v2  ;;  %v983_v12 = vpop.f32.mrb[15].mxu1  ;;  %v846_v14 = vpack.c.bf16 %v839_v10, %v836_v3  ;;  %v841_v15 = vpop.f32.mrb[15].mxu0 }
 0x280   : > { %v12817_v15 = vld [vmem:[#allocation7 + $0x18c] ss:$16 sps:$4 sm:$0xff]  }
 0x281   : > { %11065 = vmatmul.mubr.msk.bf16.gmra.mrb[28].mxu0 %vm765_vm0, %v988_v11  ;;  %11069 = vmatmul.mubr.msk.bf16.gmra.mrb[28].mxu1 %vm765_vm0, %v988_v11  ;;  %v12799_v11 = vld [vmem:[#allocation5 + $0xc4] ss:$8 sps:$4 sm:$0xff]  }
 0x282   : > { %1368 = vmatprep.mubr.bf16.mxu0 %v14438_v0  ;;  %1441 = vmatprep.mubr.bf16.mxu1 %v14438_v0 }
 0x289   : > { %11086 = vmatmul.mubr.msk.bf16.vlgmr.msra.gmra.mrb[16].mxu0 %vm765_vm0, %v15014_v27  ;;  %11090 = vmatmul.mubr.msk.bf16.vlgmr.msra.gmra.mrb[16].mxu1 %vm765_vm0, %v15014_v27  ;;  %v12764_v27 = vld [vmem:[#allocation5 + $0x94] ss:$8 sps:$4 sm:$0xff]  }
 0x28a   : > { %1540 = vmatpush1.bf16.msra.mxu0 %v14913_v4  ;;  %1378 = vmatprep.mubr.bf16.mxu0 %v14438_v0 }
 0x28b   : > { %1541 = vmatprep.subr.bf16.mxu0 %v14438_v0  ;;  %1451 = vmatprep.mubr.bf16.mxu1 %v14438_v0 }
 0x28c   : > { %1791 = vmatpush1.bf16.msra.mxu1 %v12773_v16  ;;  %v12797_v16 = vld [vmem:[#allocation5 + $0xc0] ss:$8 sps:$4 sm:$0xff]  }
 0x28d   : > { %1792 = vmatprep.subr.bf16.mxu1 %v12778_v18  ;;  %v12800_v18 = vld [vmem:[#allocation5 + $0xd4] ss:$8 sps:$4 sm:$0xff]  }
 0x28e   : > { %1542 = vmatpush1.bf16.msra.mxu0 %v14917_v6 }
 0x28f   : > { %1543 = vmatprep.subr.bf16.mxu0 %v14438_v0 }
 0x290   : > { %1793 = vmatpush1.bf16.msra.mxu1 %v12776_v19  ;;  %v12815_v19 = vld [vmem:[#allocation7 + $0x188] ss:$16 sps:$4 sm:$0xff]  }
 0x291   : > { %11087 = vmatmul.mubr.msk.bf16.gmra.mrb[20].mxu0 %vm765_vm0, %v15020_v50  ;;  %11091 = vmatmul.mubr.msk.bf16.gmra.mrb[20].mxu1 %vm765_vm0, %v15020_v50 }
 0x292   : > { %1544 = vmatpush1.bf16.msra.mxu0 %v14925_v9  ;;  %1388 = vmatprep.mubr.bf16.mxu0 %v14438_v0 }
 0x293   : > { %1545 = vmatprep.subr.bf16.mxu0 %v14438_v0  ;;  %1461 = vmatprep.mubr.bf16.mxu1 %v14438_v0 }
 0x294   : > { %1794 = vmatprep.subr.bf16.mxu1 %v12787_v21  ;;  %v12823_v21 = vld [vmem:[#allocation7 + $0x1ac] ss:$16 sps:$4 sm:$0xff]  }
 0x295   : > { %1795 = vmatpush1.bf16.msra.mxu1 %v12785_v22  ;;  %v12821_v22 = vld [vmem:[#allocation7 + $0x1a8] ss:$16 sps:$4 sm:$0xff]  }
 0x296   : > { %1546 = vmatpush1.bf16.msra.mxu0 %v14933_v13  ;;  %1796 = vmatprep.subr.bf16.mxu1 %v12793_v43 }
 0x297   : > { %1547 = vmatprep.subr.bf16.mxu0 %v14438_v0 }
 0x299   : > { %11088 = vmatmul.mubr.msk.bf16.gmra.mrb[24].mxu0 %vm765_vm0, %v845_v63  ;;  %11092 = vmatmul.mubr.msk.bf16.gmra.mrb[24].mxu1 %vm765_vm0, %v845_v63 }
 0x29a   : > { %1548 = vmatpush1.bf16.msra.mxu0 %v14942_v17  ;;  %1398 = vmatprep.mubr.bf16.mxu0 %v14438_v0 }
 0x29b   : > { %1549 = vmatprep.subr.bf16.mxu0 %v14438_v0  ;;  %1471 = vmatprep.mubr.bf16.mxu1 %v14438_v0 }
 0x29c   : > { %1797 = vmatpush1.bf16.msra.mxu1 %v12791_v44 }
 0x29d   : > { %1952 = vmatprep.subr.bf16.mxu1 %v14438_v0 }
 0x29e   : > { %1550 = vmatpush1.bf16.msra.mxu0 %v14951_v20 }
 0x29f   : > { %1551 = vmatprep.subr.bf16.mxu0 %v14438_v0 }
 0x2a1   : > { %11089 = vmatmul.mubr.msk.bf16.gmra.mrb[28].mxu0 %vm765_vm0, %v846_v14  ;;  %11093 = vmatmul.mubr.msk.bf16.gmra.mrb[28].mxu1 %vm765_vm0, %v846_v14 }
 0x2a2   : > { %1552 = vmatpush1.bf16.msra.mxu0 %v14959_v23  ;;  %11102 = vmatprep.mubr.msk.bf16.mxu0 %vm765_vm0, %v12763_v24  ;;  %v12826_v24 = vld [vmem:[#allocation7 + $0x1cc] ss:$16 sps:$4 sm:$0xff]  }
 0x2a3   : > { %1553 = vmatprep.subr.bf16.mxu0 %v14438_v0  ;;  %1822 = vmatprep.mubr.bf16.mxu1 %v14438_v0 }
 0x2a6   : > { %1554 = vmatpush1.bf16.msra.mxu0 %v14969_v28 }
 0x2a7   : > { %1555 = vmatprep.subr.bf16.mxu0 %v14438_v0 }
 0x2aa   : > { %1556 = vmatpush1.bf16.msra.mxu0 %v14977_v31 }
 0x2ab   : > { %1557 = vmatprep.subr.bf16.mxu0 %v14438_v0 }
 0x2ae   : > { %1558 = vmatpush1.bf16.msra.mxu0 %v14985_v34 }
 0x2af   : > { %1559 = vmatprep.subr.bf16.mxu0 %v14438_v0 }
 0x2b2   : > { %1560 = vmatpush1.bf16.msra.mxu0 %v14993_v37 }
 0x2b3   : > { %1561 = vmatprep.subr.bf16.mxu0 %v14438_v0 }
 0x2b6   : > { %1562 = vmatpush1.bf16.msra.mxu0 %v14999_v40 }
 0x2b7   : > { %1717 = vmatprep.subr.bf16.mxu0 %v12781_v25  ;;  %v12802_v25 = vld [vmem:[#allocation5 + $0xd0] ss:$8 sps:$4 sm:$0xff]  }
 0x2b9   : > { %1572 = vmatmul.mubr.bf16.vlgmr.msra.gmra.mrb[32].mxu0 %v12761_v26  ;;  %v12803_v26 = vld [vmem:[#allocation5 + $0xe4] ss:$8 sps:$4 sm:$0xff]  }
 0x2ba   : > { %11103 = vmatprep.mubr.msk.bf16.mxu0 %vm765_vm0, %v12764_v27  ;;  %1718 = vmatpush1.bf16.msra.mxu0 %v12779_v29  ;;  %v12824_v27 = vld [vmem:[#allocation7 + $0x1c8] ss:$16 sps:$4 sm:$0xff]  }
 0x2bb   : > { %1719 = vmatprep.subr.bf16.mxu0 %v12784_v30  ;;  %v12805_v29 = vld [vmem:[#allocation5 + $0xe0] ss:$8 sps:$4 sm:$0xff]   ;;  %v12806_v30 = vld [vmem:[#allocation5 + $0xf4] ss:$8 sps:$4 sm:$0xff]  }
 0x2be   : > { %1720 = vmatpush1.bf16.msra.mxu0 %v12782_v32  ;;  %v12808_v32 = vld [vmem:[#allocation5 + $0xf0] ss:$8 sps:$4 sm:$0xff]  }
 0x2bf   : > { %1721 = vmatprep.subr.bf16.mxu0 %v12790_v33  ;;  %v12829_v33 = vld [vmem:[#allocation7 + $0x1e4] ss:$16 sps:$4 sm:$0xff]  }
 0x2c1   : > { %1580 = vmatmul.mubr.bf16.gmra.mrb[36].mxu0 %v12766_v35  ;;  %v12827_v35 = vld [vmem:[#allocation7 + $0x1e0] ss:$16 sps:$4 sm:$0xff]  }
 0x2c2   : > { %11104 = vmatprep.mubr.msk.bf16.mxu0 %vm765_vm0, %v12767_v36  ;;  %1722 = vmatpush1.bf16.msra.mxu0 %v12788_v38  ;;  %v12832_v36 = vld [vmem:[#allocation7 + $0x1ec] ss:$16 sps:$4 sm:$0xff]   ;;  %v12830_v38 = vld [vmem:[#allocation7 + $0x1e8] ss:$16 sps:$4 sm:$0xff]  }
 0x2c3   : > { %1723 = vmatprep.subr.bf16.mxu0 %v12796_v45 }
 0x2c6   : > { %1724 = vmatpush1.bf16.msra.mxu0 %v12794_v46  ;;  %v12845_v46 = vld [vmem:[#allocation7 + $0x208] ss:$16 sps:$4 sm:$0xff]  }
 0x2c7   : > { %2130 = vmatprep.subr.bf16.mxu0 %v12811_v47  ;;  %v12850_v47 = vld [vmem:[#allocation7 + $0x22c] ss:$16 sps:$4 sm:$0xff]  }
 0x2c9   : > { %1588 = vmatmul.mubr.bf16.gmra.mrb[40].mxu0 %v12769_v39  ;;  %v12847_v39 = vld [vmem:[#allocation7 + $0x20c] ss:$16 sps:$4 sm:$0xff]  }
 0x2ca   : > { %11105 = vmatprep.mubr.msk.bf16.mxu0 %vm765_vm0, %v12770_v41 }
 0x2d1   : > { %1596 = vmatmul.mubr.bf16.gmra.mrb[44].mxu0 %v12772_v42 }
 0x2d2   : > { %1749 = vmatprep.mubr.bf16.mxu0 %v14438_v0 }
 0x38c   : > { %v1573_v48 = vpop.f32.mrb[32].mxu0 }
 0x38d   : > { %v1575_v49 = vpop.f32.mrb[33].mxu0 }
 0x38e   : > { %v1576_v50 = vpop.f32.mrb[34].mxu0  ;;  %v12848_v49 = vld [vmem:[#allocation7 + $0x228] ss:$16 sps:$4 sm:$0xff]  }
 0x38f   : > { %v1604_v51 = vpack.c.bf16 %v1576_v50, %v1573_v48  ;;  %v1578_v52 = vpop.f32.mrb[35].mxu0 }
 0x391   : > { %11122 = vmatmul.mubr.msk.bf16.vlgmr.msra.gmra.mrb[16].mxu0 %vm765_vm0, %v1604_v51  ;;  %11126 = vmatmul.mubr.msk.bf16.vlgmr.msra.gmra.mrb[16].mxu1 %vm765_vm0, %v1604_v51 }
 0x392   : > { %1953 = vmatpush1.bf16.msra.mxu1 %v14913_v4  ;;  %1759 = vmatprep.mubr.bf16.mxu0 %v14438_v0 }
 0x393   : > { %1954 = vmatprep.subr.bf16.mxu1 %v14438_v0  ;;  %1832 = vmatprep.mubr.bf16.mxu1 %v14438_v0 }
 0x394   : > { %v1581_v55 = vpop.f32.mrb[36].mxu0  ;;  %2131 = vmatpush1.bf16.msra.mxu0 %v12809_v53 }
 0x395   : > { %v1583_v57 = vpop.f32.mrb[37].mxu0  ;;  %2132 = vmatprep.subr.bf16.mxu0 %v12814_v54  ;;  %v12859_v54 = vld [vmem:[#allocation7 + $0x24c] ss:$16 sps:$4 sm:$0xff]  }
 0x396   : > { %1955 = vmatpush1.bf16.msra.mxu1 %v14917_v6  ;;  %v1584_v58 = vpop.f32.mrb[38].mxu0 }
 0x397   : > { %1956 = vmatprep.subr.bf16.mxu1 %v14438_v0  ;;  %v1605_v59 = vpack.c.bf16 %v1584_v58, %v1581_v55  ;;  %v1586_v60 = vpop.f32.mrb[39].mxu0  ;;  %v12857_v55 = vld [vmem:[#allocation7 + $0x248] ss:$16 sps:$4 sm:$0xff]  }
 0x398   : > { %2133 = vmatpush1.bf16.msra.mxu0 %v12812_v56 }
 0x399   : > { %11123 = vmatmul.mubr.msk.bf16.gmra.mrb[20].mxu0 %vm765_vm0, %v1605_v59  ;;  %11127 = vmatmul.mubr.msk.bf16.gmra.mrb[20].mxu1 %vm765_vm0, %v1605_v59 }
 0x39a   : > { %1957 = vmatpush1.bf16.msra.mxu1 %v14925_v9  ;;  %1769 = vmatprep.mubr.bf16.mxu0 %v14438_v0 }
 0x39b   : > { %1958 = vmatprep.subr.bf16.mxu1 %v14438_v0  ;;  %1842 = vmatprep.mubr.bf16.mxu1 %v14438_v0 }
 0x39c   : > { %v1589_v63 = vpop.f32.mrb[40].mxu0  ;;  %2134 = vmatprep.subr.bf16.mxu0 %v12820_v61 }
 0x39d   : > { %v1591_v1 = vpop.f32.mrb[41].mxu0  ;;  %2135 = vmatpush1.bf16.msra.mxu0 %v12818_v62 }
 0x39e   : > { %1959 = vmatpush1.bf16.msra.mxu1 %v14933_v13  ;;  %v1592_v2 = vpop.f32.mrb[42].mxu0  ;;  %2136 = vmatprep.subr.bf16.mxu0 %v12829_v33  ;;  %v12835_v1 = vld [vmem:[#allocation5 + $0x104] ss:$8 sps:$4 sm:$0xff]  }
 0x39f   : > { %1960 = vmatprep.subr.bf16.mxu1 %v14438_v0  ;;  %v1606_v3 = vpack.c.bf16 %v1592_v2, %v1589_v63  ;;  %v1594_v5 = vpop.f32.mrb[43].mxu0 }
 0x3a0   : > { %v12853_v5 = vld [vmem:[#allocation7 + $0x204] ss:$16 sps:$4 sm:$0xff]  }
 0x3a1   : > { %11124 = vmatmul.mubr.msk.bf16.gmra.mrb[24].mxu0 %vm765_vm0, %v1606_v3  ;;  %11128 = vmatmul.mubr.msk.bf16.gmra.mrb[24].mxu1 %vm765_vm0, %v1606_v3 }
 0x3a2   : > { %1961 = vmatpush1.bf16.msra.mxu1 %v14942_v17  ;;  %1779 = vmatprep.mubr.bf16.mxu0 %v14438_v0 }
 0x3a3   : > { %1962 = vmatprep.subr.bf16.mxu1 %v14438_v0  ;;  %1852 = vmatprep.mubr.bf16.mxu1 %v14438_v0 }
 0x3a4   : > { %v1597_v7 = vpop.f32.mrb[44].mxu0  ;;  %2137 = vmatpush1.bf16.msra.mxu0 %v12827_v35 }
 0x3a5   : > { %v1599_v8 = vpop.f32.mrb[45].mxu0  ;;  %2365 = vmatprep.subr.bf16.mxu0 %v14438_v0 }
 0x3a6   : > { %1963 = vmatpush1.bf16.msra.mxu1 %v14951_v20  ;;  %v1600_v10 = vpop.f32.mrb[46].mxu0  ;;  %v12836_v8 = vld [vmem:[#allocation5 + $0x114] ss:$8 sps:$4 sm:$0xff]  }
 0x3a7   : > { %1964 = vmatprep.subr.bf16.mxu1 %v14438_v0  ;;  %v1607_v12 = vpack.c.bf16 %v1600_v10, %v1597_v7  ;;  %v1602_v14 = vpop.f32.mrb[47].mxu0  ;;  %v12833_v7 = vld [vmem:[#allocation5 + $0x100] ss:$8 sps:$4 sm:$0xff]  }
 0x3a8   : > { %v12851_v10 = vld [vmem:[#allocation7 + $0x200] ss:$16 sps:$4 sm:$0xff]   ;;  %v12862_v14 = vld [vmem:[#allocation7 + $0x244] ss:$16 sps:$4 sm:$0xff]  }
 0x3a9   : > { %11125 = vmatmul.mubr.msk.bf16.gmra.mrb[28].mxu0 %vm765_vm0, %v1607_v12  ;;  %11129 = vmatmul.mubr.msk.bf16.gmra.mrb[28].mxu1 %vm765_vm0, %v1607_v12  ;;  %v12854_v12 = vld [vmem:[#allocation7 + $0x220] ss:$16 sps:$4 sm:$0xff]  }
 0x3aa   : > { %1965 = vmatpush1.bf16.msra.mxu1 %v14959_v23  ;;  %11138 = vmatprep.mubr.msk.bf16.mxu1 %vm765_vm0, %v12799_v11  ;;  %v12856_v11 = vld [vmem:[#allocation7 + $0x224] ss:$16 sps:$4 sm:$0xff]  }
 0x3ab   : > { %1966 = vmatprep.subr.bf16.mxu1 %v14438_v0  ;;  %2162 = vmatprep.mubr.bf16.mxu0 %v14438_v0 }
 0x3ae   : > { %1967 = vmatpush1.bf16.msra.mxu1 %v14969_v28 }
 0x3af   : > { %1968 = vmatprep.subr.bf16.mxu1 %v14438_v0 }
 0x3b2   : > { %1969 = vmatpush1.bf16.msra.mxu1 %v14977_v31 }
 0x3b3   : > { %1970 = vmatprep.subr.bf16.mxu1 %v14438_v0 }
 0x3b6   : > { %1971 = vmatpush1.bf16.msra.mxu1 %v14985_v34 }
 0x3b7   : > { %1972 = vmatprep.subr.bf16.mxu1 %v14438_v0 }
 0x3ba   : > { %1973 = vmatpush1.bf16.msra.mxu1 %v14993_v37 }
 0x3bb   : > { %1974 = vmatprep.subr.bf16.mxu1 %v14438_v0 }
 0x3be   : > { %1975 = vmatpush1.bf16.msra.mxu1 %v14999_v40 }
 0x3bf   : > { %2203 = vmatprep.subr.bf16.mxu1 %v12817_v15  ;;  %v12838_v15 = vld [vmem:[#allocation5 + $0x110] ss:$8 sps:$4 sm:$0xff]  }
 0x3c1   : > { %1985 = vmatmul.mubr.bf16.vlgmr.msra.gmra.mrb[32].mxu1 %v12797_v16  ;;  %v12839_v16 = vld [vmem:[#allocation5 + $0x124] ss:$8 sps:$4 sm:$0xff]  }
 0x3c2   : > { %11139 = vmatprep.mubr.msk.bf16.mxu1 %vm765_vm0, %v12800_v18  ;;  %2204 = vmatpush1.bf16.msra.mxu1 %v12815_v19  ;;  %v12860_v18 = vld [vmem:[#allocation7 + $0x240] ss:$16 sps:$4 sm:$0xff]  }
 0x3c3   : > { %2205 = vmatprep.subr.bf16.mxu1 %v12823_v21  ;;  %v12841_v19 = vld [vmem:[#allocation5 + $0x120] ss:$8 sps:$4 sm:$0xff]   ;;  %v12842_v21 = vld [vmem:[#allocation5 + $0x134] ss:$8 sps:$4 sm:$0xff]  }
 0x3c6   : > { %2206 = vmatpush1.bf16.msra.mxu1 %v12821_v22  ;;  %v12844_v22 = vld [vmem:[#allocation5 + $0x130] ss:$8 sps:$4 sm:$0xff]  }
 0x3c7   : > { %2207 = vmatprep.subr.bf16.mxu1 %v12826_v24  ;;  %v12865_v24 = vld [vmem:[#allocation7 + $0x26c] ss:$16 sps:$4 sm:$0xff]  }
 0x3c9   : > { %1993 = vmatmul.mubr.bf16.gmra.mrb[36].mxu1 %v12802_v25  ;;  %v12863_v25 = vld [vmem:[#allocation7 + $0x268] ss:$16 sps:$4 sm:$0xff]  }
 0x3ca   : > { %11140 = vmatprep.mubr.msk.bf16.mxu1 %vm765_vm0, %v12803_v26  ;;  %2208 = vmatpush1.bf16.msra.mxu1 %v12824_v27  ;;  %v12868_v26 = vld [vmem:[#allocation7 + $0x264] ss:$16 sps:$4 sm:$0xff]   ;;  %v12866_v27 = vld [vmem:[#allocation7 + $0x260] ss:$16 sps:$4 sm:$0xff]  }
 0x3cb   : > { %2209 = vmatprep.subr.bf16.mxu1 %v12832_v36 }
 0x3ce   : > { %2210 = vmatpush1.bf16.msra.mxu1 %v12830_v38  ;;  %v12881_v38 = vld [vmem:[#allocation7 + $0x280] ss:$16 sps:$4 sm:$0xff]  }
 0x3cf   : > { %2616 = vmatprep.subr.bf16.mxu1 %v12847_v39  ;;  %v12886_v39 = vld [vmem:[#allocation7 + $0x2a4] ss:$16 sps:$4 sm:$0xff]  }
 0x3d1   : > { %2001 = vmatmul.mubr.bf16.gmra.mrb[40].mxu1 %v12805_v29  ;;  %v12883_v29 = vld [vmem:[#allocation7 + $0x284] ss:$16 sps:$4 sm:$0xff]  }
 0x3d2   : > { %11141 = vmatprep.mubr.msk.bf16.mxu1 %vm765_vm0, %v12806_v30 }
 0x3d9   : > { %2009 = vmatmul.mubr.bf16.gmra.mrb[44].mxu1 %v12808_v32 }
 0x3da   : > { %2235 = vmatprep.mubr.bf16.mxu1 %v14438_v0 }
 0x494   : > { %v1986_v41 = vpop.f32.mrb[32].mxu1 }
 0x495   : > { %v1988_v42 = vpop.f32.mrb[33].mxu1 }
 0x496   : > { %v1989_v43 = vpop.f32.mrb[34].mxu1  ;;  %v12884_v42 = vld [vmem:[#allocation7 + $0x2a0] ss:$16 sps:$4 sm:$0xff]  }
 0x497   : > { %v2017_v44 = vpack.c.bf16 %v1989_v43, %v1986_v41  ;;  %v1991_v45 = vpop.f32.mrb[35].mxu1 }
 0x499   : > { %11158 = vmatmul.mubr.msk.bf16.vlgmr.msra.gmra.mrb[16].mxu0 %vm765_vm0, %v2017_v44  ;;  %11162 = vmatmul.mubr.msk.bf16.vlgmr.msra.gmra.mrb[16].mxu1 %vm765_vm0, %v2017_v44 }
 0x49a   : > { %2366 = vmatpush1.bf16.msra.mxu0 %v14913_v4  ;;  %2172 = vmatprep.mubr.bf16.mxu0 %v14438_v0 }
 0x49b   : > { %2367 = vmatprep.subr.bf16.mxu0 %v14438_v0  ;;  %2245 = vmatprep.mubr.bf16.mxu1 %v14438_v0 }
 0x49c   : > { %v1994_v48 = vpop.f32.mrb[36].mxu1  ;;  %2617 = vmatpush1.bf16.msra.mxu1 %v12845_v46 }
 0x49d   : > { %v1996_v50 = vpop.f32.mrb[37].mxu1  ;;  %2618 = vmatprep.subr.bf16.mxu1 %v12850_v47  ;;  %v12892_v47 = vld [vmem:[#allocation7 + $0x2c4] ss:$16 sps:$4 sm:$0xff]  }
 0x49e   : > { %2368 = vmatpush1.bf16.msra.mxu0 %v14917_v6  ;;  %v1997_v51 = vpop.f32.mrb[38].mxu1 }
 0x49f   : > { %2369 = vmatprep.subr.bf16.mxu0 %v14438_v0  ;;  %v2018_v52 = vpack.c.bf16 %v1997_v51, %v1994_v48  ;;  %v1999_v53 = vpop.f32.mrb[39].mxu1  ;;  %v12890_v48 = vld [vmem:[#allocation7 + $0x2c0] ss:$16 sps:$4 sm:$0xff]  }
 0x4a0   : > { %2619 = vmatpush1.bf16.msra.mxu1 %v12848_v49 }
 0x4a1   : > { %11159 = vmatmul.mubr.msk.bf16.gmra.mrb[20].mxu0 %vm765_vm0, %v2018_v52  ;;  %11163 = vmatmul.mubr.msk.bf16.gmra.mrb[20].mxu1 %vm765_vm0, %v2018_v52 }
 0x4a2   : > { %2370 = vmatpush1.bf16.msra.mxu0 %v14925_v9  ;;  %2182 = vmatprep.mubr.bf16.mxu0 %v14438_v0 }
 0x4a3   : > { %2371 = vmatprep.subr.bf16.mxu0 %v14438_v0  ;;  %2255 = vmatprep.mubr.bf16.mxu1 %v14438_v0 }
 0x4a4   : > { %v2002_v56 = vpop.f32.mrb[40].mxu1  ;;  %2620 = vmatprep.subr.bf16.mxu1 %v12859_v54 }
 0x4a5   : > { %v2004_v57 = vpop.f32.mrb[41].mxu1  ;;  %2621 = vmatpush1.bf16.msra.mxu1 %v12857_v55 }
 0x4a6   : > { %2372 = vmatpush1.bf16.msra.mxu0 %v14933_v13  ;;  %v2005_v58 = vpop.f32.mrb[42].mxu1  ;;  %2622 = vmatprep.subr.bf16.mxu1 %v12865_v24  ;;  %v12871_v57 = vld [vmem:[#allocation5 + $0x144] ss:$8 sps:$4 sm:$0xff]  }
 0x4a7   : > { %2373 = vmatprep.subr.bf16.mxu0 %v14438_v0  ;;  %v2019_v59 = vpack.c.bf16 %v2005_v58, %v2002_v56  ;;  %v2007_v60 = vpop.f32.mrb[43].mxu1 }
 0x4a8   : > { %v12889_v60 = vld [vmem:[#allocation7 + $0x28c] ss:$16 sps:$4 sm:$0xff]  }
 0x4a9   : > { %11160 = vmatmul.mubr.msk.bf16.gmra.mrb[24].mxu0 %vm765_vm0, %v2019_v59  ;;  %11164 = vmatmul.mubr.msk.bf16.gmra.mrb[24].mxu1 %vm765_vm0, %v2019_v59 }
 0x4aa   : > { %2374 = vmatpush1.bf16.msra.mxu0 %v14942_v17  ;;  %2192 = vmatprep.mubr.bf16.mxu0 %v14438_v0 }
 0x4ab   : > { %2375 = vmatprep.subr.bf16.mxu0 %v14438_v0  ;;  %2265 = vmatprep.mubr.bf16.mxu1 %v14438_v0 }
 0x4ac   : > { %v2010_v61 = vpop.f32.mrb[44].mxu1  ;;  %2623 = vmatpush1.bf16.msra.mxu1 %v12863_v25 }
 0x4ad   : > { %v2012_v62 = vpop.f32.mrb[45].mxu1  ;;  %2778 = vmatprep.subr.bf16.mxu1 %v14438_v0 }
 0x4ae   : > { %2376 = vmatpush1.bf16.msra.mxu0 %v14951_v20  ;;  %v2013_v63 = vpop.f32.mrb[46].mxu1  ;;  %v12872_v62 = vld [vmem:[#allocation5 + $0x154] ss:$8 sps:$4 sm:$0xff]  }
 0x4af   : > { %2377 = vmatprep.subr.bf16.mxu0 %v14438_v0  ;;  %v2020_v2 = vpack.c.bf16 %v2013_v63, %v2010_v61  ;;  %v2015_v3 = vpop.f32.mrb[47].mxu1  ;;  %v12869_v61 = vld [vmem:[#allocation5 + $0x140] ss:$8 sps:$4 sm:$0xff]  }
 0x4b0   : > { %v12887_v63 = vld [vmem:[#allocation7 + $0x288] ss:$16 sps:$4 sm:$0xff]   ;;  %v12898_v3 = vld [vmem:[#allocation7 + $0x2cc] ss:$16 sps:$4 sm:$0xff]  }
 0x4b1   : > { %11161 = vmatmul.mubr.msk.bf16.gmra.mrb[28].mxu0 %vm765_vm0, %v2020_v2  ;;  %11165 = vmatmul.mubr.msk.bf16.gmra.mrb[28].mxu1 %vm765_vm0, %v2020_v2  ;;  %v12893_v2 = vld [vmem:[#allocation7 + $0x2a8] ss:$16 sps:$4 sm:$0xff]  }
 0x4b2   : > { %2378 = vmatpush1.bf16.msra.mxu0 %v14959_v23  ;;  %11174 = vmatprep.mubr.msk.bf16.mxu0 %vm765_vm0, %v12835_v1  ;;  %v12895_v1 = vld [vmem:[#allocation7 + $0x2ac] ss:$16 sps:$4 sm:$0xff]  }
 0x4b3   : > { %2379 = vmatprep.subr.bf16.mxu0 %v14438_v0  ;;  %2648 = vmatprep.mubr.bf16.mxu1 %v14438_v0 }
 0x4b6   : > { %2380 = vmatpush1.bf16.msra.mxu0 %v14969_v28 }
 0x4b7   : > { %2381 = vmatprep.subr.bf16.mxu0 %v14438_v0 }
 0x4ba   : > { %2382 = vmatpush1.bf16.msra.mxu0 %v14977_v31 }
 0x4bb   : > { %2383 = vmatprep.subr.bf16.mxu0 %v14438_v0 }
 0x4be   : > { %2384 = vmatpush1.bf16.msra.mxu0 %v14985_v34 }
 0x4bf   : > { %2385 = vmatprep.subr.bf16.mxu0 %v14438_v0 }
 0x4c2   : > { %2386 = vmatpush1.bf16.msra.mxu0 %v14993_v37 }
 0x4c3   : > { %2387 = vmatprep.subr.bf16.mxu0 %v14438_v0 }
 0x4c6   : > { %2388 = vmatpush1.bf16.msra.mxu0 %v14999_v40 }
 0x4c7   : > { %2543 = vmatprep.subr.bf16.mxu0 %v12853_v5  ;;  %v12874_v5 = vld [vmem:[#allocation5 + $0x150] ss:$8 sps:$4 sm:$0xff]  }
 0x4c9   : > { %2398 = vmatmul.mubr.bf16.vlgmr.msra.gmra.mrb[48].mxu0 %v12833_v7  ;;  %v12875_v7 = vld [vmem:[#allocation5 + $0x164] ss:$8 sps:$4 sm:$0xff]  }
 0x4ca   : > { %11175 = vmatprep.mubr.msk.bf16.mxu0 %vm765_vm0, %v12836_v8  ;;  %2544 = vmatpush1.bf16.msra.mxu0 %v12851_v10  ;;  %v12896_v8 = vld [vmem:[#allocation7 + $0x2c8] ss:$16 sps:$4 sm:$0xff]  }
 0x4cb   : > { %2545 = vmatprep.subr.bf16.mxu0 %v12856_v11  ;;  %v12877_v10 = vld [vmem:[#allocation5 + $0x160] ss:$8 sps:$4 sm:$0xff]   ;;  %v12878_v11 = vld [vmem:[#allocation5 + $0x174] ss:$8 sps:$4 sm:$0xff]  }
 0x4ce   : > { %2546 = vmatpush1.bf16.msra.mxu0 %v12854_v12  ;;  %v12880_v12 = vld [vmem:[#allocation5 + $0x170] ss:$8 sps:$4 sm:$0xff]  }
 0x4cf   : > { %2547 = vmatprep.subr.bf16.mxu0 %v12862_v14  ;;  %v12901_v14 = vld [vmem:[#allocation7 + $0x2e4] ss:$16 sps:$4 sm:$0xff]  }
 0x4d1   : > { %2406 = vmatmul.mubr.bf16.gmra.mrb[52].mxu0 %v12838_v15  ;;  %v12899_v15 = vld [vmem:[#allocation7 + $0x2e0] ss:$16 sps:$4 sm:$0xff]  }
 0x4d2   : > { %11176 = vmatprep.mubr.msk.bf16.mxu0 %vm765_vm0, %v12839_v16  ;;  %2548 = vmatpush1.bf16.msra.mxu0 %v12860_v18  ;;  %v12904_v16 = vld [vmem:[#allocation7 + $0x2ec] ss:$16 sps:$4 sm:$0xff]   ;;  %v12902_v18 = vld [vmem:[#allocation7 + $0x2e8] ss:$16 sps:$4 sm:$0xff]  }
 0x4d3   : > { %2549 = vmatprep.subr.bf16.mxu0 %v12868_v26 }
 0x4d6   : > { %2550 = vmatpush1.bf16.msra.mxu0 %v12866_v27  ;;  %v12917_v27 = vld [vmem:[#allocation7 + $0x308] ss:$16 sps:$4 sm:$0xff]  }
 0x4d7   : > { %2956 = vmatprep.subr.bf16.mxu0 %v12883_v29  ;;  %v12922_v29 = vld [vmem:[#allocation7 + $0x32c] ss:$16 sps:$4 sm:$0xff]  }
 0x4d9   : > { %2414 = vmatmul.mubr.bf16.gmra.mrb[56].mxu0 %v12841_v19  ;;  %v12919_v19 = vld [vmem:[#allocation7 + $0x30c] ss:$16 sps:$4 sm:$0xff]  }
 0x4da   : > { %11177 = vmatprep.mubr.msk.bf16.mxu0 %vm765_vm0, %v12842_v21 }
 0x4e1   : > { %2422 = vmatmul.mubr.bf16.gmra.mrb[60].mxu0 %v12844_v22 }
 0x4e2   : > { %2575 = vmatprep.mubr.bf16.mxu0 %v14438_v0 }
 0x59c   : > { %v2399_v30 = vpop.f32.mrb[48].mxu0 }
 0x59d   : > { %v2401_v32 = vpop.f32.mrb[49].mxu0 }
 0x59e   : > { %v2402_v33 = vpop.f32.mrb[50].mxu0  ;;  %v12920_v32 = vld [vmem:[#allocation7 + $0x328] ss:$16 sps:$4 sm:$0xff]  }
 0x59f   : > { %v2430_v35 = vpack.c.bf16 %v2402_v33, %v2399_v30  ;;  %v2404_v36 = vpop.f32.mrb[51].mxu0 }
 0x5a1   : > { %11194 = vmatmul.mubr.msk.bf16.vlgmr.msra.gmra.mrb[16].mxu0 %vm765_vm0, %v2430_v35  ;;  %11198 = vmatmul.mubr.msk.bf16.vlgmr.msra.gmra.mrb[16].mxu1 %vm765_vm0, %v2430_v35 }
 0x5a2   : > { %2779 = vmatpush1.bf16.msra.mxu1 %v14913_v4  ;;  %2585 = vmatprep.mubr.bf16.mxu0 %v14438_v0 }
 0x5a3   : > { %2780 = vmatprep.subr.bf16.mxu1 %v14438_v0  ;;  %2658 = vmatprep.mubr.bf16.mxu1 %v14438_v0 }
 0x5a4   : > { %v2407_v41 = vpop.f32.mrb[52].mxu0  ;;  %2957 = vmatpush1.bf16.msra.mxu0 %v12881_v38 }
 0x5a5   : > { %v2409_v43 = vpop.f32.mrb[53].mxu0  ;;  %2958 = vmatprep.subr.bf16.mxu0 %v12886_v39  ;;  %v12931_v39 = vld [vmem:[#allocation7 + $0x34c] ss:$16 sps:$4 sm:$0xff]  }
 0x5a6   : > { %2781 = vmatpush1.bf16.msra.mxu1 %v14917_v6  ;;  %v2410_v44 = vpop.f32.mrb[54].mxu0 }
 0x5a7   : > { %2782 = vmatprep.subr.bf16.mxu1 %v14438_v0  ;;  %v2431_v45 = vpack.c.bf16 %v2410_v44, %v2407_v41  ;;  %v2412_v46 = vpop.f32.mrb[55].mxu0  ;;  %v12929_v41 = vld [vmem:[#allocation7 + $0x348] ss:$16 sps:$4 sm:$0xff]  }
 0x5a8   : > { %2959 = vmatpush1.bf16.msra.mxu0 %v12884_v42 }
 0x5a9   : > { %11195 = vmatmul.mubr.msk.bf16.gmra.mrb[20].mxu0 %vm765_vm0, %v2431_v45  ;;  %11199 = vmatmul.mubr.msk.bf16.gmra.mrb[20].mxu1 %vm765_vm0, %v2431_v45 }
 0x5aa   : > { %2783 = vmatpush1.bf16.msra.mxu1 %v14925_v9  ;;  %2595 = vmatprep.mubr.bf16.mxu0 %v14438_v0 }
 0x5ab   : > { %2784 = vmatprep.subr.bf16.mxu1 %v14438_v0  ;;  %2668 = vmatprep.mubr.bf16.mxu1 %v14438_v0 }
 0x5ac   : > { %v2415_v49 = vpop.f32.mrb[56].mxu0  ;;  %2960 = vmatprep.subr.bf16.mxu0 %v12892_v47 }
 0x5ad   : > { %v2417_v50 = vpop.f32.mrb[57].mxu0  ;;  %2961 = vmatpush1.bf16.msra.mxu0 %v12890_v48 }
 0x5ae   : > { %2785 = vmatpush1.bf16.msra.mxu1 %v14933_v13  ;;  %v2418_v51 = vpop.f32.mrb[58].mxu0  ;;  %2962 = vmatprep.subr.bf16.mxu0 %v12901_v14  ;;  %v12907_v50 = vld [vmem:[#allocation5 + $0x184] ss:$8 sps:$4 sm:$0xff]  }
 0x5af   : > { %2786 = vmatprep.subr.bf16.mxu1 %v14438_v0  ;;  %v2432_v52 = vpack.c.bf16 %v2418_v51, %v2415_v49  ;;  %v2420_v53 = vpop.f32.mrb[59].mxu0 }
 0x5b0   : > { %v12925_v53 = vld [vmem:[#allocation7 + $0x304] ss:$16 sps:$4 sm:$0xff]  }
 0x5b1   : > { %11196 = vmatmul.mubr.msk.bf16.gmra.mrb[24].mxu0 %vm765_vm0, %v2432_v52  ;;  %11200 = vmatmul.mubr.msk.bf16.gmra.mrb[24].mxu1 %vm765_vm0, %v2432_v52 }
 0x5b2   : > { %2787 = vmatpush1.bf16.msra.mxu1 %v14942_v17  ;;  %2605 = vmatprep.mubr.bf16.mxu0 %v14438_v0 }
 0x5b3   : > { %2788 = vmatprep.subr.bf16.mxu1 %v14438_v0  ;;  %2678 = vmatprep.mubr.bf16.mxu1 %v14438_v0 }
 0x5b4   : > { %v2423_v54 = vpop.f32.mrb[60].mxu0  ;;  %2963 = vmatpush1.bf16.msra.mxu0 %v12899_v15 }
 0x5b5   : > { %v2425_v55 = vpop.f32.mrb[61].mxu0  ;;  %3191 = vmatprep.subr.bf16.mxu0 %v14438_v0 }
 0x5b6   : > { %2789 = vmatpush1.bf16.msra.mxu1 %v14951_v20  ;;  %v2426_v56 = vpop.f32.mrb[62].mxu0  ;;  %v12908_v55 = vld [vmem:[#allocation5 + $0x194] ss:$8 sps:$4 sm:$0xff]  }
 0x5b7   : > { %2790 = vmatprep.subr.bf16.mxu1 %v14438_v0  ;;  %v2433_v58 = vpack.c.bf16 %v2426_v56, %v2423_v54  ;;  %v2428_v59 = vpop.f32.mrb[63].mxu0  ;;  %v12905_v54 = vld [vmem:[#allocation5 + $0x180] ss:$8 sps:$4 sm:$0xff]  }
 0x5b8   : > { %v12923_v56 = vld [vmem:[#allocation7 + $0x300] ss:$16 sps:$4 sm:$0xff]   ;;  %v12934_v59 = vld [vmem:[#allocation7 + $0x344] ss:$16 sps:$4 sm:$0xff]  }
 0x5b9   : > { %11197 = vmatmul.mubr.msk.bf16.gmra.mrb[28].mxu0 %vm765_vm0, %v2433_v58  ;;  %11201 = vmatmul.mubr.msk.bf16.gmra.mrb[28].mxu1 %vm765_vm0, %v2433_v58  ;;  %v12926_v58 = vld [vmem:[#allocation7 + $0x320] ss:$16 sps:$4 sm:$0xff]  }
 0x5ba   : > { %2791 = vmatpush1.bf16.msra.mxu1 %v14959_v23  ;;  %11210 = vmatprep.mubr.msk.bf16.mxu1 %vm765_vm0, %v12871_v57  ;;  %v12928_v57 = vld [vmem:[#allocation7 + $0x324] ss:$16 sps:$4 sm:$0xff]  }
 0x5bb   : > { %2792 = vmatprep.subr.bf16.mxu1 %v14438_v0  ;;  %2988 = vmatprep.mubr.bf16.mxu0 %v14438_v0 }
 0x5be   : > { %2793 = vmatpush1.bf16.msra.mxu1 %v14969_v28 }
 0x5bf   : > { %2794 = vmatprep.subr.bf16.mxu1 %v14438_v0 }
 0x5c2   : > { %2795 = vmatpush1.bf16.msra.mxu1 %v14977_v31 }
 0x5c3   : > { %2796 = vmatprep.subr.bf16.mxu1 %v14438_v0 }
 0x5c6   : > { %2797 = vmatpush1.bf16.msra.mxu1 %v14985_v34 }
 0x5c7   : > { %2798 = vmatprep.subr.bf16.mxu1 %v14438_v0 }
 0x5ca   : > { %2799 = vmatpush1.bf16.msra.mxu1 %v14993_v37 }
 0x5cb   : > { %2800 = vmatprep.subr.bf16.mxu1 %v14438_v0 }
 0x5ce   : > { %2801 = vmatpush1.bf16.msra.mxu1 %v14999_v40 }
 0x5cf   : > { %3029 = vmatprep.subr.bf16.mxu1 %v12889_v60  ;;  %v12910_v60 = vld [vmem:[#allocation5 + $0x190] ss:$8 sps:$4 sm:$0xff]  }
 0x5d1   : > { %2811 = vmatmul.mubr.bf16.vlgmr.msra.gmra.mrb[48].mxu1 %v12869_v61  ;;  %v12911_v61 = vld [vmem:[#allocation5 + $0x1a4] ss:$8 sps:$4 sm:$0xff]  }
 0x5d2   : > { %11211 = vmatprep.mubr.msk.bf16.mxu1 %vm765_vm0, %v12872_v62  ;;  %3030 = vmatpush1.bf16.msra.mxu1 %v12887_v63  ;;  %v12932_v62 = vld [vmem:[#allocation7 + $0x340] ss:$16 sps:$4 sm:$0xff]  }
 0x5d3   : > { %3031 = vmatprep.subr.bf16.mxu1 %v12895_v1  ;;  %v12913_v63 = vld [vmem:[#allocation5 + $0x1a0] ss:$8 sps:$4 sm:$0xff]   ;;  %v12914_v1 = vld [vmem:[#allocation5 + $0x1b4] ss:$8 sps:$4 sm:$0xff]  }
 0x5d6   : > { %3032 = vmatpush1.bf16.msra.mxu1 %v12893_v2  ;;  %v12916_v2 = vld [vmem:[#allocation5 + $0x1b0] ss:$8 sps:$4 sm:$0xff]  }
 0x5d7   : > { %3033 = vmatprep.subr.bf16.mxu1 %v12898_v3  ;;  %v12937_v3 = vld [vmem:[#allocation7 + $0x36c] ss:$16 sps:$4 sm:$0xff]  }
 0x5d9   : > { %2819 = vmatmul.mubr.bf16.gmra.mrb[52].mxu1 %v12874_v5  ;;  %v12935_v5 = vld [vmem:[#allocation7 + $0x368] ss:$16 sps:$4 sm:$0xff]  }
 0x5da   : > { %11212 = vmatprep.mubr.msk.bf16.mxu1 %vm765_vm0, %v12875_v7  ;;  %3034 = vmatpush1.bf16.msra.mxu1 %v12896_v8  ;;  %v12940_v7 = vld [vmem:[#allocation7 + $0x364] ss:$16 sps:$4 sm:$0xff]   ;;  %v12938_v8 = vld [vmem:[#allocation7 + $0x360] ss:$16 sps:$4 sm:$0xff]  }
 0x5db   : > { %3035 = vmatprep.subr.bf16.mxu1 %v12904_v16 }
 0x5de   : > { %3036 = vmatpush1.bf16.msra.mxu1 %v12902_v18  ;;  %v12953_v18 = vld [vmem:[#allocation7 + $0x380] ss:$16 sps:$4 sm:$0xff]  }
 0x5df   : > { %3442 = vmatprep.subr.bf16.mxu1 %v12919_v19  ;;  %v12958_v19 = vld [vmem:[#allocation7 + $0x3a4] ss:$16 sps:$4 sm:$0xff]  }
 0x5e1   : > { %2827 = vmatmul.mubr.bf16.gmra.mrb[56].mxu1 %v12877_v10  ;;  %v12955_v10 = vld [vmem:[#allocation7 + $0x384] ss:$16 sps:$4 sm:$0xff]  }
 0x5e2   : > { %11213 = vmatprep.mubr.msk.bf16.mxu1 %vm765_vm0, %v12878_v11 }
 0x5e9   : > { %2835 = vmatmul.mubr.bf16.gmra.mrb[60].mxu1 %v12880_v12 }
 0x5ea   : > { %3061 = vmatprep.mubr.bf16.mxu1 %v14438_v0 }
 0x6a4   : > { %v2812_v21 = vpop.f32.mrb[48].mxu1 }
 0x6a5   : > { %v2814_v22 = vpop.f32.mrb[49].mxu1 }
 0x6a6   : > { %v2815_v24 = vpop.f32.mrb[50].mxu1  ;;  %v12956_v22 = vld [vmem:[#allocation7 + $0x3a0] ss:$16 sps:$4 sm:$0xff]  }
 0x6a7   : > { %v2843_v25 = vpack.c.bf16 %v2815_v24, %v2812_v21  ;;  %v2817_v26 = vpop.f32.mrb[51].mxu1 }
 0x6a9   : > { %11230 = vmatmul.mubr.msk.bf16.vlgmr.msra.gmra.mrb[16].mxu0 %vm765_vm0, %v2843_v25  ;;  %11234 = vmatmul.mubr.msk.bf16.vlgmr.msra.gmra.mrb[16].mxu1 %vm765_vm0, %v2843_v25 }
 0x6aa   : > { %3192 = vmatpush1.bf16.msra.mxu0 %v14913_v4  ;;  %2998 = vmatprep.mubr.bf16.mxu0 %v14438_v0 }
 0x6ab   : > { %3193 = vmatprep.subr.bf16.mxu0 %v14438_v0  ;;  %3071 = vmatprep.mubr.bf16.mxu1 %v14438_v0 }
 0x6ac   : > { %v2820_v30 = vpop.f32.mrb[52].mxu1  ;;  %3443 = vmatpush1.bf16.msra.mxu1 %v12917_v27 }
 0x6ad   : > { %v2822_v33 = vpop.f32.mrb[53].mxu1  ;;  %3444 = vmatprep.subr.bf16.mxu1 %v12922_v29  ;;  %v12964_v29 = vld [vmem:[#allocation7 + $0x3c4] ss:$16 sps:$4 sm:$0xff]  }
 0x6ae   : > { %3194 = vmatpush1.bf16.msra.mxu0 %v14917_v6  ;;  %v2823_v35 = vpop.f32.mrb[54].mxu1 }
 0x6af   : > { %3195 = vmatprep.subr.bf16.mxu0 %v14438_v0  ;;  %v2844_v36 = vpack.c.bf16 %v2823_v35, %v2820_v30  ;;  %v2825_v38 = vpop.f32.mrb[55].mxu1  ;;  %v12962_v30 = vld [vmem:[#allocation7 + $0x3c0] ss:$16 sps:$4 sm:$0xff]  }
 0x6b0   : > { %3445 = vmatpush1.bf16.msra.mxu1 %v12920_v32 }
 0x6b1   : > { %11231 = vmatmul.mubr.msk.bf16.gmra.mrb[20].mxu0 %vm765_vm0, %v2844_v36  ;;  %11235 = vmatmul.mubr.msk.bf16.gmra.mrb[20].mxu1 %vm765_vm0, %v2844_v36 }
 0x6b2   : > { %3196 = vmatpush1.bf16.msra.mxu0 %v14925_v9  ;;  %3008 = vmatprep.mubr.bf16.mxu0 %v14438_v0 }
 0x6b3   : > { %3197 = vmatprep.subr.bf16.mxu0 %v14438_v0  ;;  %3081 = vmatprep.mubr.bf16.mxu1 %v14438_v0 }
 0x6b4   : > { %v2828_v42 = vpop.f32.mrb[56].mxu1  ;;  %3446 = vmatprep.subr.bf16.mxu1 %v12931_v39 }
 0x6b5   : > { %v2830_v43 = vpop.f32.mrb[57].mxu1  ;;  %3447 = vmatpush1.bf16.msra.mxu1 %v12929_v41 }
 0x6b6   : > { %3198 = vmatpush1.bf16.msra.mxu0 %v14933_v13  ;;  %v2831_v44 = vpop.f32.mrb[58].mxu1  ;;  %3448 = vmatprep.subr.bf16.mxu1 %v12937_v3  ;;  %v12943_v43 = vld [vmem:[#allocation5 + $0x1c4] ss:$8 sps:$4 sm:$0xff]  }
 0x6b7   : > { %3199 = vmatprep.subr.bf16.mxu0 %v14438_v0  ;;  %v2845_v45 = vpack.c.bf16 %v2831_v44, %v2828_v42  ;;  %v2833_v46 = vpop.f32.mrb[59].mxu1 }
 0x6b8   : > { %v12961_v46 = vld [vmem:[#allocation7 + $0x38c] ss:$16 sps:$4 sm:$0xff]  }
 0x6b9   : > { %11232 = vmatmul.mubr.msk.bf16.gmra.mrb[24].mxu0 %vm765_vm0, %v2845_v45  ;;  %11236 = vmatmul.mubr.msk.bf16.gmra.mrb[24].mxu1 %vm765_vm0, %v2845_v45 }
 0x6ba   : > { %3200 = vmatpush1.bf16.msra.mxu0 %v14942_v17  ;;  %3018 = vmatprep.mubr.bf16.mxu0 %v14438_v0 }
 0x6bb   : > { %3201 = vmatprep.subr.bf16.mxu0 %v14438_v0  ;;  %3091 = vmatprep.mubr.bf16.mxu1 %v14438_v0 }
 0x6bc   : > { %v2836_v47 = vpop.f32.mrb[60].mxu1  ;;  %3449 = vmatpush1.bf16.msra.mxu1 %v12935_v5 }
 0x6bd   : > { %v2838_v48 = vpop.f32.mrb[61].mxu1  ;;  %3604 = vmatprep.subr.bf16.mxu1 %v14438_v0 }
 0x6be   : > { %3202 = vmatpush1.bf16.msra.mxu0 %v14951_v20  ;;  %v2839_v49 = vpop.f32.mrb[62].mxu1  ;;  %v12944_v48 = vld [vmem:[#allocation5 + $0x1d4] ss:$8 sps:$4 sm:$0xff]  }
 0x6bf   : > { %3203 = vmatprep.subr.bf16.mxu0 %v14438_v0  ;;  %v2846_v51 = vpack.c.bf16 %v2839_v49, %v2836_v47  ;;  %v2841_v52 = vpop.f32.mrb[63].mxu1  ;;  %v12941_v47 = vld [vmem:[#allocation5 + $0x1c0] ss:$8 sps:$4 sm:$0xff]  }
 0x6c0   : > { %v12959_v49 = vld [vmem:[#allocation7 + $0x388] ss:$16 sps:$4 sm:$0xff]   ;;  %v12970_v52 = vld [vmem:[#allocation7 + $0x3cc] ss:$16 sps:$4 sm:$0xff]  }
 0x6c1   : > { %11233 = vmatmul.mubr.msk.bf16.gmra.mrb[28].mxu0 %vm765_vm0, %v2846_v51  ;;  %11237 = vmatmul.mubr.msk.bf16.gmra.mrb[28].mxu1 %vm765_vm0, %v2846_v51  ;;  %v12965_v51 = vld [vmem:[#allocation7 + $0x3a8] ss:$16 sps:$4 sm:$0xff]  }
 0x6c2   : > { %3204 = vmatpush1.bf16.msra.mxu0 %v14959_v23  ;;  %11246 = vmatprep.mubr.msk.bf16.mxu0 %vm765_vm0, %v12907_v50  ;;  %v12967_v50 = vld [vmem:[#allocation7 + $0x3ac] ss:$16 sps:$4 sm:$0xff]  }
 0x6c3   : > { %3205 = vmatprep.subr.bf16.mxu0 %v14438_v0  ;;  %3474 = vmatprep.mubr.bf16.mxu1 %v14438_v0 }
 0x6c6   : > { %3206 = vmatpush1.bf16.msra.mxu0 %v14969_v28 }
 0x6c7   : > { %3207 = vmatprep.subr.bf16.mxu0 %v14438_v0 }
 0x6ca   : > { %3208 = vmatpush1.bf16.msra.mxu0 %v14977_v31 }
 0x6cb   : > { %3209 = vmatprep.subr.bf16.mxu0 %v14438_v0 }
 0x6ce   : > { %3210 = vmatpush1.bf16.msra.mxu0 %v14985_v34 }
 0x6cf   : > { %3211 = vmatprep.subr.bf16.mxu0 %v14438_v0 }
 0x6d2   : > { %3212 = vmatpush1.bf16.msra.mxu0 %v14993_v37 }
 0x6d3   : > { %3213 = vmatprep.subr.bf16.mxu0 %v14438_v0 }
 0x6d6   : > { %3214 = vmatpush1.bf16.msra.mxu0 %v14999_v40 }
 0x6d7   : > { %3369 = vmatprep.subr.bf16.mxu0 %v12925_v53  ;;  %v12946_v53 = vld [vmem:[#allocation5 + $0x1d0] ss:$8 sps:$4 sm:$0xff]  }
 0x6d9   : > { %3224 = vmatmul.mubr.bf16.vlgmr.msra.gmra.mrb[64].mxu0 %v12905_v54  ;;  %v12947_v54 = vld [vmem:[#allocation5 + $0x1e4] ss:$8 sps:$4 sm:$0xff]  }
 0x6da   : > { %11247 = vmatprep.mubr.msk.bf16.mxu0 %vm765_vm0, %v12908_v55  ;;  %3370 = vmatpush1.bf16.msra.mxu0 %v12923_v56  ;;  %v12968_v55 = vld [vmem:[#allocation7 + $0x3c8] ss:$16 sps:$4 sm:$0xff]  }
 0x6db   : > { %3371 = vmatprep.subr.bf16.mxu0 %v12928_v57  ;;  %v12949_v56 = vld [vmem:[#allocation5 + $0x1e0] ss:$8 sps:$4 sm:$0xff]   ;;  %v12950_v57 = vld [vmem:[#allocation5 + $0x1f4] ss:$8 sps:$4 sm:$0xff]  }
 0x6de   : > { %3372 = vmatpush1.bf16.msra.mxu0 %v12926_v58  ;;  %v12952_v58 = vld [vmem:[#allocation5 + $0x1f0] ss:$8 sps:$4 sm:$0xff]  }
 0x6df   : > { %3373 = vmatprep.subr.bf16.mxu0 %v12934_v59  ;;  %v12973_v59 = vld [vmem:[#allocation7 + $0x3e4] ss:$16 sps:$4 sm:$0xff]  }
 0x6e1   : > { %3232 = vmatmul.mubr.bf16.gmra.mrb[68].mxu0 %v12910_v60  ;;  %v12971_v60 = vld [vmem:[#allocation7 + $0x3e0] ss:$16 sps:$4 sm:$0xff]  }
 0x6e2   : > { %11248 = vmatprep.mubr.msk.bf16.mxu0 %vm765_vm0, %v12911_v61  ;;  %3374 = vmatpush1.bf16.msra.mxu0 %v12932_v62  ;;  %v12976_v61 = vld [vmem:[#allocation7 + $0x3ec] ss:$16 sps:$4 sm:$0xff]   ;;  %v12974_v62 = vld [vmem:[#allocation7 + $0x3e8] ss:$16 sps:$4 sm:$0xff]  }
 0x6e3   : > { %3375 = vmatprep.subr.bf16.mxu0 %v12940_v7 }
 0x6e6   : > { %3376 = vmatpush1.bf16.msra.mxu0 %v12938_v8  ;;  %v12995_v8 = vld [vmem:[#allocation7 + $0x408] ss:$16 sps:$4 sm:$0xff]  }
 0x6e7   : > { %3782 = vmatprep.subr.bf16.mxu0 %v12955_v10  ;;  %v13003_v10 = vld [vmem:[#allocation7 + $0x42c] ss:$16 sps:$4 sm:$0xff]  }
 0x6e9   : > { %3240 = vmatmul.mubr.bf16.gmra.mrb[72].mxu0 %v12913_v63  ;;  %v12997_v63 = vld [vmem:[#allocation7 + $0x40c] ss:$16 sps:$4 sm:$0xff]  }
 0x6ea   : > { %11249 = vmatprep.mubr.msk.bf16.mxu0 %vm765_vm0, %v12914_v1 }
 0x6f1   : > { %3248 = vmatmul.mubr.bf16.gmra.mrb[76].mxu0 %v12916_v2 }
 0x6f2   : > { %3401 = vmatprep.mubr.bf16.mxu0 %v14438_v0 }
 0x7ac   : > { %v3225_v11 = vpop.f32.mrb[64].mxu0 }
 0x7ad   : > { %v3227_v12 = vpop.f32.mrb[65].mxu0 }
 0x7ae   : > { %v3228_v14 = vpop.f32.mrb[66].mxu0  ;;  %v13001_v12 = vld [vmem:[#allocation7 + $0x428] ss:$16 sps:$4 sm:$0xff]  }
 0x7af   : > { %v3256_v15 = vpack.c.bf16 %v3228_v14, %v3225_v11  ;;  %v3230_v16 = vpop.f32.mrb[67].mxu0 }
 0x7b1   : > { %11266 = vmatmul.mubr.msk.bf16.vlgmr.msra.gmra.mrb[16].mxu0 %vm765_vm0, %v3256_v15  ;;  %11270 = vmatmul.mubr.msk.bf16.vlgmr.msra.gmra.mrb[16].mxu1 %vm765_vm0, %v3256_v15 }
 0x7b2   : > { %3605 = vmatpush1.bf16.msra.mxu1 %v14913_v4  ;;  %3411 = vmatprep.mubr.bf16.mxu0 %v14438_v0 }
 0x7b3   : > { %3606 = vmatprep.subr.bf16.mxu1 %v14438_v0  ;;  %3484 = vmatprep.mubr.bf16.mxu1 %v14438_v0 }
 0x7b4   : > { %v3233_v21 = vpop.f32.mrb[68].mxu0  ;;  %3783 = vmatpush1.bf16.msra.mxu0 %v12953_v18 }
 0x7b5   : > { %v3235_v24 = vpop.f32.mrb[69].mxu0  ;;  %3784 = vmatprep.subr.bf16.mxu0 %v12958_v19  ;;  %v13004_v19 = vld [vmem:[#allocation7 + $0x448] ss:$16 sps:$4 sm:$0xff]  }
 0x7b6   : > { %3607 = vmatpush1.bf16.msra.mxu1 %v14917_v6  ;;  %v3236_v25 = vpop.f32.mrb[70].mxu0 }
 0x7b7   : > { %3608 = vmatprep.subr.bf16.mxu1 %v14438_v0  ;;  %v3257_v26 = vpack.c.bf16 %v3236_v25, %v3233_v21  ;;  %v3238_v27 = vpop.f32.mrb[71].mxu0 }
 0x7b8   : > { %3785 = vmatpush1.bf16.msra.mxu0 %v12956_v22  ;;  %v12979_v27 = vld [vmem:[#allocation5 + $0x204] ss:$8 sps:$4 sm:$0xff]  }
 0x7b9   : > { %11267 = vmatmul.mubr.msk.bf16.gmra.mrb[20].mxu0 %vm765_vm0, %v3257_v26  ;;  %11271 = vmatmul.mubr.msk.bf16.gmra.mrb[20].mxu1 %vm765_vm0, %v3257_v26 }
 0x7ba   : > { %3609 = vmatpush1.bf16.msra.mxu1 %v14925_v9  ;;  %3421 = vmatprep.mubr.bf16.mxu0 %v14438_v0 }
 0x7bb   : > { %3610 = vmatprep.subr.bf16.mxu1 %v14438_v0  ;;  %3494 = vmatprep.mubr.bf16.mxu1 %v14438_v0 }
 0x7bc   : > { %v3241_v32 = vpop.f32.mrb[72].mxu0  ;;  %3786 = vmatprep.subr.bf16.mxu0 %v12964_v29 }
 0x7bd   : > { %v3243_v33 = vpop.f32.mrb[73].mxu0  ;;  %3787 = vmatpush1.bf16.msra.mxu0 %v12962_v30 }
 0x7be   : > { %3611 = vmatpush1.bf16.msra.mxu1 %v14933_v13  ;;  %v3244_v35 = vpop.f32.mrb[74].mxu0  ;;  %3788 = vmatprep.subr.bf16.mxu0 %v12973_v59  ;;  %v12982_v33 = vld [vmem:[#allocation5 + $0x210] ss:$8 sps:$4 sm:$0xff]   ;;  %v13030_v59 = vld [vmem:[#allocation8 + $0x224] ss:$8 sps:$4 sm:$0xff]  }
 0x7bf   : > { %3612 = vmatprep.subr.bf16.mxu1 %v14438_v0  ;;  %v3258_v36 = vpack.c.bf16 %v3244_v35, %v3241_v32  ;;  %v3246_v38 = vpop.f32.mrb[75].mxu0  ;;  %v12994_v32 = vld [vmem:[#allocation7 + $0x424] ss:$16 sps:$4 sm:$0xff]  }
 0x7c0   : > { %v12983_v35 = vld [vmem:[#allocation5 + $0x224] ss:$8 sps:$4 sm:$0xff]   ;;  %v12988_v38 = vld [vmem:[#allocation5 + $0x230] ss:$8 sps:$4 sm:$0xff]  }
 0x7c1   : > { %11268 = vmatmul.mubr.msk.bf16.gmra.mrb[24].mxu0 %vm765_vm0, %v3258_v36  ;;  %11272 = vmatmul.mubr.msk.bf16.gmra.mrb[24].mxu1 %vm765_vm0, %v3258_v36  ;;  %v12986_v36 = vld [vmem:[#allocation5 + $0x234] ss:$8 sps:$4 sm:$0xff]  }
 0x7c2   : > { %3613 = vmatpush1.bf16.msra.mxu1 %v14942_v17  ;;  %3431 = vmatprep.mubr.bf16.mxu0 %v14438_v0 }
 0x7c3   : > { %3614 = vmatprep.subr.bf16.mxu1 %v14438_v0  ;;  %3504 = vmatprep.mubr.bf16.mxu1 %v14438_v0 }
 0x7c4   : > { %v3249_v39 = vpop.f32.mrb[76].mxu0  ;;  %3789 = vmatpush1.bf16.msra.mxu0 %v12971_v60 }
 0x7c5   : > { %v3251_v41 = vpop.f32.mrb[77].mxu0  ;;  %4017 = vmatprep.subr.bf16.mxu0 %v14438_v0 }
 0x7c6   : > { %3615 = vmatpush1.bf16.msra.mxu1 %v14951_v20  ;;  %v3252_v42 = vpop.f32.mrb[78].mxu0  ;;  %v13012_v41 = vld [vmem:[#allocation7 + $0x46c] ss:$16 sps:$4 sm:$0xff]  }
 0x7c7   : > { %3616 = vmatprep.subr.bf16.mxu1 %v14438_v0  ;;  %v3259_v44 = vpack.c.bf16 %v3252_v42, %v3249_v39  ;;  %v3254_v45 = vpop.f32.mrb[79].mxu0  ;;  %v13009_v39 = vld [vmem:[#allocation7 + $0x464] ss:$16 sps:$4 sm:$0xff]   ;;  %v13007_v42 = vld [vmem:[#allocation7 + $0x460] ss:$16 sps:$4 sm:$0xff]  }
 0x7c8   : > { %v13018_v45 = vld [vmem:[#allocation8 + $0x204] ss:$8 sps:$4 sm:$0xff]  }
 0x7c9   : > { %11269 = vmatmul.mubr.msk.bf16.gmra.mrb[28].mxu0 %vm765_vm0, %v3259_v44  ;;  %11273 = vmatmul.mubr.msk.bf16.gmra.mrb[28].mxu1 %vm765_vm0, %v3259_v44  ;;  %v13015_v44 = vld [vmem:[#allocation8 + $0x4] ss:$8 sps:$4 sm:$0xff]  }
 0x7ca   : > { %3617 = vmatpush1.bf16.msra.mxu1 %v14959_v23  ;;  %11282 = vmatprep.mubr.msk.bf16.mxu1 %vm765_vm0, %v12943_v43  ;;  %v13010_v43 = vld [vmem:[#allocation7 + $0x468] ss:$16 sps:$4 sm:$0xff]  }
 0x7cb   : > { %3618 = vmatprep.subr.bf16.mxu1 %v14438_v0  ;;  %3814 = vmatprep.mubr.bf16.mxu0 %v14438_v0 }
 0x7ce   : > { %3619 = vmatpush1.bf16.msra.mxu1 %v14969_v28 }
 0x7cf   : > { %3620 = vmatprep.subr.bf16.mxu1 %v14438_v0 }
 0x7d2   : > { %3621 = vmatpush1.bf16.msra.mxu1 %v14977_v31 }
 0x7d3   : > { %3622 = vmatprep.subr.bf16.mxu1 %v14438_v0 }
 0x7d6   : > { %3623 = vmatpush1.bf16.msra.mxu1 %v14985_v34 }
 0x7d7   : > { %3624 = vmatprep.subr.bf16.mxu1 %v14438_v0 }
 0x7da   : > { %3625 = vmatpush1.bf16.msra.mxu1 %v14993_v37 }
 0x7db   : > { %3626 = vmatprep.subr.bf16.mxu1 %v14438_v0 }
 0x7de   : > { %3627 = vmatpush1.bf16.msra.mxu1 %v14999_v40 }
 0x7df   : > { %3855 = vmatprep.subr.bf16.mxu1 %v12961_v46 }
 0x7e1   : > { %3637 = vmatmul.mubr.bf16.vlgmr.msra.gmra.mrb[64].mxu1 %v12941_v47 }
 0x7e2   : > { %11283 = vmatprep.mubr.msk.bf16.mxu1 %vm765_vm0, %v12944_v48  ;;  %3856 = vmatpush1.bf16.msra.mxu1 %v12959_v49 }
 0x7e3   : > { %3857 = vmatprep.subr.bf16.mxu1 %v12967_v50 }
 0x7e6   : > { %3858 = vmatpush1.bf16.msra.mxu1 %v12965_v51  ;;  %v13013_v51 = vld [vmem:[#allocation8] ss:$8 sps:$4 sm:$0xff]  }
 0x7e7   : > { %3859 = vmatprep.subr.bf16.mxu1 %v12970_v52  ;;  %v13016_v52 = vld [vmem:[#allocation8 + $0x200] ss:$8 sps:$4 sm:$0xff]  }
 0x7e9   : > { %3645 = vmatmul.mubr.bf16.gmra.mrb[68].mxu1 %v12946_v53  ;;  %v13021_v53 = vld [vmem:[#allocation8 + $0x14] ss:$8 sps:$4 sm:$0xff]  }
 0x7ea   : > { %11284 = vmatprep.mubr.msk.bf16.mxu1 %vm765_vm0, %v12947_v54  ;;  %3860 = vmatpush1.bf16.msra.mxu1 %v12968_v55  ;;  %v13024_v54 = vld [vmem:[#allocation8 + $0x214] ss:$8 sps:$4 sm:$0xff]   ;;  %v13019_v55 = vld [vmem:[#allocation8 + $0x10] ss:$8 sps:$4 sm:$0xff]  }
 0x7eb   : > { %3861 = vmatprep.subr.bf16.mxu1 %v12976_v61 }
 0x7ee   : > { %3862 = vmatpush1.bf16.msra.mxu1 %v12974_v62 }
 0x7ef   : > { %4268 = vmatprep.subr.bf16.mxu1 %v12997_v63 }
 0x7f1   : > { %3653 = vmatmul.mubr.bf16.gmra.mrb[72].mxu1 %v12949_v56  ;;  %v13022_v56 = vld [vmem:[#allocation8 + $0x210] ss:$8 sps:$4 sm:$0xff]  }
 0x7f2   : > { %11285 = vmatprep.mubr.msk.bf16.mxu1 %vm765_vm0, %v12950_v57 }
 0x7f9   : > { %3661 = vmatmul.mubr.bf16.gmra.mrb[76].mxu1 %v12952_v58  ;;  %v13027_v58 = vld [vmem:[#allocation8 + $0x24] ss:$8 sps:$4 sm:$0xff]  }
 0x7fa   : > { %3887 = vmatprep.mubr.bf16.mxu1 %v14438_v0 }
 0x8b4   : > { %v3638_v1 = vpop.f32.mrb[64].mxu1 }
 0x8b5   : > { %v3640_v2 = vpop.f32.mrb[65].mxu1 }
 0x8b6   : > { %v3641_v3 = vpop.f32.mrb[66].mxu1  ;;  %v13028_v2 = vld [vmem:[#allocation8 + $0x220] ss:$8 sps:$4 sm:$0xff]  }
 0x8b7   : > { %v3669_v5 = vpack.c.bf16 %v3641_v3, %v3638_v1  ;;  %v3643_v7 = vpop.f32.mrb[67].mxu1  ;;  %v13025_v1 = vld [vmem:[#allocation8 + $0x20] ss:$8 sps:$4 sm:$0xff]   ;;  %v13033_v3 = vld [vmem:[#allocation8 + $0x34] ss:$8 sps:$4 sm:$0xff]  }
 0x8b8   : > { %v13031_v7 = vld [vmem:[#allocation8 + $0x30] ss:$8 sps:$4 sm:$0xff]  }
 0x8b9   : > { %11302 = vmatmul.mubr.msk.bf16.vlgmr.msra.gmra.mrb[16].mxu0 %vm765_vm0, %v3669_v5  ;;  %11306 = vmatmul.mubr.msk.bf16.vlgmr.msra.gmra.mrb[16].mxu1 %vm765_vm0, %v3669_v5  ;;  %v13036_v5 = vld [vmem:[#allocation8 + $0x234] ss:$8 sps:$4 sm:$0xff]  }
 0x8ba   : > { %4018 = vmatpush1.bf16.msra.mxu0 %v14913_v4  ;;  %3824 = vmatprep.mubr.bf16.mxu0 %v14438_v0  ;;  %v13006_v4 = vld [vmem:[#allocation7 + $0x44c] ss:$16 sps:$4 sm:$0xff]  }
 0x8bb   : > { %4019 = vmatprep.subr.bf16.mxu0 %v14438_v0  ;;  %3897 = vmatprep.mubr.bf16.mxu1 %v14438_v0 }
 0x8bc   : > { %v3646_v11 = vpop.f32.mrb[68].mxu1  ;;  %4269 = vmatpush1.bf16.msra.mxu1 %v12995_v8  ;;  %v13034_v8 = vld [vmem:[#allocation8 + $0x230] ss:$8 sps:$4 sm:$0xff]  }
 0x8bd   : > { %v3648_v14 = vpop.f32.mrb[69].mxu1  ;;  %4270 = vmatprep.subr.bf16.mxu1 %v13003_v10 }
 0x8be   : > { %4020 = vmatpush1.bf16.msra.mxu0 %v14917_v6  ;;  %v3649_v15 = vpop.f32.mrb[70].mxu1 }
 0x8bf   : > { %4021 = vmatprep.subr.bf16.mxu0 %v14438_v0  ;;  %v3670_v16 = vpack.c.bf16 %v3649_v15, %v3646_v11  ;;  %v3651_v18 = vpop.f32.mrb[71].mxu1  ;;  %v13039_v11 = vld [vmem:[#allocation8 + $0x44] ss:$8 sps:$4 sm:$0xff]  }
 0x8c0   : > { %4271 = vmatpush1.bf16.msra.mxu1 %v13001_v12  ;;  %v13042_v12 = vld [vmem:[#allocation8 + $0x244] ss:$8 sps:$4 sm:$0xff]  }
 0x8c1   : > { %11303 = vmatmul.mubr.msk.bf16.gmra.mrb[20].mxu0 %vm765_vm0, %v3670_v16  ;;  %11307 = vmatmul.mubr.msk.bf16.gmra.mrb[20].mxu1 %vm765_vm0, %v3670_v16 }
 0x8c2   : > { %4022 = vmatpush1.bf16.msra.mxu0 %v14925_v9  ;;  %3834 = vmatprep.mubr.bf16.mxu0 %v14438_v0 }
 0x8c3   : > { %4023 = vmatprep.subr.bf16.mxu0 %v14438_v0  ;;  %3907 = vmatprep.mubr.bf16.mxu1 %v14438_v0 }
 0x8c4   : > { %v3654_v6 = vpop.f32.mrb[72].mxu1  ;;  %4272 = vmatprep.subr.bf16.mxu1 %v13006_v4  ;;  %v13037_v4 = vld [vmem:[#allocation8 + $0x40] ss:$8 sps:$4 sm:$0xff]  }
 0x8c5   : > { %v3656_v21 = vpop.f32.mrb[73].mxu1  ;;  %4273 = vmatpush1.bf16.msra.mxu1 %v13004_v19  ;;  %v13040_v19 = vld [vmem:[#allocation8 + $0x240] ss:$8 sps:$4 sm:$0xff]  }
 0x8c6   : > { %4024 = vmatpush1.bf16.msra.mxu0 %v14933_v13  ;;  %v3657_v22 = vpop.f32.mrb[74].mxu1  ;;  %4274 = vmatprep.subr.bf16.mxu1 %v13012_v41  ;;  %v13048_v21 = vld [vmem:[#allocation8 + $0x254] ss:$8 sps:$4 sm:$0xff]   ;;  %v13075_v41 = vld [vmem:[#allocation8 + $0xa4] ss:$8 sps:$4 sm:$0xff]  }
 0x8c7   : > { %4025 = vmatprep.subr.bf16.mxu0 %v14438_v0  ;;  %v3671_v24 = vpack.c.bf16 %v3657_v22, %v3654_v6  ;;  %v3659_v25 = vpop.f32.mrb[75].mxu1  ;;  %v13045_v6 = vld [vmem:[#allocation8 + $0x54] ss:$8 sps:$4 sm:$0xff]   ;;  %v13043_v22 = vld [vmem:[#allocation8 + $0x50] ss:$8 sps:$4 sm:$0xff]  }
 0x8c9   : > { %11304 = vmatmul.mubr.msk.bf16.gmra.mrb[24].mxu0 %vm765_vm0, %v3671_v24  ;;  %11308 = vmatmul.mubr.msk.bf16.gmra.mrb[24].mxu1 %vm765_vm0, %v3671_v24  ;;  %v13046_v24 = vld [vmem:[#allocation8 + $0x250] ss:$8 sps:$4 sm:$0xff]  }
 0x8ca   : > { %4026 = vmatpush1.bf16.msra.mxu0 %v14942_v17  ;;  %3844 = vmatprep.mubr.bf16.mxu0 %v14438_v0  ;;  %v12991_v17 = vld [vmem:[#allocation7 + $0x404] ss:$16 sps:$4 sm:$0xff]  }
 0x8cb   : > { %4027 = vmatprep.subr.bf16.mxu0 %v14438_v0  ;;  %3917 = vmatprep.mubr.bf16.mxu1 %v14438_v0 }
 0x8cc   : > { %v3662_v9 = vpop.f32.mrb[76].mxu1  ;;  %4275 = vmatpush1.bf16.msra.mxu1 %v13010_v43  ;;  %v13073_v43 = vld [vmem:[#allocation8 + $0xa0] ss:$8 sps:$4 sm:$0xff]  }
 0x8cd   : > { %v3664_v26 = vpop.f32.mrb[77].mxu1  ;;  %4859 = vmatprep.subr.bf16.mxu1 %v13015_v44  ;;  %v13076_v44 = vld [vmem:[#allocation8 + $0x2a0] ss:$8 sps:$4 sm:$0xff]  }
 0x8ce   : > { %4028 = vmatpush1.bf16.msra.mxu0 %v14951_v20  ;;  %v3665_v13 = vpop.f32.mrb[78].mxu1  ;;  %v12977_v20 = vld [vmem:[#allocation5 + $0x200] ss:$8 sps:$4 sm:$0xff]   ;;  %v13054_v26 = vld [vmem:[#allocation8 + $0x264] ss:$8 sps:$4 sm:$0xff]  }
 0x8cf   : > { %4029 = vmatprep.subr.bf16.mxu0 %v14438_v0  ;;  %v3672_v29 = vpack.c.bf16 %v3665_v13, %v3662_v9  ;;  %v3667_v30 = vpop.f32.mrb[79].mxu1  ;;  %v13051_v9 = vld [vmem:[#allocation8 + $0x64] ss:$8 sps:$4 sm:$0xff]  }
 0x8d1   : > { %11305 = vmatmul.mubr.msk.bf16.gmra.mrb[28].mxu0 %vm765_vm0, %v3672_v29  ;;  %11309 = vmatmul.mubr.msk.bf16.gmra.mrb[28].mxu1 %vm765_vm0, %v3672_v29 }
 0x8d2   : > { %4030 = vmatpush1.bf16.msra.mxu0 %v14959_v23  ;;  %11318 = vmatprep.mubr.msk.bf16.mxu0 %vm765_vm0, %v12979_v27  ;;  %v12980_v23 = vld [vmem:[#allocation5 + $0x214] ss:$8 sps:$4 sm:$0xff]  }
 0x8d3   : > { %4031 = vmatprep.subr.bf16.mxu0 %v14438_v0  ;;  %4300 = vmatprep.mubr.bf16.mxu1 %v14438_v0 }
 0x8d6   : > { %4032 = vmatpush1.bf16.msra.mxu0 %v14969_v28  ;;  %v12989_v28 = vld [vmem:[#allocation7 + $0x400] ss:$16 sps:$4 sm:$0xff]  }
 0x8d7   : > { %4033 = vmatprep.subr.bf16.mxu0 %v14438_v0 }
 0x8da   : > { %4034 = vmatpush1.bf16.msra.mxu0 %v14977_v31  ;;  %v12992_v31 = vld [vmem:[#allocation7 + $0x420] ss:$16 sps:$4 sm:$0xff]  }
 0x8db   : > { %4035 = vmatprep.subr.bf16.mxu0 %v14438_v0 }
 0x8de   : > { %4036 = vmatpush1.bf16.msra.mxu0 %v14985_v34  ;;  %v13000_v34 = vld [vmem:[#allocation7 + $0x444] ss:$16 sps:$4 sm:$0xff]  }
 0x8df   : > { %4037 = vmatprep.subr.bf16.mxu0 %v14438_v0 }
 0x8e2   : > { %4038 = vmatpush1.bf16.msra.mxu0 %v14993_v37  ;;  %v12998_v37 = vld [vmem:[#allocation7 + $0x440] ss:$16 sps:$4 sm:$0xff]  }
 0x8e3   : > { %4039 = vmatprep.subr.bf16.mxu0 %v14438_v0 }
 0x8e6   : > { %4040 = vmatpush1.bf16.msra.mxu0 %v14999_v40  ;;  %v12985_v40 = vld [vmem:[#allocation5 + $0x220] ss:$8 sps:$4 sm:$0xff]  }
 0x8e7   : > { %4195 = vmatprep.subr.bf16.mxu0 %v12991_v17  ;;  %v13049_v17 = vld [vmem:[#allocation8 + $0x60] ss:$8 sps:$4 sm:$0xff]  }
 0x8e9   : > { %4050 = vmatmul.mubr.bf16.vlgmr.msra.gmra.mrb[80].mxu0 %v12977_v20  ;;  %v13052_v20 = vld [vmem:[#allocation8 + $0x260] ss:$8 sps:$4 sm:$0xff]  }
 0x8ea   : > { %11319 = vmatprep.mubr.msk.bf16.mxu0 %vm765_vm0, %v12980_v23  ;;  %4196 = vmatpush1.bf16.msra.mxu0 %v12989_v28  ;;  %v13057_v23 = vld [vmem:[#allocation8 + $0x74] ss:$8 sps:$4 sm:$0xff]  }
 0x8eb   : > { %4197 = vmatprep.subr.bf16.mxu0 %v12994_v32  ;;  %v13060_v28 = vld [vmem:[#allocation8 + $0x274] ss:$8 sps:$4 sm:$0xff]   ;;  %v13055_v32 = vld [vmem:[#allocation8 + $0x70] ss:$8 sps:$4 sm:$0xff]  }
 0x8ee   : > { %4198 = vmatpush1.bf16.msra.mxu0 %v12992_v31  ;;  %v13058_v31 = vld [vmem:[#allocation8 + $0x270] ss:$8 sps:$4 sm:$0xff]  }
 0x8ef   : > { %4199 = vmatprep.subr.bf16.mxu0 %v13000_v34  ;;  %v13063_v34 = vld [vmem:[#allocation8 + $0x84] ss:$8 sps:$4 sm:$0xff]  }
 0x8f1   : > { %4058 = vmatmul.mubr.bf16.gmra.mrb[84].mxu0 %v12982_v33  ;;  %v13066_v33 = vld [vmem:[#allocation8 + $0x284] ss:$8 sps:$4 sm:$0xff]  }
 0x8f2   : > { %11320 = vmatprep.mubr.msk.bf16.mxu0 %vm765_vm0, %v12983_v35  ;;  %4200 = vmatpush1.bf16.msra.mxu0 %v12998_v37  ;;  %v13061_v35 = vld [vmem:[#allocation8 + $0x80] ss:$8 sps:$4 sm:$0xff]  }
 0x8f3   : > { %4201 = vmatprep.subr.bf16.mxu0 %v13009_v39  ;;  %v13064_v37 = vld [vmem:[#allocation8 + $0x280] ss:$8 sps:$4 sm:$0xff]   ;;  %v13070_v39 = vld [vmem:[#allocation8 + $0x290] ss:$8 sps:$4 sm:$0xff]  }
 0x8f6   : > { %4202 = vmatpush1.bf16.msra.mxu0 %v13007_v42  ;;  %v13078_v42 = vld [vmem:[#allocation8 + $0x2a4] ss:$8 sps:$4 sm:$0xff]  }
 0x8f7   : > { %5390 = vmatprep.subr.bf16.mxu0 %v13018_v45  ;;  %v13081_v45 = vld [vmem:[#allocation8 + $0xb4] ss:$8 sps:$4 sm:$0xff]  }
 0x8f9   : > { %4066 = vmatmul.mubr.bf16.gmra.mrb[88].mxu0 %v12985_v40  ;;  %v13069_v40 = vld [vmem:[#allocation8 + $0x94] ss:$8 sps:$4 sm:$0xff]  }
 0x8fa   : > { %11321 = vmatprep.mubr.msk.bf16.mxu0 %vm765_vm0, %v12986_v36  ;;  %v13072_v36 = vld [vmem:[#allocation8 + $0x294] ss:$8 sps:$4 sm:$0xff]  }
 0x901   : > { %4074 = vmatmul.mubr.bf16.gmra.mrb[92].mxu0 %v12988_v38  ;;  %v13067_v38 = vld [vmem:[#allocation8 + $0x90] ss:$8 sps:$4 sm:$0xff]  }
 0x902   : > { %4227 = vmatprep.mubr.bf16.mxu0 %v14438_v0 }
 0x9bc   : > { %v4051_v46 = vpop.f32.mrb[80].mxu0 }
 0x9bd   : > { %v4053_v47 = vpop.f32.mrb[81].mxu0 }
 0x9be   : > { %v4054_v48 = vpop.f32.mrb[82].mxu0  ;;  %v13079_v47 = vld [vmem:[#allocation8 + $0xb0] ss:$8 sps:$4 sm:$0xff]  }
 0x9bf   : > { %v4082_v49 = vpack.c.bf16 %v4054_v48, %v4051_v46  ;;  %v4056_v50 = vpop.f32.mrb[83].mxu0  ;;  %v13084_v46 = vld [vmem:[#allocation8 + $0x2b4] ss:$8 sps:$4 sm:$0xff]   ;;  %v13082_v48 = vld [vmem:[#allocation8 + $0x2b0] ss:$8 sps:$4 sm:$0xff]  }
 0x9c0   : > { %v13090_v50 = vld [vmem:[#allocation8 + $0x2c4] ss:$8 sps:$4 sm:$0xff]  }
 0x9c1   : > { %11338 = vmatmul.mubr.msk.bf16.vlgmr.msra.gmra.mrb[16].mxu0 %vm765_vm0, %v4082_v49  ;;  %11342 = vmatmul.mubr.msk.bf16.vlgmr.msra.gmra.mrb[16].mxu1 %vm765_vm0, %v4082_v49  ;;  %v13087_v49 = vld [vmem:[#allocation8 + $0xc4] ss:$8 sps:$4 sm:$0xff]  }
 0x9c2   : > { %4237 = vmatprep.mubr.bf16.mxu0 %v14438_v0  ;;  %4310 = vmatprep.mubr.bf16.mxu1 %v14438_v0 }
 0x9c3   : > { %4860 = vmatpush1.bf16.msra.mxu1 %v13013_v51  ;;  %5391 = vmatpush1.bf16.msra.mxu0 %v13016_v52  ;;  %v13085_v51 = vld [vmem:[#allocation8 + $0xc0] ss:$8 sps:$4 sm:$0xff]  }
 0x9c4   : > { %v4059_v57 = vpop.f32.mrb[84].mxu0  ;;  %4861 = vmatprep.subr.bf16.mxu1 %v13021_v53  ;;  %5392 = vmatprep.subr.bf16.mxu0 %v13024_v54  ;;  %v13088_v52 = vld [vmem:[#allocation8 + $0x2c0] ss:$8 sps:$4 sm:$0xff]   ;;  %v13093_v53 = vld [vmem:[#allocation8 + $0xd4] ss:$8 sps:$4 sm:$0xff]  }
 0x9c5   : > { %v4061_v60 = vpop.f32.mrb[85].mxu0  ;;  %v13096_v54 = vld [vmem:[#allocation8 + $0x2d4] ss:$8 sps:$4 sm:$0xff]  }
 0x9c6   : > { %v4062_v61 = vpop.f32.mrb[86].mxu0  ;;  %v13100_v60 = vld [vmem:[#allocation8 + $0x2e0] ss:$8 sps:$4 sm:$0xff]  }
 0x9c7   : > { %v4083_v62 = vpack.c.bf16 %v4062_v61, %v4059_v57  ;;  %v4064_v63 = vpop.f32.mrb[87].mxu0  ;;  %4862 = vmatpush1.bf16.msra.mxu1 %v13019_v55  ;;  %5393 = vmatpush1.bf16.msra.mxu0 %v13022_v56  ;;  %v13091_v55 = vld [vmem:[#allocation8 + $0xd0] ss:$8 sps:$4 sm:$0xff]   ;;  %v13099_v57 = vld [vmem:[#allocation8 + $0xe4] ss:$8 sps:$4 sm:$0xff]  }
 0x9c8   : > { %4863 = vmatprep.subr.bf16.mxu1 %v13027_v58  ;;  %5394 = vmatprep.subr.bf16.mxu0 %v13030_v59  ;;  %v13094_v56 = vld [vmem:[#allocation8 + $0x2d0] ss:$8 sps:$4 sm:$0xff]   ;;  %v13102_v58 = vld [vmem:[#allocation8 + $0x2e4] ss:$8 sps:$4 sm:$0xff]   ;;  %v13097_v59 = vld [vmem:[#allocation8 + $0xe0] ss:$8 sps:$4 sm:$0xff]  }
 0x9c9   : > { %11339 = vmatmul.mubr.msk.bf16.gmra.mrb[20].mxu0 %vm765_vm0, %v4083_v62  ;;  %11343 = vmatmul.mubr.msk.bf16.gmra.mrb[20].mxu1 %vm765_vm0, %v4083_v62  ;;  %v13105_v61 = vld [vmem:[#allocation8 + $0xf4] ss:$8 sps:$4 sm:$0xff]   ;;  %v13103_v63 = vld [vmem:[#allocation8 + $0xf0] ss:$8 sps:$4 sm:$0xff]  }
 0x9ca   : > { %4247 = vmatprep.mubr.bf16.mxu0 %v14438_v0  ;;  %4320 = vmatprep.mubr.bf16.mxu1 %v14438_v0  ;;  %v13108_v62 = vld [vmem:[#allocation8 + $0x2f4] ss:$8 sps:$4 sm:$0xff]  }
 0x9cb   : > { %4864 = vmatpush1.bf16.msra.mxu1 %v13025_v1  ;;  %5395 = vmatpush1.bf16.msra.mxu0 %v13028_v2  ;;  %v13106_v1 = vld [vmem:[#allocation8 + $0x2f0] ss:$8 sps:$4 sm:$0xff]   ;;  %v13111_v2 = vld [vmem:[#allocation8 + $0x104] ss:$8 sps:$4 sm:$0xff]  }
 0x9cc   : > { %v4067_v10 = vpop.f32.mrb[88].mxu0  ;;  %4865 = vmatprep.subr.bf16.mxu1 %v13033_v3  ;;  %5396 = vmatprep.subr.bf16.mxu0 %v13036_v5  ;;  %v13114_v3 = vld [vmem:[#allocation8 + $0x304] ss:$8 sps:$4 sm:$0xff]   ;;  %v4375_v5 = vlaneseq }
 0x9cd   : > { %v4069_v14 = vpop.f32.mrb[89].mxu0 }
 0x9ce   : > { %v4070_v15 = vpop.f32.mrb[90].mxu0 }
 0x9cf   : > { %v4084_v16 = vpack.c.bf16 %v4070_v15, %v4067_v10  ;;  %v4072_v18 = vpop.f32.mrb[91].mxu0  ;;  %4866 = vmatpush1.bf16.msra.mxu1 %v13031_v7  ;;  %5397 = vmatpush1.bf16.msra.mxu0 %v13034_v8  ;;  %v4376_v7 = vshrl.u32 %v4375_v5, 7 }
 0x9d0   : > { %4867 = vmatprep.subr.bf16.mxu1 %v13039_v11  ;;  %5398 = vmatprep.subr.bf16.mxu0 %v13042_v12  ;;  %v4373_v11 = vld [vmem:[%s15765_s20] sm:$0xf]  ;;  %s12054_s20 = sshll.u32 %s14549_s27, 4  ;;  %s14442_s27 = smov [#allocation20]  }
 0x9d1   : > { %11340 = vmatmul.mubr.msk.bf16.gmra.mrb[24].mxu0 %vm765_vm0, %v4084_v16  ;;  %11344 = vmatmul.mubr.msk.bf16.gmra.mrb[24].mxu1 %vm765_vm0, %v4084_v16  ;;  %v15360_v8 = vsub.s32 0, %v4376_v7  ;;  %v15362_v10 = vsub.s32 2, %v4376_v7  ;;  %v15367_v12 = vsub.s32 1, %v4376_v7  ;;  %v15369_v14 = vsub.s32 3, %v4376_v7  ;;  %s14337_s19 = sshll.u32 %s14442_s27, 4  ;;  %s14338_s19 = int_to_ptr.vmem [resolvable:$false] %s14337_s19 }
 0x9d2   : > { %4257 = vmatprep.mubr.bf16.mxu0 %v14438_v0  ;;  %4330 = vmatprep.mubr.bf16.mxu1 %v14438_v0  ;;  %s14339_s7 = scalar_lea.vmem %s14338_s19, 32  ;;  %p14340_p7 = scmp.lt.s32.totalorder %s15649_s11, %s14338_s19 }
 0x9d3   : > { %4868 = vmatpush1.bf16.msra.mxu1 %v13037_v4  ;;  %5399 = vmatpush1.bf16.msra.mxu0 %v13040_v19  ;;  %v15372_v15 = vrot.slane %v4373_v11, %v15360_v8  ;;  %v15375_v16 = vrot.slane %v4373_v11, %v15362_v10  ;;  %v15378_v18 = vrot.slane %v4373_v11, %v15367_v12  ;;  %p14341_p9 = scmp.lt.s32.totalorder %s14339_s7, %s14333_s5 }
 0x9d4   : > { %v4075_v25 = vpop.f32.mrb[92].mxu0  ;;  %4869 = vmatprep.subr.bf16.mxu1 %v13045_v6  ;;  %5400 = vmatprep.subr.bf16.mxu0 %v13048_v21  ;;  %v15381_v4 = vrot.slane %v4373_v11, %v15369_v14 }
 0x9d5   : > { %v4077_v13 = vpop.f32.mrb[93].mxu0  ;;  %p14342_p4 = por %p14341_p9, %p14340_p7 }
 0x9d6   : > { %v4078_v27 = vpop.f32.mrb[94].mxu0 }
 0x9d7   : > { %v4085_v29 = vpack.c.bf16 %v4078_v27, %v4075_v25  ;;  %v4080_v30 = vpop.f32.mrb[95].mxu0  ;;  %4870 = vmatpush1.bf16.msra.mxu1 %v13043_v22  ;;  %5401 = vmatpush1.bf16.msra.mxu0 %v13046_v24  ;;  %p14343_p3 = pnand %p14342_p4, %p14336_p8 }
 0x9d8   : > { %4871 = vmatprep.subr.bf16.mxu1 %v13051_v9  ;;  %5402 = vmatprep.subr.bf16.mxu0 %v13054_v26 }
 0x9d9   : > { %11341 = vmatmul.mubr.msk.bf16.gmra.mrb[28].mxu0 %vm765_vm0, %v4085_v29  ;;  %11345 = vmatmul.mubr.msk.bf16.gmra.mrb[28].mxu1 %vm765_vm0, %v4085_v29 }
 0x9db   : > { %4872 = vmatpush1.bf16.msra.mxu1 %v13049_v17  ;;  %5403 = vmatpush1.bf16.msra.mxu0 %v13052_v20 }
 0x9dc   : > { %4873 = vmatprep.subr.bf16.mxu1 %v13057_v23  ;;  %5404 = vmatprep.subr.bf16.mxu0 %v13060_v28 }
 0x9df   : > { %4874 = vmatpush1.bf16.msra.mxu1 %v13055_v32  ;;  %5405 = vmatpush1.bf16.msra.mxu0 %v13058_v31 }
 0x9e0   : > { %4875 = vmatprep.subr.bf16.mxu1 %v13063_v34  ;;  %5406 = vmatprep.subr.bf16.mxu0 %v13066_v33 }
 0x9e3   : > { %4876 = vmatpush1.bf16.msra.mxu1 %v13061_v35  ;;  %5407 = vmatpush1.bf16.msra.mxu0 %v13064_v37 }
 0x9e4   : > { %4877 = vmatprep.subr.bf16.mxu1 %v13069_v40  ;;  %5408 = vmatprep.subr.bf16.mxu0 %v13072_v36 }
 0x9e7   : > { %4878 = vmatpush1.bf16.msra.mxu1 %v13067_v38  ;;  %5409 = vmatpush1.bf16.msra.mxu0 %v13070_v39 }
 0x9e8   : > { %4879 = vmatprep.subr.bf16.mxu1 %v13075_v41  ;;  %5410 = vmatprep.subr.bf16.mxu0 %v13078_v42 }
 0x9eb   : > { %4880 = vmatpush1.bf16.msra.mxu1 %v13073_v43  ;;  %5411 = vmatpush1.bf16.msra.mxu0 %v13076_v44 }
 0x9ec   : > { %4881 = vmatprep.subr.bf16.mxu1 %v13081_v45  ;;  %5412 = vmatprep.subr.bf16.mxu0 %v13084_v46  ;;  %v13109_v45 = vld [vmem:[#allocation8 + $0x100] ss:$8 sps:$4 sm:$0xff]  }
 0x9ed   : > { %v13112_v46 = vld [vmem:[#allocation8 + $0x300] ss:$8 sps:$4 sm:$0xff]  }
 0x9ef   : > { %4882 = vmatpush1.bf16.msra.mxu1 %v13079_v47  ;;  %5413 = vmatpush1.bf16.msra.mxu0 %v13082_v48 }
 0x9f0   : > { %4883 = vmatprep.subr.bf16.mxu1 %v13087_v49  ;;  %5414 = vmatprep.subr.bf16.mxu0 %v13090_v50 }
 0x9f3   : > { %4884 = vmatpush1.bf16.msra.mxu1 %v13085_v51  ;;  %5415 = vmatpush1.bf16.msra.mxu0 %v13088_v52  ;;  %v13117_v51 = vld [vmem:[#allocation8 + $0x114] ss:$8 sps:$4 sm:$0xff]  }
 0x9f4   : > { %4885 = vmatprep.subr.bf16.mxu1 %v13093_v53  ;;  %5416 = vmatprep.subr.bf16.mxu0 %v13096_v54  ;;  %v13120_v52 = vld [vmem:[#allocation8 + $0x314] ss:$8 sps:$4 sm:$0xff]  }
 0x9f7   : > { %4886 = vmatpush1.bf16.msra.mxu1 %v13091_v55  ;;  %5417 = vmatpush1.bf16.msra.mxu0 %v13094_v56 }
 0x9f8   : > { %4887 = vmatprep.subr.bf16.mxu1 %v13099_v57  ;;  %5418 = vmatprep.subr.bf16.mxu0 %v13102_v58 }
 0x9fb   : > { %4888 = vmatpush1.bf16.msra.mxu1 %v13097_v59  ;;  %5419 = vmatpush1.bf16.msra.mxu0 %v13100_v60 }
 0x9fc   : > { %4889 = vmatprep.subr.bf16.mxu1 %v13105_v61  ;;  %5420 = vmatprep.subr.bf16.mxu0 %v13108_v62 }
 0x9ff   : > { %4890 = vmatpush1.bf16.msra.mxu1 %v13103_v63  ;;  %5421 = vmatpush1.bf16.msra.mxu0 %v13106_v1  ;;  %v13115_v63 = vld [vmem:[#allocation8 + $0x110] ss:$8 sps:$4 sm:$0xff]  }
 0xa00   : > { %4932 = vmatprep.subr.bf16.mxu1 %v13111_v2  ;;  %5463 = vmatprep.subr.bf16.mxu0 %v13114_v3  ;;  %v13118_v1 = vld [vmem:[#allocation8 + $0x310] ss:$8 sps:$4 sm:$0xff]   ;;  %v13123_v2 = vld [vmem:[#allocation8 + $0x124] ss:$8 sps:$4 sm:$0xff]  }
 0xa94   : > { %v4229_v19 = vpop.f32.mrb[16].mxu0  ;;  %v4302_v6 = vpop.f32.mrb[16].mxu1 }
 0xa95   : > { %v4395_v21 = vadd.f32 %v15372_v15, %v4229_v19  ;;  %v4397_v22 = vadd.f32 %v15375_v16, %v4302_v6  ;;  %v4231_v24 = vpop.f32.mrb[17].mxu0  ;;  %v4304_v25 = vpop.f32.mrb[17].mxu1  ;;  %v13126_v19 = vld [vmem:[#allocation8 + $0x324] ss:$8 sps:$4 sm:$0xff]  }
 0xa96   : > { %v4396_v9 = vadd.f32 %v15378_v18, %v4231_v24  ;;  %v4398_v26 = vadd.f32 %v15381_v4, %v4304_v25  ;;  %v4233_v13 = vpop.f32.mrb[18].mxu0  ;;  %v4306_v27 = vpop.f32.mrb[18].mxu1 }
 0xa97   : > { %v4399_v29 = vadd.f32 %v15372_v15, %v4233_v13  ;;  %v4401_v30 = vadd.f32 %v15375_v16, %v4306_v27  ;;  %v4235_v17 = vpop.f32.mrb[19].mxu0  ;;  %v4308_v20 = vpop.f32.mrb[19].mxu1  ;;  %v4427_v32 = vmax.f32 %v4395_v21, 0.0  ;;  %v4429_v31 = vmax.f32 %v4397_v22, 0.0 }
 0xa98   : > { %v4400_v23 = vadd.f32 %v15378_v18, %v4235_v17  ;;  %v4402_v28 = vadd.f32 %v15381_v4, %v4308_v20  ;;  %v4428_v35 = vmax.f32 %v4396_v9, 0.0  ;;  %v4430_v37 = vmax.f32 %v4398_v26, 0.0  ;;  %v13124_v17 = vld [vmem:[#allocation8 + $0x320] ss:$8 sps:$4 sm:$0xff]  }
 0xa99   : > { %v4431_v34 = vmax.f32 %v4399_v29, 0.0  ;;  %v4433_v33 = vmax.f32 %v4401_v30, 0.0  ;;  %v13121_v30 = vld [vmem:[#allocation8 + $0x120] ss:$8 sps:$4 sm:$0xff]  }
 0xa9a   : > { %v4432_v40 = vmax.f32 %v4400_v23, 0.0  ;;  %v4434_v36 = vmax.f32 %v4402_v28, 0.0 }
 0xa9b   : > { %v4459_v38 = vpack.c.bf16 %v4431_v34, %v4427_v32  ;;  %v15391_v39 = vpack.c.bf16 %v4433_v33, %v4429_v31  ;;  %v13129_v31 = vld [vmem:[#allocation8 + $0x134] ss:$8 sps:$4 sm:$0xff]  }
 0xa9c   : > { %v4460_v41 = vpack.c.bf16 %v4432_v40, %v4428_v35  ;;  %v15393_v42 = vpack.c.bf16 %v4434_v36, %v4430_v37  ;;  %v4239_v43 = vpop.f32.mrb[20].mxu0  ;;  %v4312_v44 = vpop.f32.mrb[20].mxu1  ;;  %v13132_v34 = vld [vmem:[#allocation8 + $0x334] ss:$8 sps:$4 sm:$0xff]  }
 0xa9d   : > { %v4403_v47 = vadd.f32 %v15372_v15, %v4239_v43  ;;  %v4405_v48 = vadd.f32 %v15375_v16, %v4312_v44  ;;  %v4241_v49 = vpop.f32.mrb[21].mxu0  ;;  %v4314_v50 = vpop.f32.mrb[21].mxu1 }
 0xa9e   : > { %v4404_v53 = vadd.f32 %v15378_v18, %v4241_v49  ;;  %v4406_v54 = vadd.f32 %v15381_v4, %v4314_v50  ;;  %v4243_v55 = vpop.f32.mrb[22].mxu0  ;;  %v4316_v56 = vpop.f32.mrb[22].mxu1  ;;  %4891 = vmatprep.mubr.bf16.mxu1 %v4460_v41  ;;  %5422 = vmatprep.mubr.bf16.mxu0 %v4460_v41 }
 0xa9f   : > { %v4407_v57 = vadd.f32 %v15372_v15, %v4243_v55  ;;  %v4409_v58 = vadd.f32 %v15375_v16, %v4316_v56  ;;  %v4245_v59 = vpop.f32.mrb[23].mxu0  ;;  %v4318_v60 = vpop.f32.mrb[23].mxu1  ;;  %4892 = vmatmul.mubr.bf16.vlgmr.msra.gmra.mrb[80].mxu1 %v4459_v38  ;;  %5423 = vmatmul.mubr.bf16.vlgmr.msra.gmra.mrb[96].mxu0 %v4459_v38  ;;  %v4435_v3 = vmax.f32 %v4403_v47, 0.0  ;;  %v4437_v5 = vmax.f32 %v4405_v48, 0.0  ;;  %v13130_v47 = vld [vmem:[#allocation8 + $0x330] ss:$8 sps:$4 sm:$0xff]  }
 0xaa0   : > { %v4408_v61 = vadd.f32 %v15378_v18, %v4245_v59  ;;  %v4410_v62 = vadd.f32 %v15381_v4, %v4318_v60  ;;  %4933 = vmatpush1.bf16.msra.mxu1 %v13109_v45  ;;  %5464 = vmatpush1.bf16.msra.mxu0 %v13112_v46  ;;  %v4436_v6 = vmax.f32 %v4404_v53, 0.0  ;;  %v4438_v21 = vmax.f32 %v4406_v54, 0.0  ;;  %v13127_v46 = vld [vmem:[#allocation8 + $0x130] ss:$8 sps:$4 sm:$0xff]   ;;  %v13135_v48 = vld [vmem:[#allocation8 + $0x144] ss:$8 sps:$4 sm:$0xff]  }
 0xaa1   : > { %v4439_v7 = vmax.f32 %v4407_v57, 0.0  ;;  %v4441_v11 = vmax.f32 %v4409_v58, 0.0  ;;  %4934 = vmatprep.subr.bf16.mxu1 %v13117_v51  ;;  %5465 = vmatprep.subr.bf16.mxu0 %v13120_v52  ;;  %v13138_v53 = vld [vmem:[#allocation8 + $0x344] ss:$8 sps:$4 sm:$0xff]  }
 0xaa2   : > { %v4440_v22 = vmax.f32 %v4408_v61, 0.0  ;;  %v4442_v24 = vmax.f32 %v4410_v62, 0.0 }
 0xaa3   : > { %v4463_v25 = vpack.c.bf16 %v4439_v7, %v4435_v3  ;;  %v15403_v9 = vpack.c.bf16 %v4441_v11, %v4437_v5 }
 0xaa4   : > { %v4464_v26 = vpack.c.bf16 %v4440_v22, %v4436_v6  ;;  %v15405_v13 = vpack.c.bf16 %v4442_v24, %v4438_v21  ;;  %4935 = vmatpush1.bf16.msra.mxu1 %v13115_v63  ;;  %5466 = vmatpush1.bf16.msra.mxu0 %v13118_v1  ;;  %v4249_v27 = vpop.f32.mrb[24].mxu0  ;;  %v4322_v29 = vpop.f32.mrb[24].mxu1  ;;  %v13133_v1 = vld [vmem:[#allocation8 + $0x140] ss:$8 sps:$4 sm:$0xff]   ;;  %v13144_v6 = vld [vmem:[#allocation8 + $0x354] ss:$8 sps:$4 sm:$0xff]  }
 0xaa5   : > { %v4411_v20 = vadd.f32 %v15372_v15, %v4249_v27  ;;  %v4413_v23 = vadd.f32 %v15375_v16, %v4322_v29  ;;  %v4251_v28 = vpop.f32.mrb[25].mxu0  ;;  %v4324_v32 = vpop.f32.mrb[25].mxu1  ;;  %4936 = vmatprep.subr.bf16.mxu1 %v13123_v2  ;;  %5467 = vmatprep.subr.bf16.mxu0 %v13126_v19  ;;  %v13136_v2 = vld [vmem:[#allocation8 + $0x340] ss:$8 sps:$4 sm:$0xff]   ;;  %v13141_v19 = vld [vmem:[#allocation8 + $0x154] ss:$8 sps:$4 sm:$0xff]  }
 0xaa6   : > { %v4412_v33 = vadd.f32 %v15378_v18, %v4251_v28  ;;  %v4414_v35 = vadd.f32 %v15381_v4, %v4324_v32  ;;  %v4253_v37 = vpop.f32.mrb[26].mxu0  ;;  %v4326_v40 = vpop.f32.mrb[26].mxu1  ;;  %4901 = vmatprep.mubr.bf16.mxu1 %v4464_v26  ;;  %5432 = vmatprep.mubr.bf16.mxu0 %v4464_v26  ;;  %v13142_v28 = vld [vmem:[#allocation8 + $0x350] ss:$8 sps:$4 sm:$0xff]   ;;  %v13147_v32 = vld [vmem:[#allocation8 + $0x164] ss:$8 sps:$4 sm:$0xff]  }
 0xaa7   : > { %v4415_v36 = vadd.f32 %v15372_v15, %v4253_v37  ;;  %v4417_v38 = vadd.f32 %v15375_v16, %v4326_v40  ;;  %v4255_v41 = vpop.f32.mrb[27].mxu0  ;;  %v4328_v43 = vpop.f32.mrb[27].mxu1  ;;  %4902 = vmatmul.mubr.bf16.gmra.mrb[84].mxu1 %v4463_v25  ;;  %5433 = vmatmul.mubr.bf16.gmra.mrb[100].mxu0 %v4463_v25  ;;  %v4443_v49 = vmax.f32 %v4411_v20, 0.0  ;;  %v4445_v50 = vmax.f32 %v4413_v23, 0.0  ;;  %v13139_v23 = vld [vmem:[#allocation8 + $0x150] ss:$8 sps:$4 sm:$0xff]  }
 0xaa8   : > { %v4416_v44 = vadd.f32 %v15378_v18, %v4255_v41  ;;  %v4418_v45 = vadd.f32 %v15381_v4, %v4328_v43  ;;  %4937 = vmatpush1.bf16.msra.mxu1 %v13121_v30  ;;  %5468 = vmatpush1.bf16.msra.mxu0 %v13124_v17  ;;  %v4444_v54 = vmax.f32 %v4412_v33, 0.0  ;;  %v4446_v55 = vmax.f32 %v4414_v35, 0.0  ;;  %v13145_v43 = vld [vmem:[#allocation8 + $0x160] ss:$8 sps:$4 sm:$0xff]  }
 0xaa9   : > { %v4447_v51 = vmax.f32 %v4415_v36, 0.0  ;;  %v4449_v52 = vmax.f32 %v4417_v38, 0.0  ;;  %4938 = vmatprep.subr.bf16.mxu1 %v13129_v31  ;;  %5469 = vmatprep.subr.bf16.mxu0 %v13132_v34 }
 0xaaa   : > { %v4448_v56 = vmax.f32 %v4416_v44, 0.0  ;;  %v4450_v57 = vmax.f32 %v4418_v45, 0.0  ;;  %v13148_v44 = vld [vmem:[#allocation8 + $0x360] ss:$8 sps:$4 sm:$0xff]   ;;  %v13153_v45 = vld [vmem:[#allocation8 + $0x174] ss:$8 sps:$4 sm:$0xff]  }
 0xaab   : > { %v4467_v58 = vpack.c.bf16 %v4447_v51, %v4443_v49  ;;  %v15415_v59 = vpack.c.bf16 %v4449_v52, %v4445_v50  ;;  %v13159_v49 = vld [vmem:[#allocation8 + $0x184] ss:$8 sps:$4 sm:$0xff]   ;;  %v13157_v51 = vld [vmem:[#allocation8 + $0x180] ss:$8 sps:$4 sm:$0xff]  }
 0xaac   : > { %v4468_v60 = vpack.c.bf16 %v4448_v56, %v4444_v54  ;;  %v15417_v61 = vpack.c.bf16 %v4450_v57, %v4446_v55  ;;  %4939 = vmatpush1.bf16.msra.mxu1 %v13127_v46  ;;  %5470 = vmatpush1.bf16.msra.mxu0 %v13130_v47  ;;  %v4259_v62 = vpop.f32.mrb[28].mxu0  ;;  %v4332_v63 = vpop.f32.mrb[28].mxu1  ;;  %v13156_v46 = vld [vmem:[#allocation8 + $0x374] ss:$8 sps:$4 sm:$0xff]   ;;  %v13151_v47 = vld [vmem:[#allocation8 + $0x170] ss:$8 sps:$4 sm:$0xff]  }
 0xaad   : > { %v4419_v3 = vadd.f32 %v15372_v15, %v4259_v62  ;;  %v4421_v5 = vadd.f32 %v15375_v16, %v4332_v63  ;;  %v4261_v7 = vpop.f32.mrb[29].mxu0  ;;  %v4334_v11 = vpop.f32.mrb[29].mxu1  ;;  %4940 = vmatprep.subr.bf16.mxu1 %v13135_v48  ;;  %5471 = vmatprep.subr.bf16.mxu0 %v13138_v53  ;;  %v13154_v48 = vld [vmem:[#allocation8 + $0x370] ss:$8 sps:$4 sm:$0xff]   ;;  %v13162_v50 = vld [vmem:[#allocation8 + $0x384] ss:$8 sps:$4 sm:$0xff]  }
 0xaae   : > { %v4420_v21 = vadd.f32 %v15378_v18, %v4261_v7  ;;  %v4422_v22 = vadd.f32 %v15381_v4, %v4334_v11  ;;  %v4263_v24 = vpop.f32.mrb[30].mxu0  ;;  %v4336_v25 = vpop.f32.mrb[30].mxu1  ;;  %4911 = vmatprep.mubr.bf16.mxu1 %v4468_v60  ;;  %5442 = vmatprep.mubr.bf16.mxu0 %v4468_v60  ;;  %v13160_v52 = vld [vmem:[#allocation8 + $0x380] ss:$8 sps:$4 sm:$0xff]   ;;  %v13165_v53 = vld [vmem:[#allocation8 + $0x194] ss:$8 sps:$4 sm:$0xff]  }
 0xaaf   : > { %v4423_v26 = vadd.f32 %v15372_v15, %v4263_v24  ;;  %v4425_v27 = vadd.f32 %v15375_v16, %v4336_v25  ;;  %v4265_v29 = vpop.f32.mrb[31].mxu0  ;;  %v4338_v30 = vpop.f32.mrb[31].mxu1  ;;  %4912 = vmatmul.mubr.bf16.gmra.mrb[88].mxu1 %v4467_v58  ;;  %5443 = vmatmul.mubr.bf16.gmra.mrb[104].mxu0 %v4467_v58  ;;  %v4451_v31 = vmax.f32 %v4419_v3, 0.0  ;;  %v4453_v34 = vmax.f32 %v4421_v5, 0.0  ;;  %v13150_v15 = vld [vmem:[#allocation8 + $0x364] ss:$8 sps:$4 sm:$0xff]  }
 0xab0   : > { %v4424_v17 = vadd.f32 %v15378_v18, %v4265_v29  ;;  %v4426_v20 = vadd.f32 %v15381_v4, %v4338_v30  ;;  %4941 = vmatpush1.bf16.msra.mxu1 %v13133_v1  ;;  %5472 = vmatpush1.bf16.msra.mxu0 %v13136_v2  ;;  %v4452_v16 = vmax.f32 %v4420_v21, 0.0  ;;  %v4454_v37 = vmax.f32 %v4422_v22, 0.0  ;;  %v13168_v54 = vld [vmem:[#allocation8 + $0x394] ss:$8 sps:$4 sm:$0xff]   ;;  %v13163_v55 = vld [vmem:[#allocation8 + $0x190] ss:$8 sps:$4 sm:$0xff]  }
 0xab1   : > { %v4455_v33 = vmax.f32 %v4423_v26, 0.0  ;;  %v4457_v35 = vmax.f32 %v4425_v27, 0.0  ;;  %4942 = vmatprep.subr.bf16.mxu1 %v13141_v19  ;;  %5473 = vmatprep.subr.bf16.mxu0 %v13144_v6  ;;  %v13166_v56 = vld [vmem:[#allocation8 + $0x390] ss:$8 sps:$4 sm:$0xff]   ;;  %v13171_v57 = vld [vmem:[#allocation8 + $0x1a4] ss:$8 sps:$4 sm:$0xff]  }
 0xab2   : > { %v4456_v40 = vmax.f32 %v4424_v17, 0.0  ;;  %v4458_v36 = vmax.f32 %v4426_v20, 0.0  ;;  %v13169_v58 = vld [vmem:[#allocation8 + $0x1a0] ss:$8 sps:$4 sm:$0xff]   ;;  %v13177_v62 = vld [vmem:[#allocation8 + $0x1b4] ss:$8 sps:$4 sm:$0xff]  }
 0xab3   : > { %v4471_v38 = vpack.c.bf16 %v4455_v33, %v4451_v31  ;;  %v15427_v18 = vpack.c.bf16 %v4457_v35, %v4453_v34  ;;  %v13172_v60 = vld [vmem:[#allocation8 + $0x3a0] ss:$8 sps:$4 sm:$0xff]   ;;  %v13180_v63 = vld [vmem:[#allocation8 + $0x3b4] ss:$8 sps:$4 sm:$0xff]   ;;  %v13175_v1 = vld [vmem:[#allocation8 + $0x1b0] ss:$8 sps:$4 sm:$0xff]  }
 0xab4   : > { %v4472_v4 = vpack.c.bf16 %v4456_v40, %v4452_v16  ;;  %v15429_v41 = vpack.c.bf16 %v4458_v36, %v4454_v37  ;;  %4943 = vmatpush1.bf16.msra.mxu1 %v13139_v23  ;;  %5474 = vmatpush1.bf16.msra.mxu0 %v13142_v28  ;;  %v13178_v2 = vld [vmem:[#allocation8 + $0x3b0] ss:$8 sps:$4 sm:$0xff]   ;;  %v13183_v3 = vld [vmem:[#allocation8 + $0x1c4] ss:$8 sps:$4 sm:$0xff]   ;;  %v13181_v7 = vld [vmem:[#allocation8 + $0x1c0] ss:$8 sps:$4 sm:$0xff]  }
 0xab5   : > { %4944 = vmatprep.subr.bf16.mxu1 %v13147_v32  ;;  %5475 = vmatprep.subr.bf16.mxu0 %v13150_v15  ;;  %v13186_v5 = vld [vmem:[#allocation8 + $0x3c4] ss:$8 sps:$4 sm:$0xff]   ;;  %v13184_v11 = vld [vmem:[#allocation8 + $0x3c0] ss:$8 sps:$4 sm:$0xff]   ;;  %v13189_v19 = vld [vmem:[#allocation8 + $0x1d4] ss:$8 sps:$4 sm:$0xff]  }
 0xab6   : > { %4921 = vmatprep.mubr.bf16.mxu1 %v4472_v4  ;;  %5452 = vmatprep.mubr.bf16.mxu0 %v4472_v4  ;;  %v13192_v6 = vld [vmem:[#allocation8 + $0x3d4] ss:$8 sps:$4 sm:$0xff]   ;;  %v13187_v21 = vld [vmem:[#allocation8 + $0x1d0] ss:$8 sps:$4 sm:$0xff]   ;;  %v13195_v24 = vld [vmem:[#allocation8 + $0x1e4] ss:$8 sps:$4 sm:$0xff]  }
 0xab7   : > { %4922 = vmatmul.mubr.bf16.gmra.mrb[92].mxu1 %v4471_v38  ;;  %5453 = vmatmul.mubr.bf16.gmra.mrb[108].mxu0 %v4471_v38  ;;  %v13190_v22 = vld [vmem:[#allocation8 + $0x3d0] ss:$8 sps:$4 sm:$0xff]   ;;  %v13198_v25 = vld [vmem:[#allocation8 + $0x3e4] ss:$8 sps:$4 sm:$0xff]   ;;  %v13193_v26 = vld [vmem:[#allocation8 + $0x1e0] ss:$8 sps:$4 sm:$0xff]  }
 0xab8   : > { %4945 = vmatpush1.bf16.msra.mxu1 %v13145_v43  ;;  %5476 = vmatpush1.bf16.msra.mxu0 %v13148_v44  ;;  %v13196_v27 = vld [vmem:[#allocation8 + $0x3e0] ss:$8 sps:$4 sm:$0xff]   ;;  %v13201_v29 = vld [vmem:[#allocation8 + $0x1f4] ss:$8 sps:$4 sm:$0xff]   ;;  %v13199_v17 = vld [vmem:[#allocation8 + $0x1f0] ss:$8 sps:$4 sm:$0xff]  }
 0xab9   : > { %4964 = vmatprep.mubr.bf16.mxu1 %v15393_v42  ;;  %5495 = vmatprep.mubr.bf16.mxu0 %v15393_v42  ;;  %v13174_v42 = vld [vmem:[#allocation8 + $0x3a4] ss:$8 sps:$4 sm:$0xff]   ;;  %v13204_v30 = vld [vmem:[#allocation8 + $0x3f4] ss:$8 sps:$4 sm:$0xff]   ;;  %v13202_v20 = vld [vmem:[#allocation8 + $0x3f0] ss:$8 sps:$4 sm:$0xff]  }
 0xaba   : > { %4946 = vmatprep.subr.bf16.mxu1 %v13153_v45  ;;  %5477 = vmatprep.subr.bf16.mxu0 %v13156_v46 }
 0xabc   : > { %4947 = vmatpush1.bf16.msra.mxu1 %v13151_v47  ;;  %5478 = vmatpush1.bf16.msra.mxu0 %v13154_v48 }
 0xabd   : > { %4948 = vmatprep.subr.bf16.mxu1 %v13159_v49  ;;  %5479 = vmatprep.subr.bf16.mxu0 %v13162_v50 }
 0xac0   : > { %4949 = vmatpush1.bf16.msra.mxu1 %v13157_v51  ;;  %5480 = vmatpush1.bf16.msra.mxu0 %v13160_v52 }
 0xac1   : > { %4950 = vmatprep.subr.bf16.mxu1 %v13165_v53  ;;  %5481 = vmatprep.subr.bf16.mxu0 %v13168_v54 }
 0xac4   : > { %4951 = vmatpush1.bf16.msra.mxu1 %v13163_v55  ;;  %5482 = vmatpush1.bf16.msra.mxu0 %v13166_v56 }
 0xac5   : > { %4952 = vmatprep.subr.bf16.mxu1 %v13171_v57  ;;  %5483 = vmatprep.subr.bf16.mxu0 %v13174_v42 }
 0xac8   : > { %4953 = vmatpush1.bf16.msra.mxu1 %v13169_v58  ;;  %5484 = vmatpush1.bf16.msra.mxu0 %v13172_v60 }
 0xac9   : > { %4954 = vmatprep.subr.bf16.mxu1 %v13177_v62  ;;  %5485 = vmatprep.subr.bf16.mxu0 %v13180_v63 }
 0xacc   : > { %4955 = vmatpush1.bf16.msra.mxu1 %v13175_v1  ;;  %5486 = vmatpush1.bf16.msra.mxu0 %v13178_v2 }
 0xacd   : > { %4956 = vmatprep.subr.bf16.mxu1 %v13183_v3  ;;  %5487 = vmatprep.subr.bf16.mxu0 %v13186_v5 }
 0xad0   : > { %4957 = vmatpush1.bf16.msra.mxu1 %v13181_v7  ;;  %5488 = vmatpush1.bf16.msra.mxu0 %v13184_v11 }
 0xad1   : > { %4958 = vmatprep.subr.bf16.mxu1 %v13189_v19  ;;  %5489 = vmatprep.subr.bf16.mxu0 %v13192_v6 }
 0xad4   : > { %4959 = vmatpush1.bf16.msra.mxu1 %v13187_v21  ;;  %5490 = vmatpush1.bf16.msra.mxu0 %v13190_v22 }
 0xad5   : > { %4960 = vmatprep.subr.bf16.mxu1 %v13195_v24  ;;  %5491 = vmatprep.subr.bf16.mxu0 %v13198_v25 }
 0xad8   : > { %4961 = vmatpush1.bf16.msra.mxu1 %v13193_v26  ;;  %5492 = vmatpush1.bf16.msra.mxu0 %v13196_v27 }
 0xad9   : > { %4962 = vmatprep.subr.bf16.mxu1 %v13201_v29  ;;  %5493 = vmatprep.subr.bf16.mxu0 %v13204_v30  ;;  %v13218_v30 = vld [vmem:[#allocation11 + $0x20c] ss:$16 sps:$4 sm:$0xff]  }
 0xadc   : > { %4963 = vmatpush1.bf16.msra.mxu1 %v13199_v17  ;;  %5494 = vmatpush1.bf16.msra.mxu0 %v13202_v20  ;;  %v13205_v17 = vld [vmem:[#allocation10] sm:$0xff]   ;;  %v13209_v20 = vld [vmem:[#allocation10 + $0x30] sm:$0xff]  }
 0xadf   : > { %4965 = vmatmul.mubr.bf16.vlgmr.msra.gmra.mrb[80].mxu1 %v15391_v39  ;;  %5496 = vmatmul.mubr.bf16.vlgmr.msra.gmra.mrb[96].mxu0 %v15391_v39 }
 0xae0   : > { %4974 = vmatprep.mubr.bf16.mxu1 %v15405_v13  ;;  %5505 = vmatprep.mubr.bf16.mxu0 %v15405_v13 }
 0xae7   : > { %4975 = vmatmul.mubr.bf16.gmra.mrb[84].mxu1 %v15403_v9  ;;  %5506 = vmatmul.mubr.bf16.gmra.mrb[100].mxu0 %v15403_v9 }
 0xae8   : > { %4984 = vmatprep.mubr.bf16.mxu1 %v15417_v61  ;;  %5515 = vmatprep.mubr.bf16.mxu0 %v15417_v61 }
 0xaef   : > { %4985 = vmatmul.mubr.bf16.gmra.mrb[88].mxu1 %v15415_v59  ;;  %5516 = vmatmul.mubr.bf16.gmra.mrb[104].mxu0 %v15415_v59 }
 0xaf0   : > { %4994 = vmatprep.mubr.bf16.mxu1 %v15429_v41  ;;  %5525 = vmatprep.mubr.bf16.mxu0 %v15429_v41 }
 0xaf7   : > { %4995 = vmatmul.mubr.bf16.gmra.mrb[92].mxu1 %v15427_v18  ;;  %5526 = vmatmul.mubr.bf16.gmra.mrb[108].mxu0 %v15427_v18 }
 0xaf8   : > { %5612 = vmatprep.mubr.bf16.mxu1 %v14438_v0  ;;  %5910 = vmatprep.mubr.bf16.mxu0 %v14438_v0 }
 0xbb2   : > { %v4966_v39 = vpop.f32.mrb[80].mxu1  ;;  %v5497_v9 = vpop.f32.mrb[96].mxu0 }
 0xbb3   : > { %v5536_v13 = vmax.f32 %v4966_v39, %v5497_v9  ;;  %v4968_v61 = vpop.f32.mrb[81].mxu1  ;;  %v5499_v23 = vpop.f32.mrb[97].mxu0  ;;  %v13216_v39 = vld [vmem:[#allocation11 + $0x208] ss:$16 sps:$4 sm:$0xff]   ;;  %v13224_v9 = vld [vmem:[#allocation11 + $0x22c] ss:$16 sps:$4 sm:$0xff]  }
 0xbb4   : > { %v5537_v28 = vmax.f32 %v4968_v61, %v5499_v23  ;;  %v4970_v32 = vpop.f32.mrb[82].mxu1  ;;  %v5501_v59 = vpop.f32.mrb[98].mxu0  ;;  %v13206_v61 = vld [vmem:[#allocation10 + $0x8] sm:$0xff]   ;;  %v13212_v23 = vld [vmem:[#allocation10 + $0x38] sm:$0xff]  }
 0xbb5   : > { %v5538_v31 = vmax.f32 %v4970_v32, %v5501_v59  ;;  %v4972_v34 = vpop.f32.mrb[83].mxu1  ;;  %v5503_v33 = vpop.f32.mrb[99].mxu0  ;;  %v13228_v32 = vld [vmem:[#allocation11 + $0x248] ss:$16 sps:$4 sm:$0xff]   ;;  %v13236_v59 = vld [vmem:[#allocation11 + $0x26c] ss:$16 sps:$4 sm:$0xff]  }
 0xbb6   : > { %v5539_v35 = vmax.f32 %v4972_v34, %v5503_v33  ;;  %v13207_v34 = vld [vmem:[#allocation10 + $0x10] sm:$0xff]   ;;  %v13242_v33 = vld [vmem:[#allocation11 + $0x28c] ss:$16 sps:$4 sm:$0xff]  }
 0xbb7   : > { %v15449_v15 = vpack.c.bf16 %v5538_v31, %v5536_v13  ;;  %v13222_v13 = vld [vmem:[#allocation11 + $0x228] ss:$16 sps:$4 sm:$0xff]  }
 0xbb8   : > { %v15451_v16 = vpack.c.bf16 %v5539_v35, %v5537_v28  ;;  %v13230_v28 = vld [vmem:[#allocation11 + $0x24c] ss:$16 sps:$4 sm:$0xff]   ;;  %v13234_v31 = vld [vmem:[#allocation11 + $0x268] ss:$16 sps:$4 sm:$0xff]  }
 0xbb9   : > { %v13240_v35 = vld [vmem:[#allocation11 + $0x288] ss:$16 sps:$4 sm:$0xff]  }
 0xbba   : > { %v4976_v37 = vpop.f32.mrb[84].mxu1  ;;  %v5507_v40 = vpop.f32.mrb[100].mxu0  ;;  %5580 = vmatprep.subr.bf16.mxu1 %v15451_v16  ;;  %5878 = vmatprep.subr.bf16.mxu0 %v15451_v16 }
 0xbbb   : > { %v5540_v36 = vmax.f32 %v4976_v37, %v5507_v40  ;;  %v4978_v38 = vpop.f32.mrb[85].mxu1  ;;  %v5509_v18 = vpop.f32.mrb[101].mxu0  ;;  %5581 = vmatpush1.bf16.msra.mxu1 %v15449_v15  ;;  %5879 = vmatpush1.bf16.msra.mxu0 %v15449_v15  ;;  %v13248_v37 = vld [vmem:[#allocation11 + $0x2ac] ss:$16 sps:$4 sm:$0xff]   ;;  %v13246_v40 = vld [vmem:[#allocation11 + $0x2a8] ss:$16 sps:$4 sm:$0xff]  }
 0xbbc   : > { %v5541_v4 = vmax.f32 %v4978_v38, %v5509_v18  ;;  %v4980_v41 = vpop.f32.mrb[86].mxu1  ;;  %v5511_v43 = vpop.f32.mrb[102].mxu0  ;;  %v13215_v38 = vld [vmem:[#allocation11 + $0x204] ss:$16 sps:$4 sm:$0xff]  }
 0xbbd   : > { %v5542_v44 = vmax.f32 %v4980_v41, %v5511_v43  ;;  %v4982_v45 = vpop.f32.mrb[87].mxu1  ;;  %v5513_v46 = vpop.f32.mrb[103].mxu0  ;;  %v13210_v18 = vld [vmem:[#allocation10 + $0x20] sm:$0xff]  }
 0xbbe   : > { %v5543_v47 = vmax.f32 %v4982_v45, %v5513_v46  ;;  %v13221_v41 = vld [vmem:[#allocation11 + $0x224] ss:$16 sps:$4 sm:$0xff]   ;;  %v13219_v43 = vld [vmem:[#allocation11 + $0x220] ss:$16 sps:$4 sm:$0xff]   ;;  %v13211_v45 = vld [vmem:[#allocation10 + $0x28] sm:$0xff]  }
 0xbbf   : > { %v15457_v48 = vpack.c.bf16 %v5542_v44, %v5540_v36  ;;  %v13208_v36 = vld [vmem:[#allocation10 + $0x18] sm:$0xff]   ;;  %v13227_v44 = vld [vmem:[#allocation11 + $0x244] ss:$16 sps:$4 sm:$0xff]   ;;  %v13225_v46 = vld [vmem:[#allocation11 + $0x240] ss:$16 sps:$4 sm:$0xff]  }
 0xbc0   : > { %v15459_v49 = vpack.c.bf16 %v5543_v47, %v5541_v4  ;;  %v13213_v4 = vld [vmem:[#allocation11 + $0x200] ss:$16 sps:$4 sm:$0xff]   ;;  %v13233_v47 = vld [vmem:[#allocation11 + $0x264] ss:$16 sps:$4 sm:$0xff]  }
 0xbc2   : > { %v4986_v50 = vpop.f32.mrb[88].mxu1  ;;  %v5517_v51 = vpop.f32.mrb[104].mxu0  ;;  %5582 = vmatprep.subr.bf16.mxu1 %v15459_v49  ;;  %5880 = vmatprep.subr.bf16.mxu0 %v15459_v49 }
 0xbc3   : > { %v5544_v52 = vmax.f32 %v4986_v50, %v5517_v51  ;;  %v4988_v53 = vpop.f32.mrb[89].mxu1  ;;  %v5519_v54 = vpop.f32.mrb[105].mxu0  ;;  %5583 = vmatpush1.bf16.msra.mxu1 %v15457_v48  ;;  %5881 = vmatpush1.bf16.msra.mxu0 %v15457_v48  ;;  %v13231_v50 = vld [vmem:[#allocation11 + $0x260] ss:$16 sps:$4 sm:$0xff]   ;;  %v13239_v51 = vld [vmem:[#allocation11 + $0x284] ss:$16 sps:$4 sm:$0xff]  }
 0xbc4   : > { %v5545_v55 = vmax.f32 %v4988_v53, %v5519_v54  ;;  %v4990_v56 = vpop.f32.mrb[90].mxu1  ;;  %v5521_v57 = vpop.f32.mrb[106].mxu0  ;;  %v13245_v53 = vld [vmem:[#allocation11 + $0x2a4] ss:$16 sps:$4 sm:$0xff]   ;;  %v13243_v54 = vld [vmem:[#allocation11 + $0x2a0] ss:$16 sps:$4 sm:$0xff]  }
 0xbc5   : > { %v5546_v42 = vmax.f32 %v4990_v56, %v5521_v57  ;;  %v4992_v58 = vpop.f32.mrb[91].mxu1  ;;  %v5523_v60 = vpop.f32.mrb[107].mxu0  ;;  %v13254_v56 = vld [vmem:[#allocation11 + $0x2cc] ss:$16 sps:$4 sm:$0xff]   ;;  %v13249_v57 = vld [vmem:[#allocation11 + $0x2c0] ss:$16 sps:$4 sm:$0xff]  }
 0xbc6   : > { %v5547_v62 = vmax.f32 %v4992_v58, %v5523_v60  ;;  %v13257_v58 = vld [vmem:[#allocation11 + $0x2e4] ss:$16 sps:$4 sm:$0xff]   ;;  %v13260_v60 = vld [vmem:[#allocation11 + $0x2ec] ss:$16 sps:$4 sm:$0xff]  }
 0xbc7   : > { %v15465_v63 = vpack.c.bf16 %v5546_v42, %v5544_v52  ;;  %v13237_v52 = vld [vmem:[#allocation11 + $0x280] ss:$16 sps:$4 sm:$0xff]   ;;  %v13252_v42 = vld [vmem:[#allocation11 + $0x2c8] ss:$16 sps:$4 sm:$0xff]  }
 0xbc8   : > { %v15467_v1 = vpack.c.bf16 %v5547_v62, %v5545_v55  ;;  %v13251_v55 = vld [vmem:[#allocation11 + $0x2c4] ss:$16 sps:$4 sm:$0xff]   ;;  %v13255_v62 = vld [vmem:[#allocation11 + $0x2e0] ss:$16 sps:$4 sm:$0xff]  }
 0xbca   : > { %v4996_v2 = vpop.f32.mrb[92].mxu1  ;;  %v5527_v3 = vpop.f32.mrb[108].mxu0  ;;  %5584 = vmatprep.subr.bf16.mxu1 %v15467_v1  ;;  %5882 = vmatprep.subr.bf16.mxu0 %v15467_v1 }
 0xbcb   : > { %v5548_v5 = vmax.f32 %v4996_v2, %v5527_v3  ;;  %v4998_v7 = vpop.f32.mrb[93].mxu1  ;;  %v5529_v11 = vpop.f32.mrb[109].mxu0  ;;  %5585 = vmatpush1.bf16.msra.mxu1 %v15465_v63  ;;  %5883 = vmatpush1.bf16.msra.mxu0 %v15465_v63  ;;  %v13258_v2 = vld [vmem:[#allocation11 + $0x2e8] ss:$16 sps:$4 sm:$0xff]   ;;  %v13263_v3 = vld [vmem:[#allocation11 + $0x304] ss:$16 sps:$4 sm:$0xff]  }
 0xbcc   : > { %v5549_v19 = vmax.f32 %v4998_v7, %v5529_v11  ;;  %v5000_v6 = vpop.f32.mrb[94].mxu1  ;;  %v5531_v21 = vpop.f32.mrb[110].mxu0  ;;  %v13261_v7 = vld [vmem:[#allocation11 + $0x300] ss:$16 sps:$4 sm:$0xff]   ;;  %v13264_v11 = vld [vmem:[#allocation11 + $0x308] ss:$16 sps:$4 sm:$0xff]  }
 0xbcd   : > { %v5550_v22 = vmax.f32 %v5000_v6, %v5531_v21  ;;  %v5002_v24 = vpop.f32.mrb[95].mxu1  ;;  %v5533_v25 = vpop.f32.mrb[111].mxu0  ;;  %v13272_v6 = vld [vmem:[#allocation11 + $0x32c] ss:$16 sps:$4 sm:$0xff]   ;;  %v13267_v21 = vld [vmem:[#allocation11 + $0x320] ss:$16 sps:$4 sm:$0xff]  }
 0xbce   : > { %v5551_v26 = vmax.f32 %v5002_v24, %v5533_v25  ;;  %v13275_v24 = vld [vmem:[#allocation11 + $0x344] ss:$16 sps:$4 sm:$0xff]   ;;  %v13278_v25 = vld [vmem:[#allocation11 + $0x34c] ss:$16 sps:$4 sm:$0xff]  }
 0xbcf   : > { %v15473_v27 = vpack.c.bf16 %v5550_v22, %v5548_v5  ;;  %v13266_v5 = vld [vmem:[#allocation11 + $0x30c] ss:$16 sps:$4 sm:$0xff]   ;;  %v13270_v22 = vld [vmem:[#allocation11 + $0x328] ss:$16 sps:$4 sm:$0xff]  }
 0xbd0   : > { %v15475_v29 = vpack.c.bf16 %v5551_v26, %v5549_v19  ;;  %v13269_v19 = vld [vmem:[#allocation11 + $0x324] ss:$16 sps:$4 sm:$0xff]   ;;  %v13273_v26 = vld [vmem:[#allocation11 + $0x340] ss:$16 sps:$4 sm:$0xff]  }
 0xbd2   : > { %5586 = vmatprep.subr.bf16.mxu1 %v15475_v29  ;;  %5884 = vmatprep.subr.bf16.mxu0 %v15475_v29 }
 0xbd3   : > { %5587 = vmatpush1.bf16.msra.mxu1 %v15473_v27  ;;  %5885 = vmatpush1.bf16.msra.mxu0 %v15473_v27 }
 0xbd4   : > { %5654 = vmatprep.subr.bf16.mxu1 %v15451_v16  ;;  %6381 = vmatprep.subr.bf16.mxu0 %v13218_v30  ;;  %v13276_v30 = vld [vmem:[#allocation11 + $0x348] ss:$16 sps:$4 sm:$0xff]  }
 0xbd6   : > { %11476 = vmatmul.mubr.msk.bf16.vlgmr.msra.gmra.mrb[96].mxu1 %vm765_vm0, %v13205_v17  ;;  %11488 = vmatmul.mubr.msk.bf16.vlgmr.msra.gmra.mrb[112].mxu0 %vm765_vm0, %v13209_v20  ;;  %v13281_v17 = vld [vmem:[#allocation11 + $0x364] ss:$16 sps:$4 sm:$0xff]   ;;  %v13284_v20 = vld [vmem:[#allocation11 + $0x36c] ss:$16 sps:$4 sm:$0xff]  }
 0xbd7   : > { %5655 = vmatpush1.bf16.msra.mxu1 %v15449_v15  ;;  %5622 = vmatprep.mubr.bf16.mxu1 %v14438_v0 }
 0xbd8   : > { %5656 = vmatprep.subr.bf16.mxu1 %v15459_v49  ;;  %5920 = vmatprep.mubr.bf16.mxu0 %v14438_v0 }
 0xbd9   : > { %6382 = vmatpush1.bf16.msra.mxu0 %v13216_v39  ;;  %v13279_v39 = vld [vmem:[#allocation11 + $0x360] ss:$16 sps:$4 sm:$0xff]  }
 0xbda   : > { %6383 = vmatprep.subr.bf16.mxu0 %v13224_v9  ;;  %v13282_v9 = vld [vmem:[#allocation11 + $0x368] ss:$16 sps:$4 sm:$0xff]  }
 0xbdb   : > { %5657 = vmatpush1.bf16.msra.mxu1 %v15457_v48 }
 0xbdc   : > { %5658 = vmatprep.subr.bf16.mxu1 %v15467_v1 }
 0xbdd   : > { %6384 = vmatpush1.bf16.msra.mxu0 %v13222_v13  ;;  %v13287_v13 = vld [vmem:[#allocation11 + $0x384] ss:$16 sps:$4 sm:$0xff]  }
 0xbde   : > { %11477 = vmatmul.mubr.msk.bf16.gmra.mrb[100].mxu1 %vm765_vm0, %v13206_v61  ;;  %11489 = vmatmul.mubr.msk.bf16.gmra.mrb[116].mxu0 %vm765_vm0, %v13212_v23  ;;  %v13290_v61 = vld [vmem:[#allocation11 + $0x38c] ss:$16 sps:$4 sm:$0xff]   ;;  %v13285_v23 = vld [vmem:[#allocation11 + $0x380] ss:$16 sps:$4 sm:$0xff]  }
 0xbdf   : > { %5659 = vmatpush1.bf16.msra.mxu1 %v15465_v63  ;;  %5686 = vmatprep.mubr.bf16.mxu1 %v14438_v0 }
 0xbe0   : > { %5660 = vmatprep.subr.bf16.mxu1 %v15475_v29  ;;  %6385 = vmatprep.subr.bf16.mxu0 %v13230_v28  ;;  %v13288_v28 = vld [vmem:[#allocation11 + $0x388] ss:$16 sps:$4 sm:$0xff]  }
 0xbe1   : > { %6386 = vmatpush1.bf16.msra.mxu0 %v13228_v32  ;;  %v13293_v32 = vld [vmem:[#allocation11 + $0x3a4] ss:$16 sps:$4 sm:$0xff]  }
 0xbe2   : > { %6387 = vmatprep.subr.bf16.mxu0 %v13236_v59  ;;  %v13296_v59 = vld [vmem:[#allocation11 + $0x3ac] ss:$16 sps:$4 sm:$0xff]  }
 0xbe3   : > { %5661 = vmatpush1.bf16.msra.mxu1 %v15473_v27 }
 0xbe4   : > { %5804 = vmatprep.subr.bf16.mxu1 %v15451_v16 }
 0xbe5   : > { %6388 = vmatpush1.bf16.msra.mxu0 %v13234_v31  ;;  %v13291_v31 = vld [vmem:[#allocation11 + $0x3a0] ss:$16 sps:$4 sm:$0xff]  }
 0xbe6   : > { %11480 = vmatmul.mubr.msk.bf16.vlgmr.msra.gmra.mrb[104].mxu1 %vm765_vm0, %v13207_v34  ;;  %6389 = vmatprep.subr.bf16.mxu0 %v13242_v33  ;;  %v13294_v34 = vld [vmem:[#allocation11 + $0x3a8] ss:$16 sps:$4 sm:$0xff]   ;;  %v13299_v33 = vld [vmem:[#allocation11 + $0x3c4] ss:$16 sps:$4 sm:$0xff]  }
 0xbe7   : > { %5805 = vmatpush1.bf16.msra.mxu1 %v15449_v15  ;;  %5696 = vmatprep.mubr.bf16.mxu1 %v14438_v0 }
 0xbe8   : > { %5806 = vmatprep.subr.bf16.mxu1 %v15459_v49 }
 0xbe9   : > { %6390 = vmatpush1.bf16.msra.mxu0 %v13240_v35  ;;  %v13302_v35 = vld [vmem:[#allocation11 + $0x3cc] ss:$16 sps:$4 sm:$0xff]  }
 0xbea   : > { %6391 = vmatprep.subr.bf16.mxu0 %v13248_v37  ;;  %v13297_v37 = vld [vmem:[#allocation11 + $0x3c0] ss:$16 sps:$4 sm:$0xff]  }
 0xbeb   : > { %5807 = vmatpush1.bf16.msra.mxu1 %v15457_v48 }
 0xbec   : > { %5808 = vmatprep.subr.bf16.mxu1 %v15467_v1 }
 0xbed   : > { %6392 = vmatpush1.bf16.msra.mxu0 %v13246_v40  ;;  %v13300_v40 = vld [vmem:[#allocation11 + $0x3c8] ss:$16 sps:$4 sm:$0xff]  }
 0xbee   : > { %11481 = vmatmul.mubr.msk.bf16.gmra.mrb[108].mxu1 %vm765_vm0, %v13208_v36  ;;  %6393 = vmatprep.subr.bf16.mxu0 %v13254_v56  ;;  %v13305_v36 = vld [vmem:[#allocation11 + $0x3e4] ss:$16 sps:$4 sm:$0xff]  }
 0xbef   : > { %5809 = vmatpush1.bf16.msra.mxu1 %v15465_v63  ;;  %5836 = vmatprep.mubr.bf16.mxu1 %v14438_v0 }
 0xbf0   : > { %5810 = vmatprep.subr.bf16.mxu1 %v15475_v29 }
 0xbf1   : > { %6394 = vmatpush1.bf16.msra.mxu0 %v13252_v42 }
 0xbf2   : > { %6395 = vmatprep.subr.bf16.mxu0 %v13260_v60 }
 0xbf3   : > { %5811 = vmatpush1.bf16.msra.mxu1 %v15473_v27 }
 0xbf4   : > { %6328 = vmatprep.subr.bf16.mxu1 %v13215_v38  ;;  %v13308_v38 = vld [vmem:[#allocation11 + $0x3ec] ss:$16 sps:$4 sm:$0xff]  }
 0xbf5   : > { %6396 = vmatpush1.bf16.msra.mxu0 %v13258_v2 }
 0xbf6   : > { %11484 = vmatmul.mubr.msk.bf16.vlgmr.msra.gmra.mrb[112].mxu1 %vm765_vm0, %v13210_v18  ;;  %6397 = vmatprep.subr.bf16.mxu0 %v13266_v5  ;;  %v13303_v18 = vld [vmem:[#allocation11 + $0x3e0] ss:$16 sps:$4 sm:$0xff]  }
 0xbf7   : > { %5846 = vmatprep.mubr.bf16.mxu1 %v14438_v0  ;;  %6329 = vmatpush1.bf16.msra.mxu1 %v13213_v4  ;;  %v13306_v4 = vld [vmem:[#allocation11 + $0x3e8] ss:$16 sps:$4 sm:$0xff]  }
 0xbf8   : > { %6330 = vmatprep.subr.bf16.mxu1 %v13221_v41  ;;  %v13311_v41 = vld [vmem:[#allocation11 + $0x4] ss:$16 sps:$4 sm:$0xff]  }
 0xbf9   : > { %6398 = vmatpush1.bf16.msra.mxu0 %v13264_v11 }
 0xbfa   : > { %6399 = vmatprep.subr.bf16.mxu0 %v13272_v6 }
 0xbfb   : > { %6331 = vmatpush1.bf16.msra.mxu1 %v13219_v43  ;;  %v13314_v43 = vld [vmem:[#allocation11 + $0xc] ss:$16 sps:$4 sm:$0xff]  }
 0xbfc   : > { %6332 = vmatprep.subr.bf16.mxu1 %v13227_v44 }
 0xbfd   : > { %6400 = vmatpush1.bf16.msra.mxu0 %v13270_v22 }
 0xbfe   : > { %11485 = vmatmul.mubr.msk.bf16.gmra.mrb[116].mxu1 %vm765_vm0, %v13211_v45  ;;  %6401 = vmatprep.subr.bf16.mxu0 %v13278_v25 }
 0xbff   : > { %6333 = vmatpush1.bf16.msra.mxu1 %v13225_v46 }
 0xc00   : > { %6334 = vmatprep.subr.bf16.mxu1 %v13233_v47 }
 0xc01   : > { %6402 = vmatpush1.bf16.msra.mxu0 %v13276_v30 }
 0xc02   : > { %6403 = vmatprep.subr.bf16.mxu0 %v13284_v20 }
 0xc03   : > { %6335 = vmatpush1.bf16.msra.mxu1 %v13231_v50 }
 0xc04   : > { %6336 = vmatprep.subr.bf16.mxu1 %v13239_v51 }
 0xc05   : > { %6404 = vmatpush1.bf16.msra.mxu0 %v13282_v9 }
 0xc06   : > { %6405 = vmatprep.subr.bf16.mxu0 %v13290_v61 }
 0xc07   : > { %6337 = vmatpush1.bf16.msra.mxu1 %v13237_v52 }
 0xc08   : > { %6338 = vmatprep.subr.bf16.mxu1 %v13245_v53 }
 0xc09   : > { %6406 = vmatpush1.bf16.msra.mxu0 %v13288_v28 }
 0xc0a   : > { %6407 = vmatprep.subr.bf16.mxu0 %v13296_v59 }
 0xc0b   : > { %6339 = vmatpush1.bf16.msra.mxu1 %v13243_v54 }
 0xc0c   : > { %6340 = vmatprep.subr.bf16.mxu1 %v13251_v55 }
 0xc0d   : > { %6408 = vmatpush1.bf16.msra.mxu0 %v13294_v34 }
 0xc0e   : > { %6409 = vmatprep.subr.bf16.mxu0 %v13302_v35 }
 0xc0f   : > { %6341 = vmatpush1.bf16.msra.mxu1 %v13249_v57 }
 0xc10   : > { %6342 = vmatprep.subr.bf16.mxu1 %v13257_v58 }
 0xc11   : > { %6410 = vmatpush1.bf16.msra.mxu0 %v13300_v40 }
 0xc12   : > { %6411 = vmatprep.subr.bf16.mxu0 %v13308_v38  ;;  %v13309_v38 = vld [vmem:[#allocation11] ss:$16 sps:$4 sm:$0xff]  }
 0xc13   : > { %6343 = vmatpush1.bf16.msra.mxu1 %v13255_v62 }
 0xc14   : > { %6344 = vmatprep.subr.bf16.mxu1 %v13263_v3 }
 0xc15   : > { %6412 = vmatpush1.bf16.msra.mxu0 %v13306_v4  ;;  %v13317_v4 = vld [vmem:[#allocation11 + $0x24] ss:$16 sps:$4 sm:$0xff]  }
 0xc16   : > { %6807 = vmatprep.subr.bf16.mxu0 %v13314_v43 }
 0xc17   : > { %6345 = vmatpush1.bf16.msra.mxu1 %v13261_v7 }
 0xc18   : > { %6346 = vmatprep.subr.bf16.mxu1 %v13269_v19 }
 0xc1b   : > { %6347 = vmatpush1.bf16.msra.mxu1 %v13267_v21 }
 0xc1c   : > { %6348 = vmatprep.subr.bf16.mxu1 %v13275_v24 }
 0xc1f   : > { %6349 = vmatpush1.bf16.msra.mxu1 %v13273_v26 }
 0xc20   : > { %6350 = vmatprep.subr.bf16.mxu1 %v13281_v17 }
 0xc23   : > { %6351 = vmatpush1.bf16.msra.mxu1 %v13279_v39 }
 0xc24   : > { %6352 = vmatprep.subr.bf16.mxu1 %v13287_v13 }
 0xc27   : > { %6353 = vmatpush1.bf16.msra.mxu1 %v13285_v23 }
 0xc28   : > { %6354 = vmatprep.subr.bf16.mxu1 %v13293_v32 }
 0xc2b   : > { %6355 = vmatpush1.bf16.msra.mxu1 %v13291_v31 }
 0xc2c   : > { %6356 = vmatprep.subr.bf16.mxu1 %v13299_v33 }
 0xc2f   : > { %6357 = vmatpush1.bf16.msra.mxu1 %v13297_v37 }
 0xc30   : > { %6358 = vmatprep.subr.bf16.mxu1 %v13305_v36 }
 0xc33   : > { %6359 = vmatpush1.bf16.msra.mxu1 %v13303_v18  ;;  %v13312_v18 = vld [vmem:[#allocation11 + $0x8] ss:$16 sps:$4 sm:$0xff]  }
 0xc34   : > { %6754 = vmatprep.subr.bf16.mxu1 %v13311_v41  ;;  %v13320_v41 = vld [vmem:[#allocation11 + $0x2c] ss:$16 sps:$4 sm:$0xff]  }
 0xca9   : > { %v5614_v44 = vpop.f32.mrb[96].mxu1  ;;  %v5912_v45 = vpop.f32.mrb[112].mxu0 }
 0xcaa   : > { %v5616_v46 = vpop.f32.mrb[97].mxu1  ;;  %v5914_v47 = vpop.f32.mrb[113].mxu0 }
 0xcab   : > { %v5618_v50 = vpop.f32.mrb[98].mxu1  ;;  %v5916_v51 = vpop.f32.mrb[114].mxu0 }
 0xcac   : > { %v5620_v52 = vpop.f32.mrb[99].mxu1  ;;  %v5918_v53 = vpop.f32.mrb[115].mxu0 }
 0xcb1   : > { %v5624_v54 = vpop.f32.mrb[100].mxu1  ;;  %v5922_v55 = vpop.f32.mrb[116].mxu0 }
 0xcb2   : > { %v5626_v56 = vpop.f32.mrb[101].mxu1  ;;  %v5924_v57 = vpop.f32.mrb[117].mxu0 }
 0xcb3   : > { %v5628_v42 = vpop.f32.mrb[102].mxu1  ;;  %v5926_v58 = vpop.f32.mrb[118].mxu0 }
 0xcb4   : > { %v5630_v60 = vpop.f32.mrb[103].mxu1  ;;  %v5928_v62 = vpop.f32.mrb[119].mxu0 }
 0xcb9   : > { %v5688_v2 = vpop.f32.mrb[104].mxu1 }
 0xcba   : > { %v5707_v3 = vmax.f32 %v5614_v44, %v5688_v2  ;;  %v5690_v5 = vpop.f32.mrb[105].mxu1 }
 0xcbb   : > { %v5708_v7 = vmax.f32 %v5616_v46, %v5690_v5  ;;  %v5692_v11 = vpop.f32.mrb[106].mxu1  ;;  %v13332_v5 = vld [vmem:[#allocation11 + $0x6c] ss:$16 sps:$4 sm:$0xff]  }
 0xcbc   : > { %v5709_v19 = vmax.f32 %v5618_v50, %v5692_v11  ;;  %v5694_v6 = vpop.f32.mrb[107].mxu1  ;;  %v13315_v50 = vld [vmem:[#allocation11 + $0x20] ss:$16 sps:$4 sm:$0xff]   ;;  %v13338_v11 = vld [vmem:[#allocation11 + $0x8c] ss:$16 sps:$4 sm:$0xff]  }
 0xcbd   : > { %v5710_v21 = vmax.f32 %v5620_v52, %v5694_v6  ;;  %v13336_v6 = vld [vmem:[#allocation11 + $0x88] ss:$16 sps:$4 sm:$0xff]  }
 0xcbe   : > { %v15511_v22 = vpack.c.bf16 %v5709_v19, %v5707_v3  ;;  %v13324_v3 = vld [vmem:[#allocation11 + $0x48] ss:$16 sps:$4 sm:$0xff]   ;;  %v13333_v19 = vld [vmem:[#allocation11 + $0x80] ss:$16 sps:$4 sm:$0xff]  }
 0xcbf   : > { %v15513_v24 = vpack.c.bf16 %v5710_v21, %v5708_v7  ;;  %v13330_v7 = vld [vmem:[#allocation11 + $0x68] ss:$16 sps:$4 sm:$0xff]   ;;  %v13341_v21 = vld [vmem:[#allocation11 + $0xa4] ss:$16 sps:$4 sm:$0xff]  }
 0xcc1   : > { %v5698_v25 = vpop.f32.mrb[108].mxu1 }
 0xcc2   : > { %v5711_v26 = vmax.f32 %v5624_v54, %v5698_v25  ;;  %v5700_v30 = vpop.f32.mrb[109].mxu1  ;;  %v13323_v54 = vld [vmem:[#allocation11 + $0x44] ss:$16 sps:$4 sm:$0xff]   ;;  %v13344_v25 = vld [vmem:[#allocation11 + $0xac] ss:$16 sps:$4 sm:$0xff]  }
 0xcc3   : > { %v5712_v17 = vmax.f32 %v5626_v56, %v5700_v30  ;;  %v5702_v20 = vpop.f32.mrb[110].mxu1  ;;  %v13326_v56 = vld [vmem:[#allocation11 + $0x4c] ss:$16 sps:$4 sm:$0xff]   ;;  %v13342_v30 = vld [vmem:[#allocation11 + $0xa8] ss:$16 sps:$4 sm:$0xff]  }
 0xcc4   : > { %v5713_v39 = vmax.f32 %v5628_v42, %v5702_v20  ;;  %v5704_v9 = vpop.f32.mrb[111].mxu1  ;;  %v13345_v20 = vld [vmem:[#allocation11 + $0xc0] ss:$16 sps:$4 sm:$0xff]  }
 0xcc5   : > { %v5714_v13 = vmax.f32 %v5630_v60, %v5704_v9  ;;  %v13353_v9 = vld [vmem:[#allocation11 + $0xe4] ss:$16 sps:$4 sm:$0xff]  }
 0xcc6   : > { %v15515_v61 = vpack.c.bf16 %v5713_v39, %v5711_v26  ;;  %v13339_v26 = vld [vmem:[#allocation11 + $0xa0] ss:$16 sps:$4 sm:$0xff]   ;;  %v13348_v39 = vld [vmem:[#allocation11 + $0xc8] ss:$16 sps:$4 sm:$0xff]  }
 0xcc7   : > { %v15517_v23 = vpack.c.bf16 %v5714_v13, %v5712_v17  ;;  %v13347_v17 = vld [vmem:[#allocation11 + $0xc4] ss:$16 sps:$4 sm:$0xff]   ;;  %v13356_v13 = vld [vmem:[#allocation11 + $0xec] ss:$16 sps:$4 sm:$0xff]  }
 0xcc9   : > { %v5838_v28 = vpop.f32.mrb[112].mxu1 }
 0xcca   : > { %v5931_v32 = vmax.f32 %v5838_v28, %v5912_v45  ;;  %v5840_v59 = vpop.f32.mrb[113].mxu1  ;;  %v13351_v28 = vld [vmem:[#allocation11 + $0xe0] ss:$16 sps:$4 sm:$0xff]  }
 0xccb   : > { %v5932_v31 = vmax.f32 %v5840_v59, %v5914_v47  ;;  %v5842_v34 = vpop.f32.mrb[114].mxu1  ;;  %v13359_v59 = vld [vmem:[#allocation11 + $0x104] ss:$16 sps:$4 sm:$0xff]  }
 0xccc   : > { %v5933_v33 = vmax.f32 %v5842_v34, %v5916_v51  ;;  %v5844_v35 = vpop.f32.mrb[115].mxu1  ;;  %v13318_v51 = vld [vmem:[#allocation11 + $0x28] ss:$16 sps:$4 sm:$0xff]   ;;  %v13357_v34 = vld [vmem:[#allocation11 + $0x100] ss:$16 sps:$4 sm:$0xff]  }
 0xccd   : > { %v5934_v37 = vmax.f32 %v5844_v35, %v5918_v53  ;;  %v13365_v35 = vld [vmem:[#allocation11 + $0x124] ss:$16 sps:$4 sm:$0xff]  }
 0xcce   : > { %v5939_v40 = vpack.c.bf16 %v5933_v33, %v5931_v32  ;;  %v13354_v32 = vld [vmem:[#allocation11 + $0xe8] ss:$16 sps:$4 sm:$0xff]  }
 0xccf   : > { %v5940_v36 = vpack.c.bf16 %v5934_v37, %v5932_v31  ;;  %v13362_v31 = vld [vmem:[#allocation11 + $0x10c] ss:$16 sps:$4 sm:$0xff]   ;;  %v13360_v33 = vld [vmem:[#allocation11 + $0x108] ss:$16 sps:$4 sm:$0xff]  }
 0xcd0   : > { %v13368_v37 = vld [vmem:[#allocation11 + $0x12c] ss:$16 sps:$4 sm:$0xff]  }
 0xcd1   : > { %v5848_v43 = vpop.f32.mrb[116].mxu1  ;;  %6360 = vmatprep.mubr.bf16.mxu1 %v5940_v36  ;;  %6413 = vmatprep.mubr.bf16.mxu0 %v5940_v36  ;;  %v13366_v36 = vld [vmem:[#allocation11 + $0x128] ss:$16 sps:$4 sm:$0xff]  }
 0xcd2   : > { %v5935_v44 = vmax.f32 %v5848_v43, %v5922_v55  ;;  %v5850_v46 = vpop.f32.mrb[117].mxu1  ;;  %6361 = vmatmul.mubr.bf16.vlgmr.msra.gmra.mrb[120].mxu1 %v5939_v40  ;;  %6414 = vmatmul.mubr.bf16.vlgmr.msra.gmra.mrb[120].mxu0 %v5939_v40  ;;  %v13321_v55 = vld [vmem:[#allocation11 + $0x40] ss:$16 sps:$4 sm:$0xff]   ;;  %v13377_v43 = vld [vmem:[#allocation11 + $0x164] ss:$16 sps:$4 sm:$0xff]  }
 0xcd3   : > { %v5936_v45 = vmax.f32 %v5850_v46, %v5924_v57  ;;  %6755 = vmatpush1.bf16.msra.mxu1 %v13309_v38  ;;  %6808 = vmatpush1.bf16.msra.mxu0 %v13312_v18  ;;  %v5852_v47 = vpop.f32.mrb[118].mxu1  ;;  %v13329_v57 = vld [vmem:[#allocation11 + $0x64] ss:$16 sps:$4 sm:$0xff]   ;;  %v13363_v40 = vld [vmem:[#allocation11 + $0x120] ss:$16 sps:$4 sm:$0xff]  }
 0xcd4   : > { %v5937_v52 = vmax.f32 %v5852_v47, %v5926_v58  ;;  %v5854_v53 = vpop.f32.mrb[119].mxu1  ;;  %6756 = vmatprep.subr.bf16.mxu1 %v13317_v4  ;;  %6809 = vmatprep.subr.bf16.mxu0 %v13320_v41  ;;  %v13327_v58 = vld [vmem:[#allocation11 + $0x60] ss:$16 sps:$4 sm:$0xff]   ;;  %v13371_v38 = vld [vmem:[#allocation11 + $0x144] ss:$16 sps:$4 sm:$0xff]  }
 0xcd5   : > { %v5938_v42 = vmax.f32 %v5854_v53, %v5928_v62  ;;  %v13335_v62 = vld [vmem:[#allocation11 + $0x84] ss:$16 sps:$4 sm:$0xff]   ;;  %v13374_v18 = vld [vmem:[#allocation11 + $0x14c] ss:$16 sps:$4 sm:$0xff]   ;;  %v13369_v4 = vld [vmem:[#allocation11 + $0x140] ss:$16 sps:$4 sm:$0xff]  }
 0xcd6   : > { %v5941_v60 = vpack.c.bf16 %v5937_v52, %v5935_v44  ;;  %v13372_v41 = vld [vmem:[#allocation11 + $0x148] ss:$16 sps:$4 sm:$0xff]   ;;  %v13380_v44 = vld [vmem:[#allocation11 + $0x16c] ss:$16 sps:$4 sm:$0xff]   ;;  %v13375_v46 = vld [vmem:[#allocation11 + $0x160] ss:$16 sps:$4 sm:$0xff]  }
 0xcd7   : > { %v5942_v2 = vpack.c.bf16 %v5938_v42, %v5936_v45  ;;  %6757 = vmatpush1.bf16.msra.mxu1 %v13315_v50  ;;  %6810 = vmatpush1.bf16.msra.mxu0 %v13318_v51  ;;  %v13378_v45 = vld [vmem:[#allocation11 + $0x168] ss:$16 sps:$4 sm:$0xff]   ;;  %v13383_v47 = vld [vmem:[#allocation11 + $0x184] ss:$16 sps:$4 sm:$0xff]   ;;  %v13386_v50 = vld [vmem:[#allocation11 + $0x18c] ss:$16 sps:$4 sm:$0xff]  }
 0xcd8   : > { %6758 = vmatprep.subr.bf16.mxu1 %v13323_v54  ;;  %6811 = vmatprep.subr.bf16.mxu0 %v13326_v56  ;;  %v13381_v51 = vld [vmem:[#allocation11 + $0x180] ss:$16 sps:$4 sm:$0xff]   ;;  %v13384_v52 = vld [vmem:[#allocation11 + $0x188] ss:$16 sps:$4 sm:$0xff]   ;;  %v13389_v53 = vld [vmem:[#allocation11 + $0x1a4] ss:$16 sps:$4 sm:$0xff]  }
 0xcd9   : > { %6370 = vmatprep.mubr.bf16.mxu1 %v5942_v2  ;;  %6423 = vmatprep.mubr.bf16.mxu0 %v5942_v2  ;;  %v13392_v54 = vld [vmem:[#allocation11 + $0x1ac] ss:$16 sps:$4 sm:$0xff]   ;;  %v13387_v56 = vld [vmem:[#allocation11 + $0x1a0] ss:$16 sps:$4 sm:$0xff]   ;;  %v13390_v42 = vld [vmem:[#allocation11 + $0x1a8] ss:$16 sps:$4 sm:$0xff]  }
 0xcda   : > { %6371 = vmatmul.mubr.bf16.gmra.mrb[124].mxu1 %v5941_v60  ;;  %6424 = vmatmul.mubr.bf16.gmra.mrb[124].mxu0 %v5941_v60  ;;  %v13395_v60 = vld [vmem:[#allocation11 + $0x1c4] ss:$16 sps:$4 sm:$0xff]   ;;  %v13398_v2 = vld [vmem:[#allocation11 + $0x1cc] ss:$16 sps:$4 sm:$0xff]  }
 0xcdb   : > { %6759 = vmatpush1.bf16.msra.mxu1 %v13321_v55  ;;  %6812 = vmatpush1.bf16.msra.mxu0 %v13324_v3  ;;  %v13393_v55 = vld [vmem:[#allocation11 + $0x1c0] ss:$16 sps:$4 sm:$0xff]   ;;  %v13396_v3 = vld [vmem:[#allocation11 + $0x1c8] ss:$16 sps:$4 sm:$0xff]  }
 0xcdc   : > { %6786 = vmatprep.mubr.bf16.mxu1 %v15513_v24  ;;  %6839 = vmatprep.mubr.bf16.mxu0 %v15513_v24  ;;  %v13350_v24 = vld [vmem:[#allocation11 + $0xcc] ss:$16 sps:$4 sm:$0xff]  }
 0xcdd   : > { %6760 = vmatprep.subr.bf16.mxu1 %v13329_v57  ;;  %6813 = vmatprep.subr.bf16.mxu0 %v13332_v5  ;;  %v13401_v57 = vld [vmem:[#allocation11 + $0x1e4] ss:$16 sps:$4 sm:$0xff]   ;;  %v13404_v5 = vld [vmem:[#allocation11 + $0x1ec] ss:$16 sps:$4 sm:$0xff]  }
 0xcdf   : > { %6761 = vmatpush1.bf16.msra.mxu1 %v13327_v58  ;;  %6814 = vmatpush1.bf16.msra.mxu0 %v13330_v7  ;;  %v13399_v58 = vld [vmem:[#allocation11 + $0x1e0] ss:$16 sps:$4 sm:$0xff]   ;;  %v13402_v7 = vld [vmem:[#allocation11 + $0x1e8] ss:$16 sps:$4 sm:$0xff]  }
 0xce0   : > { %6762 = vmatprep.subr.bf16.mxu1 %v13335_v62  ;;  %6815 = vmatprep.subr.bf16.mxu0 %v13338_v11  ;;  %v13426_v62 = vld [vmem:[#allocation11 + $0x44c] ss:$16 sps:$4 sm:$0xff]  }
 0xce1   : > { %v13407_v11 = vld [vmem:[#allocation10 + $0x48] sm:$0xff]  }
 0xce3   : > { %6763 = vmatpush1.bf16.msra.mxu1 %v13333_v19  ;;  %6816 = vmatpush1.bf16.msra.mxu0 %v13336_v6  ;;  %v13408_v19 = vld [vmem:[#allocation10 + $0x58] sm:$0xff]   ;;  %v13421_v6 = vld [vmem:[#allocation11 + $0x440] ss:$16 sps:$4 sm:$0xff]  }
 0xce4   : > { %6764 = vmatprep.subr.bf16.mxu1 %v13341_v21  ;;  %6817 = vmatprep.subr.bf16.mxu0 %v13344_v25  ;;  %v13424_v21 = vld [vmem:[#allocation11 + $0x448] ss:$16 sps:$4 sm:$0xff]   ;;  %v13429_v25 = vld [vmem:[#allocation11 + $0x464] ss:$16 sps:$4 sm:$0xff]  }
 0xce7   : > { %6765 = vmatpush1.bf16.msra.mxu1 %v13339_v26  ;;  %6818 = vmatpush1.bf16.msra.mxu0 %v13342_v30  ;;  %v13432_v26 = vld [vmem:[#allocation11 + $0x46c] ss:$16 sps:$4 sm:$0xff]   ;;  %v13427_v30 = vld [vmem:[#allocation11 + $0x460] ss:$16 sps:$4 sm:$0xff]  }
 0xce8   : > { %6766 = vmatprep.subr.bf16.mxu1 %v13347_v17  ;;  %6819 = vmatprep.subr.bf16.mxu0 %v13350_v24  ;;  %v13430_v17 = vld [vmem:[#allocation11 + $0x468] ss:$16 sps:$4 sm:$0xff]   ;;  %v13435_v24 = vld [vmem:[#allocation11 + $0x484] ss:$16 sps:$4 sm:$0xff]  }
 0xceb   : > { %6767 = vmatpush1.bf16.msra.mxu1 %v13345_v20  ;;  %6820 = vmatpush1.bf16.msra.mxu0 %v13348_v39  ;;  %v13438_v20 = vld [vmem:[#allocation11 + $0x48c] ss:$16 sps:$4 sm:$0xff]   ;;  %v13433_v39 = vld [vmem:[#allocation11 + $0x480] ss:$16 sps:$4 sm:$0xff]  }
 0xcec   : > { %6768 = vmatprep.subr.bf16.mxu1 %v13353_v9  ;;  %6821 = vmatprep.subr.bf16.mxu0 %v13356_v13  ;;  %v13436_v9 = vld [vmem:[#allocation11 + $0x488] ss:$16 sps:$4 sm:$0xff]   ;;  %v13441_v13 = vld [vmem:[#allocation11 + $0x4a4] ss:$16 sps:$4 sm:$0xff]  }
 0xcef   : > { %6769 = vmatpush1.bf16.msra.mxu1 %v13351_v28  ;;  %6822 = vmatpush1.bf16.msra.mxu0 %v13354_v32  ;;  %v13444_v28 = vld [vmem:[#allocation11 + $0x4ac] ss:$16 sps:$4 sm:$0xff]   ;;  %v13439_v32 = vld [vmem:[#allocation11 + $0x4a0] ss:$16 sps:$4 sm:$0xff]  }
 0xcf0   : > { %6770 = vmatprep.subr.bf16.mxu1 %v13359_v59  ;;  %6823 = vmatprep.subr.bf16.mxu0 %v13362_v31  ;;  %v13442_v59 = vld [vmem:[#allocation11 + $0x4a8] ss:$16 sps:$4 sm:$0xff]   ;;  %v13447_v31 = vld [vmem:[#allocation11 + $0x4c4] ss:$16 sps:$4 sm:$0xff]  }
 0xcf3   : > { %6771 = vmatpush1.bf16.msra.mxu1 %v13357_v34  ;;  %6824 = vmatpush1.bf16.msra.mxu0 %v13360_v33  ;;  %v13450_v34 = vld [vmem:[#allocation11 + $0x4cc] ss:$16 sps:$4 sm:$0xff]   ;;  %v13445_v33 = vld [vmem:[#allocation11 + $0x4c0] ss:$16 sps:$4 sm:$0xff]  }
 0xcf4   : > { %6772 = vmatprep.subr.bf16.mxu1 %v13365_v35  ;;  %6825 = vmatprep.subr.bf16.mxu0 %v13368_v37  ;;  %v13448_v35 = vld [vmem:[#allocation11 + $0x4c8] ss:$16 sps:$4 sm:$0xff]   ;;  %v13453_v37 = vld [vmem:[#allocation11 + $0x4e4] ss:$16 sps:$4 sm:$0xff]  }
 0xcf7   : > { %6773 = vmatpush1.bf16.msra.mxu1 %v13363_v40  ;;  %6826 = vmatpush1.bf16.msra.mxu0 %v13366_v36  ;;  %v13456_v40 = vld [vmem:[#allocation11 + $0x4ec] ss:$16 sps:$4 sm:$0xff]   ;;  %v13451_v36 = vld [vmem:[#allocation11 + $0x4e0] ss:$16 sps:$4 sm:$0xff]  }
 0xcf8   : > { %6774 = vmatprep.subr.bf16.mxu1 %v13371_v38  ;;  %6827 = vmatprep.subr.bf16.mxu0 %v13374_v18  ;;  %v13454_v38 = vld [vmem:[#allocation11 + $0x4e8] ss:$16 sps:$4 sm:$0xff]   ;;  %v13459_v18 = vld [vmem:[#allocation11 + $0x504] ss:$16 sps:$4 sm:$0xff]  }
 0xcfb   : > { %6775 = vmatpush1.bf16.msra.mxu1 %v13369_v4  ;;  %6828 = vmatpush1.bf16.msra.mxu0 %v13372_v41  ;;  %v13462_v4 = vld [vmem:[#allocation11 + $0x50c] ss:$16 sps:$4 sm:$0xff]   ;;  %v13457_v41 = vld [vmem:[#allocation11 + $0x500] ss:$16 sps:$4 sm:$0xff]  }
 0xcfc   : > { %6776 = vmatprep.subr.bf16.mxu1 %v13377_v43  ;;  %6829 = vmatprep.subr.bf16.mxu0 %v13380_v44  ;;  %v13460_v43 = vld [vmem:[#allocation11 + $0x508] ss:$16 sps:$4 sm:$0xff]   ;;  %v13465_v44 = vld [vmem:[#allocation11 + $0x524] ss:$16 sps:$4 sm:$0xff]  }
 0xcff   : > { %6777 = vmatpush1.bf16.msra.mxu1 %v13375_v46  ;;  %6830 = vmatpush1.bf16.msra.mxu0 %v13378_v45  ;;  %v13468_v46 = vld [vmem:[#allocation11 + $0x52c] ss:$16 sps:$4 sm:$0xff]   ;;  %v13463_v45 = vld [vmem:[#allocation11 + $0x520] ss:$16 sps:$4 sm:$0xff]  }
 0xd00   : > { %6778 = vmatprep.subr.bf16.mxu1 %v13383_v47  ;;  %6831 = vmatprep.subr.bf16.mxu0 %v13386_v50  ;;  %v13466_v47 = vld [vmem:[#allocation11 + $0x528] ss:$16 sps:$4 sm:$0xff]   ;;  %v13471_v50 = vld [vmem:[#allocation11 + $0x544] ss:$16 sps:$4 sm:$0xff]  }
 0xd03   : > { %6779 = vmatpush1.bf16.msra.mxu1 %v13381_v51  ;;  %6832 = vmatpush1.bf16.msra.mxu0 %v13384_v52  ;;  %v13474_v51 = vld [vmem:[#allocation11 + $0x54c] ss:$16 sps:$4 sm:$0xff]   ;;  %v13469_v52 = vld [vmem:[#allocation11 + $0x540] ss:$16 sps:$4 sm:$0xff]  }
 0xd04   : > { %6780 = vmatprep.subr.bf16.mxu1 %v13389_v53  ;;  %6833 = vmatprep.subr.bf16.mxu0 %v13392_v54  ;;  %v13472_v53 = vld [vmem:[#allocation11 + $0x548] ss:$16 sps:$4 sm:$0xff]   ;;  %v13477_v54 = vld [vmem:[#allocation11 + $0x564] ss:$16 sps:$4 sm:$0xff]  }
 0xd07   : > { %6781 = vmatpush1.bf16.msra.mxu1 %v13387_v56  ;;  %6834 = vmatpush1.bf16.msra.mxu0 %v13390_v42  ;;  %v13480_v56 = vld [vmem:[#allocation11 + $0x56c] ss:$16 sps:$4 sm:$0xff]   ;;  %v13475_v42 = vld [vmem:[#allocation11 + $0x560] ss:$16 sps:$4 sm:$0xff]  }
 0xd08   : > { %6782 = vmatprep.subr.bf16.mxu1 %v13395_v60  ;;  %6835 = vmatprep.subr.bf16.mxu0 %v13398_v2  ;;  %v13478_v60 = vld [vmem:[#allocation11 + $0x568] ss:$16 sps:$4 sm:$0xff]   ;;  %v13483_v2 = vld [vmem:[#allocation11 + $0x584] ss:$16 sps:$4 sm:$0xff]  }
 0xd0b   : > { %6783 = vmatpush1.bf16.msra.mxu1 %v13393_v55  ;;  %6836 = vmatpush1.bf16.msra.mxu0 %v13396_v3  ;;  %v13486_v55 = vld [vmem:[#allocation11 + $0x58c] ss:$16 sps:$4 sm:$0xff]   ;;  %v13481_v3 = vld [vmem:[#allocation11 + $0x580] ss:$16 sps:$4 sm:$0xff]  }
 0xd0c   : > { %6784 = vmatprep.subr.bf16.mxu1 %v13401_v57  ;;  %6837 = vmatprep.subr.bf16.mxu0 %v13404_v5  ;;  %v13484_v57 = vld [vmem:[#allocation11 + $0x588] ss:$16 sps:$4 sm:$0xff]   ;;  %v13489_v5 = vld [vmem:[#allocation11 + $0x5a4] ss:$16 sps:$4 sm:$0xff]  }
 0xd0f   : > { %6785 = vmatpush1.bf16.msra.mxu1 %v13399_v58  ;;  %6838 = vmatpush1.bf16.msra.mxu0 %v13402_v7  ;;  %v13492_v58 = vld [vmem:[#allocation11 + $0x5ac] ss:$16 sps:$4 sm:$0xff]   ;;  %v13487_v7 = vld [vmem:[#allocation11 + $0x5a0] ss:$16 sps:$4 sm:$0xff]  }
 0xd10   : > { %6881 = vmatprep.subr.bf16.mxu1 %v15451_v16  ;;  %6955 = vmatprep.subr.bf16.mxu0 %v15451_v16  ;;  %v13414_v16 = vld [vmem:[#allocation11 + $0x40c] ss:$16 sps:$4 sm:$0xff]  }
 0xd12   : > { %6787 = vmatmul.mubr.bf16.vlgmr.msra.gmra.mrb[120].mxu1 %v15511_v22  ;;  %6840 = vmatmul.mubr.bf16.vlgmr.msra.gmra.mrb[120].mxu0 %v15511_v22  ;;  %v13412_v22 = vld [vmem:[#allocation11 + $0x408] ss:$16 sps:$4 sm:$0xff]  }
 0xd13   : > { %6796 = vmatprep.mubr.bf16.mxu1 %v15517_v23  ;;  %6849 = vmatprep.mubr.bf16.mxu0 %v15517_v23  ;;  %v13420_v23 = vld [vmem:[#allocation11 + $0x42c] ss:$16 sps:$4 sm:$0xff]  }
 0xd14   : > { %6882 = vmatpush1.bf16.msra.mxu1 %v15449_v15  ;;  %6956 = vmatpush1.bf16.msra.mxu0 %v15449_v15  ;;  %v13411_v15 = vld [vmem:[#allocation11 + $0x404] ss:$16 sps:$4 sm:$0xff]  }
 0xd15   : > { %6883 = vmatprep.subr.bf16.mxu1 %v15459_v49  ;;  %6957 = vmatprep.subr.bf16.mxu0 %v15459_v49  ;;  %v13406_v49 = vld [vmem:[#allocation10 + $0x50] sm:$0xff]  }
 0xd18   : > { %6884 = vmatpush1.bf16.msra.mxu1 %v15457_v48  ;;  %6958 = vmatpush1.bf16.msra.mxu0 %v15457_v48  ;;  %v13405_v48 = vld [vmem:[#allocation10 + $0x40] sm:$0xff]  }
 0xd19   : > { %6885 = vmatprep.subr.bf16.mxu1 %v15467_v1  ;;  %6959 = vmatprep.subr.bf16.mxu0 %v15467_v1  ;;  %v13409_v1 = vld [vmem:[#allocation11 + $0x400] ss:$16 sps:$4 sm:$0xff]  }
 0xd1a   : > { %6797 = vmatmul.mubr.bf16.gmra.mrb[124].mxu1 %v15515_v61  ;;  %6850 = vmatmul.mubr.bf16.gmra.mrb[124].mxu0 %v15515_v61  ;;  %v13417_v61 = vld [vmem:[#allocation11 + $0x424] ss:$16 sps:$4 sm:$0xff]  }
 0xd1b   : > { %6913 = vmatprep.mubr.bf16.mxu1 %v14438_v0  ;;  %6987 = vmatprep.mubr.bf16.mxu0 %v14438_v0 }
 0xd1c   : > { %6886 = vmatpush1.bf16.msra.mxu1 %v15465_v63  ;;  %6960 = vmatpush1.bf16.msra.mxu0 %v15465_v63  ;;  %v13415_v63 = vld [vmem:[#allocation11 + $0x420] ss:$16 sps:$4 sm:$0xff]  }
 0xd1d   : > { %6887 = vmatprep.subr.bf16.mxu1 %v15475_v29  ;;  %6961 = vmatprep.subr.bf16.mxu0 %v15475_v29  ;;  %v13418_v29 = vld [vmem:[#allocation11 + $0x428] ss:$16 sps:$4 sm:$0xff]  }
 0xd20   : > { %6888 = vmatpush1.bf16.msra.mxu1 %v15473_v27  ;;  %6962 = vmatpush1.bf16.msra.mxu0 %v15473_v27  ;;  %v13423_v27 = vld [vmem:[#allocation11 + $0x444] ss:$16 sps:$4 sm:$0xff]  }
 0xd21   : > { %7405 = vmatprep.subr.bf16.mxu1 %v13411_v15  ;;  %7458 = vmatprep.subr.bf16.mxu0 %v13414_v16  ;;  %v13490_v15 = vld [vmem:[#allocation11 + $0x5a8] ss:$16 sps:$4 sm:$0xff]   ;;  %v13495_v16 = vld [vmem:[#allocation11 + $0x5c4] ss:$16 sps:$4 sm:$0xff]  }
 0xd23   : > { %11620 = vmatmul.mubr.msk.bf16.vlgmr.msra.gmra.mrb[128].mxu1 %vm765_vm0, %v13405_v48  ;;  %11624 = vmatmul.mubr.msk.bf16.vlgmr.msra.gmra.mrb[128].mxu0 %vm765_vm0, %v13406_v49  ;;  %v13498_v48 = vld [vmem:[#allocation11 + $0x5cc] ss:$16 sps:$4 sm:$0xff]   ;;  %v13493_v49 = vld [vmem:[#allocation11 + $0x5c0] ss:$16 sps:$4 sm:$0xff]  }
 0xd24   : > { %6923 = vmatprep.mubr.bf16.mxu1 %v14438_v0  ;;  %6997 = vmatprep.mubr.bf16.mxu0 %v14438_v0 }
 0xd25   : > { %7406 = vmatpush1.bf16.msra.mxu1 %v13409_v1  ;;  %7459 = vmatpush1.bf16.msra.mxu0 %v13412_v22  ;;  %v13496_v1 = vld [vmem:[#allocation11 + $0x5c8] ss:$16 sps:$4 sm:$0xff]   ;;  %v13501_v22 = vld [vmem:[#allocation11 + $0x5e4] ss:$16 sps:$4 sm:$0xff]  }
 0xd26   : > { %7407 = vmatprep.subr.bf16.mxu1 %v13417_v61  ;;  %7460 = vmatprep.subr.bf16.mxu0 %v13420_v23  ;;  %v13504_v61 = vld [vmem:[#allocation11 + $0x5ec] ss:$16 sps:$4 sm:$0xff]   ;;  %v13499_v23 = vld [vmem:[#allocation11 + $0x5e0] ss:$16 sps:$4 sm:$0xff]  }
 0xd29   : > { %7408 = vmatpush1.bf16.msra.mxu1 %v13415_v63  ;;  %7461 = vmatpush1.bf16.msra.mxu0 %v13418_v29  ;;  %v13502_v63 = vld [vmem:[#allocation11 + $0x5e8] ss:$16 sps:$4 sm:$0xff]   ;;  %v13507_v29 = vld [vmem:[#allocation13 + $0x4] ss:$8 sps:$4 sm:$0xff]  }
 0xd2a   : > { %7409 = vmatprep.subr.bf16.mxu1 %v13423_v27  ;;  %7462 = vmatprep.subr.bf16.mxu0 %v13426_v62  ;;  %v13510_v27 = vld [vmem:[#allocation13 + $0x204] ss:$8 sps:$4 sm:$0xff]  }
 0xd2b   : > { %11621 = vmatmul.mubr.msk.bf16.gmra.mrb[132].mxu1 %vm765_vm0, %v13407_v11  ;;  %11625 = vmatmul.mubr.msk.bf16.gmra.mrb[132].mxu0 %vm765_vm0, %v13408_v19 }
 0xd2d   : > { %7410 = vmatpush1.bf16.msra.mxu1 %v13421_v6  ;;  %7463 = vmatpush1.bf16.msra.mxu0 %v13424_v21 }
 0xd2e   : > { %7411 = vmatprep.subr.bf16.mxu1 %v13429_v25  ;;  %7464 = vmatprep.subr.bf16.mxu0 %v13432_v26 }
 0xd31   : > { %7412 = vmatpush1.bf16.msra.mxu1 %v13427_v30  ;;  %7465 = vmatpush1.bf16.msra.mxu0 %v13430_v17 }
 0xd32   : > { %7413 = vmatprep.subr.bf16.mxu1 %v13435_v24  ;;  %7466 = vmatprep.subr.bf16.mxu0 %v13438_v20 }
 0xd35   : > { %7414 = vmatpush1.bf16.msra.mxu1 %v13433_v39  ;;  %7467 = vmatpush1.bf16.msra.mxu0 %v13436_v9 }
 0xd36   : > { %7415 = vmatprep.subr.bf16.mxu1 %v13441_v13  ;;  %7468 = vmatprep.subr.bf16.mxu0 %v13444_v28  ;;  %v13505_v28 = vld [vmem:[#allocation13] ss:$8 sps:$4 sm:$0xff]  }
 0xd39   : > { %7416 = vmatpush1.bf16.msra.mxu1 %v13439_v32  ;;  %7469 = vmatpush1.bf16.msra.mxu0 %v13442_v59  ;;  %v13508_v32 = vld [vmem:[#allocation13 + $0x200] ss:$8 sps:$4 sm:$0xff]   ;;  %v13513_v59 = vld [vmem:[#allocation13 + $0x14] ss:$8 sps:$4 sm:$0xff]  }
 0xd3a   : > { %7417 = vmatprep.subr.bf16.mxu1 %v13447_v31  ;;  %7470 = vmatprep.subr.bf16.mxu0 %v13450_v34  ;;  %v13516_v31 = vld [vmem:[#allocation13 + $0x214] ss:$8 sps:$4 sm:$0xff]  }
 0xd3d   : > { %7418 = vmatpush1.bf16.msra.mxu1 %v13445_v33  ;;  %7471 = vmatpush1.bf16.msra.mxu0 %v13448_v35 }
 0xd3e   : > { %7419 = vmatprep.subr.bf16.mxu1 %v13453_v37  ;;  %7472 = vmatprep.subr.bf16.mxu0 %v13456_v40 }
 0xd41   : > { %7420 = vmatpush1.bf16.msra.mxu1 %v13451_v36  ;;  %7473 = vmatpush1.bf16.msra.mxu0 %v13454_v38 }
 0xd42   : > { %7421 = vmatprep.subr.bf16.mxu1 %v13459_v18  ;;  %7474 = vmatprep.subr.bf16.mxu0 %v13462_v4  ;;  %v13511_v4 = vld [vmem:[#allocation13 + $0x10] ss:$8 sps:$4 sm:$0xff]  }
 0xd45   : > { %7422 = vmatpush1.bf16.msra.mxu1 %v13457_v41  ;;  %7475 = vmatpush1.bf16.msra.mxu0 %v13460_v43  ;;  %v13514_v41 = vld [vmem:[#allocation13 + $0x210] ss:$8 sps:$4 sm:$0xff]  }
 0xd46   : > { %7423 = vmatprep.subr.bf16.mxu1 %v13465_v44  ;;  %7476 = vmatprep.subr.bf16.mxu0 %v13468_v46 }
 0xd49   : > { %7424 = vmatpush1.bf16.msra.mxu1 %v13463_v45  ;;  %7477 = vmatpush1.bf16.msra.mxu0 %v13466_v47  ;;  %v13519_v45 = vld [vmem:[#allocation13 + $0x24] ss:$8 sps:$4 sm:$0xff]  }
 0xd4a   : > { %7425 = vmatprep.subr.bf16.mxu1 %v13471_v50  ;;  %7478 = vmatprep.subr.bf16.mxu0 %v13474_v51  ;;  %v13522_v47 = vld [vmem:[#allocation13 + $0x224] ss:$8 sps:$4 sm:$0xff]  }
 0xd4d   : > { %7426 = vmatpush1.bf16.msra.mxu1 %v13469_v52  ;;  %7479 = vmatpush1.bf16.msra.mxu0 %v13472_v53  ;;  %v13517_v53 = vld [vmem:[#allocation13 + $0x20] ss:$8 sps:$4 sm:$0xff]  }
 0xd4e   : > { %7427 = vmatprep.subr.bf16.mxu1 %v13477_v54  ;;  %7480 = vmatprep.subr.bf16.mxu0 %v13480_v56  ;;  %v13520_v54 = vld [vmem:[#allocation13 + $0x220] ss:$8 sps:$4 sm:$0xff]   ;;  %v13525_v56 = vld [vmem:[#allocation13 + $0x34] ss:$8 sps:$4 sm:$0xff]  }
 0xd51   : > { %7428 = vmatpush1.bf16.msra.mxu1 %v13475_v42  ;;  %7481 = vmatpush1.bf16.msra.mxu0 %v13478_v60  ;;  %v13528_v42 = vld [vmem:[#allocation13 + $0x234] ss:$8 sps:$4 sm:$0xff]   ;;  %v13523_v60 = vld [vmem:[#allocation13 + $0x30] ss:$8 sps:$4 sm:$0xff]  }
 0xd52   : > { %7429 = vmatprep.subr.bf16.mxu1 %v13483_v2  ;;  %7482 = vmatprep.subr.bf16.mxu0 %v13486_v55  ;;  %v13526_v2 = vld [vmem:[#allocation13 + $0x230] ss:$8 sps:$4 sm:$0xff]   ;;  %v13531_v55 = vld [vmem:[#allocation13 + $0x44] ss:$8 sps:$4 sm:$0xff]  }
 0xd55   : > { %7430 = vmatpush1.bf16.msra.mxu1 %v13481_v3  ;;  %7483 = vmatpush1.bf16.msra.mxu0 %v13484_v57  ;;  %v13534_v3 = vld [vmem:[#allocation13 + $0x244] ss:$8 sps:$4 sm:$0xff]   ;;  %v13529_v57 = vld [vmem:[#allocation13 + $0x40] ss:$8 sps:$4 sm:$0xff]  }
 0xd56   : > { %7431 = vmatprep.subr.bf16.mxu1 %v13489_v5  ;;  %7484 = vmatprep.subr.bf16.mxu0 %v13492_v58  ;;  %v13532_v5 = vld [vmem:[#allocation13 + $0x240] ss:$8 sps:$4 sm:$0xff]   ;;  %v13537_v58 = vld [vmem:[#allocation13 + $0x54] ss:$8 sps:$4 sm:$0xff]  }
 0xd59   : > { %7432 = vmatpush1.bf16.msra.mxu1 %v13487_v7  ;;  %7485 = vmatpush1.bf16.msra.mxu0 %v13490_v15  ;;  %v13540_v7 = vld [vmem:[#allocation13 + $0x254] ss:$8 sps:$4 sm:$0xff]   ;;  %v13535_v15 = vld [vmem:[#allocation13 + $0x50] ss:$8 sps:$4 sm:$0xff]  }
 0xd5a   : > { %7433 = vmatprep.subr.bf16.mxu1 %v13495_v16  ;;  %7486 = vmatprep.subr.bf16.mxu0 %v13498_v48  ;;  %v13538_v16 = vld [vmem:[#allocation13 + $0x250] ss:$8 sps:$4 sm:$0xff]   ;;  %v13543_v48 = vld [vmem:[#allocation13 + $0x64] ss:$8 sps:$4 sm:$0xff]  }
 0xd5d   : > { %7434 = vmatpush1.bf16.msra.mxu1 %v13493_v49  ;;  %7487 = vmatpush1.bf16.msra.mxu0 %v13496_v1  ;;  %v13546_v49 = vld [vmem:[#allocation13 + $0x264] ss:$8 sps:$4 sm:$0xff]   ;;  %v13541_v1 = vld [vmem:[#allocation13 + $0x60] ss:$8 sps:$4 sm:$0xff]  }
 0xd5e   : > { %7435 = vmatprep.subr.bf16.mxu1 %v13501_v22  ;;  %7488 = vmatprep.subr.bf16.mxu0 %v13504_v61  ;;  %v13544_v22 = vld [vmem:[#allocation13 + $0x260] ss:$8 sps:$4 sm:$0xff]   ;;  %v13549_v61 = vld [vmem:[#allocation13 + $0x74] ss:$8 sps:$4 sm:$0xff]  }
 0xd61   : > { %7436 = vmatpush1.bf16.msra.mxu1 %v13499_v23  ;;  %7489 = vmatpush1.bf16.msra.mxu0 %v13502_v63  ;;  %v13552_v23 = vld [vmem:[#allocation13 + $0x274] ss:$8 sps:$4 sm:$0xff]   ;;  %v13547_v63 = vld [vmem:[#allocation13 + $0x70] ss:$8 sps:$4 sm:$0xff]  }
 0xd62   : > { %7973 = vmatprep.subr.bf16.mxu1 %v13507_v29  ;;  %8464 = vmatprep.subr.bf16.mxu0 %v13510_v27  ;;  %v13550_v29 = vld [vmem:[#allocation13 + $0x270] ss:$8 sps:$4 sm:$0xff]   ;;  %v13555_v27 = vld [vmem:[#allocation13 + $0x84] ss:$8 sps:$4 sm:$0xff]  }
 0xdf6   : > { %v6915_v62 = vpop.f32.mrb[128].mxu1  ;;  %v6989_v11 = vpop.f32.mrb[128].mxu0 }
 0xdf7   : > { %v7008_v19 = vmax.f32 %v6915_v62, %v6989_v11  ;;  %v6917_v6 = vpop.f32.mrb[129].mxu1  ;;  %v6991_v21 = vpop.f32.mrb[129].mxu0  ;;  %v13558_v62 = vld [vmem:[#allocation13 + $0x284] ss:$8 sps:$4 sm:$0xff]   ;;  %v13553_v11 = vld [vmem:[#allocation13 + $0x80] ss:$8 sps:$4 sm:$0xff]  }
 0xdf8   : > { %v7009_v25 = vmax.f32 %v6917_v6, %v6991_v21  ;;  %v6919_v26 = vpop.f32.mrb[130].mxu1  ;;  %v6993_v30 = vpop.f32.mrb[130].mxu0  ;;  %v13561_v6 = vld [vmem:[#allocation13 + $0x94] ss:$8 sps:$4 sm:$0xff]  }
 0xdf9   : > { %v7010_v17 = vmax.f32 %v6919_v26, %v6993_v30  ;;  %v6921_v24 = vpop.f32.mrb[131].mxu1  ;;  %v6995_v20 = vpop.f32.mrb[131].mxu0  ;;  %v13564_v21 = vld [vmem:[#allocation13 + $0x294] ss:$8 sps:$4 sm:$0xff]   ;;  %v13562_v26 = vld [vmem:[#allocation13 + $0x290] ss:$8 sps:$4 sm:$0xff]  }
 0xdfa   : > { %v7011_v39 = vmax.f32 %v6921_v24, %v6995_v20  ;;  %v13567_v30 = vld [vmem:[#allocation13 + $0xa4] ss:$8 sps:$4 sm:$0xff]   ;;  %v13565_v24 = vld [vmem:[#allocation13 + $0xa0] ss:$8 sps:$4 sm:$0xff]  }
 0xdfb   : > { %v7016_v9 = vpack.c.bf16 %v7010_v17, %v7008_v19  ;;  %v13556_v19 = vld [vmem:[#allocation13 + $0x280] ss:$8 sps:$4 sm:$0xff]   ;;  %v13570_v17 = vld [vmem:[#allocation13 + $0x2a4] ss:$8 sps:$4 sm:$0xff]  }
 0xdfc   : > { %v7017_v13 = vpack.c.bf16 %v7011_v39, %v7009_v25  ;;  %v13559_v25 = vld [vmem:[#allocation13 + $0x90] ss:$8 sps:$4 sm:$0xff]   ;;  %v13568_v20 = vld [vmem:[#allocation13 + $0x2a0] ss:$8 sps:$4 sm:$0xff]   ;;  %v13573_v39 = vld [vmem:[#allocation13 + $0xb4] ss:$8 sps:$4 sm:$0xff]  }
 0xdfe   : > { %v6925_v34 = vpop.f32.mrb[132].mxu1  ;;  %v6999_v33 = vpop.f32.mrb[132].mxu0  ;;  %7437 = vmatprep.mubr.bf16.mxu1 %v7017_v13  ;;  %7490 = vmatprep.mubr.bf16.mxu0 %v7017_v13  ;;  %v13571_v13 = vld [vmem:[#allocation13 + $0xb0] ss:$8 sps:$4 sm:$0xff]  }
 0xdff   : > { %v7012_v35 = vmax.f32 %v6925_v34, %v6999_v33  ;;  %v6927_v37 = vpop.f32.mrb[133].mxu1  ;;  %v7001_v40 = vpop.f32.mrb[133].mxu0  ;;  %7438 = vmatmul.mubr.bf16.vlgmr.msra.gmra.mrb[120].mxu1 %v7016_v9  ;;  %7491 = vmatmul.mubr.bf16.vlgmr.msra.gmra.mrb[120].mxu0 %v7016_v9  ;;  %v13576_v9 = vld [vmem:[#allocation13 + $0x2b4] ss:$8 sps:$4 sm:$0xff]   ;;  %v13580_v34 = vld [vmem:[#allocation13 + $0x2c0] ss:$8 sps:$4 sm:$0xff]  }
 0xe00   : > { %v7013_v36 = vmax.f32 %v6927_v37, %v7001_v40  ;;  %v6929_v38 = vpop.f32.mrb[134].mxu1  ;;  %v7003_v18 = vpop.f32.mrb[134].mxu0  ;;  %7974 = vmatpush1.bf16.msra.mxu1 %v13505_v28  ;;  %8465 = vmatpush1.bf16.msra.mxu0 %v13508_v32  ;;  %v13574_v28 = vld [vmem:[#allocation13 + $0x2b0] ss:$8 sps:$4 sm:$0xff]   ;;  %v13579_v32 = vld [vmem:[#allocation13 + $0xc4] ss:$8 sps:$4 sm:$0xff]  }
 0xe01   : > { %v7014_v43 = vmax.f32 %v6929_v38, %v7003_v18  ;;  %v6931_v44 = vpop.f32.mrb[135].mxu1  ;;  %v7005_v46 = vpop.f32.mrb[135].mxu0  ;;  %7975 = vmatprep.subr.bf16.mxu1 %v13513_v59  ;;  %8466 = vmatprep.subr.bf16.mxu0 %v13516_v31  ;;  %v13582_v59 = vld [vmem:[#allocation13 + $0x2c4] ss:$8 sps:$4 sm:$0xff]   ;;  %v13577_v31 = vld [vmem:[#allocation13 + $0xc0] ss:$8 sps:$4 sm:$0xff]  }
 0xe02   : > { %v7015_v50 = vmax.f32 %v6931_v44, %v7005_v46  ;;  %v13585_v33 = vld [vmem:[#allocation13 + $0xd4] ss:$8 sps:$4 sm:$0xff]   ;;  %v13583_v37 = vld [vmem:[#allocation13 + $0xd0] ss:$8 sps:$4 sm:$0xff]   ;;  %v13594_v38 = vld [vmem:[#allocation13 + $0x2e4] ss:$8 sps:$4 sm:$0xff]  }
 0xe03   : > { %v7018_v51 = vpack.c.bf16 %v7014_v43, %v7012_v35  ;;  %v13588_v35 = vld [vmem:[#allocation13 + $0x2d4] ss:$8 sps:$4 sm:$0xff]   ;;  %v13586_v40 = vld [vmem:[#allocation13 + $0x2d0] ss:$8 sps:$4 sm:$0xff]   ;;  %v13589_v18 = vld [vmem:[#allocation13 + $0xe0] ss:$8 sps:$4 sm:$0xff]  }
 0xe04   : > { %v7019_v52 = vpack.c.bf16 %v7015_v50, %v7013_v36  ;;  %7976 = vmatpush1.bf16.msra.mxu1 %v13511_v4  ;;  %8467 = vmatpush1.bf16.msra.mxu0 %v13514_v41  ;;  %v13591_v36 = vld [vmem:[#allocation13 + $0xe4] ss:$8 sps:$4 sm:$0xff]   ;;  %v13592_v4 = vld [vmem:[#allocation13 + $0x2e0] ss:$8 sps:$4 sm:$0xff]   ;;  %v13597_v41 = vld [vmem:[#allocation13 + $0xf4] ss:$8 sps:$4 sm:$0xff]  }
 0xe05   : > { %7977 = vmatprep.subr.bf16.mxu1 %v13519_v45  ;;  %8468 = vmatprep.subr.bf16.mxu0 %v13522_v47  ;;  %v13600_v43 = vld [vmem:[#allocation13 + $0x2f4] ss:$8 sps:$4 sm:$0xff]   ;;  %v13595_v44 = vld [vmem:[#allocation13 + $0xf0] ss:$8 sps:$4 sm:$0xff]   ;;  %v13603_v45 = vld [vmem:[#allocation13 + $0x104] ss:$8 sps:$4 sm:$0xff]  }
 0xe06   : > { %7447 = vmatprep.mubr.bf16.mxu1 %v7019_v52  ;;  %7500 = vmatprep.mubr.bf16.mxu0 %v7019_v52  ;;  %v13598_v46 = vld [vmem:[#allocation13 + $0x2f0] ss:$8 sps:$4 sm:$0xff]   ;;  %v13606_v47 = vld [vmem:[#allocation13 + $0x304] ss:$8 sps:$4 sm:$0xff]   ;;  %v7527_v50 = vld [vmem:[%s15766_s16] sm:$0xf] }
 0xe07   : > { %7448 = vmatmul.mubr.bf16.gmra.mrb[124].mxu1 %v7018_v51  ;;  %7501 = vmatmul.mubr.bf16.gmra.mrb[124].mxu0 %v7018_v51  ;;  %v7532_v51 = vrot.slane %v7527_v50, %v15360_v8  ;;  %v7540_v52 = vrot.slane %v7527_v50, %v15362_v10 }
 0xe08   : > { %7978 = vmatpush1.bf16.msra.mxu1 %v13517_v53  ;;  %8469 = vmatpush1.bf16.msra.mxu0 %v13520_v54  ;;  %v7536_v53 = vrot.slane %v7527_v50, %v15367_v12  ;;  %v7544_v54 = vrot.slane %v7527_v50, %v15369_v14 }
 0xe09   : > { %7979 = vmatprep.subr.bf16.mxu1 %v13525_v56  ;;  %8470 = vmatprep.subr.bf16.mxu0 %v13528_v42 }
 0xe0c   : > { %7980 = vmatpush1.bf16.msra.mxu1 %v13523_v60  ;;  %8471 = vmatpush1.bf16.msra.mxu0 %v13526_v2 }
 0xe0d   : > { %7981 = vmatprep.subr.bf16.mxu1 %v13531_v55  ;;  %8472 = vmatprep.subr.bf16.mxu0 %v13534_v3 }
 0xe10   : > { %7982 = vmatpush1.bf16.msra.mxu1 %v13529_v57  ;;  %8473 = vmatpush1.bf16.msra.mxu0 %v13532_v5 }
 0xe11   : > { %7983 = vmatprep.subr.bf16.mxu1 %v13537_v58  ;;  %8474 = vmatprep.subr.bf16.mxu0 %v13540_v7 }
 0xe14   : > { %7984 = vmatpush1.bf16.msra.mxu1 %v13535_v15  ;;  %8475 = vmatpush1.bf16.msra.mxu0 %v13538_v16 }
 0xe15   : > { %7985 = vmatprep.subr.bf16.mxu1 %v13543_v48  ;;  %8476 = vmatprep.subr.bf16.mxu0 %v13546_v49 }
 0xe18   : > { %7986 = vmatpush1.bf16.msra.mxu1 %v13541_v1  ;;  %8477 = vmatpush1.bf16.msra.mxu0 %v13544_v22 }
 0xe19   : > { %7987 = vmatprep.subr.bf16.mxu1 %v13549_v61  ;;  %8478 = vmatprep.subr.bf16.mxu0 %v13552_v23 }
 0xe1c   : > { %7988 = vmatpush1.bf16.msra.mxu1 %v13547_v63  ;;  %8479 = vmatpush1.bf16.msra.mxu0 %v13550_v29 }
 0xe1d   : > { %7989 = vmatprep.subr.bf16.mxu1 %v13555_v27  ;;  %8480 = vmatprep.subr.bf16.mxu0 %v13558_v62 }
 0xe20   : > { %7990 = vmatpush1.bf16.msra.mxu1 %v13553_v11  ;;  %8481 = vmatpush1.bf16.msra.mxu0 %v13556_v19 }
 0xe21   : > { %7991 = vmatprep.subr.bf16.mxu1 %v13561_v6  ;;  %8482 = vmatprep.subr.bf16.mxu0 %v13564_v21 }
 0xe24   : > { %7992 = vmatpush1.bf16.msra.mxu1 %v13559_v25  ;;  %8483 = vmatpush1.bf16.msra.mxu0 %v13562_v26 }
 0xe25   : > { %7993 = vmatprep.subr.bf16.mxu1 %v13567_v30  ;;  %8484 = vmatprep.subr.bf16.mxu0 %v13570_v17 }
 0xe28   : > { %7994 = vmatpush1.bf16.msra.mxu1 %v13565_v24  ;;  %8485 = vmatpush1.bf16.msra.mxu0 %v13568_v20  ;;  %v13601_v24 = vld [vmem:[#allocation13 + $0x100] ss:$8 sps:$4 sm:$0xff]  }
 0xe29   : > { %7995 = vmatprep.subr.bf16.mxu1 %v13573_v39  ;;  %8486 = vmatprep.subr.bf16.mxu0 %v13576_v9  ;;  %v13604_v20 = vld [vmem:[#allocation13 + $0x300] ss:$8 sps:$4 sm:$0xff]  }
 0xe2c   : > { %7996 = vmatpush1.bf16.msra.mxu1 %v13571_v13  ;;  %8487 = vmatpush1.bf16.msra.mxu0 %v13574_v28 }
 0xe2d   : > { %7997 = vmatprep.subr.bf16.mxu1 %v13579_v32  ;;  %8488 = vmatprep.subr.bf16.mxu0 %v13582_v59  ;;  %v13609_v32 = vld [vmem:[#allocation13 + $0x114] ss:$8 sps:$4 sm:$0xff]  }
 0xe2e   : > { %v13612_v59 = vld [vmem:[#allocation13 + $0x314] ss:$8 sps:$4 sm:$0xff]  }
 0xe30   : > { %7998 = vmatpush1.bf16.msra.mxu1 %v13577_v31  ;;  %8489 = vmatpush1.bf16.msra.mxu0 %v13580_v34 }
 0xe31   : > { %7999 = vmatprep.subr.bf16.mxu1 %v13585_v33  ;;  %8490 = vmatprep.subr.bf16.mxu0 %v13588_v35 }
 0xe34   : > { %8000 = vmatpush1.bf16.msra.mxu1 %v13583_v37  ;;  %8491 = vmatpush1.bf16.msra.mxu0 %v13586_v40 }
 0xe35   : > { %8001 = vmatprep.subr.bf16.mxu1 %v13591_v36  ;;  %8492 = vmatprep.subr.bf16.mxu0 %v13594_v38 }
 0xe38   : > { %8002 = vmatpush1.bf16.msra.mxu1 %v13589_v18  ;;  %8493 = vmatpush1.bf16.msra.mxu0 %v13592_v4 }
 0xe39   : > { %8003 = vmatprep.subr.bf16.mxu1 %v13597_v41  ;;  %8494 = vmatprep.subr.bf16.mxu0 %v13600_v43  ;;  %v13607_v41 = vld [vmem:[#allocation13 + $0x110] ss:$8 sps:$4 sm:$0xff]  }
 0xe3a   : > { %v13610_v43 = vld [vmem:[#allocation13 + $0x310] ss:$8 sps:$4 sm:$0xff]  }
 0xe3c   : > { %8004 = vmatpush1.bf16.msra.mxu1 %v13595_v44  ;;  %8495 = vmatpush1.bf16.msra.mxu0 %v13598_v46  ;;  %v13615_v44 = vld [vmem:[#allocation13 + $0x124] ss:$8 sps:$4 sm:$0xff]  }
 0xe3d   : > { %8026 = vmatprep.subr.bf16.mxu1 %v13603_v45  ;;  %8517 = vmatprep.subr.bf16.mxu0 %v13606_v47 }
 0xed2   : > { %v7439_v56 = vpop.f32.mrb[120].mxu1  ;;  %v7492_v42 = vpop.f32.mrb[120].mxu0 }
 0xed3   : > { %v7549_v60 = vadd.f32 %v7532_v51, %v7439_v56  ;;  %v7551_v2 = vadd.f32 %v7540_v52, %v7492_v42  ;;  %v7441_v55 = vpop.f32.mrb[121].mxu1  ;;  %v7494_v3 = vpop.f32.mrb[121].mxu0  ;;  %v13618_v56 = vld [vmem:[#allocation13 + $0x324] ss:$8 sps:$4 sm:$0xff]  }
 0xed4   : > { %v7550_v57 = vadd.f32 %v7536_v53, %v7441_v55  ;;  %v7552_v5 = vadd.f32 %v7544_v54, %v7494_v3  ;;  %v7443_v58 = vpop.f32.mrb[122].mxu1  ;;  %v7496_v7 = vpop.f32.mrb[122].mxu0  ;;  %v13613_v3 = vld [vmem:[#allocation13 + $0x120] ss:$8 sps:$4 sm:$0xff]  }
 0xed5   : > { %v7553_v15 = vadd.f32 %v7532_v51, %v7443_v58  ;;  %v7555_v16 = vadd.f32 %v7540_v52, %v7496_v7  ;;  %v7445_v48 = vpop.f32.mrb[123].mxu1  ;;  %v7498_v49 = vpop.f32.mrb[123].mxu0  ;;  %v7565_v61 = vmax.f32 %v7549_v60, 0.0  ;;  %v7567_v23 = vmax.f32 %v7551_v2, 0.0  ;;  %v13624_v58 = vld [vmem:[#allocation13 + $0x334] ss:$8 sps:$4 sm:$0xff]  }
 0xed6   : > { %v7554_v1 = vadd.f32 %v7536_v53, %v7445_v48  ;;  %v7556_v22 = vadd.f32 %v7544_v54, %v7498_v49  ;;  %v7566_v27 = vmax.f32 %v7550_v57, 0.0  ;;  %v7568_v62 = vmax.f32 %v7552_v5, 0.0  ;;  %v13616_v57 = vld [vmem:[#allocation13 + $0x320] ss:$8 sps:$4 sm:$0xff]   ;;  %v13621_v5 = vld [vmem:[#allocation13 + $0x134] ss:$8 sps:$4 sm:$0xff]  }
 0xed7   : > { %v7569_v63 = vmax.f32 %v7553_v15, 0.0  ;;  %v7571_v29 = vmax.f32 %v7555_v16, 0.0  ;;  %v13619_v7 = vld [vmem:[#allocation13 + $0x130] ss:$8 sps:$4 sm:$0xff]   ;;  %v13627_v16 = vld [vmem:[#allocation13 + $0x144] ss:$8 sps:$4 sm:$0xff]  }
 0xed8   : > { %v7570_v11 = vmax.f32 %v7554_v1, 0.0  ;;  %v7572_v19 = vmax.f32 %v7556_v22, 0.0  ;;  %v13622_v15 = vld [vmem:[#allocation13 + $0x330] ss:$8 sps:$4 sm:$0xff]   ;;  %v13630_v48 = vld [vmem:[#allocation13 + $0x344] ss:$8 sps:$4 sm:$0xff]  }
 0xed9   : > { %v7581_v6 = vpack.c.bf16 %v7569_v63, %v7565_v61  ;;  %v15558_v21 = vpack.c.bf16 %v7571_v29, %v7567_v23  ;;  %v13625_v49 = vld [vmem:[#allocation13 + $0x140] ss:$8 sps:$4 sm:$0xff]   ;;  %v13633_v22 = vld [vmem:[#allocation13 + $0x154] ss:$8 sps:$4 sm:$0xff]   ;;  %v13631_v23 = vld [vmem:[#allocation13 + $0x150] ss:$8 sps:$4 sm:$0xff]  }
 0xeda   : > { %v7582_v25 = vpack.c.bf16 %v7570_v11, %v7566_v27  ;;  %v7584_v26 = vpack.c.bf16 %v7572_v19, %v7568_v62  ;;  %v7449_v30 = vpop.f32.mrb[124].mxu1  ;;  %v7502_v17 = vpop.f32.mrb[124].mxu0  ;;  %v13628_v1 = vld [vmem:[#allocation13 + $0x340] ss:$8 sps:$4 sm:$0xff]   ;;  %v13636_v61 = vld [vmem:[#allocation13 + $0x354] ss:$8 sps:$4 sm:$0xff]  }
 0xedb   : > { %v7557_v39 = vadd.f32 %v7532_v51, %v7449_v30  ;;  %v7559_v9 = vadd.f32 %v7540_v52, %v7502_v17  ;;  %v7451_v13 = vpop.f32.mrb[125].mxu1  ;;  %v7504_v28 = vpop.f32.mrb[125].mxu0  ;;  %v13634_v63 = vld [vmem:[#allocation13 + $0x350] ss:$8 sps:$4 sm:$0xff]   ;;  %v13639_v29 = vld [vmem:[#allocation13 + $0x164] ss:$8 sps:$4 sm:$0xff]  }
 0xedc   : > { %v7558_v31 = vadd.f32 %v7536_v53, %v7451_v13  ;;  %v7560_v34 = vadd.f32 %v7544_v54, %v7504_v28  ;;  %v7453_v33 = vpop.f32.mrb[126].mxu1  ;;  %v7506_v35 = vpop.f32.mrb[126].mxu0  ;;  %8005 = vmatprep.mubr.bf16.mxu1 %v7582_v25  ;;  %8496 = vmatprep.mubr.bf16.mxu0 %v7582_v25  ;;  %v13642_v27 = vld [vmem:[#allocation13 + $0x364] ss:$8 sps:$4 sm:$0xff]   ;;  %v13637_v62 = vld [vmem:[#allocation13 + $0x160] ss:$8 sps:$4 sm:$0xff]  }
 0xedd   : > { %v7561_v37 = vadd.f32 %v7532_v51, %v7453_v33  ;;  %v7563_v40 = vadd.f32 %v7540_v52, %v7506_v35  ;;  %v7455_v36 = vpop.f32.mrb[127].mxu1  ;;  %v7508_v38 = vpop.f32.mrb[127].mxu0  ;;  %8006 = vmatmul.mubr.bf16.vlgmr.msra.gmra.mrb[136].mxu1 %v7581_v6  ;;  %8497 = vmatmul.mubr.bf16.vlgmr.msra.gmra.mrb[136].mxu0 %v7581_v6  ;;  %v7573_v46 = vmax.f32 %v7557_v39, 0.0  ;;  %v7575_v45 = vmax.f32 %v7559_v9, 0.0  ;;  %v13640_v11 = vld [vmem:[#allocation13 + $0x360] ss:$8 sps:$4 sm:$0xff]  }
 0xede   : > { %v7562_v18 = vadd.f32 %v7536_v53, %v7455_v36  ;;  %v7564_v4 = vadd.f32 %v7544_v54, %v7508_v38  ;;  %8027 = vmatpush1.bf16.msra.mxu1 %v13601_v24  ;;  %8518 = vmatpush1.bf16.msra.mxu0 %v13604_v20  ;;  %v7574_v51 = vmax.f32 %v7558_v31, 0.0  ;;  %v7576_v52 = vmax.f32 %v7560_v34, 0.0  ;;  %v13645_v19 = vld [vmem:[#allocation13 + $0x174] ss:$8 sps:$4 sm:$0xff]   ;;  %v13643_v25 = vld [vmem:[#allocation13 + $0x170] ss:$8 sps:$4 sm:$0xff]  }
 0xedf   : > { %v7577_v47 = vmax.f32 %v7561_v37, 0.0  ;;  %v7579_v50 = vmax.f32 %v7563_v40, 0.0  ;;  %8028 = vmatprep.subr.bf16.mxu1 %v13609_v32  ;;  %8519 = vmatprep.subr.bf16.mxu0 %v13612_v59  ;;  %v13648_v6 = vld [vmem:[#allocation13 + $0x374] ss:$8 sps:$4 sm:$0xff]   ;;  %v13651_v30 = vld [vmem:[#allocation13 + $0x184] ss:$8 sps:$4 sm:$0xff]  }
 0xee0   : > { %v7578_v42 = vmax.f32 %v7562_v18, 0.0  ;;  %v7580_v60 = vmax.f32 %v7564_v4, 0.0  ;;  %v13654_v17 = vld [vmem:[#allocation13 + $0x384] ss:$8 sps:$4 sm:$0xff]   ;;  %v13649_v24 = vld [vmem:[#allocation13 + $0x180] ss:$8 sps:$4 sm:$0xff]  }
 0xee1   : > { %v7585_v2 = vpack.c.bf16 %v7577_v47, %v7573_v46  ;;  %v15560_v55 = vpack.c.bf16 %v7579_v50, %v7575_v45  ;;  %v13652_v20 = vld [vmem:[#allocation13 + $0x380] ss:$8 sps:$4 sm:$0xff]   ;;  %v13657_v39 = vld [vmem:[#allocation13 + $0x194] ss:$8 sps:$4 sm:$0xff]   ;;  %v13655_v13 = vld [vmem:[#allocation13 + $0x190] ss:$8 sps:$4 sm:$0xff]  }
 0xee2   : > { %v7586_v53 = vpack.c.bf16 %v7578_v42, %v7574_v51  ;;  %v15562_v54 = vpack.c.bf16 %v7580_v60, %v7576_v52  ;;  %8029 = vmatpush1.bf16.msra.mxu1 %v13607_v41  ;;  %8520 = vmatpush1.bf16.msra.mxu0 %v13610_v43  ;;  %v13660_v9 = vld [vmem:[#allocation13 + $0x394] ss:$8 sps:$4 sm:$0xff]   ;;  %v13658_v28 = vld [vmem:[#allocation13 + $0x390] ss:$8 sps:$4 sm:$0xff]   ;;  %v13663_v32 = vld [vmem:[#allocation13 + $0x1a4] ss:$8 sps:$4 sm:$0xff]  }
 0xee3   : > { %8030 = vmatprep.subr.bf16.mxu1 %v13615_v44  ;;  %8521 = vmatprep.subr.bf16.mxu0 %v13618_v56  ;;  %v13666_v59 = vld [vmem:[#allocation13 + $0x3a4] ss:$8 sps:$4 sm:$0xff]   ;;  %v13661_v31 = vld [vmem:[#allocation13 + $0x1a0] ss:$8 sps:$4 sm:$0xff]   ;;  %v13669_v33 = vld [vmem:[#allocation13 + $0x1b4] ss:$8 sps:$4 sm:$0xff]  }
 0xee4   : > { %8015 = vmatprep.mubr.bf16.mxu1 %v7586_v53  ;;  %8506 = vmatprep.mubr.bf16.mxu0 %v7586_v53  ;;  %v13664_v34 = vld [vmem:[#allocation13 + $0x3a0] ss:$8 sps:$4 sm:$0xff]   ;;  %v13672_v35 = vld [vmem:[#allocation13 + $0x3b4] ss:$8 sps:$4 sm:$0xff]   ;;  %v13667_v37 = vld [vmem:[#allocation13 + $0x1b0] ss:$8 sps:$4 sm:$0xff]  }
 0xee5   : > { %8016 = vmatmul.mubr.bf16.gmra.mrb[140].mxu1 %v7585_v2  ;;  %8507 = vmatmul.mubr.bf16.gmra.mrb[140].mxu0 %v7585_v2  ;;  %v13670_v40 = vld [vmem:[#allocation13 + $0x3b0] ss:$8 sps:$4 sm:$0xff]   ;;  %v13675_v36 = vld [vmem:[#allocation13 + $0x1c4] ss:$8 sps:$4 sm:$0xff]   ;;  %v13673_v18 = vld [vmem:[#allocation13 + $0x1c0] ss:$8 sps:$4 sm:$0xff]  }
 0xee6   : > { %8031 = vmatpush1.bf16.msra.mxu1 %v13613_v3  ;;  %8522 = vmatpush1.bf16.msra.mxu0 %v13616_v57  ;;  %v13678_v38 = vld [vmem:[#allocation13 + $0x3c4] ss:$8 sps:$4 sm:$0xff]   ;;  %v13676_v4 = vld [vmem:[#allocation13 + $0x3c0] ss:$8 sps:$4 sm:$0xff]   ;;  %v13681_v41 = vld [vmem:[#allocation13 + $0x1d4] ss:$8 sps:$4 sm:$0xff]  }
 0xee7   : > { %8058 = vmatprep.mubr.bf16.mxu1 %v7584_v26  ;;  %8549 = vmatprep.mubr.bf16.mxu0 %v7584_v26  ;;  %v13646_v26 = vld [vmem:[#allocation13 + $0x370] ss:$8 sps:$4 sm:$0xff]   ;;  %v13684_v43 = vld [vmem:[#allocation13 + $0x3d4] ss:$8 sps:$4 sm:$0xff]   ;;  %v13687_v45 = vld [vmem:[#allocation13 + $0x1e4] ss:$8 sps:$4 sm:$0xff]  }
 0xee8   : > { %8032 = vmatprep.subr.bf16.mxu1 %v13621_v5  ;;  %8523 = vmatprep.subr.bf16.mxu0 %v13624_v58  ;;  %v13679_v44 = vld [vmem:[#allocation13 + $0x1d0] ss:$8 sps:$4 sm:$0xff]   ;;  %v13690_v47 = vld [vmem:[#allocation13 + $0x3e4] ss:$8 sps:$4 sm:$0xff]   ;;  %v13685_v50 = vld [vmem:[#allocation13 + $0x1e0] ss:$8 sps:$4 sm:$0xff]  }
 0xee9   : > { %v13682_v46 = vld [vmem:[#allocation13 + $0x3d0] ss:$8 sps:$4 sm:$0xff]   ;;  %v13688_v56 = vld [vmem:[#allocation13 + $0x3e0] ss:$8 sps:$4 sm:$0xff]   ;;  %v13693_v51 = vld [vmem:[#allocation13 + $0x1f4] ss:$8 sps:$4 sm:$0xff]  }
 0xeea   : > { %8033 = vmatpush1.bf16.msra.mxu1 %v13619_v7  ;;  %8524 = vmatpush1.bf16.msra.mxu0 %v13622_v15  ;;  %v13696_v52 = vld [vmem:[#allocation13 + $0x3f4] ss:$8 sps:$4 sm:$0xff]   ;;  %v13691_v42 = vld [vmem:[#allocation13 + $0x1f0] ss:$8 sps:$4 sm:$0xff]  }
 0xeeb   : > { %8034 = vmatprep.subr.bf16.mxu1 %v13627_v16  ;;  %8525 = vmatprep.subr.bf16.mxu0 %v13630_v48  ;;  %v13694_v60 = vld [vmem:[#allocation13 + $0x3f0] ss:$8 sps:$4 sm:$0xff]   ;;  %v13703_v53 = vld [vmem:[#allocation16 + $0x204] ss:$16 sps:$4 sm:$0xff]  }
 0xeec   : > { %v13701_v2 = vld [vmem:[#allocation16 + $0x200] ss:$16 sps:$4 sm:$0xff]   ;;  %v13709_v3 = vld [vmem:[#allocation16 + $0x224] ss:$16 sps:$4 sm:$0xff]  }
 0xeed   : > { %v13707_v57 = vld [vmem:[#allocation16 + $0x220] ss:$16 sps:$4 sm:$0xff]   ;;  %v13715_v5 = vld [vmem:[#allocation16 + $0x244] ss:$16 sps:$4 sm:$0xff]  }
 0xeee   : > { %8035 = vmatpush1.bf16.msra.mxu1 %v13625_v49  ;;  %8526 = vmatpush1.bf16.msra.mxu0 %v13628_v1  ;;  %v13721_v58 = vld [vmem:[#allocation16 + $0x264] ss:$16 sps:$4 sm:$0xff]   ;;  %v13731_v16 = vld [vmem:[#allocation16 + $0x2a0] ss:$16 sps:$4 sm:$0xff]  }
 0xeef   : > { %8036 = vmatprep.subr.bf16.mxu1 %v13633_v22  ;;  %8527 = vmatprep.subr.bf16.mxu0 %v13636_v61  ;;  %v13727_v7 = vld [vmem:[#allocation16 + $0x284] ss:$16 sps:$4 sm:$0xff]   ;;  %v13737_v49 = vld [vmem:[#allocation16 + $0x2c0] ss:$16 sps:$4 sm:$0xff]  }
 0xef0   : > { %v13733_v15 = vld [vmem:[#allocation16 + $0x2a4] ss:$16 sps:$4 sm:$0xff]   ;;  %v13743_v22 = vld [vmem:[#allocation16 + $0x2e0] ss:$16 sps:$4 sm:$0xff]  }
 0xef1   : > { %v13739_v48 = vld [vmem:[#allocation16 + $0x2c4] ss:$16 sps:$4 sm:$0xff]  }
 0xef2   : > { %8037 = vmatpush1.bf16.msra.mxu1 %v13631_v23  ;;  %8528 = vmatpush1.bf16.msra.mxu0 %v13634_v63  ;;  %v13745_v1 = vld [vmem:[#allocation16 + $0x2e4] ss:$16 sps:$4 sm:$0xff]   ;;  %v13749_v23 = vld [vmem:[#allocation16 + $0x300] ss:$16 sps:$4 sm:$0xff]  }
 0xef3   : > { %8038 = vmatprep.subr.bf16.mxu1 %v13639_v29  ;;  %8529 = vmatprep.subr.bf16.mxu0 %v13642_v27  ;;  %v13751_v61 = vld [vmem:[#allocation16 + $0x304] ss:$16 sps:$4 sm:$0xff]  }
 0xef6   : > { %8039 = vmatpush1.bf16.msra.mxu1 %v13637_v62  ;;  %8530 = vmatpush1.bf16.msra.mxu0 %v13640_v11 }
 0xef7   : > { %8040 = vmatprep.subr.bf16.mxu1 %v13645_v19  ;;  %8531 = vmatprep.subr.bf16.mxu0 %v13648_v6 }
 0xefa   : > { %8041 = vmatpush1.bf16.msra.mxu1 %v13643_v25  ;;  %8532 = vmatpush1.bf16.msra.mxu0 %v13646_v26 }
 0xefb   : > { %8042 = vmatprep.subr.bf16.mxu1 %v13651_v30  ;;  %8533 = vmatprep.subr.bf16.mxu0 %v13654_v17 }
 0xefe   : > { %8043 = vmatpush1.bf16.msra.mxu1 %v13649_v24  ;;  %8534 = vmatpush1.bf16.msra.mxu0 %v13652_v20 }
 0xeff   : > { %8044 = vmatprep.subr.bf16.mxu1 %v13657_v39  ;;  %8535 = vmatprep.subr.bf16.mxu0 %v13660_v9 }
 0xf02   : > { %8045 = vmatpush1.bf16.msra.mxu1 %v13655_v13  ;;  %8536 = vmatpush1.bf16.msra.mxu0 %v13658_v28 }
 0xf03   : > { %8046 = vmatprep.subr.bf16.mxu1 %v13663_v32  ;;  %8537 = vmatprep.subr.bf16.mxu0 %v13666_v59 }
 0xf06   : > { %8047 = vmatpush1.bf16.msra.mxu1 %v13661_v31  ;;  %8538 = vmatpush1.bf16.msra.mxu0 %v13664_v34 }
 0xf07   : > { %8048 = vmatprep.subr.bf16.mxu1 %v13669_v33  ;;  %8539 = vmatprep.subr.bf16.mxu0 %v13672_v35 }
 0xf0a   : > { %8049 = vmatpush1.bf16.msra.mxu1 %v13667_v37  ;;  %8540 = vmatpush1.bf16.msra.mxu0 %v13670_v40 }
 0xf0b   : > { %8050 = vmatprep.subr.bf16.mxu1 %v13675_v36  ;;  %8541 = vmatprep.subr.bf16.mxu0 %v13678_v38 }
 0xf0e   : > { %8051 = vmatpush1.bf16.msra.mxu1 %v13673_v18  ;;  %8542 = vmatpush1.bf16.msra.mxu0 %v13676_v4  ;;  %v13697_v4 = vld [vmem:[#allocation14] sm:$0xff]  }
 0xf0f   : > { %8052 = vmatprep.subr.bf16.mxu1 %v13681_v41  ;;  %8543 = vmatprep.subr.bf16.mxu0 %v13684_v43  ;;  %v13698_v41 = vld [vmem:[#allocation14 + $0x8] sm:$0xff]   ;;  %v13699_v43 = vld [vmem:[#allocation14 + $0x10] sm:$0xff]  }
 0xf12   : > { %8053 = vmatpush1.bf16.msra.mxu1 %v13679_v44  ;;  %8544 = vmatpush1.bf16.msra.mxu0 %v13682_v46  ;;  %v13706_v44 = vld [vmem:[#allocation16 + $0x20c] ss:$16 sps:$4 sm:$0xff]  }
 0xf13   : > { %8054 = vmatprep.subr.bf16.mxu1 %v13687_v45  ;;  %8545 = vmatprep.subr.bf16.mxu0 %v13690_v47  ;;  %v13700_v46 = vld [vmem:[#allocation14 + $0x18] sm:$0xff]  }
 0xf14   : > { %v13704_v45 = vld [vmem:[#allocation16 + $0x208] ss:$16 sps:$4 sm:$0xff]   ;;  %v13712_v47 = vld [vmem:[#allocation16 + $0x22c] ss:$16 sps:$4 sm:$0xff]  }
 0xf16   : > { %8055 = vmatpush1.bf16.msra.mxu1 %v13685_v50  ;;  %8546 = vmatpush1.bf16.msra.mxu0 %v13688_v56  ;;  %v13710_v50 = vld [vmem:[#allocation16 + $0x228] ss:$16 sps:$4 sm:$0xff]   ;;  %v13718_v56 = vld [vmem:[#allocation16 + $0x24c] ss:$16 sps:$4 sm:$0xff]  }
 0xf17   : > { %8056 = vmatprep.subr.bf16.mxu1 %v13693_v51  ;;  %8547 = vmatprep.subr.bf16.mxu0 %v13696_v52  ;;  %v13716_v51 = vld [vmem:[#allocation16 + $0x248] ss:$16 sps:$4 sm:$0xff]   ;;  %v13724_v52 = vld [vmem:[#allocation16 + $0x26c] ss:$16 sps:$4 sm:$0xff]  }
 0xf1a   : > { %8057 = vmatpush1.bf16.msra.mxu1 %v13691_v42  ;;  %8548 = vmatpush1.bf16.msra.mxu0 %v13694_v60  ;;  %v13722_v42 = vld [vmem:[#allocation16 + $0x268] ss:$16 sps:$4 sm:$0xff]   ;;  %v13730_v60 = vld [vmem:[#allocation16 + $0x28c] ss:$16 sps:$4 sm:$0xff]  }
 0xf1b   : > { %9259 = vmatprep.subr.bf16.mxu0 %v13703_v53  ;;  %v13736_v53 = vld [vmem:[#allocation16 + $0x2ac] ss:$16 sps:$4 sm:$0xff]  }
 0xf1d   : > { %8059 = vmatmul.mubr.bf16.vlgmr.msra.gmra.mrb[136].mxu1 %v15558_v21  ;;  %8550 = vmatmul.mubr.bf16.vlgmr.msra.gmra.mrb[136].mxu0 %v15558_v21  ;;  %v13713_v21 = vld [vmem:[#allocation16 + $0x240] ss:$16 sps:$4 sm:$0xff]  }
 0xf1e   : > { %8068 = vmatprep.mubr.bf16.mxu1 %v15562_v54  ;;  %8559 = vmatprep.mubr.bf16.mxu0 %v15562_v54  ;;  %v13719_v54 = vld [vmem:[#allocation16 + $0x260] ss:$16 sps:$4 sm:$0xff]  }
 0xf1f   : > { %9260 = vmatpush1.bf16.msra.mxu0 %v13701_v2  ;;  %v13728_v2 = vld [vmem:[#allocation16 + $0x288] ss:$16 sps:$4 sm:$0xff]  }
 0xf20   : > { %9261 = vmatprep.subr.bf16.mxu0 %v13709_v3  ;;  %v13734_v3 = vld [vmem:[#allocation16 + $0x2a8] ss:$16 sps:$4 sm:$0xff]  }
 0xf23   : > { %9262 = vmatpush1.bf16.msra.mxu0 %v13707_v57  ;;  %v13742_v57 = vld [vmem:[#allocation16 + $0x2cc] ss:$16 sps:$4 sm:$0xff]  }
 0xf24   : > { %9263 = vmatprep.subr.bf16.mxu0 %v13715_v5  ;;  %v13740_v5 = vld [vmem:[#allocation16 + $0x2c8] ss:$16 sps:$4 sm:$0xff]  }
 0xf25   : > { %8069 = vmatmul.mubr.bf16.gmra.mrb[140].mxu1 %v15560_v55  ;;  %8560 = vmatmul.mubr.bf16.gmra.mrb[140].mxu0 %v15560_v55  ;;  %v13725_v55 = vld [vmem:[#allocation16 + $0x280] ss:$16 sps:$4 sm:$0xff]  }
 0xf26   : > { %8625 = vmatprep.mubr.bf16.mxu1 %v14438_v0 }
 0xf27   : > { %9264 = vmatpush1.bf16.msra.mxu0 %v13713_v21  ;;  %v13748_v21 = vld [vmem:[#allocation16 + $0x2ec] ss:$16 sps:$4 sm:$0xff]  }
 0xf28   : > { %9265 = vmatprep.subr.bf16.mxu0 %v13721_v58  ;;  %v13746_v58 = vld [vmem:[#allocation16 + $0x2e8] ss:$16 sps:$4 sm:$0xff]  }
 0xf2b   : > { %9266 = vmatpush1.bf16.msra.mxu0 %v13719_v54  ;;  %v13754_v54 = vld [vmem:[#allocation16 + $0x30c] ss:$16 sps:$4 sm:$0xff]  }
 0xf2c   : > { %9267 = vmatprep.subr.bf16.mxu0 %v13727_v7  ;;  %v13752_v7 = vld [vmem:[#allocation16 + $0x308] ss:$16 sps:$4 sm:$0xff]  }
 0xf2f   : > { %9268 = vmatpush1.bf16.msra.mxu0 %v13725_v55  ;;  %v13757_v55 = vld [vmem:[#allocation16 + $0x324] ss:$16 sps:$4 sm:$0xff]  }
 0xf30   : > { %9269 = vmatprep.subr.bf16.mxu0 %v13733_v15  ;;  %v13760_v15 = vld [vmem:[#allocation16 + $0x32c] ss:$16 sps:$4 sm:$0xff]  }
 0xf33   : > { %9270 = vmatpush1.bf16.msra.mxu0 %v13731_v16  ;;  %v13755_v16 = vld [vmem:[#allocation16 + $0x320] ss:$16 sps:$4 sm:$0xff]  }
 0xf34   : > { %9271 = vmatprep.subr.bf16.mxu0 %v13739_v48  ;;  %v13758_v48 = vld [vmem:[#allocation16 + $0x328] ss:$16 sps:$4 sm:$0xff]  }
 0xf37   : > { %9272 = vmatpush1.bf16.msra.mxu0 %v13737_v49  ;;  %v13763_v49 = vld [vmem:[#allocation16 + $0x344] ss:$16 sps:$4 sm:$0xff]  }
 0xf38   : > { %9273 = vmatprep.subr.bf16.mxu0 %v13745_v1  ;;  %v13766_v1 = vld [vmem:[#allocation16 + $0x34c] ss:$16 sps:$4 sm:$0xff]  }
 0xf3b   : > { %9274 = vmatpush1.bf16.msra.mxu0 %v13743_v22  ;;  %v13761_v22 = vld [vmem:[#allocation16 + $0x340] ss:$16 sps:$4 sm:$0xff]  }
 0xf3c   : > { %9275 = vmatprep.subr.bf16.mxu0 %v13751_v61  ;;  %v13764_v61 = vld [vmem:[#allocation16 + $0x348] ss:$16 sps:$4 sm:$0xff]  }
 0xf3f   : > { %9276 = vmatpush1.bf16.msra.mxu0 %v13749_v23  ;;  %v13769_v23 = vld [vmem:[#allocation16 + $0x364] ss:$16 sps:$4 sm:$0xff]  }
 0xf40   : > { %9277 = vmatprep.subr.bf16.mxu0 %v13757_v55 }
 0xf43   : > { %9278 = vmatpush1.bf16.msra.mxu0 %v13755_v16 }
 0xf44   : > { %9279 = vmatprep.subr.bf16.mxu0 %v13763_v49  ;;  %v13800_v49 = vld [vmem:[#allocation16 + $0x8] ss:$16 sps:$4 sm:$0xff]  }
 0xf47   : > { %9280 = vmatpush1.bf16.msra.mxu0 %v13761_v22  ;;  %v13808_v22 = vld [vmem:[#allocation16 + $0x2c] ss:$16 sps:$4 sm:$0xff]  }
 0xf48   : > { %9281 = vmatprep.subr.bf16.mxu0 %v13769_v23  ;;  %v13806_v23 = vld [vmem:[#allocation16 + $0x28] ss:$16 sps:$4 sm:$0xff]  }
 0xff0   : > { %v8060_v63 = vpop.f32.mrb[136].mxu1  ;;  %v8551_v29 = vpop.f32.mrb[136].mxu0 }
 0xff1   : > { %v8570_v27 = vmax.f32 %v8060_v63, %v8551_v29  ;;  %v8062_v62 = vpop.f32.mrb[137].mxu1  ;;  %v8553_v11 = vpop.f32.mrb[137].mxu0  ;;  %v13772_v63 = vld [vmem:[#allocation16 + $0x36c] ss:$16 sps:$4 sm:$0xff]   ;;  %v13767_v29 = vld [vmem:[#allocation16 + $0x360] ss:$16 sps:$4 sm:$0xff]  }
 0xff2   : > { %v8571_v19 = vmax.f32 %v8062_v62, %v8553_v11  ;;  %v8064_v6 = vpop.f32.mrb[138].mxu1  ;;  %v8555_v25 = vpop.f32.mrb[138].mxu0  ;;  %9282 = vmatpush1.bf16.msra.mxu0 %v13767_v29  ;;  %v13773_v62 = vld [vmem:[#allocation16 + $0x380] ss:$16 sps:$4 sm:$0xff]   ;;  %v13775_v11 = vld [vmem:[#allocation16 + $0x384] ss:$16 sps:$4 sm:$0xff]  }
 0xff3   : > { %v8572_v26 = vmax.f32 %v8064_v6, %v8555_v25  ;;  %v8066_v30 = vpop.f32.mrb[139].mxu1  ;;  %v8557_v17 = vpop.f32.mrb[139].mxu0  ;;  %v13778_v6 = vld [vmem:[#allocation16 + $0x38c] ss:$16 sps:$4 sm:$0xff]   ;;  %9283 = vmatprep.subr.bf16.mxu0 %v13775_v11  ;;  %v13781_v25 = vld [vmem:[#allocation16 + $0x3a4] ss:$16 sps:$4 sm:$0xff]  }
 0xff4   : > { %v8573_v24 = vmax.f32 %v8066_v30, %v8557_v17  ;;  %v13779_v30 = vld [vmem:[#allocation16 + $0x3a0] ss:$16 sps:$4 sm:$0xff]   ;;  %v13782_v17 = vld [vmem:[#allocation16 + $0x3a8] ss:$16 sps:$4 sm:$0xff]   ;;  %v13814_v29 = vld [vmem:[#allocation16 + $0x4c] ss:$16 sps:$4 sm:$0xff]  }
 0xff5   : > { %v15571_v20 = vpack.c.bf16 %v8572_v26, %v8570_v27  ;;  %v13770_v27 = vld [vmem:[#allocation16 + $0x368] ss:$16 sps:$4 sm:$0xff]   ;;  %v13784_v26 = vld [vmem:[#allocation16 + $0x3ac] ss:$16 sps:$4 sm:$0xff]   ;;  %v13817_v11 = vld [vmem:[#allocation16 + $0x64] ss:$16 sps:$4 sm:$0xff]  }
 0xff6   : > { %v15573_v39 = vpack.c.bf16 %v8573_v24, %v8571_v19  ;;  %v13776_v19 = vld [vmem:[#allocation16 + $0x388] ss:$16 sps:$4 sm:$0xff]   ;;  %9284 = vmatpush1.bf16.msra.mxu0 %v13773_v62  ;;  %v13787_v24 = vld [vmem:[#allocation16 + $0x3c4] ss:$16 sps:$4 sm:$0xff]  }
 0xff7   : > { %9285 = vmatprep.subr.bf16.mxu0 %v13781_v25  ;;  %v13812_v62 = vld [vmem:[#allocation16 + $0x48] ss:$16 sps:$4 sm:$0xff]  }
 0xff8   : > { %v8070_v9 = vpop.f32.mrb[140].mxu1  ;;  %v8561_v13 = vpop.f32.mrb[140].mxu0  ;;  %8593 = vmatprep.subr.bf16.mxu1 %v15573_v39  ;;  %v13818_v25 = vld [vmem:[#allocation16 + $0x68] ss:$16 sps:$4 sm:$0xff]  }
 0xff9   : > { %v8574_v28 = vmax.f32 %v8070_v9, %v8561_v13  ;;  %v8072_v32 = vpop.f32.mrb[141].mxu1  ;;  %v8563_v59 = vpop.f32.mrb[141].mxu0  ;;  %8594 = vmatpush1.bf16.msra.mxu1 %v15571_v20  ;;  %v13790_v9 = vld [vmem:[#allocation16 + $0x3cc] ss:$16 sps:$4 sm:$0xff]   ;;  %v13785_v13 = vld [vmem:[#allocation16 + $0x3c0] ss:$16 sps:$4 sm:$0xff]  }
 0xffa   : > { %v8575_v31 = vmax.f32 %v8072_v32, %v8563_v59  ;;  %v8074_v34 = vpop.f32.mrb[142].mxu1  ;;  %v8565_v33 = vpop.f32.mrb[142].mxu0  ;;  %9286 = vmatpush1.bf16.msra.mxu0 %v13779_v30  ;;  %v13793_v32 = vld [vmem:[#allocation16 + $0x3e4] ss:$16 sps:$4 sm:$0xff]   ;;  %v13796_v59 = vld [vmem:[#allocation16 + $0x3ec] ss:$16 sps:$4 sm:$0xff]  }
 0xffb   : > { %v8576_v35 = vmax.f32 %v8074_v34, %v8565_v33  ;;  %v8076_v37 = vpop.f32.mrb[143].mxu1  ;;  %v8567_v40 = vpop.f32.mrb[143].mxu0  ;;  %9287 = vmatprep.subr.bf16.mxu0 %v13787_v24  ;;  %v13794_v34 = vld [vmem:[#allocation16 + $0x3e8] ss:$16 sps:$4 sm:$0xff]   ;;  %v13799_v33 = vld [vmem:[#allocation16 + $0x4] ss:$16 sps:$4 sm:$0xff]  }
 0xffc   : > { %v8577_v36 = vmax.f32 %v8076_v37, %v8567_v40  ;;  %v13826_v30 = vld [vmem:[#allocation16 + $0x8c] ss:$16 sps:$4 sm:$0xff]   ;;  %v13824_v24 = vld [vmem:[#allocation16 + $0x88] ss:$16 sps:$4 sm:$0xff]  }
 0xffd   : > { %v15577_v38 = vpack.c.bf16 %v8576_v35, %v8574_v28  ;;  %v13788_v28 = vld [vmem:[#allocation16 + $0x3c8] ss:$16 sps:$4 sm:$0xff]   ;;  %v13802_v35 = vld [vmem:[#allocation16 + $0xc] ss:$16 sps:$4 sm:$0xff]  }
 0xffe   : > { %v15579_v18 = vpack.c.bf16 %v8577_v36, %v8575_v31  ;;  %9288 = vmatpush1.bf16.msra.mxu0 %v13785_v13  ;;  %v13791_v31 = vld [vmem:[#allocation16 + $0x3e0] ss:$16 sps:$4 sm:$0xff]   ;;  %v13832_v13 = vld [vmem:[#allocation16 + $0xac] ss:$16 sps:$4 sm:$0xff]  }
 0xfff   : > { %9289 = vmatprep.subr.bf16.mxu0 %v13793_v32  ;;  %v13830_v32 = vld [vmem:[#allocation16 + $0xa8] ss:$16 sps:$4 sm:$0xff]  }
0x1000   : > { %8595 = vmatprep.subr.bf16.mxu1 %v15579_v18 }
0x1001   : > { %8596 = vmatpush1.bf16.msra.mxu1 %v15577_v38 }
0x1002   : > { %8647 = vmatprep.subr.bf16.mxu1 %v15573_v39  ;;  %9290 = vmatpush1.bf16.msra.mxu0 %v13791_v31  ;;  %v13838_v31 = vld [vmem:[#allocation16 + $0xcc] ss:$16 sps:$4 sm:$0xff]  }
0x1003   : > { %9665 = vmatprep.subr.bf16.mxu0 %v13799_v33  ;;  %v13836_v33 = vld [vmem:[#allocation16 + $0xc8] ss:$16 sps:$4 sm:$0xff]  }
0x1004   : > { %11819 = vmatmul.mubr.msk.bf16.vlgmr.msra.gmra.mrb[144].mxu1 %vm8589_vm1, %v13697_v4 }
0x1005   : > { %8648 = vmatpush1.bf16.msra.mxu1 %v15571_v20  ;;  %8679 = vmatprep.mubr.bf16.mxu1 %v14438_v0 }
0x1006   : > { %8649 = vmatprep.subr.bf16.mxu1 %v15579_v18 }
0x1009   : > { %8650 = vmatpush1.bf16.msra.mxu1 %v15577_v38 }
0x100a   : > { %8771 = vmatprep.subr.bf16.mxu1 %v15573_v39 }
0x100c   : > { %11821 = vmatmul.mubr.msk.bf16.vlgmr.msra.gmra.mrb[148].mxu1 %vm8589_vm1, %v13698_v41 }
0x100d   : > { %8772 = vmatpush1.bf16.msra.mxu1 %v15571_v20  ;;  %8803 = vmatprep.mubr.bf16.mxu1 %v14438_v0 }
0x100e   : > { %8773 = vmatprep.subr.bf16.mxu1 %v15579_v18 }
0x1011   : > { %8774 = vmatpush1.bf16.msra.mxu1 %v15577_v38 }
0x1012   : > { %8825 = vmatprep.subr.bf16.mxu1 %v15573_v39 }
0x1014   : > { %11823 = vmatmul.mubr.msk.bf16.vlgmr.msra.gmra.mrb[152].mxu1 %vm8589_vm1, %v13699_v43 }
0x1015   : > { %8826 = vmatpush1.bf16.msra.mxu1 %v15571_v20  ;;  %8857 = vmatprep.mubr.bf16.mxu1 %v14438_v0 }
0x1016   : > { %8827 = vmatprep.subr.bf16.mxu1 %v15579_v18 }
0x1019   : > { %8828 = vmatpush1.bf16.msra.mxu1 %v15577_v38 }
0x101a   : > { %9302 = vmatprep.subr.bf16.mxu1 %v13706_v44 }
0x101c   : > { %11825 = vmatmul.mubr.msk.bf16.vlgmr.msra.gmra.mrb[156].mxu1 %vm8589_vm1, %v13700_v46 }
0x101d   : > { %9303 = vmatpush1.bf16.msra.mxu1 %v13704_v45 }
0x101e   : > { %9304 = vmatprep.subr.bf16.mxu1 %v13712_v47 }
0x1021   : > { %9305 = vmatpush1.bf16.msra.mxu1 %v13710_v50 }
0x1022   : > { %9306 = vmatprep.subr.bf16.mxu1 %v13718_v56 }
0x1025   : > { %9307 = vmatpush1.bf16.msra.mxu1 %v13716_v51 }
0x1026   : > { %9308 = vmatprep.subr.bf16.mxu1 %v13724_v52 }
0x1029   : > { %9309 = vmatpush1.bf16.msra.mxu1 %v13722_v42 }
0x102a   : > { %9310 = vmatprep.subr.bf16.mxu1 %v13730_v60 }
0x102d   : > { %9311 = vmatpush1.bf16.msra.mxu1 %v13728_v2 }
0x102e   : > { %9312 = vmatprep.subr.bf16.mxu1 %v13736_v53 }
0x1031   : > { %9313 = vmatpush1.bf16.msra.mxu1 %v13734_v3 }
0x1032   : > { %9314 = vmatprep.subr.bf16.mxu1 %v13742_v57 }
0x1035   : > { %9315 = vmatpush1.bf16.msra.mxu1 %v13740_v5 }
0x1036   : > { %9316 = vmatprep.subr.bf16.mxu1 %v13748_v21 }
0x1039   : > { %9317 = vmatpush1.bf16.msra.mxu1 %v13746_v58 }
0x103a   : > { %9318 = vmatprep.subr.bf16.mxu1 %v13754_v54 }
0x103d   : > { %9319 = vmatpush1.bf16.msra.mxu1 %v13752_v7 }
0x103e   : > { %9320 = vmatprep.subr.bf16.mxu1 %v13760_v15 }
0x1041   : > { %9321 = vmatpush1.bf16.msra.mxu1 %v13758_v48  ;;  %v13797_v48 = vld [vmem:[#allocation16] ss:$16 sps:$4 sm:$0xff]  }
0x1042   : > { %9322 = vmatprep.subr.bf16.mxu1 %v13766_v1  ;;  %v13805_v1 = vld [vmem:[#allocation16 + $0x24] ss:$16 sps:$4 sm:$0xff]  }
0x1045   : > { %9323 = vmatpush1.bf16.msra.mxu1 %v13764_v61  ;;  %v13803_v61 = vld [vmem:[#allocation16 + $0x20] ss:$16 sps:$4 sm:$0xff]  }
0x1046   : > { %9324 = vmatprep.subr.bf16.mxu1 %v13772_v63  ;;  %v13811_v63 = vld [vmem:[#allocation16 + $0x44] ss:$16 sps:$4 sm:$0xff]  }
0x1049   : > { %9325 = vmatpush1.bf16.msra.mxu1 %v13770_v27  ;;  %v13809_v27 = vld [vmem:[#allocation16 + $0x40] ss:$16 sps:$4 sm:$0xff]  }
0x104a   : > { %9326 = vmatprep.subr.bf16.mxu1 %v13778_v6  ;;  %v13815_v6 = vld [vmem:[#allocation16 + $0x60] ss:$16 sps:$4 sm:$0xff]  }
0x104d   : > { %9327 = vmatpush1.bf16.msra.mxu1 %v13776_v19  ;;  %v13820_v19 = vld [vmem:[#allocation16 + $0x6c] ss:$16 sps:$4 sm:$0xff]  }
0x104e   : > { %9328 = vmatprep.subr.bf16.mxu1 %v13784_v26  ;;  %v13823_v26 = vld [vmem:[#allocation16 + $0x84] ss:$16 sps:$4 sm:$0xff]  }
0x1051   : > { %9329 = vmatpush1.bf16.msra.mxu1 %v13782_v17  ;;  %v13821_v17 = vld [vmem:[#allocation16 + $0x80] ss:$16 sps:$4 sm:$0xff]  }
0x1052   : > { %9330 = vmatprep.subr.bf16.mxu1 %v13790_v9  ;;  %v13829_v9 = vld [vmem:[#allocation16 + $0xa4] ss:$16 sps:$4 sm:$0xff]  }
0x1055   : > { %9331 = vmatpush1.bf16.msra.mxu1 %v13788_v28  ;;  %v13827_v28 = vld [vmem:[#allocation16 + $0xa0] ss:$16 sps:$4 sm:$0xff]  }
0x1056   : > { %9332 = vmatprep.subr.bf16.mxu1 %v13796_v59  ;;  %v13835_v59 = vld [vmem:[#allocation16 + $0xc4] ss:$16 sps:$4 sm:$0xff]  }
0x1059   : > { %9333 = vmatpush1.bf16.msra.mxu1 %v13794_v34  ;;  %v13833_v34 = vld [vmem:[#allocation16 + $0xc0] ss:$16 sps:$4 sm:$0xff]  }
0x105a   : > { %9708 = vmatprep.subr.bf16.mxu1 %v13802_v35  ;;  %v13841_v35 = vld [vmem:[#allocation16 + $0xe4] ss:$16 sps:$4 sm:$0xff]  }
0x10d7   : > { %v8627_v37 = vpop.f32.mrb[144].mxu1 }
0x10d8   : > { %v8629_v40 = vpop.f32.mrb[145].mxu1 }
0x10d9   : > { %v8631_v36 = vpop.f32.mrb[146].mxu1 }
0x10da   : > { %v8633_v4 = vpop.f32.mrb[147].mxu1 }
0x10df   : > { %v8681_v41 = vpop.f32.mrb[148].mxu1 }
0x10e0   : > { %v8690_v43 = vmax.f32 %v8627_v37, %v8681_v41  ;;  %v8683_v44 = vpop.f32.mrb[149].mxu1  ;;  %v13844_v37 = vld [vmem:[#allocation16 + $0xec] ss:$16 sps:$4 sm:$0xff]  }
0x10e1   : > { %v8691_v46 = vmax.f32 %v8629_v40, %v8683_v44  ;;  %v8685_v45 = vpop.f32.mrb[150].mxu1  ;;  %v13839_v40 = vld [vmem:[#allocation16 + $0xe0] ss:$16 sps:$4 sm:$0xff]   ;;  %v13850_v41 = vld [vmem:[#allocation16 + $0x10c] ss:$16 sps:$4 sm:$0xff]  }
0x10e2   : > { %v8692_v47 = vmax.f32 %v8631_v36, %v8685_v45  ;;  %v8687_v50 = vpop.f32.mrb[151].mxu1  ;;  %v13842_v36 = vld [vmem:[#allocation16 + $0xe8] ss:$16 sps:$4 sm:$0xff]   ;;  %v13856_v45 = vld [vmem:[#allocation16 + $0x12c] ss:$16 sps:$4 sm:$0xff]  }
0x10e3   : > { %v8693_v56 = vmax.f32 %v8633_v4, %v8687_v50  ;;  %v13847_v4 = vld [vmem:[#allocation16 + $0x104] ss:$16 sps:$4 sm:$0xff]   ;;  %v13848_v44 = vld [vmem:[#allocation16 + $0x108] ss:$16 sps:$4 sm:$0xff]  }
0x10e4   : > { %v15602_v51 = vpack.c.bf16 %v8692_v47, %v8690_v43  ;;  %v13845_v43 = vld [vmem:[#allocation16 + $0x100] ss:$16 sps:$4 sm:$0xff]   ;;  %v13854_v50 = vld [vmem:[#allocation16 + $0x128] ss:$16 sps:$4 sm:$0xff]  }
0x10e5   : > { %v8695_v52 = vpack.c.bf16 %v8693_v56, %v8691_v46  ;;  %v13853_v46 = vld [vmem:[#allocation16 + $0x124] ss:$16 sps:$4 sm:$0xff]   ;;  %v13851_v47 = vld [vmem:[#allocation16 + $0x120] ss:$16 sps:$4 sm:$0xff]  }
0x10e6   : > { %v13859_v56 = vld [vmem:[#allocation16 + $0x144] ss:$16 sps:$4 sm:$0xff]  }
0x10e7   : > { %v8805_v42 = vpop.f32.mrb[152].mxu1 }
0x10e8   : > { %v8807_v60 = vpop.f32.mrb[153].mxu1 }
0x10e9   : > { %v8809_v2 = vpop.f32.mrb[154].mxu1 }
0x10ea   : > { %v8811_v53 = vpop.f32.mrb[155].mxu1 }
0x10ef   : > { %v8859_v3 = vpop.f32.mrb[156].mxu1 }
0x10f0   : > { %v8868_v57 = vmax.f32 %v8805_v42, %v8859_v3  ;;  %v8861_v5 = vpop.f32.mrb[157].mxu1  ;;  %v13857_v42 = vld [vmem:[#allocation16 + $0x140] ss:$16 sps:$4 sm:$0xff]  }
0x10f1   : > { %v8869_v21 = vmax.f32 %v8807_v60, %v8861_v5  ;;  %v8863_v58 = vpop.f32.mrb[158].mxu1  ;;  %v13860_v60 = vld [vmem:[#allocation16 + $0x148] ss:$16 sps:$4 sm:$0xff]   ;;  %v13863_v3 = vld [vmem:[#allocation16 + $0x160] ss:$16 sps:$4 sm:$0xff]  }
0x10f2   : > { %v8870_v54 = vmax.f32 %v8809_v2, %v8863_v58  ;;  %v8865_v7 = vpop.f32.mrb[159].mxu1  ;;  %v13865_v2 = vld [vmem:[#allocation16 + $0x164] ss:$16 sps:$4 sm:$0xff]   ;;  %v13869_v58 = vld [vmem:[#allocation16 + $0x180] ss:$16 sps:$4 sm:$0xff]  }
0x10f3   : > { %v8871_v55 = vmax.f32 %v8811_v53, %v8865_v7  ;;  %v13868_v53 = vld [vmem:[#allocation16 + $0x16c] ss:$16 sps:$4 sm:$0xff]   ;;  %v13871_v5 = vld [vmem:[#allocation16 + $0x184] ss:$16 sps:$4 sm:$0xff]  }
0x10f4   : > { %v8872_v15 = vpack.c.bf16 %v8870_v54, %v8868_v57  ;;  %v13866_v57 = vld [vmem:[#allocation16 + $0x168] ss:$16 sps:$4 sm:$0xff]   ;;  %v13877_v7 = vld [vmem:[#allocation16 + $0x1a4] ss:$16 sps:$4 sm:$0xff]  }
0x10f5   : > { %v8873_v16 = vpack.c.bf16 %v8871_v55, %v8869_v21  ;;  %v13874_v21 = vld [vmem:[#allocation16 + $0x18c] ss:$16 sps:$4 sm:$0xff]   ;;  %v13872_v54 = vld [vmem:[#allocation16 + $0x188] ss:$16 sps:$4 sm:$0xff]  }
0x10f6   : > { %v13880_v55 = vld [vmem:[#allocation16 + $0x1ac] ss:$16 sps:$4 sm:$0xff]  }
0x10f7   : > { %9291 = vmatprep.mubr.bf16.mxu0 %v8873_v16  ;;  %9334 = vmatprep.mubr.bf16.mxu1 %v8873_v16  ;;  %v13878_v16 = vld [vmem:[#allocation16 + $0x1a8] ss:$16 sps:$4 sm:$0xff]  }
0x10f8   : > { %9292 = vmatmul.mubr.bf16.vlgmr.msra.gmra.mrb[144].mxu0 %v8872_v15  ;;  %9335 = vmatmul.mubr.bf16.vlgmr.msra.gmra.mrb[160].mxu1 %v8872_v15  ;;  %v13875_v15 = vld [vmem:[#allocation16 + $0x1a0] ss:$16 sps:$4 sm:$0xff]  }
0x10f9   : > { %9666 = vmatpush1.bf16.msra.mxu0 %v13797_v48  ;;  %9709 = vmatpush1.bf16.msra.mxu1 %v13800_v49  ;;  %v13883_v48 = vld [vmem:[#allocation16 + $0x1c4] ss:$16 sps:$4 sm:$0xff]   ;;  %v13886_v49 = vld [vmem:[#allocation16 + $0x1cc] ss:$16 sps:$4 sm:$0xff]  }
0x10fa   : > { %9697 = vmatprep.mubr.bf16.mxu0 %v8695_v52  ;;  %9740 = vmatprep.mubr.bf16.mxu1 %v8695_v52  ;;  %v13862_v52 = vld [vmem:[#allocation16 + $0x14c] ss:$16 sps:$4 sm:$0xff]  }
0x10fb   : > { %9667 = vmatprep.subr.bf16.mxu0 %v13805_v1  ;;  %9710 = vmatprep.subr.bf16.mxu1 %v13808_v22  ;;  %v13881_v1 = vld [vmem:[#allocation16 + $0x1c0] ss:$16 sps:$4 sm:$0xff]   ;;  %v13884_v22 = vld [vmem:[#allocation16 + $0x1c8] ss:$16 sps:$4 sm:$0xff]  }
0x10fd   : > { %9668 = vmatpush1.bf16.msra.mxu0 %v13803_v61  ;;  %9711 = vmatpush1.bf16.msra.mxu1 %v13806_v23  ;;  %v13889_v61 = vld [vmem:[#allocation16 + $0x1e4] ss:$16 sps:$4 sm:$0xff]   ;;  %v13892_v23 = vld [vmem:[#allocation16 + $0x1ec] ss:$16 sps:$4 sm:$0xff]  }
0x10fe   : > { %9669 = vmatprep.subr.bf16.mxu0 %v13811_v63  ;;  %9712 = vmatprep.subr.bf16.mxu1 %v13814_v29  ;;  %v13887_v63 = vld [vmem:[#allocation16 + $0x1e0] ss:$16 sps:$4 sm:$0xff]   ;;  %v13890_v29 = vld [vmem:[#allocation16 + $0x1e8] ss:$16 sps:$4 sm:$0xff]  }
0x1101   : > { %9670 = vmatpush1.bf16.msra.mxu0 %v13809_v27  ;;  %9713 = vmatpush1.bf16.msra.mxu1 %v13812_v62  ;;  %v13897_v27 = vld [vmem:[#allocation16 + $0x404] ss:$16 sps:$4 sm:$0xff]   ;;  %v13900_v62 = vld [vmem:[#allocation16 + $0x40c] ss:$16 sps:$4 sm:$0xff]  }
0x1102   : > { %9671 = vmatprep.subr.bf16.mxu0 %v13817_v11  ;;  %9714 = vmatprep.subr.bf16.mxu1 %v13820_v19  ;;  %v13893_v11 = vld [vmem:[#allocation14 + $0x20] sm:$0xff]   ;;  %v13898_v19 = vld [vmem:[#allocation16 + $0x408] ss:$16 sps:$4 sm:$0xff]  }
0x1105   : > { %9672 = vmatpush1.bf16.msra.mxu0 %v13815_v6  ;;  %9715 = vmatpush1.bf16.msra.mxu1 %v13818_v25  ;;  %v13906_v6 = vld [vmem:[#allocation16 + $0x42c] ss:$16 sps:$4 sm:$0xff]   ;;  %v13909_v25 = vld [vmem:[#allocation16 + $0x444] ss:$16 sps:$4 sm:$0xff]  }
0x1106   : > { %9673 = vmatprep.subr.bf16.mxu0 %v13823_v26  ;;  %9716 = vmatprep.subr.bf16.mxu1 %v13826_v30  ;;  %v13912_v26 = vld [vmem:[#allocation16 + $0x44c] ss:$16 sps:$4 sm:$0xff]   ;;  %v13910_v30 = vld [vmem:[#allocation16 + $0x448] ss:$16 sps:$4 sm:$0xff]  }
0x1109   : > { %9674 = vmatpush1.bf16.msra.mxu0 %v13821_v17  ;;  %9717 = vmatpush1.bf16.msra.mxu1 %v13824_v24  ;;  %v13915_v17 = vld [vmem:[#allocation16 + $0x464] ss:$16 sps:$4 sm:$0xff]   ;;  %v13918_v24 = vld [vmem:[#allocation16 + $0x46c] ss:$16 sps:$4 sm:$0xff]  }
0x110a   : > { %9675 = vmatprep.subr.bf16.mxu0 %v13829_v9  ;;  %9718 = vmatprep.subr.bf16.mxu1 %v13832_v13  ;;  %v13913_v9 = vld [vmem:[#allocation16 + $0x460] ss:$16 sps:$4 sm:$0xff]   ;;  %v13916_v13 = vld [vmem:[#allocation16 + $0x468] ss:$16 sps:$4 sm:$0xff]  }
0x110d   : > { %9676 = vmatpush1.bf16.msra.mxu0 %v13827_v28  ;;  %9719 = vmatpush1.bf16.msra.mxu1 %v13830_v32  ;;  %v13921_v28 = vld [vmem:[#allocation16 + $0x484] ss:$16 sps:$4 sm:$0xff]   ;;  %v13924_v32 = vld [vmem:[#allocation16 + $0x48c] ss:$16 sps:$4 sm:$0xff]  }
0x110e   : > { %9677 = vmatprep.subr.bf16.mxu0 %v13835_v59  ;;  %9720 = vmatprep.subr.bf16.mxu1 %v13838_v31  ;;  %v13919_v59 = vld [vmem:[#allocation16 + $0x480] ss:$16 sps:$4 sm:$0xff]   ;;  %v13922_v31 = vld [vmem:[#allocation16 + $0x488] ss:$16 sps:$4 sm:$0xff]  }
0x1111   : > { %9678 = vmatpush1.bf16.msra.mxu0 %v13833_v34  ;;  %9721 = vmatpush1.bf16.msra.mxu1 %v13836_v33  ;;  %v13927_v34 = vld [vmem:[#allocation16 + $0x4a4] ss:$16 sps:$4 sm:$0xff]   ;;  %v13930_v33 = vld [vmem:[#allocation16 + $0x4ac] ss:$16 sps:$4 sm:$0xff]  }
0x1112   : > { %9679 = vmatprep.subr.bf16.mxu0 %v13841_v35  ;;  %9722 = vmatprep.subr.bf16.mxu1 %v13844_v37  ;;  %v13925_v35 = vld [vmem:[#allocation16 + $0x4a0] ss:$16 sps:$4 sm:$0xff]   ;;  %v13928_v37 = vld [vmem:[#allocation16 + $0x4a8] ss:$16 sps:$4 sm:$0xff]  }
0x1115   : > { %9680 = vmatpush1.bf16.msra.mxu0 %v13839_v40  ;;  %9723 = vmatpush1.bf16.msra.mxu1 %v13842_v36  ;;  %v13933_v40 = vld [vmem:[#allocation16 + $0x4c4] ss:$16 sps:$4 sm:$0xff]   ;;  %v13936_v36 = vld [vmem:[#allocation16 + $0x4cc] ss:$16 sps:$4 sm:$0xff]  }
0x1116   : > { %9681 = vmatprep.subr.bf16.mxu0 %v13847_v4  ;;  %9724 = vmatprep.subr.bf16.mxu1 %v13850_v41  ;;  %v13931_v4 = vld [vmem:[#allocation16 + $0x4c0] ss:$16 sps:$4 sm:$0xff]   ;;  %v13934_v41 = vld [vmem:[#allocation16 + $0x4c8] ss:$16 sps:$4 sm:$0xff]  }
0x1119   : > { %9682 = vmatpush1.bf16.msra.mxu0 %v13845_v43  ;;  %9725 = vmatpush1.bf16.msra.mxu1 %v13848_v44  ;;  %v13939_v43 = vld [vmem:[#allocation16 + $0x4e4] ss:$16 sps:$4 sm:$0xff]   ;;  %v13942_v44 = vld [vmem:[#allocation16 + $0x4ec] ss:$16 sps:$4 sm:$0xff]  }
0x111a   : > { %9683 = vmatprep.subr.bf16.mxu0 %v13853_v46  ;;  %9726 = vmatprep.subr.bf16.mxu1 %v13856_v45  ;;  %v13937_v46 = vld [vmem:[#allocation16 + $0x4e0] ss:$16 sps:$4 sm:$0xff]   ;;  %v13940_v45 = vld [vmem:[#allocation16 + $0x4e8] ss:$16 sps:$4 sm:$0xff]  }
0x111d   : > { %9684 = vmatpush1.bf16.msra.mxu0 %v13851_v47  ;;  %9727 = vmatpush1.bf16.msra.mxu1 %v13854_v50  ;;  %v13945_v47 = vld [vmem:[#allocation16 + $0x504] ss:$16 sps:$4 sm:$0xff]   ;;  %v13948_v50 = vld [vmem:[#allocation16 + $0x50c] ss:$16 sps:$4 sm:$0xff]  }
0x111e   : > { %9685 = vmatprep.subr.bf16.mxu0 %v13859_v56  ;;  %9728 = vmatprep.subr.bf16.mxu1 %v13862_v52  ;;  %v13943_v56 = vld [vmem:[#allocation16 + $0x500] ss:$16 sps:$4 sm:$0xff]   ;;  %v13946_v52 = vld [vmem:[#allocation16 + $0x508] ss:$16 sps:$4 sm:$0xff]  }
0x1121   : > { %9686 = vmatpush1.bf16.msra.mxu0 %v13857_v42  ;;  %9729 = vmatpush1.bf16.msra.mxu1 %v13860_v60  ;;  %v13951_v42 = vld [vmem:[#allocation16 + $0x524] ss:$16 sps:$4 sm:$0xff]   ;;  %v13954_v60 = vld [vmem:[#allocation16 + $0x52c] ss:$16 sps:$4 sm:$0xff]  }
0x1122   : > { %9687 = vmatprep.subr.bf16.mxu0 %v13865_v2  ;;  %9730 = vmatprep.subr.bf16.mxu1 %v13868_v53  ;;  %v13949_v2 = vld [vmem:[#allocation16 + $0x520] ss:$16 sps:$4 sm:$0xff]   ;;  %v13952_v53 = vld [vmem:[#allocation16 + $0x528] ss:$16 sps:$4 sm:$0xff]  }
0x1125   : > { %9688 = vmatpush1.bf16.msra.mxu0 %v13863_v3  ;;  %9731 = vmatpush1.bf16.msra.mxu1 %v13866_v57  ;;  %v13957_v3 = vld [vmem:[#allocation16 + $0x544] ss:$16 sps:$4 sm:$0xff]   ;;  %v13960_v57 = vld [vmem:[#allocation16 + $0x54c] ss:$16 sps:$4 sm:$0xff]  }
0x1126   : > { %9689 = vmatprep.subr.bf16.mxu0 %v13871_v5  ;;  %9732 = vmatprep.subr.bf16.mxu1 %v13874_v21  ;;  %v13955_v5 = vld [vmem:[#allocation16 + $0x540] ss:$16 sps:$4 sm:$0xff]   ;;  %v13958_v21 = vld [vmem:[#allocation16 + $0x548] ss:$16 sps:$4 sm:$0xff]  }
0x1129   : > { %9690 = vmatpush1.bf16.msra.mxu0 %v13869_v58  ;;  %9733 = vmatpush1.bf16.msra.mxu1 %v13872_v54  ;;  %v13963_v58 = vld [vmem:[#allocation16 + $0x564] ss:$16 sps:$4 sm:$0xff]   ;;  %v13966_v54 = vld [vmem:[#allocation16 + $0x56c] ss:$16 sps:$4 sm:$0xff]  }
0x112a   : > { %9691 = vmatprep.subr.bf16.mxu0 %v13877_v7  ;;  %9734 = vmatprep.subr.bf16.mxu1 %v13880_v55  ;;  %v13961_v7 = vld [vmem:[#allocation16 + $0x560] ss:$16 sps:$4 sm:$0xff]   ;;  %v13964_v55 = vld [vmem:[#allocation16 + $0x568] ss:$16 sps:$4 sm:$0xff]  }
0x112d   : > { %9692 = vmatpush1.bf16.msra.mxu0 %v13875_v15  ;;  %9735 = vmatpush1.bf16.msra.mxu1 %v13878_v16  ;;  %v13969_v15 = vld [vmem:[#allocation16 + $0x584] ss:$16 sps:$4 sm:$0xff]   ;;  %v13972_v16 = vld [vmem:[#allocation16 + $0x58c] ss:$16 sps:$4 sm:$0xff]  }
0x112e   : > { %9693 = vmatprep.subr.bf16.mxu0 %v13883_v48  ;;  %9736 = vmatprep.subr.bf16.mxu1 %v13886_v49  ;;  %v13967_v48 = vld [vmem:[#allocation16 + $0x580] ss:$16 sps:$4 sm:$0xff]   ;;  %v13970_v49 = vld [vmem:[#allocation16 + $0x588] ss:$16 sps:$4 sm:$0xff]  }
0x1131   : > { %9694 = vmatpush1.bf16.msra.mxu0 %v13881_v1  ;;  %9737 = vmatpush1.bf16.msra.mxu1 %v13884_v22  ;;  %v13975_v1 = vld [vmem:[#allocation16 + $0x5a4] ss:$16 sps:$4 sm:$0xff]   ;;  %v13978_v22 = vld [vmem:[#allocation16 + $0x5ac] ss:$16 sps:$4 sm:$0xff]  }
0x1132   : > { %9695 = vmatprep.subr.bf16.mxu0 %v13889_v61  ;;  %9738 = vmatprep.subr.bf16.mxu1 %v13892_v23  ;;  %v13973_v61 = vld [vmem:[#allocation16 + $0x5a0] ss:$16 sps:$4 sm:$0xff]   ;;  %v13976_v23 = vld [vmem:[#allocation16 + $0x5a8] ss:$16 sps:$4 sm:$0xff]  }
0x1135   : > { %9696 = vmatpush1.bf16.msra.mxu0 %v13887_v63  ;;  %9739 = vmatpush1.bf16.msra.mxu1 %v13890_v29  ;;  %v13981_v63 = vld [vmem:[#allocation16 + $0x5c4] ss:$16 sps:$4 sm:$0xff]   ;;  %v13984_v29 = vld [vmem:[#allocation16 + $0x5cc] ss:$16 sps:$4 sm:$0xff]  }
0x1136   : > { %9762 = vmatprep.subr.bf16.mxu0 %v15573_v39  ;;  %9816 = vmatprep.subr.bf16.mxu1 %v15573_v39  ;;  %v13894_v39 = vld [vmem:[#allocation14 + $0x28] sm:$0xff]  }
0x1138   : > { %9698 = vmatmul.mubr.bf16.vlgmr.msra.gmra.mrb[144].mxu0 %v15602_v51  ;;  %9741 = vmatmul.mubr.bf16.vlgmr.msra.gmra.mrb[160].mxu1 %v15602_v51  ;;  %v13895_v51 = vld [vmem:[#allocation16 + $0x400] ss:$16 sps:$4 sm:$0xff]  }
0x1139   : > { %9763 = vmatpush1.bf16.msra.mxu0 %v15571_v20  ;;  %9817 = vmatpush1.bf16.msra.mxu1 %v15571_v20  ;;  %v13903_v20 = vld [vmem:[#allocation16 + $0x424] ss:$16 sps:$4 sm:$0xff]  }
0x113a   : > { %9764 = vmatprep.subr.bf16.mxu0 %v15579_v18  ;;  %9818 = vmatprep.subr.bf16.mxu1 %v15579_v18  ;;  %v13901_v18 = vld [vmem:[#allocation16 + $0x420] ss:$16 sps:$4 sm:$0xff]  }
0x113b   : > { %9794 = vmatprep.mubr.bf16.mxu0 %v14438_v0  ;;  %9848 = vmatprep.mubr.bf16.mxu1 %v14438_v0  ;;  %v13904_v0 = vld [vmem:[#allocation16 + $0x428] ss:$16 sps:$4 sm:$0xff]  }
0x113d   : > { %9765 = vmatpush1.bf16.msra.mxu0 %v15577_v38  ;;  %9819 = vmatpush1.bf16.msra.mxu1 %v15577_v38  ;;  %v13907_v38 = vld [vmem:[#allocation16 + $0x440] ss:$16 sps:$4 sm:$0xff]  }
0x113e   : > { %10250 = vmatprep.subr.bf16.mxu0 %v13897_v27  ;;  %10293 = vmatprep.subr.bf16.mxu1 %v13900_v62  ;;  %v13979_v27 = vld [vmem:[#allocation16 + $0x5c0] ss:$16 sps:$4 sm:$0xff]   ;;  %v13982_v62 = vld [vmem:[#allocation16 + $0x5c8] ss:$16 sps:$4 sm:$0xff]  }
0x1140   : > { %11955 = vmatmul.mubr.msk.bf16.vlgmr.msra.gmra.mrb[148].mxu0 %vm8589_vm1, %v13893_v11  ;;  %11957 = vmatmul.mubr.msk.bf16.vlgmr.msra.gmra.mrb[164].mxu1 %vm8589_vm1, %v13894_v39  ;;  %v13987_v11 = vld [vmem:[#allocation16 + $0x5e4] ss:$16 sps:$4 sm:$0xff]   ;;  %v13990_v39 = vld [vmem:[#allocation16 + $0x5ec] ss:$16 sps:$4 sm:$0xff]  }
0x1141   : > { %10251 = vmatpush1.bf16.msra.mxu0 %v13895_v51  ;;  %10294 = vmatpush1.bf16.msra.mxu1 %v13898_v19  ;;  %v13985_v51 = vld [vmem:[#allocation16 + $0x5e0] ss:$16 sps:$4 sm:$0xff]   ;;  %v13988_v19 = vld [vmem:[#allocation16 + $0x5e8] ss:$16 sps:$4 sm:$0xff]  }
0x1142   : > { %10252 = vmatprep.subr.bf16.mxu0 %v13903_v20  ;;  %10295 = vmatprep.subr.bf16.mxu1 %v13906_v6  ;;  %v13991_v20 = vld [vmem:[#allocation17 + $0x40] sm:$0xff]  }
0x1143   : > { %v13992_v6 = vld [vmem:[#allocation17 + $0xc0] sm:$0xff]  }
0x1145   : > { %10253 = vmatpush1.bf16.msra.mxu0 %v13901_v18  ;;  %10296 = vmatpush1.bf16.msra.mxu1 %v13904_v0 }
0x1146   : > { %10254 = vmatprep.subr.bf16.mxu0 %v13909_v25  ;;  %10297 = vmatprep.subr.bf16.mxu1 %v13912_v26 }
0x1149   : > { %10255 = vmatpush1.bf16.msra.mxu0 %v13907_v38  ;;  %10298 = vmatpush1.bf16.msra.mxu1 %v13910_v30 }
0x114a   : > { %10256 = vmatprep.subr.bf16.mxu0 %v13915_v17  ;;  %10299 = vmatprep.subr.bf16.mxu1 %v13918_v24 }
0x114d   : > { %10257 = vmatpush1.bf16.msra.mxu0 %v13913_v9  ;;  %10300 = vmatpush1.bf16.msra.mxu1 %v13916_v13 }
0x114e   : > { %10258 = vmatprep.subr.bf16.mxu0 %v13921_v28  ;;  %10301 = vmatprep.subr.bf16.mxu1 %v13924_v32 }
0x1151   : > { %10259 = vmatpush1.bf16.msra.mxu0 %v13919_v59  ;;  %10302 = vmatpush1.bf16.msra.mxu1 %v13922_v31 }
0x1152   : > { %10260 = vmatprep.subr.bf16.mxu0 %v13927_v34  ;;  %10303 = vmatprep.subr.bf16.mxu1 %v13930_v33  ;;  %v13993_v34 = vld [vmem:[#allocation17] sm:$0xff]  }
0x1153   : > { %v13994_v33 = vld [vmem:[#allocation17 + $0x80] sm:$0xff]  }
0x1155   : > { %10261 = vmatpush1.bf16.msra.mxu0 %v13925_v35  ;;  %10304 = vmatpush1.bf16.msra.mxu1 %v13928_v37  ;;  %v13995_v35 = vld [vmem:[#allocation17 + $0x48] sm:$0xff]  }
0x1156   : > { %10262 = vmatprep.subr.bf16.mxu0 %v13933_v40  ;;  %10305 = vmatprep.subr.bf16.mxu1 %v13936_v36  ;;  %v13996_v37 = vld [vmem:[#allocation17 + $0xc8] sm:$0xff]  }
0x1157   : > { %v13997_v40 = vld [vmem:[#allocation17 + $0x8] sm:$0xff]  }
0x1158   : > { %v13998_v36 = vld [vmem:[#allocation17 + $0x88] sm:$0xff]  }
0x1159   : > { %10263 = vmatpush1.bf16.msra.mxu0 %v13931_v4  ;;  %10306 = vmatpush1.bf16.msra.mxu1 %v13934_v41  ;;  %v13999_v4 = vld [vmem:[#allocation17 + $0x50] sm:$0xff]  }
0x115a   : > { %10264 = vmatprep.subr.bf16.mxu0 %v13939_v43  ;;  %10307 = vmatprep.subr.bf16.mxu1 %v13942_v44  ;;  %v14000_v41 = vld [vmem:[#allocation17 + $0xd0] sm:$0xff]  }
0x115b   : > { %v14001_v43 = vld [vmem:[#allocation17 + $0x10] sm:$0xff]  }
0x115c   : > { %v14002_v44 = vld [vmem:[#allocation17 + $0x90] sm:$0xff]  }
0x115d   : > { %10265 = vmatpush1.bf16.msra.mxu0 %v13937_v46  ;;  %10308 = vmatpush1.bf16.msra.mxu1 %v13940_v45  ;;  %v14003_v46 = vld [vmem:[#allocation17 + $0x58] sm:$0xff]  }
0x115e   : > { %10266 = vmatprep.subr.bf16.mxu0 %v13945_v47  ;;  %10309 = vmatprep.subr.bf16.mxu1 %v13948_v50  ;;  %v14004_v45 = vld [vmem:[#allocation17 + $0xd8] sm:$0xff]  }
0x115f   : > { %v14005_v47 = vld [vmem:[#allocation17 + $0x18] sm:$0xff]  }
0x1160   : > { %v14006_v50 = vld [vmem:[#allocation17 + $0x98] sm:$0xff]  }
0x1161   : > { %10267 = vmatpush1.bf16.msra.mxu0 %v13943_v56  ;;  %10310 = vmatpush1.bf16.msra.mxu1 %v13946_v52  ;;  %v14007_v56 = vld [vmem:[#allocation17 + $0x60] sm:$0xff]  }
0x1162   : > { %10268 = vmatprep.subr.bf16.mxu0 %v13951_v42  ;;  %10311 = vmatprep.subr.bf16.mxu1 %v13954_v60  ;;  %v14008_v52 = vld [vmem:[#allocation17 + $0xe0] sm:$0xff]  }
0x1163   : > { %v14009_v42 = vld [vmem:[#allocation17 + $0x20] sm:$0xff]  }
0x1164   : > { %v14010_v60 = vld [vmem:[#allocation17 + $0xa0] sm:$0xff]  }
0x1165   : > { %10269 = vmatpush1.bf16.msra.mxu0 %v13949_v2  ;;  %10312 = vmatpush1.bf16.msra.mxu1 %v13952_v53  ;;  %v14011_v2 = vld [vmem:[#allocation17 + $0x68] sm:$0xff]  }
0x1166   : > { %10270 = vmatprep.subr.bf16.mxu0 %v13957_v3  ;;  %10313 = vmatprep.subr.bf16.mxu1 %v13960_v57  ;;  %v14012_v53 = vld [vmem:[#allocation17 + $0xe8] sm:$0xff]  }
0x1167   : > { %v14013_v3 = vld [vmem:[#allocation17 + $0x28] sm:$0xff]  }
0x1168   : > { %v14014_v57 = vld [vmem:[#allocation17 + $0xa8] sm:$0xff]  }
0x1169   : > { %10271 = vmatpush1.bf16.msra.mxu0 %v13955_v5  ;;  %10314 = vmatpush1.bf16.msra.mxu1 %v13958_v21  ;;  %v14015_v5 = vld [vmem:[#allocation17 + $0x70] sm:$0xff]  }
0x116a   : > { %10272 = vmatprep.subr.bf16.mxu0 %v13963_v58  ;;  %10315 = vmatprep.subr.bf16.mxu1 %v13966_v54  ;;  %v14016_v21 = vld [vmem:[#allocation17 + $0xf0] sm:$0xff]  }
0x116b   : > { %v14017_v58 = vld [vmem:[#allocation17 + $0x30] sm:$0xff]  }
0x116c   : > { %v14018_v54 = vld [vmem:[#allocation17 + $0xb0] sm:$0xff]  }
0x116d   : > { %10273 = vmatpush1.bf16.msra.mxu0 %v13961_v7  ;;  %10316 = vmatpush1.bf16.msra.mxu1 %v13964_v55  ;;  %v14019_v7 = vld [vmem:[#allocation17 + $0x78] sm:$0xff]  }
0x116e   : > { %10274 = vmatprep.subr.bf16.mxu0 %v13969_v15  ;;  %10317 = vmatprep.subr.bf16.mxu1 %v13972_v16  ;;  %v14020_v55 = vld [vmem:[#allocation17 + $0xf8] sm:$0xff]  }
0x116f   : > { %v14021_v15 = vld [vmem:[#allocation17 + $0x38] sm:$0xff]  }
0x1170   : > { %v14022_v16 = vld [vmem:[#allocation17 + $0xb8] sm:$0xff]  }
0x1171   : > { %10275 = vmatpush1.bf16.msra.mxu0 %v13967_v48  ;;  %10318 = vmatpush1.bf16.msra.mxu1 %v13970_v49  ;;  %v14439_v48 = vmov 0.0|0.0   ;;  %v10344_v49 = vld [vmem:[%s15767_s18] sm:$0xf]  ;;  %s15647_s18 = scalar_lea.hbm %s15770_s4, %s12054_s20 }
0x1172   : > { %10276 = vmatprep.subr.bf16.mxu0 %v13975_v1  ;;  %10319 = vmatprep.subr.bf16.mxu1 %v13978_v22  ;;  %v10349_v1 = vrot.slane %v10344_v49, %v15360_v8  ;;  %v10357_v22 = vrot.slane %v10344_v49, %v15362_v10 }
0x1175   : > { %10277 = vmatpush1.bf16.msra.mxu0 %v13973_v61  ;;  %10320 = vmatpush1.bf16.msra.mxu1 %v13976_v23  ;;  %v10353_v61 = vrot.slane %v10344_v49, %v15367_v12  ;;  %v10361_v23 = vrot.slane %v10344_v49, %v15369_v14 }
0x1176   : > { %10278 = vmatprep.subr.bf16.mxu0 %v13981_v63  ;;  %10321 = vmatprep.subr.bf16.mxu1 %v13984_v29 }
0x1179   : > { %10279 = vmatpush1.bf16.msra.mxu0 %v13979_v27  ;;  %10322 = vmatpush1.bf16.msra.mxu1 %v13982_v62 }
0x117a   : > { %10280 = vmatprep.subr.bf16.mxu0 %v13987_v11  ;;  %10323 = vmatprep.subr.bf16.mxu1 %v13990_v39 }
0x117d   : > { %10281 = vmatpush1.bf16.msra.mxu0 %v13985_v51  ;;  %10324 = vmatpush1.bf16.msra.mxu1 %v13988_v19 }
0x117e   : > { %12057 = vmatprep.subr.bf16.mxu0 %v13991_v20  ;;  %12079 = vmatprep.subr.bf16.mxu1 %v13992_v6 }
0x1213   : > { %v9796_v18 = vpop.f32.mrb[148].mxu0  ;;  %v9850_v0 = vpop.f32.mrb[164].mxu1 }
0x1214   : > { %v9859_v25 = vmax.f32 %v9796_v18, %v9850_v0  ;;  %v9798_v26 = vpop.f32.mrb[149].mxu0  ;;  %v9852_v38 = vpop.f32.mrb[165].mxu1 }
0x1215   : > { %v9860_v30 = vmax.f32 %v9798_v26, %v9852_v38  ;;  %v9800_v17 = vpop.f32.mrb[150].mxu0  ;;  %v9854_v24 = vpop.f32.mrb[166].mxu1 }
0x1216   : > { %v9861_v9 = vmax.f32 %v9800_v17, %v9854_v24  ;;  %v9802_v13 = vpop.f32.mrb[151].mxu0  ;;  %v9856_v28 = vpop.f32.mrb[167].mxu1  ;;  %v10735_v17 = vld [vmem:[#allocation19] sm:$0xff]  ;;  %v10736_v24 = vld [vmem:[#allocation19 + $0x8] sm:$0xff] }
0x1217   : > { %v9862_v32 = vmax.f32 %v9802_v13, %v9856_v28 }
0x1218   : > { %v9863_v59 = vpack.c.bf16 %v9861_v9, %v9859_v25 }
0x1219   : > { %v9864_v31 = vpack.c.bf16 %v9862_v32, %v9860_v30 }
0x121b   : > { %10282 = vmatprep.mubr.bf16.mxu0 %v9864_v31  ;;  %10325 = vmatprep.mubr.bf16.mxu1 %v9864_v31 }
0x121c   : > { %10283 = vmatmul.mubr.bf16.vlgmr.msra.gmra.mrb[144].mxu0 %v9863_v59  ;;  %10326 = vmatmul.mubr.bf16.vlgmr.msra.gmra.mrb[160].mxu1 %v9863_v59 }
0x121d   : > { %12058 = vmatpush3.bf16.msra.mxu0 %v13993_v34  ;;  %12080 = vmatpush3.bf16.msra.mxu1 %v13994_v33 }
0x121e   : > { %12059 = vmatprep.subr.bf16.mxu0 %v13995_v35  ;;  %12081 = vmatprep.subr.bf16.mxu1 %v13996_v37  ;;  %v12154_v35 = vpack.c.bf16 %v10736_v24, %v10735_v17  ;;  %v10737_v37 = vld [vmem:[#allocation19 + $0x10] sm:$0xff] }
0x1221   : > { %12060 = vmatpush3.bf16.msra.mxu0 %v13997_v40  ;;  %12082 = vmatpush3.bf16.msra.mxu1 %v13998_v36  ;;  %v10738_v40 = vld [vmem:[#allocation19 + $0x18] sm:$0xff] }
0x1222   : > { %12061 = vmatprep.subr.bf16.mxu0 %v13999_v4  ;;  %12083 = vmatprep.subr.bf16.mxu1 %v14000_v41  ;;  %v12157_v36 = vpack.c.bf16 %v10738_v40, %v10737_v37  ;;  %v10739_v4 = vld [vmem:[#allocation19 + $0x20] sm:$0xff]  ;;  %v10740_v41 = vld [vmem:[#allocation19 + $0x28] sm:$0xff] }
0x1225   : > { %12062 = vmatpush3.bf16.msra.mxu0 %v14001_v43  ;;  %12084 = vmatpush3.bf16.msra.mxu1 %v14002_v44  ;;  %v12160_v43 = vpack.c.bf16 %v10740_v41, %v10739_v4  ;;  %v10741_v44 = vld [vmem:[#allocation19 + $0x30] sm:$0xff] }
0x1226   : > { %12063 = vmatprep.subr.bf16.mxu0 %v14003_v46  ;;  %12085 = vmatprep.subr.bf16.mxu1 %v14004_v45  ;;  %v10742_v46 = vld [vmem:[#allocation19 + $0x38] sm:$0xff] }
0x1227   : > { %v12163_v45 = vpack.c.bf16 %v10742_v46, %v10741_v44 }
0x1229   : > { %12064 = vmatpush3.bf16.msra.mxu0 %v14005_v47  ;;  %12086 = vmatpush3.bf16.msra.mxu1 %v14006_v50  ;;  %v10743_v47 = vld [vmem:[#allocation19 + $0x40] sm:$0xff]  ;;  %v10744_v50 = vld [vmem:[#allocation19 + $0x48] sm:$0xff] }
0x122a   : > { %12065 = vmatprep.subr.bf16.mxu0 %v14007_v56  ;;  %12087 = vmatprep.subr.bf16.mxu1 %v14008_v52  ;;  %v12166_v56 = vpack.c.bf16 %v10744_v50, %v10743_v47  ;;  %v10745_v52 = vld [vmem:[#allocation19 + $0x50] sm:$0xff] }
0x122d   : > { %12066 = vmatpush3.bf16.msra.mxu0 %v14009_v42  ;;  %12088 = vmatpush3.bf16.msra.mxu1 %v14010_v60  ;;  %v10746_v42 = vld [vmem:[#allocation19 + $0x58] sm:$0xff] }
0x122e   : > { %12067 = vmatprep.subr.bf16.mxu0 %v14011_v2  ;;  %12089 = vmatprep.subr.bf16.mxu1 %v14012_v53  ;;  %v12169_v60 = vpack.c.bf16 %v10746_v42, %v10745_v52  ;;  %v10747_v2 = vld [vmem:[#allocation19 + $0x60] sm:$0xff]  ;;  %v10748_v53 = vld [vmem:[#allocation19 + $0x68] sm:$0xff] }
0x1231   : > { %12068 = vmatpush3.bf16.msra.mxu0 %v14013_v3  ;;  %12090 = vmatpush3.bf16.msra.mxu1 %v14014_v57  ;;  %v12172_v3 = vpack.c.bf16 %v10748_v53, %v10747_v2  ;;  %v10749_v57 = vld [vmem:[#allocation19 + $0x70] sm:$0xff] }
0x1232   : > { %12069 = vmatprep.subr.bf16.mxu0 %v14015_v5  ;;  %12091 = vmatprep.subr.bf16.mxu1 %v14016_v21  ;;  %v10750_v5 = vld [vmem:[#allocation19 + $0x78] sm:$0xff] }
0x1233   : > { %v12175_v21 = vpack.c.bf16 %v10750_v5, %v10749_v57 }
0x1235   : > { %12070 = vmatpush3.bf16.msra.mxu0 %v14017_v58  ;;  %12092 = vmatpush3.bf16.msra.mxu1 %v14018_v54  ;;  %v14441_v58 = vmov 0.0  }
0x1236   : > { %12071 = vmatprep.subr.bf16.mxu0 %v14019_v7  ;;  %12093 = vmatprep.subr.bf16.mxu1 %v14020_v55 }
0x1239   : > { %12072 = vmatpush3.bf16.msra.mxu0 %v14021_v15  ;;  %12094 = vmatpush3.bf16.msra.mxu1 %v14022_v16 }
0x123a   : > { %12153 = vmatprep.subr.bf16.mxu0 %v14439_v48 }
0x12ef   : > { %v10284_v63 = vpop.f32.mrb[144].mxu0  ;;  %v10327_v29 = vpop.f32.mrb[160].mxu1 }
0x12f0   : > { %v10366_v27 = vadd.f32 %v10349_v1, %v10284_v63  ;;  %v10368_v62 = vadd.f32 %v10357_v22, %v10327_v29  ;;  %v10286_v11 = vpop.f32.mrb[145].mxu0  ;;  %v10329_v39 = vpop.f32.mrb[161].mxu1 }
0x12f1   : > { %v10367_v51 = vadd.f32 %v10353_v61, %v10286_v11  ;;  %v10369_v19 = vadd.f32 %v10361_v23, %v10329_v39  ;;  %v10288_v20 = vpop.f32.mrb[146].mxu0  ;;  %v10331_v6 = vpop.f32.mrb[162].mxu1 }
0x12f2   : > { %v10370_v18 = vadd.f32 %v10349_v1, %v10288_v20  ;;  %v10372_v0 = vadd.f32 %v10357_v22, %v10331_v6  ;;  %v10290_v25 = vpop.f32.mrb[147].mxu0  ;;  %v10333_v8 = vpop.f32.mrb[163].mxu1  ;;  %v10374_v38 = vmax.f32 %v10366_v27, 0.0  ;;  %v10376_v12 = vmax.f32 %v10368_v62, 0.0  ;;  %v10725_v62 = vld [vmem:[%s15768_s2 + $0x8] sm:$0xff] }
0x12f3   : > { %v10371_v26 = vadd.f32 %v10353_v61, %v10290_v25  ;;  %v10373_v10 = vadd.f32 %v10361_v23, %v10333_v8  ;;  %v10375_v9 = vmax.f32 %v10367_v51, 0.0  ;;  %v10377_v13 = vmax.f32 %v10369_v19, 0.0 }
0x12f4   : > { %v10378_v30 = vmax.f32 %v10370_v18, 0.0  ;;  %v10380_v14 = vmax.f32 %v10372_v0, 0.0 }
0x12f5   : > { %v10379_v28 = vmax.f32 %v10371_v26, 0.0  ;;  %v10381_v32 = vmax.f32 %v10373_v10, 0.0  ;;  %v10751_v26 = vld [vmem:[%s15769_s28] sm:$0x1] }
0x12f6   : > { %v10382_v59 = vpack.c.bf16 %v10378_v30, %v10374_v38  ;;  %v10384_v31 = vpack.c.bf16 %v10380_v14, %v10376_v12 }
0x12f7   : > { %v10383_v34 = vpack.c.bf16 %v10379_v28, %v10375_v9  ;;  %v10385_v33 = vpack.c.bf16 %v10381_v32, %v10377_v13 }
0x12f9   : > { %10674 = vmatprep.mubr.bf16.mxu0 %v10383_v34  ;;  %10715 = vmatprep.mubr.bf16.mxu1 %v10385_v33 }
0x12fa   : > { %10675 = vmatmul.mubr.bf16.vlgmr.msra.gmra.mrb[152].mxu0 %v10382_v59  ;;  %10716 = vmatmul.mubr.bf16.vlgmr.msra.gmra.mrb[168].mxu1 %v10384_v31 }
0x12fb   : > { %12155 = vmatpush3.bf16.msra.mxu0 %v12154_v35  ;;  %12150 = vmatprep.mubr.msk.f32.mxu0 %vm14440_vm2, %v14441_v58 }
0x12fc   : > { %12156 = vmatprep.subr.bf16.mxu0 %v14439_v48 }
0x12ff   : > { %12158 = vmatpush3.bf16.msra.mxu0 %v12157_v36 }
0x1300   : > { %12159 = vmatprep.subr.bf16.mxu0 %v14439_v48 }
0x1303   : > { %12161 = vmatpush3.bf16.msra.mxu0 %v12160_v43 }
0x1304   : > { %12162 = vmatprep.subr.bf16.mxu0 %v14439_v48 }
0x1307   : > { %12164 = vmatpush3.bf16.msra.mxu0 %v12163_v45 }
0x1308   : > { %12165 = vmatprep.subr.bf16.mxu0 %v14439_v48 }
0x130b   : > { %12167 = vmatpush3.bf16.msra.mxu0 %v12166_v56 }
0x130c   : > { %12168 = vmatprep.subr.bf16.mxu0 %v14439_v48 }
0x130f   : > { %12170 = vmatpush3.bf16.msra.mxu0 %v12169_v60 }
0x1310   : > { %12171 = vmatprep.subr.bf16.mxu0 %v14439_v48 }
0x1313   : > { %12173 = vmatpush3.bf16.msra.mxu0 %v12172_v3 }
0x1314   : > { %12174 = vmatprep.subr.bf16.mxu0 %v14439_v48  ;;  %v10724_v48 = vld [vmem:[%s15768_s2] sm:$0xff] }
0x1317   : > { %12176 = vmatpush3.bf16.msra.mxu0 %v12175_v21 }
0x13cd   : > { %v12073_v54 = vpop.f32.mrb[152].mxu0  ;;  %v12095_v7 = vpop.f32.mrb[168].mxu1 }
0x13ce   : > { %v12074_v55 = vpop.f32.mrb[153].mxu0  ;;  %v12096_v15 = vpop.f32.mrb[169].mxu1 }
0x13cf   : > { %v12075_v16 = vadd.f32 %v12074_v55, %v12073_v54  ;;  %v12097_v49 = vadd.f32 %v12096_v15, %v12095_v7  ;;  %v12076_v1 = vpop.f32.mrb[154].mxu0  ;;  %v12098_v22 = vpop.f32.mrb[170].mxu1 }
0x13d0   : > { %v12077_v61 = vpop.f32.mrb[155].mxu0  ;;  %v12099_v23 = vpop.f32.mrb[171].mxu1 }
0x13d1   : > { %v10718_v63 = vadd.f32 %v12097_v49, %v12075_v16  ;;  %v12078_v29 = vadd.f32 %v12077_v61, %v12076_v1  ;;  %v12100_v27 = vadd.f32 %v12099_v23, %v12098_v22 }
0x13d3   : > { %v10721_v11 = vadd.f32 %v12100_v27, %v12078_v29  ;;  %v10726_v39 = vmul.f32 %v10724_v48, %v10718_v63 }
0x13d5   : > { %v10727_v51 = vmul.f32 %v10725_v62, %v10721_v11 }
0x13d7   : > { %v10728_v19 = vadd.f32 %v10727_v51, %v10726_v39 }
0x13d9   : > { %v10729_v20 = vrot.slane %v10728_v19, 4 }
0x13db   : > { %v10730_v6 = vadd.f32 %v10729_v20, %v10728_v19 }
0x13dd   : > { %v10731_v18 = vrot.slane %v10730_v6, 2 }
0x13df   : > { %v10732_v0 = vadd.f32 %v10731_v18, %v10730_v6 }
0x13e1   : > { %v10733_v25 = vrot.slane %v10732_v0, 1 }
0x13e3   : > { %v10734_v8 = vadd.f32 %v10733_v25, %v10732_v0 }
0x13e5   : > { %12151 = vmatmul.mubr.f32.vlgmr.msra.gmra.mrb[156].mxu0 %v10734_v8 }
0x14b8   : > { %v10818_v10 = vpop.f32.mrb[156].mxu0 }
0x14b9   : > { %v10819_v38 = vadd.f32 %v10818_v10, %v10751_v26  ;;  %v12152_v12 = vpop.f32.mrb[157].mxu0 }
0x14bb   : > { %10822 = vst [vmem:[%s683_s25] sm:$0x1] %v10819_v38 }
0x14bc   : > { %14346 = shalt.err (!%p14343_p3)
}
0x14bd   : > { %s14347_s6 = scalar_lea.hbm %s15647_s18, 16  ;;  %s14351_s28 = scalar_lea.hbm %s15770_s4, 32 }
0x14be   : > { %p14348_p6 = scmp.ne.s32.totalorder %s15647_s18, %s14347_s6  ;;  %p14352_p5 = scmp.lt.u32.totalorder %s15647_s18, %s15770_s4 }
0x14bf   : > { %p14353_p10 = scmp.lt.u32.totalorder %s14351_s28, %s14347_s6  ;;  %p14355_p11 = scmp.lt.u32.totalorder %s14347_s6, %s15647_s18 }
0x14c0   : > { %p14349_p2 = pnand %p14348_p6, %p15771_p12 }
0x14c1   : > { %p14354_p1 = por %p14353_p10, %p14352_p5 }
0x14c2   : > { %p14350_p0 = pneg %p14349_p2 }
0x14c3   : > { %p14356_p13 = por %p14355_p11, %p14354_p1 }
0x14c5   : > { %p14357_p8 = pnand %p14356_p13, %p14350_p0 }
0x14c7   : > { %14360 = shalt.err (!%p14357_p8)
}
0x14c8   : > { %12574 = dma.vmem_to_hbm [thread:$0]  (%p15771_p12), %s15649_s11, 16, %s15647_s18, %s10824_s0  }
0x14c9 PF: > { %s10848_s16 = sand.u32 1, %s14407_s21   ;;  %p15772_p7 = scmp.ne.s32.totalorder %s15750_s26, 0 }
0x14ca   : > { %p15773_p9 = scmp.ge.s32.totalorder %s14419_s24, 2  ;;  %s10849_s3 = scalar_lea.sflag [#allocation4], %s10848_s16 }
0x14cc   : > { %p12612_p4 = pnand %p15773_p9, %p15772_p7 }
0x14ce   : > { %14402 = dma.done.wait (!%p12612_p4), %s10849_s3, 16  }
0x14cf   : > { %14404 = vsyncadd (!%p12612_p4), %s10849_s3, 4294967280  ;;  %p34_p3 = scmp.ge.s32.totalorder %s14802_s29, 4   ;;  %s15774_s21 = smov %s14411_s22 }
0x14d0   : > { %s15775_s22 = smov %s14415_s23  ;;  %s15776_s23 = smov %s14813_s30 }
0x14d1   : > { %s15777_s24 = smov %s14802_s29  ;;  %36 = sbr.rel (!%p34_p3) target bundleno = 23 (0x17), region = 201 }
0x14d8   :  { %10853 = vsyncpa [#allocation3], 1 }
0x14d9   :  { %10855 = vsyncpa [#allocation3 + $0x1], 1 }
0x14da   :  { %10856 = vsyncpa [#allocation6], 1 }
0x14db   :  { %10857 = vsyncpa [#allocation9], 1 }
0x14dc   :  { %10858 = vsyncpa [#allocation12], 1 }
0x14dd   :  { %10859 = vsyncpa [#allocation15], 1 }
0x14de   :  { %10860 = vsyncpa [#allocation18], 1 }
0x14df   :  { %10861 = vsyncpa [#allocation4], 1 }
0x14e0   :  { %10863 = vsyncpa [#allocation4 + $0x1], 1 }

</bundles_post_ra>
